<compile_context>
chip_gen: v5e
topology: v5e:2x2
jax: 0.10.0
libtpu: 0.0.40
codegen_flags: <defaults>
</compile_context>

<pallas_src>
import functools

import jax
import jax.numpy as jnp
from jax.experimental import pallas as pl
from jax.experimental.pallas import tpu as pltpu

EPS = 1e-5
MN_TILE = 256      # M / N tile cap (multiple of 128: OK for v5e/v6e/v7x MXUs)
K_TILE_CAP = 1024  # K tile cap


def _pick_k_tile(K):
    """Largest lane-aligned tile <= K_TILE_CAP that divides K, else full K."""
    if K <= K_TILE_CAP:
        return K
    for mult in range(K_TILE_CAP // 128, 0, -1):
        tk = 128 * mult
        if K % tk == 0:
            return tk
    return K  # fall back to full-extent K block (always legal)


# --------------------------- Pallas kernels ---------------------------------

def _matmul_kernel(a_ref, b_ref, s_ref, bi_ref, *rest, relu, has_res):
    """Tiled o = maybe_relu((A @ B) * scale + bias [+ residual]).

    Grid = (M-tiles, N-tiles, K-tiles); f32 accumulator scratch persists over
    the (sequential, 'arbitrary') K axis.
    """
    if has_res:
        r_ref, o_ref, acc_ref = rest
    else:
        o_ref, acc_ref = rest

    k = pl.program_id(2)

    @pl.when(k == 0)
    def _():
        acc_ref[...] = jnp.zeros_like(acc_ref)

    acc_ref[...] += jnp.dot(a_ref[...], b_ref[...],
                            preferred_element_type=jnp.float32)

    @pl.when(k == pl.num_programs(2) - 1)
    def _():
        out = acc_ref[...] * s_ref[...] + bi_ref[...]
        if has_res:
            out = out + r_ref[...].astype(jnp.float32)
        if relu:
            out = jnp.maximum(out, 0.0)
        o_ref[...] = out.astype(o_ref.dtype)


def fused_matmul(a, b, scale, bias, residual, relu, out_dtype=jnp.bfloat16):
    """o[M,N] = maybe_relu((a[M,K] @ b[K,N]) * scale[1,N] + bias[1,N] [+ res])."""
    M, K = a.shape
    K2, N = b.shape
    assert K == K2
    a = a.astype(jnp.bfloat16)
    b = b.astype(jnp.bfloat16)

    tm = min(MN_TILE, M)          # full-extent block when M is small/ragged
    tn = min(MN_TILE, N)          # N is 64/128/256/512 -> divides exactly
    tk = _pick_k_tile(K)          # divides K exactly or equals full K
    grid = (pl.cdiv(M, tm), pl.cdiv(N, tn), pl.cdiv(K, tk))

    has_res = residual is not None
    in_specs = [
        pl.BlockSpec((tm, tk), lambda i, j, k: (i, k)),
        pl.BlockSpec((tk, tn), lambda i, j, k: (k, j)),
        pl.BlockSpec((1, tn), lambda i, j, k: (0, j)),
        pl.BlockSpec((1, tn), lambda i, j, k: (0, j)),
    ]
    args = [a, b, scale, bias]
    if has_res:
        in_specs.append(pl.BlockSpec((tm, tn), lambda i, j, k: (i, j)))
        args.append(residual.astype(jnp.bfloat16))

    return pl.pallas_call(
        functools.partial(_matmul_kernel, relu=relu, has_res=has_res),
        out_shape=jax.ShapeDtypeStruct((M, N), out_dtype),
        grid_spec=pltpu.PrefetchScalarGridSpec(
            num_scalar_prefetch=0,
            grid=grid,
            in_specs=in_specs,
            out_specs=pl.BlockSpec((tm, tn), lambda i, j, k: (i, j)),
            scratch_shapes=[pltpu.VMEM((tm, tn), jnp.float32)]),
        compiler_params=pltpu.CompilerParams(
            dimension_semantics=("parallel", "parallel", "arbitrary")),
    )(*args)


def _max3_kernel(a_ref, b_ref, c_ref, o_ref):
    o_ref[...] = jnp.maximum(jnp.maximum(a_ref[...], b_ref[...]), c_ref[...])


def _tiled_max3(a, b, c):
    """Row-tiled elementwise max of three (M, C) arrays."""
    M, C = a.shape
    tm = min(512, M)
    return pl.pallas_call(
        _max3_kernel,
        out_shape=jax.ShapeDtypeStruct((M, C), a.dtype),
        grid_spec=pltpu.PrefetchScalarGridSpec(
            num_scalar_prefetch=0,
            grid=(pl.cdiv(M, tm),),
            in_specs=[pl.BlockSpec((tm, C), lambda i: (i, 0))] * 3,
            out_specs=pl.BlockSpec((tm, C), lambda i: (i, 0))),
        compiler_params=pltpu.CompilerParams(
            dimension_semantics=("parallel",)),
    )(a, b, c)


def _avgpool_fc_kernel(x_ref, w_ref, b_ref, o_ref, *, inv_hw):
    # Global average pool over HW then FC, fused.  Everything here is tiny.
    feats = jnp.sum(x_ref[...].astype(jnp.float32), axis=1) * inv_hw   # (N, C)
    o_ref[...] = (jnp.dot(feats, w_ref[...],
                          preferred_element_type=jnp.float32) + b_ref[...])


def avgpool_fc(x_nhwc, fc_w, fc_b):
    N, H, W, C = x_nhwc.shape
    x3 = x_nhwc.reshape(N, H * W, C)
    nc = fc_b.shape[0]
    return pl.pallas_call(
        functools.partial(_avgpool_fc_kernel, inv_hw=1.0 / float(H * W)),
        out_shape=jax.ShapeDtypeStruct((N, nc), jnp.float32),
        in_specs=[pl.BlockSpec(memory_space=pltpu.MemorySpace.VMEM)] * 3,
        out_specs=pl.BlockSpec(memory_space=pltpu.MemorySpace.VMEM),
    )(x3, fc_w.T.astype(jnp.float32), fc_b.reshape(1, nc).astype(jnp.float32))


# ----------------------------- glue (JAX) ------------------------------------

def im2col(x, kh, kw, stride, pad):
    """x: (N,H,W,C) NHWC bf16 -> ((N*Ho*Wo, kh*kw*C), (N,Ho,Wo)).

    1x1 convs take the cheap path (no tap blow-up, just a strided subsample).
    """
    N, H, W, C = x.shape
    if pad > 0:
        x = jnp.pad(x, ((0, 0), (pad, pad), (pad, pad), (0, 0)))
    Hp, Wp = H + 2 * pad, W + 2 * pad
    Ho = (Hp - kh) // stride + 1
    Wo = (Wp - kw) // stride + 1
    if kh == 1 and kw == 1:
        sub = x[:, ::stride, ::stride, :][:, :Ho, :Wo, :]
        return sub.reshape(N * Ho * Wo, C), (N, Ho, Wo)
    cols = []
    for i in range(kh):
        for j in range(kw):
            cols.append(x[:, i:i + (Ho - 1) * stride + 1:stride,
                          j:j + (Wo - 1) * stride + 1:stride, :])
    patches = jnp.stack(cols, axis=3)  # (N, Ho, Wo, kh*kw, C)
    return patches.reshape(N * Ho * Wo, kh * kw * C), (N, Ho, Wo)


def conv_bn(x, w, bn, stride, pad, relu=False, residual=None):
    """Conv2d (no bias) + BatchNorm(eval) [+ residual] [+ ReLU] via fused matmul.

    x: (N,H,W,Cin) NHWC bf16;  w: PyTorch layout (Cout, Cin, kh, kw) f32.
    """
    Cout, Cin, kh, kw = w.shape
    a, (N, Ho, Wo) = im2col(x, kh, kw, stride, pad)
    b = jnp.transpose(w, (2, 3, 1, 0)).reshape(kh * kw * Cin, Cout)
    gamma, beta, mean, var = bn
    scale = (gamma / jnp.sqrt(var + EPS)).astype(jnp.float32)
    bias = (beta - mean * scale).astype(jnp.float32)
    res2d = None
    if residual is not None:
        res2d = residual.reshape(N * Ho * Wo, Cout)
    out = fused_matmul(a, b, scale.reshape(1, Cout), bias.reshape(1, Cout),
                       res2d, relu, out_dtype=jnp.bfloat16)
    return out.reshape(N, Ho, Wo, Cout)


def maxpool_3x3_s2_p1(x):
    """PyTorch MaxPool2d(kernel_size=3, stride=2, padding=1) on NHWC, separable."""
    N, H, W, C = x.shape
    xp = jnp.pad(x, ((0, 0), (1, 1), (1, 1), (0, 0)),
                 constant_values=-jnp.inf)
    Hp, Wp = H + 2, W + 2
    Ho = (Hp - 3) // 2 + 1
    Wo = (Wp - 3) // 2 + 1
    # width pass: 3 shifted stride-2 views -> tiled max
    wv = [xp[:, :, j:j + 2 * (Wo - 1) + 1:2, :].reshape(N * Hp * Wo, C)
          for j in range(3)]
    wm = _tiled_max3(*wv).reshape(N, Hp, Wo, C)
    # height pass
    hv = [wm[:, i:i + 2 * (Ho - 1) + 1:2, :, :].reshape(N * Ho * Wo, C)
          for i in range(3)]
    return _tiled_max3(*hv).reshape(N, Ho, Wo, C)


# --------------------------- parameters --------------------------------------

def init_params(key, num_classes=10):
    keys = iter(jax.random.split(key, 256))

    def conv_w(cout, cin, k):
        return jax.random.normal(next(keys), (cout, cin, k, k), jnp.float32) * 0.05

    def bn(c):
        gamma = 1.0 + 0.1 * jax.random.normal(next(keys), (c,), jnp.float32)
        beta = 0.1 * jax.random.normal(next(keys), (c,), jnp.float32)
        mean = 0.1 * jax.random.normal(next(keys), (c,), jnp.float32)
        var = 1.0 + 0.1 * jnp.abs(jax.random.normal(next(keys), (c,), jnp.float32))
        return (gamma, beta, mean, var)

    params = {
        "conv1_w": conv_w(64, 3, 7),
        "bn1": bn(64),
    }
    layer_cfg = [(64, 64, 1), (64, 128, 2), (128, 256, 2), (256, 512, 2)]
    layers = []
    for (cin, cout, stride) in layer_cfg:
        blocks = []
        for bidx in range(2):
            s = stride if bidx == 0 else 1
            in_c = cin if bidx == 0 else cout
            blk = {
                "conv1_w": conv_w(cout, in_c, 3), "bn1": bn(cout),
                "conv2_w": conv_w(cout, cout, 3), "bn2": bn(cout),
            }
            if s != 1 or in_c != cout:
                blk["down_w"] = conv_w(cout, in_c, 1)
                blk["down_bn"] = bn(cout)
            blocks.append(blk)
        layers.append(blocks)
    params["layers"] = layers
    params["fc_w"] = jax.random.normal(next(keys), (num_classes, 512), jnp.float32) * 0.05
    params["fc_b"] = 0.01 * jax.random.normal(next(keys), (num_classes,), jnp.float32)
    return params


# ----------------------------- forward ----------------------------------------

def basic_block(x, blk, stride):
    if "down_w" in blk:
        identity = conv_bn(x, blk["down_w"], blk["down_bn"], stride, 0, relu=False)
    else:
        identity = x
    h = conv_bn(x, blk["conv1_w"], blk["bn1"], stride, 1, relu=True)
    # out = relu(bn2(conv2(h)) + identity)  -- residual & relu fused in kernel
    h = conv_bn(h, blk["conv2_w"], blk["bn2"], 1, 1, relu=True, residual=identity)
    return h


def resnet18_forward(params, x_nchw):
    x = jnp.transpose(x_nchw, (0, 2, 3, 1)).astype(jnp.bfloat16)  # NCHW -> NHWC
    x = conv_bn(x, params["conv1_w"], params["bn1"], stride=2, pad=3, relu=True)
    x = maxpool_3x3_s2_p1(x)
    layer_strides = [1, 2, 2, 2]
    for blocks, s in zip(params["layers"], layer_strides):
        for bidx, blk in enumerate(blocks):
            x = basic_block(x, blk, s if bidx == 0 else 1)
    # fused global average pool + fc (logits in f32)
    return avgpool_fc(x, params["fc_w"], params["fc_b"])


if __name__ == "__main__":
    key = jax.random.PRNGKey(0)
    pkey, xkey = jax.random.split(key)
    params = init_params(pkey, num_classes=10)
    x = jax.random.normal(xkey, (2, 3, 16, 16), jnp.float32)  # NCHW, like PyTorch
    fwd = jax.jit(resnet18_forward)
    out = fwd(params, x)
    jax.block_until_ready(out)
    assert out.shape == (2, 10) and out.dtype == jnp.float32
    print("KERNEL_OK")
</pallas_src>

<mosaic_0001>
module attributes {stable_mosaic.version = 11 : i64} {
  func.func @_matmul_kernel(%arg0: i32, %arg1: i32, %arg2: i32, %arg3: memref<128x147xbf16, #tpu.memory_space<vmem>>, %arg4: memref<147x64xbf16, #tpu.memory_space<vmem>>, %arg5: memref<1x64xf32, #tpu.memory_space<vmem>>, %arg6: memref<1x64xf32, #tpu.memory_space<vmem>>, %arg7: memref<128x64xbf16, #tpu.memory_space<vmem>>, %arg8: memref<128x64xf32, #tpu.memory_space<vmem>>) attributes {dimension_semantics = [#tpu.dimension_semantics<parallel>, #tpu.dimension_semantics<parallel>, #tpu.dimension_semantics<arbitrary>], iteration_bounds = array<i64: 1, 1, 1>, scalar_prefetch = 0 : i64, scratch_operands = 1 : i64, tpu.core_type = #tpu.core_type<tc>, window_params = [{transform_indices = @transform_0, window_bounds = array<i64: 128, 147>}, {transform_indices = @transform_1, window_bounds = array<i64: 147, 64>}, {transform_indices = @transform_2, window_bounds = array<i64: 1, 64>}, {transform_indices = @transform_3, window_bounds = array<i64: 1, 64>}, {transform_indices = @transform_4, window_bounds = array<i64: 128, 64>}]} {
    %c0_i32 = arith.constant 0 : i32
    %0 = arith.cmpi eq, %arg2, %c0_i32 : i32
    %1 = arith.extui %0 : i1 to i32
    %c0_i32_0 = arith.constant 0 : i32
    %2 = arith.cmpi ne, %1, %c0_i32_0 : i32
    scf.if %2 {
      %cst_10 = arith.constant 0.000000e+00 : f32
      %12 = vector.broadcast %cst_10 : f32 to vector<128x64xf32>
      %c0_11 = arith.constant 0 : index
      %c0_12 = arith.constant 0 : index
      %13 = vector.load %arg8[%c0_11, %c0_12] : memref<128x64xf32, #tpu.memory_space<vmem>>, vector<128x64xf32>
      tpu.vector_store %arg8[%c0_11, %c0_12], %12 {strides = array<i32>} : memref<128x64xf32, #tpu.memory_space<vmem>>, vector<128x64xf32>,
    } else {
    }
    %c0 = arith.constant 0 : index
    %c0_1 = arith.constant 0 : index
    %3 = vector.load %arg8[%c0, %c0_1] : memref<128x64xf32, #tpu.memory_space<vmem>>, vector<128x64xf32>
    %c0_2 = arith.constant 0 : index
    %c0_3 = arith.constant 0 : index
    %4 = vector.load %arg3[%c0_2, %c0_3] : memref<128x147xbf16, #tpu.memory_space<vmem>>, vector<128x147xbf16>
    %c0_4 = arith.constant 0 : index
    %c0_5 = arith.constant 0 : index
    %5 = vector.load %arg4[%c0_4, %c0_5] : memref<147x64xbf16, #tpu.memory_space<vmem>>, vector<147x64xbf16>
    %cst = arith.constant dense<0.000000e+00> : vector<128x64xf32>
    %6 = tpu.matmul %4, %5, %cst {dimension_numbers = #tpu.dot_dimension_numbers<[1], [0], [0], [1], [0, 0, 1, 1], [], []>} : vector<128x147xbf16>, vector<147x64xbf16>, vector<128x64xf32> -> vector<128x64xf32>
    %7 = arith.addf %3, %6 : vector<128x64xf32>
    %c0_6 = arith.constant 0 : index
    %c0_7 = arith.constant 0 : index
    %8 = vector.load %arg8[%c0_6, %c0_7] : memref<128x64xf32, #tpu.memory_space<vmem>>, vector<128x64xf32>
    tpu.vector_store %arg8[%c0_6, %c0_7], %7 {strides = array<i32>} : memref<128x64xf32, #tpu.memory_space<vmem>>, vector<128x64xf32>,
    %c0_i32_8 = arith.constant 0 : i32
    %9 = arith.cmpi eq, %arg2, %c0_i32_8 : i32
    %10 = arith.extui %9 : i1 to i32
    %c0_i32_9 = arith.constant 0 : i32
    %11 = arith.cmpi ne, %10, %c0_i32_9 : i32
    scf.if %11 {
      %c0_10 = arith.constant 0 : index
      %c0_11 = arith.constant 0 : index
      %12 = vector.load %arg8[%c0_10, %c0_11] : memref<128x64xf32, #tpu.memory_space<vmem>>, vector<128x64xf32>
      %c0_12 = arith.constant 0 : index
      %c0_13 = arith.constant 0 : index
      %13 = vector.load %arg5[%c0_12, %c0_13] : memref<1x64xf32, #tpu.memory_space<vmem>>, vector<1x64xf32>
      %14 = vector.broadcast %13 : vector<1x64xf32> to vector<128x64xf32>
      %15 = arith.mulf %12, %14 : vector<128x64xf32>
      %c0_14 = arith.constant 0 : index
      %c0_15 = arith.constant 0 : index
      %16 = vector.load %arg6[%c0_14, %c0_15] : memref<1x64xf32, #tpu.memory_space<vmem>>, vector<1x64xf32>
      %17 = vector.broadcast %16 : vector<1x64xf32> to vector<128x64xf32>
      %18 = arith.addf %15, %17 : vector<128x64xf32>
      %cst_16 = arith.constant 0.000000e+00 : f32
      %19 = vector.broadcast %cst_16 : f32 to vector<128x64xf32>
      %20 = arith.maximumf %18, %19 : vector<128x64xf32>
      %21 = arith.truncf %20 : vector<128x64xf32> to vector<128x64xbf16>
      %c0_17 = arith.constant 0 : index
      %c0_18 = arith.constant 0 : index
      %22 = vector.load %arg7[%c0_17, %c0_18] : memref<128x64xbf16, #tpu.memory_space<vmem>>, vector<128x64xbf16>
      tpu.vector_store %arg7[%c0_17, %c0_18], %21 {strides = array<i32>} : memref<128x64xbf16, #tpu.memory_space<vmem>>, vector<128x64xbf16>,
    } else {
    }
    return
  }
  func.func @transform_0(%arg0: i32, %arg1: i32, %arg2: i32) -> (i32, i32) {
    %c0_i32 = arith.constant 0 : i32
    return %arg0, %arg2 : i32, i32
  }
  func.func @transform_1(%arg0: i32, %arg1: i32, %arg2: i32) -> (i32, i32) {
    %c0_i32 = arith.constant 0 : i32
    return %arg2, %arg1 : i32, i32
  }
  func.func @transform_2(%arg0: i32, %arg1: i32, %arg2: i32) -> (i32, i32) {
    %c0_i32 = arith.constant 0 : i32
    %c0_i32_0 = arith.constant 0 : i32
    return %c0_i32, %arg1 : i32, i32
  }
  func.func @transform_3(%arg0: i32, %arg1: i32, %arg2: i32) -> (i32, i32) {
    %c0_i32 = arith.constant 0 : i32
    %c0_i32_0 = arith.constant 0 : i32
    return %c0_i32, %arg1 : i32, i32
  }
  func.func @transform_4(%arg0: i32, %arg1: i32, %arg2: i32) -> (i32, i32) {
    %c0_i32 = arith.constant 0 : i32
    return %arg0, %arg1 : i32, i32
  }
}

module attributes {stable_mosaic.version = 11 : i64} {
  func.func @_max3_kernel(%arg0: i32, %arg1: memref<32x64xbf16, #tpu.memory_space<vmem>>, %arg2: memref<32x64xbf16, #tpu.memory_space<vmem>>, %arg3: memref<32x64xbf16, #tpu.memory_space<vmem>>, %arg4: memref<32x64xbf16, #tpu.memory_space<vmem>>) attributes {dimension_semantics = [#tpu.dimension_semantics<parallel>], iteration_bounds = array<i64: 1>, scalar_prefetch = 0 : i64, scratch_operands = 0 : i64, tpu.core_type = #tpu.core_type<tc>, window_params = [{transform_indices = @transform_0, window_bounds = array<i64: 32, 64>}, {transform_indices = @transform_1, window_bounds = array<i64: 32, 64>}, {transform_indices = @transform_2, window_bounds = array<i64: 32, 64>}, {transform_indices = @transform_3, window_bounds = array<i64: 32, 64>}]} {
    %c0 = arith.constant 0 : index
    %c0_0 = arith.constant 0 : index
    %0 = vector.load %arg1[%c0, %c0_0] : memref<32x64xbf16, #tpu.memory_space<vmem>>, vector<32x64xbf16>
    %c0_1 = arith.constant 0 : index
    %c0_2 = arith.constant 0 : index
    %1 = vector.load %arg2[%c0_1, %c0_2] : memref<32x64xbf16, #tpu.memory_space<vmem>>, vector<32x64xbf16>
    %2 = arith.maximumf %0, %1 : vector<32x64xbf16>
    %c0_3 = arith.constant 0 : index
    %c0_4 = arith.constant 0 : index
    %3 = vector.load %arg3[%c0_3, %c0_4] : memref<32x64xbf16, #tpu.memory_space<vmem>>, vector<32x64xbf16>
    %4 = arith.maximumf %2, %3 : vector<32x64xbf16>
    %c0_5 = arith.constant 0 : index
    %c0_6 = arith.constant 0 : index
    %5 = vector.load %arg4[%c0_5, %c0_6] : memref<32x64xbf16, #tpu.memory_space<vmem>>, vector<32x64xbf16>
    tpu.vector_store %arg4[%c0_5, %c0_6], %4 {strides = array<i32>} : memref<32x64xbf16, #tpu.memory_space<vmem>>, vector<32x64xbf16>,
    return
  }
  func.func @transform_0(%arg0: i32) -> (i32, i32) {
    %c0_i32 = arith.constant 0 : i32
    %c0_i32_0 = arith.constant 0 : i32
    return %arg0, %c0_i32 : i32, i32
  }
  func.func @transform_1(%arg0: i32) -> (i32, i32) {
    %c0_i32 = arith.constant 0 : i32
    %c0_i32_0 = arith.constant 0 : i32
    return %arg0, %c0_i32 : i32, i32
  }
  func.func @transform_2(%arg0: i32) -> (i32, i32) {
    %c0_i32 = arith.constant 0 : i32
    %c0_i32_0 = arith.constant 0 : i32
    return %arg0, %c0_i32 : i32, i32
  }
  func.func @transform_3(%arg0: i32) -> (i32, i32) {
    %c0_i32 = arith.constant 0 : i32
    %c0_i32_0 = arith.constant 0 : i32
    return %arg0, %c0_i32 : i32, i32
  }
}

module attributes {stable_mosaic.version = 11 : i64} {
  func.func @_max3_kernel(%arg0: i32, %arg1: memref<80x64xbf16, #tpu.memory_space<vmem>>, %arg2: memref<80x64xbf16, #tpu.memory_space<vmem>>, %arg3: memref<80x64xbf16, #tpu.memory_space<vmem>>, %arg4: memref<80x64xbf16, #tpu.memory_space<vmem>>) attributes {dimension_semantics = [#tpu.dimension_semantics<parallel>], iteration_bounds = array<i64: 1>, scalar_prefetch = 0 : i64, scratch_operands = 0 : i64, tpu.core_type = #tpu.core_type<tc>, window_params = [{transform_indices = @transform_0, window_bounds = array<i64: 80, 64>}, {transform_indices = @transform_1, window_bounds = array<i64: 80, 64>}, {transform_indices = @transform_2, window_bounds = array<i64: 80, 64>}, {transform_indices = @transform_3, window_bounds = array<i64: 80, 64>}]} {
    %c0 = arith.constant 0 : index
    %c0_0 = arith.constant 0 : index
    %0 = vector.load %arg1[%c0, %c0_0] : memref<80x64xbf16, #tpu.memory_space<vmem>>, vector<80x64xbf16>
    %c0_1 = arith.constant 0 : index
    %c0_2 = arith.constant 0 : index
    %1 = vector.load %arg2[%c0_1, %c0_2] : memref<80x64xbf16, #tpu.memory_space<vmem>>, vector<80x64xbf16>
    %2 = arith.maximumf %0, %1 : vector<80x64xbf16>
    %c0_3 = arith.constant 0 : index
    %c0_4 = arith.constant 0 : index
    %3 = vector.load %arg3[%c0_3, %c0_4] : memref<80x64xbf16, #tpu.memory_space<vmem>>, vector<80x64xbf16>
    %4 = arith.maximumf %2, %3 : vector<80x64xbf16>
    %c0_5 = arith.constant 0 : index
    %c0_6 = arith.constant 0 : index
    %5 = vector.load %arg4[%c0_5, %c0_6] : memref<80x64xbf16, #tpu.memory_space<vmem>>, vector<80x64xbf16>
    tpu.vector_store %arg4[%c0_5, %c0_6], %4 {strides = array<i32>} : memref<80x64xbf16, #tpu.memory_space<vmem>>, vector<80x64xbf16>,
    return
  }
  func.func @transform_0(%arg0: i32) -> (i32, i32) {
    %c0_i32 = arith.constant 0 : i32
    %c0_i32_0 = arith.constant 0 : i32
    return %arg0, %c0_i32 : i32, i32
  }
  func.func @transform_1(%arg0: i32) -> (i32, i32) {
    %c0_i32 = arith.constant 0 : i32
    %c0_i32_0 = arith.constant 0 : i32
    return %arg0, %c0_i32 : i32, i32
  }
  func.func @transform_2(%arg0: i32) -> (i32, i32) {
    %c0_i32 = arith.constant 0 : i32
    %c0_i32_0 = arith.constant 0 : i32
    return %arg0, %c0_i32 : i32, i32
  }
  func.func @transform_3(%arg0: i32) -> (i32, i32) {
    %c0_i32 = arith.constant 0 : i32
    %c0_i32_0 = arith.constant 0 : i32
    return %arg0, %c0_i32 : i32, i32
  }
}

module attributes {stable_mosaic.version = 11 : i64} {
  func.func @_matmul_kernel(%arg0: i32, %arg1: i32, %arg2: i32, %arg3: memref<32x576xbf16, #tpu.memory_space<vmem>>, %arg4: memref<576x64xbf16, #tpu.memory_space<vmem>>, %arg5: memref<1x64xf32, #tpu.memory_space<vmem>>, %arg6: memref<1x64xf32, #tpu.memory_space<vmem>>, %arg7: memref<32x64xbf16, #tpu.memory_space<vmem>>, %arg8: memref<32x64xf32, #tpu.memory_space<vmem>>) attributes {dimension_semantics = [#tpu.dimension_semantics<parallel>, #tpu.dimension_semantics<parallel>, #tpu.dimension_semantics<arbitrary>], iteration_bounds = array<i64: 1, 1, 1>, scalar_prefetch = 0 : i64, scratch_operands = 1 : i64, tpu.core_type = #tpu.core_type<tc>, window_params = [{transform_indices = @transform_0, window_bounds = array<i64: 32, 576>}, {transform_indices = @transform_1, window_bounds = array<i64: 576, 64>}, {transform_indices = @transform_2, window_bounds = array<i64: 1, 64>}, {transform_indices = @transform_3, window_bounds = array<i64: 1, 64>}, {transform_indices = @transform_4, window_bounds = array<i64: 32, 64>}]} {
    %c0_i32 = arith.constant 0 : i32
    %0 = arith.cmpi eq, %arg2, %c0_i32 : i32
    %1 = arith.extui %0 : i1 to i32
    %c0_i32_0 = arith.constant 0 : i32
    %2 = arith.cmpi ne, %1, %c0_i32_0 : i32
    scf.if %2 {
      %cst_10 = arith.constant 0.000000e+00 : f32
      %12 = vector.broadcast %cst_10 : f32 to vector<32x64xf32>
      %c0_11 = arith.constant 0 : index
      %c0_12 = arith.constant 0 : index
      %13 = vector.load %arg8[%c0_11, %c0_12] : memref<32x64xf32, #tpu.memory_space<vmem>>, vector<32x64xf32>
      tpu.vector_store %arg8[%c0_11, %c0_12], %12 {strides = array<i32>} : memref<32x64xf32, #tpu.memory_space<vmem>>, vector<32x64xf32>,
    } else {
    }
    %c0 = arith.constant 0 : index
    %c0_1 = arith.constant 0 : index
    %3 = vector.load %arg8[%c0, %c0_1] : memref<32x64xf32, #tpu.memory_space<vmem>>, vector<32x64xf32>
    %c0_2 = arith.constant 0 : index
    %c0_3 = arith.constant 0 : index
    %4 = vector.load %arg3[%c0_2, %c0_3] : memref<32x576xbf16, #tpu.memory_space<vmem>>, vector<32x576xbf16>
    %c0_4 = arith.constant 0 : index
    %c0_5 = arith.constant 0 : index
    %5 = vector.load %arg4[%c0_4, %c0_5] : memref<576x64xbf16, #tpu.memory_space<vmem>>, vector<576x64xbf16>
    %cst = arith.constant dense<0.000000e+00> : vector<32x64xf32>
    %6 = tpu.matmul %4, %5, %cst {dimension_numbers = #tpu.dot_dimension_numbers<[1], [0], [0], [1], [0, 0, 1, 1], [], []>} : vector<32x576xbf16>, vector<576x64xbf16>, vector<32x64xf32> -> vector<32x64xf32>
    %7 = arith.addf %3, %6 : vector<32x64xf32>
    %c0_6 = arith.constant 0 : index
    %c0_7 = arith.constant 0 : index
    %8 = vector.load %arg8[%c0_6, %c0_7] : memref<32x64xf32, #tpu.memory_space<vmem>>, vector<32x64xf32>
    tpu.vector_store %arg8[%c0_6, %c0_7], %7 {strides = array<i32>} : memref<32x64xf32, #tpu.memory_space<vmem>>, vector<32x64xf32>,
    %c0_i32_8 = arith.constant 0 : i32
    %9 = arith.cmpi eq, %arg2, %c0_i32_8 : i32
    %10 = arith.extui %9 : i1 to i32
    %c0_i32_9 = arith.constant 0 : i32
    %11 = arith.cmpi ne, %10, %c0_i32_9 : i32
    scf.if %11 {
      %c0_10 = arith.constant 0 : index
      %c0_11 = arith.constant 0 : index
      %12 = vector.load %arg8[%c0_10, %c0_11] : memref<32x64xf32, #tpu.memory_space<vmem>>, vector<32x64xf32>
      %c0_12 = arith.constant 0 : index
      %c0_13 = arith.constant 0 : index
      %13 = vector.load %arg5[%c0_12, %c0_13] : memref<1x64xf32, #tpu.memory_space<vmem>>, vector<1x64xf32>
      %14 = vector.broadcast %13 : vector<1x64xf32> to vector<32x64xf32>
      %15 = arith.mulf %12, %14 : vector<32x64xf32>
      %c0_14 = arith.constant 0 : index
      %c0_15 = arith.constant 0 : index
      %16 = vector.load %arg6[%c0_14, %c0_15] : memref<1x64xf32, #tpu.memory_space<vmem>>, vector<1x64xf32>
      %17 = vector.broadcast %16 : vector<1x64xf32> to vector<32x64xf32>
      %18 = arith.addf %15, %17 : vector<32x64xf32>
      %cst_16 = arith.constant 0.000000e+00 : f32
      %19 = vector.broadcast %cst_16 : f32 to vector<32x64xf32>
      %20 = arith.maximumf %18, %19 : vector<32x64xf32>
      %21 = arith.truncf %20 : vector<32x64xf32> to vector<32x64xbf16>
      %c0_17 = arith.constant 0 : index
      %c0_18 = arith.constant 0 : index
      %22 = vector.load %arg7[%c0_17, %c0_18] : memref<32x64xbf16, #tpu.memory_space<vmem>>, vector<32x64xbf16>
      tpu.vector_store %arg7[%c0_17, %c0_18], %21 {strides = array<i32>} : memref<32x64xbf16, #tpu.memory_space<vmem>>, vector<32x64xbf16>,
    } else {
    }
    return
  }
  func.func @transform_0(%arg0: i32, %arg1: i32, %arg2: i32) -> (i32, i32) {
    %c0_i32 = arith.constant 0 : i32
    return %arg0, %arg2 : i32, i32
  }
  func.func @transform_1(%arg0: i32, %arg1: i32, %arg2: i32) -> (i32, i32) {
    %c0_i32 = arith.constant 0 : i32
    return %arg2, %arg1 : i32, i32
  }
  func.func @transform_2(%arg0: i32, %arg1: i32, %arg2: i32) -> (i32, i32) {
    %c0_i32 = arith.constant 0 : i32
    %c0_i32_0 = arith.constant 0 : i32
    return %c0_i32, %arg1 : i32, i32
  }
  func.func @transform_3(%arg0: i32, %arg1: i32, %arg2: i32) -> (i32, i32) {
    %c0_i32 = arith.constant 0 : i32
    %c0_i32_0 = arith.constant 0 : i32
    return %c0_i32, %arg1 : i32, i32
  }
  func.func @transform_4(%arg0: i32, %arg1: i32, %arg2: i32) -> (i32, i32) {
    %c0_i32 = arith.constant 0 : i32
    return %arg0, %arg1 : i32, i32
  }
}

module attributes {stable_mosaic.version = 11 : i64} {
  func.func @_matmul_kernel(%arg0: i32, %arg1: i32, %arg2: i32, %arg3: memref<32x576xbf16, #tpu.memory_space<vmem>>, %arg4: memref<576x64xbf16, #tpu.memory_space<vmem>>, %arg5: memref<1x64xf32, #tpu.memory_space<vmem>>, %arg6: memref<1x64xf32, #tpu.memory_space<vmem>>, %arg7: memref<32x64xbf16, #tpu.memory_space<vmem>>, %arg8: memref<32x64xbf16, #tpu.memory_space<vmem>>, %arg9: memref<32x64xf32, #tpu.memory_space<vmem>>) attributes {dimension_semantics = [#tpu.dimension_semantics<parallel>, #tpu.dimension_semantics<parallel>, #tpu.dimension_semantics<arbitrary>], iteration_bounds = array<i64: 1, 1, 1>, scalar_prefetch = 0 : i64, scratch_operands = 1 : i64, tpu.core_type = #tpu.core_type<tc>, window_params = [{transform_indices = @transform_0, window_bounds = array<i64: 32, 576>}, {transform_indices = @transform_1, window_bounds = array<i64: 576, 64>}, {transform_indices = @transform_2, window_bounds = array<i64: 1, 64>}, {transform_indices = @transform_3, window_bounds = array<i64: 1, 64>}, {transform_indices = @transform_4, window_bounds = array<i64: 32, 64>}, {transform_indices = @transform_5, window_bounds = array<i64: 32, 64>}]} {
    %c0_i32 = arith.constant 0 : i32
    %0 = arith.cmpi eq, %arg2, %c0_i32 : i32
    %1 = arith.extui %0 : i1 to i32
    %c0_i32_0 = arith.constant 0 : i32
    %2 = arith.cmpi ne, %1, %c0_i32_0 : i32
    scf.if %2 {
      %cst_10 = arith.constant 0.000000e+00 : f32
      %12 = vector.broadcast %cst_10 : f32 to vector<32x64xf32>
      %c0_11 = arith.constant 0 : index
      %c0_12 = arith.constant 0 : index
      %13 = vector.load %arg9[%c0_11, %c0_12] : memref<32x64xf32, #tpu.memory_space<vmem>>, vector<32x64xf32>
      tpu.vector_store %arg9[%c0_11, %c0_12], %12 {strides = array<i32>} : memref<32x64xf32, #tpu.memory_space<vmem>>, vector<32x64xf32>,
    } else {
    }
    %c0 = arith.constant 0 : index
    %c0_1 = arith.constant 0 : index
    %3 = vector.load %arg9[%c0, %c0_1] : memref<32x64xf32, #tpu.memory_space<vmem>>, vector<32x64xf32>
    %c0_2 = arith.constant 0 : index
    %c0_3 = arith.constant 0 : index
    %4 = vector.load %arg3[%c0_2, %c0_3] : memref<32x576xbf16, #tpu.memory_space<vmem>>, vector<32x576xbf16>
    %c0_4 = arith.constant 0 : index
    %c0_5 = arith.constant 0 : index
    %5 = vector.load %arg4[%c0_4, %c0_5] : memref<576x64xbf16, #tpu.memory_space<vmem>>, vector<576x64xbf16>
    %cst = arith.constant dense<0.000000e+00> : vector<32x64xf32>
    %6 = tpu.matmul %4, %5, %cst {dimension_numbers = #tpu.dot_dimension_numbers<[1], [0], [0], [1], [0, 0, 1, 1], [], []>} : vector<32x576xbf16>, vector<576x64xbf16>, vector<32x64xf32> -> vector<32x64xf32>
    %7 = arith.addf %3, %6 : vector<32x64xf32>
    %c0_6 = arith.constant 0 : index
    %c0_7 = arith.constant 0 : index
    %8 = vector.load %arg9[%c0_6, %c0_7] : memref<32x64xf32, #tpu.memory_space<vmem>>, vector<32x64xf32>
    tpu.vector_store %arg9[%c0_6, %c0_7], %7 {strides = array<i32>} : memref<32x64xf32, #tpu.memory_space<vmem>>, vector<32x64xf32>,
    %c0_i32_8 = arith.constant 0 : i32
    %9 = arith.cmpi eq, %arg2, %c0_i32_8 : i32
    %10 = arith.extui %9 : i1 to i32
    %c0_i32_9 = arith.constant 0 : i32
    %11 = arith.cmpi ne, %10, %c0_i32_9 : i32
    scf.if %11 {
      %c0_10 = arith.constant 0 : index
      %c0_11 = arith.constant 0 : index
      %12 = vector.load %arg9[%c0_10, %c0_11] : memref<32x64xf32, #tpu.memory_space<vmem>>, vector<32x64xf32>
      %c0_12 = arith.constant 0 : index
      %c0_13 = arith.constant 0 : index
      %13 = vector.load %arg5[%c0_12, %c0_13] : memref<1x64xf32, #tpu.memory_space<vmem>>, vector<1x64xf32>
      %14 = vector.broadcast %13 : vector<1x64xf32> to vector<32x64xf32>
      %15 = arith.mulf %12, %14 : vector<32x64xf32>
      %c0_14 = arith.constant 0 : index
      %c0_15 = arith.constant 0 : index
      %16 = vector.load %arg6[%c0_14, %c0_15] : memref<1x64xf32, #tpu.memory_space<vmem>>, vector<1x64xf32>
      %17 = vector.broadcast %16 : vector<1x64xf32> to vector<32x64xf32>
      %18 = arith.addf %15, %17 : vector<32x64xf32>
      %c0_16 = arith.constant 0 : index
      %c0_17 = arith.constant 0 : index
      %19 = vector.load %arg7[%c0_16, %c0_17] : memref<32x64xbf16, #tpu.memory_space<vmem>>, vector<32x64xbf16>
      %20 = arith.extf %19 : vector<32x64xbf16> to vector<32x64xf32>
      %21 = arith.addf %18, %20 : vector<32x64xf32>
      %cst_18 = arith.constant 0.000000e+00 : f32
      %22 = vector.broadcast %cst_18 : f32 to vector<32x64xf32>
      %23 = arith.maximumf %21, %22 : vector<32x64xf32>
      %24 = arith.truncf %23 : vector<32x64xf32> to vector<32x64xbf16>
      %c0_19 = arith.constant 0 : index
      %c0_20 = arith.constant 0 : index
      %25 = vector.load %arg8[%c0_19, %c0_20] : memref<32x64xbf16, #tpu.memory_space<vmem>>, vector<32x64xbf16>
      tpu.vector_store %arg8[%c0_19, %c0_20], %24 {strides = array<i32>} : memref<32x64xbf16, #tpu.memory_space<vmem>>, vector<32x64xbf16>,
    } else {
    }
    return
  }
  func.func @transform_0(%arg0: i32, %arg1: i32, %arg2: i32) -> (i32, i32) {
    %c0_i32 = arith.constant 0 : i32
    return %arg0, %arg2 : i32, i32
  }
  func.func @transform_1(%arg0: i32, %arg1: i32, %arg2: i32) -> (i32, i32) {
    %c0_i32 = arith.constant 0 : i32
    return %arg2, %arg1 : i32, i32
  }
  func.func @transform_2(%arg0: i32, %arg1: i32, %arg2: i32) -> (i32, i32) {
    %c0_i32 = arith.constant 0 : i32
    %c0_i32_0 = arith.constant 0 : i32
    return %c0_i32, %arg1 : i32, i32
  }
  func.func @transform_3(%arg0: i32, %arg1: i32, %arg2: i32) -> (i32, i32) {
    %c0_i32 = arith.constant 0 : i32
    %c0_i32_0 = arith.constant 0 : i32
    return %c0_i32, %arg1 : i32, i32
  }
  func.func @transform_4(%arg0: i32, %arg1: i32, %arg2: i32) -> (i32, i32) {
    %c0_i32 = arith.constant 0 : i32
    return %arg0, %arg1 : i32, i32
  }
  func.func @transform_5(%arg0: i32, %arg1: i32, %arg2: i32) -> (i32, i32) {
    %c0_i32 = arith.constant 0 : i32
    return %arg0, %arg1 : i32, i32
  }
}

module attributes {stable_mosaic.version = 11 : i64} {
  func.func @_matmul_kernel(%arg0: i32, %arg1: i32, %arg2: i32, %arg3: memref<8x576xbf16, #tpu.memory_space<vmem>>, %arg4: memref<576x128xbf16, #tpu.memory_space<vmem>>, %arg5: memref<1x128xf32, #tpu.memory_space<vmem>>, %arg6: memref<1x128xf32, #tpu.memory_space<vmem>>, %arg7: memref<8x128xbf16, #tpu.memory_space<vmem>>, %arg8: memref<8x128xf32, #tpu.memory_space<vmem>>) attributes {dimension_semantics = [#tpu.dimension_semantics<parallel>, #tpu.dimension_semantics<parallel>, #tpu.dimension_semantics<arbitrary>], iteration_bounds = array<i64: 1, 1, 1>, scalar_prefetch = 0 : i64, scratch_operands = 1 : i64, tpu.core_type = #tpu.core_type<tc>, window_params = [{transform_indices = @transform_0, window_bounds = array<i64: 8, 576>}, {transform_indices = @transform_1, window_bounds = array<i64: 576, 128>}, {transform_indices = @transform_2, window_bounds = array<i64: 1, 128>}, {transform_indices = @transform_3, window_bounds = array<i64: 1, 128>}, {transform_indices = @transform_4, window_bounds = array<i64: 8, 128>}]} {
    %c0_i32 = arith.constant 0 : i32
    %0 = arith.cmpi eq, %arg2, %c0_i32 : i32
    %1 = arith.extui %0 : i1 to i32
    %c0_i32_0 = arith.constant 0 : i32
    %2 = arith.cmpi ne, %1, %c0_i32_0 : i32
    scf.if %2 {
      %cst_10 = arith.constant 0.000000e+00 : f32
      %12 = vector.broadcast %cst_10 : f32 to vector<8x128xf32>
      %c0_11 = arith.constant 0 : index
      %c0_12 = arith.constant 0 : index
      %13 = vector.load %arg8[%c0_11, %c0_12] : memref<8x128xf32, #tpu.memory_space<vmem>>, vector<8x128xf32>
      tpu.vector_store %arg8[%c0_11, %c0_12], %12 {strides = array<i32>} : memref<8x128xf32, #tpu.memory_space<vmem>>, vector<8x128xf32>,
    } else {
    }
    %c0 = arith.constant 0 : index
    %c0_1 = arith.constant 0 : index
    %3 = vector.load %arg8[%c0, %c0_1] : memref<8x128xf32, #tpu.memory_space<vmem>>, vector<8x128xf32>
    %c0_2 = arith.constant 0 : index
    %c0_3 = arith.constant 0 : index
    %4 = vector.load %arg3[%c0_2, %c0_3] : memref<8x576xbf16, #tpu.memory_space<vmem>>, vector<8x576xbf16>
    %c0_4 = arith.constant 0 : index
    %c0_5 = arith.constant 0 : index
    %5 = vector.load %arg4[%c0_4, %c0_5] : memref<576x128xbf16, #tpu.memory_space<vmem>>, vector<576x128xbf16>
    %cst = arith.constant dense<0.000000e+00> : vector<8x128xf32>
    %6 = tpu.matmul %4, %5, %cst {dimension_numbers = #tpu.dot_dimension_numbers<[1], [0], [0], [1], [0, 0, 1, 1], [], []>} : vector<8x576xbf16>, vector<576x128xbf16>, vector<8x128xf32> -> vector<8x128xf32>
    %7 = arith.addf %3, %6 : vector<8x128xf32>
    %c0_6 = arith.constant 0 : index
    %c0_7 = arith.constant 0 : index
    %8 = vector.load %arg8[%c0_6, %c0_7] : memref<8x128xf32, #tpu.memory_space<vmem>>, vector<8x128xf32>
    tpu.vector_store %arg8[%c0_6, %c0_7], %7 {strides = array<i32>} : memref<8x128xf32, #tpu.memory_space<vmem>>, vector<8x128xf32>,
    %c0_i32_8 = arith.constant 0 : i32
    %9 = arith.cmpi eq, %arg2, %c0_i32_8 : i32
    %10 = arith.extui %9 : i1 to i32
    %c0_i32_9 = arith.constant 0 : i32
    %11 = arith.cmpi ne, %10, %c0_i32_9 : i32
    scf.if %11 {
      %c0_10 = arith.constant 0 : index
      %c0_11 = arith.constant 0 : index
      %12 = vector.load %arg8[%c0_10, %c0_11] : memref<8x128xf32, #tpu.memory_space<vmem>>, vector<8x128xf32>
      %c0_12 = arith.constant 0 : index
      %c0_13 = arith.constant 0 : index
      %13 = vector.load %arg5[%c0_12, %c0_13] : memref<1x128xf32, #tpu.memory_space<vmem>>, vector<1x128xf32>
      %14 = vector.broadcast %13 : vector<1x128xf32> to vector<8x128xf32>
      %15 = arith.mulf %12, %14 : vector<8x128xf32>
      %c0_14 = arith.constant 0 : index
      %c0_15 = arith.constant 0 : index
      %16 = vector.load %arg6[%c0_14, %c0_15] : memref<1x128xf32, #tpu.memory_space<vmem>>, vector<1x128xf32>
      %17 = vector.broadcast %16 : vector<1x128xf32> to vector<8x128xf32>
      %18 = arith.addf %15, %17 : vector<8x128xf32>
      %cst_16 = arith.constant 0.000000e+00 : f32
      %19 = vector.broadcast %cst_16 : f32 to vector<8x128xf32>
      %20 = arith.maximumf %18, %19 : vector<8x128xf32>
      %21 = arith.truncf %20 : vector<8x128xf32> to vector<8x128xbf16>
      %c0_17 = arith.constant 0 : index
      %c0_18 = arith.constant 0 : index
      %22 = vector.load %arg7[%c0_17, %c0_18] : memref<8x128xbf16, #tpu.memory_space<vmem>>, vector<8x128xbf16>
      tpu.vector_store %arg7[%c0_17, %c0_18], %21 {strides = array<i32>} : memref<8x128xbf16, #tpu.memory_space<vmem>>, vector<8x128xbf16>,
    } else {
    }
    return
  }
  func.func @transform_0(%arg0: i32, %arg1: i32, %arg2: i32) -> (i32, i32) {
    %c0_i32 = arith.constant 0 : i32
    return %arg0, %arg2 : i32, i32
  }
  func.func @transform_1(%arg0: i32, %arg1: i32, %arg2: i32) -> (i32, i32) {
    %c0_i32 = arith.constant 0 : i32
    return %arg2, %arg1 : i32, i32
  }
  func.func @transform_2(%arg0: i32, %arg1: i32, %arg2: i32) -> (i32, i32) {
    %c0_i32 = arith.constant 0 : i32
    %c0_i32_0 = arith.constant 0 : i32
    return %c0_i32, %arg1 : i32, i32
  }
  func.func @transform_3(%arg0: i32, %arg1: i32, %arg2: i32) -> (i32, i32) {
    %c0_i32 = arith.constant 0 : i32
    %c0_i32_0 = arith.constant 0 : i32
    return %c0_i32, %arg1 : i32, i32
  }
  func.func @transform_4(%arg0: i32, %arg1: i32, %arg2: i32) -> (i32, i32) {
    %c0_i32 = arith.constant 0 : i32
    return %arg0, %arg1 : i32, i32
  }
}

module attributes {stable_mosaic.version = 11 : i64} {
  func.func @_matmul_kernel(%arg0: i32, %arg1: i32, %arg2: i32, %arg3: memref<8x64xbf16, #tpu.memory_space<vmem>>, %arg4: memref<64x128xbf16, #tpu.memory_space<vmem>>, %arg5: memref<1x128xf32, #tpu.memory_space<vmem>>, %arg6: memref<1x128xf32, #tpu.memory_space<vmem>>, %arg7: memref<8x128xbf16, #tpu.memory_space<vmem>>, %arg8: memref<8x128xf32, #tpu.memory_space<vmem>>) attributes {dimension_semantics = [#tpu.dimension_semantics<parallel>, #tpu.dimension_semantics<parallel>, #tpu.dimension_semantics<arbitrary>], iteration_bounds = array<i64: 1, 1, 1>, scalar_prefetch = 0 : i64, scratch_operands = 1 : i64, tpu.core_type = #tpu.core_type<tc>, window_params = [{transform_indices = @transform_0, window_bounds = array<i64: 8, 64>}, {transform_indices = @transform_1, window_bounds = array<i64: 64, 128>}, {transform_indices = @transform_2, window_bounds = array<i64: 1, 128>}, {transform_indices = @transform_3, window_bounds = array<i64: 1, 128>}, {transform_indices = @transform_4, window_bounds = array<i64: 8, 128>}]} {
    %c0_i32 = arith.constant 0 : i32
    %0 = arith.cmpi eq, %arg2, %c0_i32 : i32
    %1 = arith.extui %0 : i1 to i32
    %c0_i32_0 = arith.constant 0 : i32
    %2 = arith.cmpi ne, %1, %c0_i32_0 : i32
    scf.if %2 {
      %cst_10 = arith.constant 0.000000e+00 : f32
      %12 = vector.broadcast %cst_10 : f32 to vector<8x128xf32>
      %c0_11 = arith.constant 0 : index
      %c0_12 = arith.constant 0 : index
      %13 = vector.load %arg8[%c0_11, %c0_12] : memref<8x128xf32, #tpu.memory_space<vmem>>, vector<8x128xf32>
      tpu.vector_store %arg8[%c0_11, %c0_12], %12 {strides = array<i32>} : memref<8x128xf32, #tpu.memory_space<vmem>>, vector<8x128xf32>,
    } else {
    }
    %c0 = arith.constant 0 : index
    %c0_1 = arith.constant 0 : index
    %3 = vector.load %arg8[%c0, %c0_1] : memref<8x128xf32, #tpu.memory_space<vmem>>, vector<8x128xf32>
    %c0_2 = arith.constant 0 : index
    %c0_3 = arith.constant 0 : index
    %4 = vector.load %arg3[%c0_2, %c0_3] : memref<8x64xbf16, #tpu.memory_space<vmem>>, vector<8x64xbf16>
    %c0_4 = arith.constant 0 : index
    %c0_5 = arith.constant 0 : index
    %5 = vector.load %arg4[%c0_4, %c0_5] : memref<64x128xbf16, #tpu.memory_space<vmem>>, vector<64x128xbf16>
    %cst = arith.constant dense<0.000000e+00> : vector<8x128xf32>
    %6 = tpu.matmul %4, %5, %cst {dimension_numbers = #tpu.dot_dimension_numbers<[1], [0], [0], [1], [0, 0, 1, 1], [], []>} : vector<8x64xbf16>, vector<64x128xbf16>, vector<8x128xf32> -> vector<8x128xf32>
    %7 = arith.addf %3, %6 : vector<8x128xf32>
    %c0_6 = arith.constant 0 : index
    %c0_7 = arith.constant 0 : index
    %8 = vector.load %arg8[%c0_6, %c0_7] : memref<8x128xf32, #tpu.memory_space<vmem>>, vector<8x128xf32>
    tpu.vector_store %arg8[%c0_6, %c0_7], %7 {strides = array<i32>} : memref<8x128xf32, #tpu.memory_space<vmem>>, vector<8x128xf32>,
    %c0_i32_8 = arith.constant 0 : i32
    %9 = arith.cmpi eq, %arg2, %c0_i32_8 : i32
    %10 = arith.extui %9 : i1 to i32
    %c0_i32_9 = arith.constant 0 : i32
    %11 = arith.cmpi ne, %10, %c0_i32_9 : i32
    scf.if %11 {
      %c0_10 = arith.constant 0 : index
      %c0_11 = arith.constant 0 : index
      %12 = vector.load %arg8[%c0_10, %c0_11] : memref<8x128xf32, #tpu.memory_space<vmem>>, vector<8x128xf32>
      %c0_12 = arith.constant 0 : index
      %c0_13 = arith.constant 0 : index
      %13 = vector.load %arg5[%c0_12, %c0_13] : memref<1x128xf32, #tpu.memory_space<vmem>>, vector<1x128xf32>
      %14 = vector.broadcast %13 : vector<1x128xf32> to vector<8x128xf32>
      %15 = arith.mulf %12, %14 : vector<8x128xf32>
      %c0_14 = arith.constant 0 : index
      %c0_15 = arith.constant 0 : index
      %16 = vector.load %arg6[%c0_14, %c0_15] : memref<1x128xf32, #tpu.memory_space<vmem>>, vector<1x128xf32>
      %17 = vector.broadcast %16 : vector<1x128xf32> to vector<8x128xf32>
      %18 = arith.addf %15, %17 : vector<8x128xf32>
      %19 = arith.truncf %18 : vector<8x128xf32> to vector<8x128xbf16>
      %c0_16 = arith.constant 0 : index
      %c0_17 = arith.constant 0 : index
      %20 = vector.load %arg7[%c0_16, %c0_17] : memref<8x128xbf16, #tpu.memory_space<vmem>>, vector<8x128xbf16>
      tpu.vector_store %arg7[%c0_16, %c0_17], %19 {strides = array<i32>} : memref<8x128xbf16, #tpu.memory_space<vmem>>, vector<8x128xbf16>,
    } else {
    }
    return
  }
  func.func @transform_0(%arg0: i32, %arg1: i32, %arg2: i32) -> (i32, i32) {
    %c0_i32 = arith.constant 0 : i32
    return %arg0, %arg2 : i32, i32
  }
  func.func @transform_1(%arg0: i32, %arg1: i32, %arg2: i32) -> (i32, i32) {
    %c0_i32 = arith.constant 0 : i32
    return %arg2, %arg1 : i32, i32
  }
  func.func @transform_2(%arg0: i32, %arg1: i32, %arg2: i32) -> (i32, i32) {
    %c0_i32 = arith.constant 0 : i32
    %c0_i32_0 = arith.constant 0 : i32
    return %c0_i32, %arg1 : i32, i32
  }
  func.func @transform_3(%arg0: i32, %arg1: i32, %arg2: i32) -> (i32, i32) {
    %c0_i32 = arith.constant 0 : i32
    %c0_i32_0 = arith.constant 0 : i32
    return %c0_i32, %arg1 : i32, i32
  }
  func.func @transform_4(%arg0: i32, %arg1: i32, %arg2: i32) -> (i32, i32) {
    %c0_i32 = arith.constant 0 : i32
    return %arg0, %arg1 : i32, i32
  }
}

module attributes {stable_mosaic.version = 11 : i64} {
  func.func @_matmul_kernel(%arg0: i32, %arg1: i32, %arg2: i32, %arg3: memref<8x384xbf16, #tpu.memory_space<vmem>>, %arg4: memref<384x128xbf16, #tpu.memory_space<vmem>>, %arg5: memref<1x128xf32, #tpu.memory_space<vmem>>, %arg6: memref<1x128xf32, #tpu.memory_space<vmem>>, %arg7: memref<8x128xbf16, #tpu.memory_space<vmem>>, %arg8: memref<8x128xbf16, #tpu.memory_space<vmem>>, %arg9: memref<8x128xf32, #tpu.memory_space<vmem>>) attributes {dimension_semantics = [#tpu.dimension_semantics<parallel>, #tpu.dimension_semantics<parallel>, #tpu.dimension_semantics<arbitrary>], iteration_bounds = array<i64: 1, 1, 3>, scalar_prefetch = 0 : i64, scratch_operands = 1 : i64, tpu.core_type = #tpu.core_type<tc>, window_params = [{transform_indices = @transform_0, window_bounds = array<i64: 8, 384>}, {transform_indices = @transform_1, window_bounds = array<i64: 384, 128>}, {transform_indices = @transform_2, window_bounds = array<i64: 1, 128>}, {transform_indices = @transform_3, window_bounds = array<i64: 1, 128>}, {transform_indices = @transform_4, window_bounds = array<i64: 8, 128>}, {transform_indices = @transform_5, window_bounds = array<i64: 8, 128>}]} {
    %c0_i32 = arith.constant 0 : i32
    %0 = arith.cmpi eq, %arg2, %c0_i32 : i32
    %1 = arith.extui %0 : i1 to i32
    %c0_i32_0 = arith.constant 0 : i32
    %2 = arith.cmpi ne, %1, %c0_i32_0 : i32
    scf.if %2 {
      %cst_9 = arith.constant 0.000000e+00 : f32
      %12 = vector.broadcast %cst_9 : f32 to vector<8x128xf32>
      %c0_10 = arith.constant 0 : index
      %c0_11 = arith.constant 0 : index
      %13 = vector.load %arg9[%c0_10, %c0_11] : memref<8x128xf32, #tpu.memory_space<vmem>>, vector<8x128xf32>
      tpu.vector_store %arg9[%c0_10, %c0_11], %12 {strides = array<i32>} : memref<8x128xf32, #tpu.memory_space<vmem>>, vector<8x128xf32>,
    } else {
    }
    %c0 = arith.constant 0 : index
    %c0_1 = arith.constant 0 : index
    %3 = vector.load %arg9[%c0, %c0_1] : memref<8x128xf32, #tpu.memory_space<vmem>>, vector<8x128xf32>
    %c0_2 = arith.constant 0 : index
    %c0_3 = arith.constant 0 : index
    %4 = vector.load %arg3[%c0_2, %c0_3] : memref<8x384xbf16, #tpu.memory_space<vmem>>, vector<8x384xbf16>
    %c0_4 = arith.constant 0 : index
    %c0_5 = arith.constant 0 : index
    %5 = vector.load %arg4[%c0_4, %c0_5] : memref<384x128xbf16, #tpu.memory_space<vmem>>, vector<384x128xbf16>
    %cst = arith.constant dense<0.000000e+00> : vector<8x128xf32>
    %6 = tpu.matmul %4, %5, %cst {dimension_numbers = #tpu.dot_dimension_numbers<[1], [0], [0], [1], [0, 0, 1, 1], [], []>} : vector<8x384xbf16>, vector<384x128xbf16>, vector<8x128xf32> -> vector<8x128xf32>
    %7 = arith.addf %3, %6 : vector<8x128xf32>
    %c0_6 = arith.constant 0 : index
    %c0_7 = arith.constant 0 : index
    %8 = vector.load %arg9[%c0_6, %c0_7] : memref<8x128xf32, #tpu.memory_space<vmem>>, vector<8x128xf32>
    tpu.vector_store %arg9[%c0_6, %c0_7], %7 {strides = array<i32>} : memref<8x128xf32, #tpu.memory_space<vmem>>, vector<8x128xf32>,
    %c2_i32 = arith.constant 2 : i32
    %9 = arith.cmpi eq, %arg2, %c2_i32 : i32
    %10 = arith.extui %9 : i1 to i32
    %c0_i32_8 = arith.constant 0 : i32
    %11 = arith.cmpi ne, %10, %c0_i32_8 : i32
    scf.if %11 {
      %c0_9 = arith.constant 0 : index
      %c0_10 = arith.constant 0 : index
      %12 = vector.load %arg9[%c0_9, %c0_10] : memref<8x128xf32, #tpu.memory_space<vmem>>, vector<8x128xf32>
      %c0_11 = arith.constant 0 : index
      %c0_12 = arith.constant 0 : index
      %13 = vector.load %arg5[%c0_11, %c0_12] : memref<1x128xf32, #tpu.memory_space<vmem>>, vector<1x128xf32>
      %14 = vector.broadcast %13 : vector<1x128xf32> to vector<8x128xf32>
      %15 = arith.mulf %12, %14 : vector<8x128xf32>
      %c0_13 = arith.constant 0 : index
      %c0_14 = arith.constant 0 : index
      %16 = vector.load %arg6[%c0_13, %c0_14] : memref<1x128xf32, #tpu.memory_space<vmem>>, vector<1x128xf32>
      %17 = vector.broadcast %16 : vector<1x128xf32> to vector<8x128xf32>
      %18 = arith.addf %15, %17 : vector<8x128xf32>
      %c0_15 = arith.constant 0 : index
      %c0_16 = arith.constant 0 : index
      %19 = vector.load %arg7[%c0_15, %c0_16] : memref<8x128xbf16, #tpu.memory_space<vmem>>, vector<8x128xbf16>
      %20 = arith.extf %19 : vector<8x128xbf16> to vector<8x128xf32>
      %21 = arith.addf %18, %20 : vector<8x128xf32>
      %cst_17 = arith.constant 0.000000e+00 : f32
      %22 = vector.broadcast %cst_17 : f32 to vector<8x128xf32>
      %23 = arith.maximumf %21, %22 : vector<8x128xf32>
      %24 = arith.truncf %23 : vector<8x128xf32> to vector<8x128xbf16>
      %c0_18 = arith.constant 0 : index
      %c0_19 = arith.constant 0 : index
      %25 = vector.load %arg8[%c0_18, %c0_19] : memref<8x128xbf16, #tpu.memory_space<vmem>>, vector<8x128xbf16>
      tpu.vector_store %arg8[%c0_18, %c0_19], %24 {strides = array<i32>} : memref<8x128xbf16, #tpu.memory_space<vmem>>, vector<8x128xbf16>,
    } else {
    }
    return
  }
  func.func @transform_0(%arg0: i32, %arg1: i32, %arg2: i32) -> (i32, i32) {
    %c0_i32 = arith.constant 0 : i32
    return %arg0, %arg2 : i32, i32
  }
  func.func @transform_1(%arg0: i32, %arg1: i32, %arg2: i32) -> (i32, i32) {
    %c0_i32 = arith.constant 0 : i32
    return %arg2, %arg1 : i32, i32
  }
  func.func @transform_2(%arg0: i32, %arg1: i32, %arg2: i32) -> (i32, i32) {
    %c0_i32 = arith.constant 0 : i32
    %c0_i32_0 = arith.constant 0 : i32
    return %c0_i32, %arg1 : i32, i32
  }
  func.func @transform_3(%arg0: i32, %arg1: i32, %arg2: i32) -> (i32, i32) {
    %c0_i32 = arith.constant 0 : i32
    %c0_i32_0 = arith.constant 0 : i32
    return %c0_i32, %arg1 : i32, i32
  }
  func.func @transform_4(%arg0: i32, %arg1: i32, %arg2: i32) -> (i32, i32) {
    %c0_i32 = arith.constant 0 : i32
    return %arg0, %arg1 : i32, i32
  }
  func.func @transform_5(%arg0: i32, %arg1: i32, %arg2: i32) -> (i32, i32) {
    %c0_i32 = arith.constant 0 : i32
    return %arg0, %arg1 : i32, i32
  }
}

module attributes {stable_mosaic.version = 11 : i64} {
  func.func @_matmul_kernel(%arg0: i32, %arg1: i32, %arg2: i32, %arg3: memref<8x384xbf16, #tpu.memory_space<vmem>>, %arg4: memref<384x128xbf16, #tpu.memory_space<vmem>>, %arg5: memref<1x128xf32, #tpu.memory_space<vmem>>, %arg6: memref<1x128xf32, #tpu.memory_space<vmem>>, %arg7: memref<8x128xbf16, #tpu.memory_space<vmem>>, %arg8: memref<8x128xf32, #tpu.memory_space<vmem>>) attributes {dimension_semantics = [#tpu.dimension_semantics<parallel>, #tpu.dimension_semantics<parallel>, #tpu.dimension_semantics<arbitrary>], iteration_bounds = array<i64: 1, 1, 3>, scalar_prefetch = 0 : i64, scratch_operands = 1 : i64, tpu.core_type = #tpu.core_type<tc>, window_params = [{transform_indices = @transform_0, window_bounds = array<i64: 8, 384>}, {transform_indices = @transform_1, window_bounds = array<i64: 384, 128>}, {transform_indices = @transform_2, window_bounds = array<i64: 1, 128>}, {transform_indices = @transform_3, window_bounds = array<i64: 1, 128>}, {transform_indices = @transform_4, window_bounds = array<i64: 8, 128>}]} {
    %c0_i32 = arith.constant 0 : i32
    %0 = arith.cmpi eq, %arg2, %c0_i32 : i32
    %1 = arith.extui %0 : i1 to i32
    %c0_i32_0 = arith.constant 0 : i32
    %2 = arith.cmpi ne, %1, %c0_i32_0 : i32
    scf.if %2 {
      %cst_9 = arith.constant 0.000000e+00 : f32
      %12 = vector.broadcast %cst_9 : f32 to vector<8x128xf32>
      %c0_10 = arith.constant 0 : index
      %c0_11 = arith.constant 0 : index
      %13 = vector.load %arg8[%c0_10, %c0_11] : memref<8x128xf32, #tpu.memory_space<vmem>>, vector<8x128xf32>
      tpu.vector_store %arg8[%c0_10, %c0_11], %12 {strides = array<i32>} : memref<8x128xf32, #tpu.memory_space<vmem>>, vector<8x128xf32>,
    } else {
    }
    %c0 = arith.constant 0 : index
    %c0_1 = arith.constant 0 : index
    %3 = vector.load %arg8[%c0, %c0_1] : memref<8x128xf32, #tpu.memory_space<vmem>>, vector<8x128xf32>
    %c0_2 = arith.constant 0 : index
    %c0_3 = arith.constant 0 : index
    %4 = vector.load %arg3[%c0_2, %c0_3] : memref<8x384xbf16, #tpu.memory_space<vmem>>, vector<8x384xbf16>
    %c0_4 = arith.constant 0 : index
    %c0_5 = arith.constant 0 : index
    %5 = vector.load %arg4[%c0_4, %c0_5] : memref<384x128xbf16, #tpu.memory_space<vmem>>, vector<384x128xbf16>
    %cst = arith.constant dense<0.000000e+00> : vector<8x128xf32>
    %6 = tpu.matmul %4, %5, %cst {dimension_numbers = #tpu.dot_dimension_numbers<[1], [0], [0], [1], [0, 0, 1, 1], [], []>} : vector<8x384xbf16>, vector<384x128xbf16>, vector<8x128xf32> -> vector<8x128xf32>
    %7 = arith.addf %3, %6 : vector<8x128xf32>
    %c0_6 = arith.constant 0 : index
    %c0_7 = arith.constant 0 : index
    %8 = vector.load %arg8[%c0_6, %c0_7] : memref<8x128xf32, #tpu.memory_space<vmem>>, vector<8x128xf32>
    tpu.vector_store %arg8[%c0_6, %c0_7], %7 {strides = array<i32>} : memref<8x128xf32, #tpu.memory_space<vmem>>, vector<8x128xf32>,
    %c2_i32 = arith.constant 2 : i32
    %9 = arith.cmpi eq, %arg2, %c2_i32 : i32
    %10 = arith.extui %9 : i1 to i32
    %c0_i32_8 = arith.constant 0 : i32
    %11 = arith.cmpi ne, %10, %c0_i32_8 : i32
    scf.if %11 {
      %c0_9 = arith.constant 0 : index
      %c0_10 = arith.constant 0 : index
      %12 = vector.load %arg8[%c0_9, %c0_10] : memref<8x128xf32, #tpu.memory_space<vmem>>, vector<8x128xf32>
      %c0_11 = arith.constant 0 : index
      %c0_12 = arith.constant 0 : index
      %13 = vector.load %arg5[%c0_11, %c0_12] : memref<1x128xf32, #tpu.memory_space<vmem>>, vector<1x128xf32>
      %14 = vector.broadcast %13 : vector<1x128xf32> to vector<8x128xf32>
      %15 = arith.mulf %12, %14 : vector<8x128xf32>
      %c0_13 = arith.constant 0 : index
      %c0_14 = arith.constant 0 : index
      %16 = vector.load %arg6[%c0_13, %c0_14] : memref<1x128xf32, #tpu.memory_space<vmem>>, vector<1x128xf32>
      %17 = vector.broadcast %16 : vector<1x128xf32> to vector<8x128xf32>
      %18 = arith.addf %15, %17 : vector<8x128xf32>
      %cst_15 = arith.constant 0.000000e+00 : f32
      %19 = vector.broadcast %cst_15 : f32 to vector<8x128xf32>
      %20 = arith.maximumf %18, %19 : vector<8x128xf32>
      %21 = arith.truncf %20 : vector<8x128xf32> to vector<8x128xbf16>
      %c0_16 = arith.constant 0 : index
      %c0_17 = arith.constant 0 : index
      %22 = vector.load %arg7[%c0_16, %c0_17] : memref<8x128xbf16, #tpu.memory_space<vmem>>, vector<8x128xbf16>
      tpu.vector_store %arg7[%c0_16, %c0_17], %21 {strides = array<i32>} : memref<8x128xbf16, #tpu.memory_space<vmem>>, vector<8x128xbf16>,
    } else {
    }
    return
  }
  func.func @transform_0(%arg0: i32, %arg1: i32, %arg2: i32) -> (i32, i32) {
    %c0_i32 = arith.constant 0 : i32
    return %arg0, %arg2 : i32, i32
  }
  func.func @transform_1(%arg0: i32, %arg1: i32, %arg2: i32) -> (i32, i32) {
    %c0_i32 = arith.constant 0 : i32
    return %arg2, %arg1 : i32, i32
  }
  func.func @transform_2(%arg0: i32, %arg1: i32, %arg2: i32) -> (i32, i32) {
    %c0_i32 = arith.constant 0 : i32
    %c0_i32_0 = arith.constant 0 : i32
    return %c0_i32, %arg1 : i32, i32
  }
  func.func @transform_3(%arg0: i32, %arg1: i32, %arg2: i32) -> (i32, i32) {
    %c0_i32 = arith.constant 0 : i32
    %c0_i32_0 = arith.constant 0 : i32
    return %c0_i32, %arg1 : i32, i32
  }
  func.func @transform_4(%arg0: i32, %arg1: i32, %arg2: i32) -> (i32, i32) {
    %c0_i32 = arith.constant 0 : i32
    return %arg0, %arg1 : i32, i32
  }
}

module attributes {stable_mosaic.version = 11 : i64} {
  func.func @_matmul_kernel(%arg0: i32, %arg1: i32, %arg2: i32, %arg3: memref<2x384xbf16, #tpu.memory_space<vmem>>, %arg4: memref<384x256xbf16, #tpu.memory_space<vmem>>, %arg5: memref<1x256xf32, #tpu.memory_space<vmem>>, %arg6: memref<1x256xf32, #tpu.memory_space<vmem>>, %arg7: memref<2x256xbf16, #tpu.memory_space<vmem>>, %arg8: memref<2x256xf32, #tpu.memory_space<vmem>>) attributes {dimension_semantics = [#tpu.dimension_semantics<parallel>, #tpu.dimension_semantics<parallel>, #tpu.dimension_semantics<arbitrary>], iteration_bounds = array<i64: 1, 1, 3>, scalar_prefetch = 0 : i64, scratch_operands = 1 : i64, tpu.core_type = #tpu.core_type<tc>, window_params = [{transform_indices = @transform_0, window_bounds = array<i64: 2, 384>}, {transform_indices = @transform_1, window_bounds = array<i64: 384, 256>}, {transform_indices = @transform_2, window_bounds = array<i64: 1, 256>}, {transform_indices = @transform_3, window_bounds = array<i64: 1, 256>}, {transform_indices = @transform_4, window_bounds = array<i64: 2, 256>}]} {
    %c0_i32 = arith.constant 0 : i32
    %0 = arith.cmpi eq, %arg2, %c0_i32 : i32
    %1 = arith.extui %0 : i1 to i32
    %c0_i32_0 = arith.constant 0 : i32
    %2 = arith.cmpi ne, %1, %c0_i32_0 : i32
    scf.if %2 {
      %cst_9 = arith.constant 0.000000e+00 : f32
      %12 = vector.broadcast %cst_9 : f32 to vector<2x256xf32>
      %c0_10 = arith.constant 0 : index
      %c0_11 = arith.constant 0 : index
      %13 = vector.load %arg8[%c0_10, %c0_11] : memref<2x256xf32, #tpu.memory_space<vmem>>, vector<2x256xf32>
      tpu.vector_store %arg8[%c0_10, %c0_11], %12 {strides = array<i32>} : memref<2x256xf32, #tpu.memory_space<vmem>>, vector<2x256xf32>,
    } else {
    }
    %c0 = arith.constant 0 : index
    %c0_1 = arith.constant 0 : index
    %3 = vector.load %arg8[%c0, %c0_1] : memref<2x256xf32, #tpu.memory_space<vmem>>, vector<2x256xf32>
    %c0_2 = arith.constant 0 : index
    %c0_3 = arith.constant 0 : index
    %4 = vector.load %arg3[%c0_2, %c0_3] : memref<2x384xbf16, #tpu.memory_space<vmem>>, vector<2x384xbf16>
    %c0_4 = arith.constant 0 : index
    %c0_5 = arith.constant 0 : index
    %5 = vector.load %arg4[%c0_4, %c0_5] : memref<384x256xbf16, #tpu.memory_space<vmem>>, vector<384x256xbf16>
    %cst = arith.constant dense<0.000000e+00> : vector<2x256xf32>
    %6 = tpu.matmul %4, %5, %cst {dimension_numbers = #tpu.dot_dimension_numbers<[1], [0], [0], [1], [0, 0, 1, 1], [], []>} : vector<2x384xbf16>, vector<384x256xbf16>, vector<2x256xf32> -> vector<2x256xf32>
    %7 = arith.addf %3, %6 : vector<2x256xf32>
    %c0_6 = arith.constant 0 : index
    %c0_7 = arith.constant 0 : index
    %8 = vector.load %arg8[%c0_6, %c0_7] : memref<2x256xf32, #tpu.memory_space<vmem>>, vector<2x256xf32>
    tpu.vector_store %arg8[%c0_6, %c0_7], %7 {strides = array<i32>} : memref<2x256xf32, #tpu.memory_space<vmem>>, vector<2x256xf32>,
    %c2_i32 = arith.constant 2 : i32
    %9 = arith.cmpi eq, %arg2, %c2_i32 : i32
    %10 = arith.extui %9 : i1 to i32
    %c0_i32_8 = arith.constant 0 : i32
    %11 = arith.cmpi ne, %10, %c0_i32_8 : i32
    scf.if %11 {
      %c0_9 = arith.constant 0 : index
      %c0_10 = arith.constant 0 : index
      %12 = vector.load %arg8[%c0_9, %c0_10] : memref<2x256xf32, #tpu.memory_space<vmem>>, vector<2x256xf32>
      %c0_11 = arith.constant 0 : index
      %c0_12 = arith.constant 0 : index
      %13 = vector.load %arg5[%c0_11, %c0_12] : memref<1x256xf32, #tpu.memory_space<vmem>>, vector<1x256xf32>
      %14 = vector.broadcast %13 : vector<1x256xf32> to vector<2x256xf32>
      %15 = arith.mulf %12, %14 : vector<2x256xf32>
      %c0_13 = arith.constant 0 : index
      %c0_14 = arith.constant 0 : index
      %16 = vector.load %arg6[%c0_13, %c0_14] : memref<1x256xf32, #tpu.memory_space<vmem>>, vector<1x256xf32>
      %17 = vector.broadcast %16 : vector<1x256xf32> to vector<2x256xf32>
      %18 = arith.addf %15, %17 : vector<2x256xf32>
      %cst_15 = arith.constant 0.000000e+00 : f32
      %19 = vector.broadcast %cst_15 : f32 to vector<2x256xf32>
      %20 = arith.maximumf %18, %19 : vector<2x256xf32>
      %21 = arith.truncf %20 : vector<2x256xf32> to vector<2x256xbf16>
      %c0_16 = arith.constant 0 : index
      %c0_17 = arith.constant 0 : index
      %22 = vector.load %arg7[%c0_16, %c0_17] : memref<2x256xbf16, #tpu.memory_space<vmem>>, vector<2x256xbf16>
      tpu.vector_store %arg7[%c0_16, %c0_17], %21 {strides = array<i32>} : memref<2x256xbf16, #tpu.memory_space<vmem>>, vector<2x256xbf16>,
    } else {
    }
    return
  }
  func.func @transform_0(%arg0: i32, %arg1: i32, %arg2: i32) -> (i32, i32) {
    %c0_i32 = arith.constant 0 : i32
    return %arg0, %arg2 : i32, i32
  }
  func.func @transform_1(%arg0: i32, %arg1: i32, %arg2: i32) -> (i32, i32) {
    %c0_i32 = arith.constant 0 : i32
    return %arg2, %arg1 : i32, i32
  }
  func.func @transform_2(%arg0: i32, %arg1: i32, %arg2: i32) -> (i32, i32) {
    %c0_i32 = arith.constant 0 : i32
    %c0_i32_0 = arith.constant 0 : i32
    return %c0_i32, %arg1 : i32, i32
  }
  func.func @transform_3(%arg0: i32, %arg1: i32, %arg2: i32) -> (i32, i32) {
    %c0_i32 = arith.constant 0 : i32
    %c0_i32_0 = arith.constant 0 : i32
    return %c0_i32, %arg1 : i32, i32
  }
  func.func @transform_4(%arg0: i32, %arg1: i32, %arg2: i32) -> (i32, i32) {
    %c0_i32 = arith.constant 0 : i32
    return %arg0, %arg1 : i32, i32
  }
}

module attributes {stable_mosaic.version = 11 : i64} {
  func.func @_matmul_kernel(%arg0: i32, %arg1: i32, %arg2: i32, %arg3: memref<2x128xbf16, #tpu.memory_space<vmem>>, %arg4: memref<128x256xbf16, #tpu.memory_space<vmem>>, %arg5: memref<1x256xf32, #tpu.memory_space<vmem>>, %arg6: memref<1x256xf32, #tpu.memory_space<vmem>>, %arg7: memref<2x256xbf16, #tpu.memory_space<vmem>>, %arg8: memref<2x256xf32, #tpu.memory_space<vmem>>) attributes {dimension_semantics = [#tpu.dimension_semantics<parallel>, #tpu.dimension_semantics<parallel>, #tpu.dimension_semantics<arbitrary>], iteration_bounds = array<i64: 1, 1, 1>, scalar_prefetch = 0 : i64, scratch_operands = 1 : i64, tpu.core_type = #tpu.core_type<tc>, window_params = [{transform_indices = @transform_0, window_bounds = array<i64: 2, 128>}, {transform_indices = @transform_1, window_bounds = array<i64: 128, 256>}, {transform_indices = @transform_2, window_bounds = array<i64: 1, 256>}, {transform_indices = @transform_3, window_bounds = array<i64: 1, 256>}, {transform_indices = @transform_4, window_bounds = array<i64: 2, 256>}]} {
    %c0_i32 = arith.constant 0 : i32
    %0 = arith.cmpi eq, %arg2, %c0_i32 : i32
    %1 = arith.extui %0 : i1 to i32
    %c0_i32_0 = arith.constant 0 : i32
    %2 = arith.cmpi ne, %1, %c0_i32_0 : i32
    scf.if %2 {
      %cst_10 = arith.constant 0.000000e+00 : f32
      %12 = vector.broadcast %cst_10 : f32 to vector<2x256xf32>
      %c0_11 = arith.constant 0 : index
      %c0_12 = arith.constant 0 : index
      %13 = vector.load %arg8[%c0_11, %c0_12] : memref<2x256xf32, #tpu.memory_space<vmem>>, vector<2x256xf32>
      tpu.vector_store %arg8[%c0_11, %c0_12], %12 {strides = array<i32>} : memref<2x256xf32, #tpu.memory_space<vmem>>, vector<2x256xf32>,
    } else {
    }
    %c0 = arith.constant 0 : index
    %c0_1 = arith.constant 0 : index
    %3 = vector.load %arg8[%c0, %c0_1] : memref<2x256xf32, #tpu.memory_space<vmem>>, vector<2x256xf32>
    %c0_2 = arith.constant 0 : index
    %c0_3 = arith.constant 0 : index
    %4 = vector.load %arg3[%c0_2, %c0_3] : memref<2x128xbf16, #tpu.memory_space<vmem>>, vector<2x128xbf16>
    %c0_4 = arith.constant 0 : index
    %c0_5 = arith.constant 0 : index
    %5 = vector.load %arg4[%c0_4, %c0_5] : memref<128x256xbf16, #tpu.memory_space<vmem>>, vector<128x256xbf16>
    %cst = arith.constant dense<0.000000e+00> : vector<2x256xf32>
    %6 = tpu.matmul %4, %5, %cst {dimension_numbers = #tpu.dot_dimension_numbers<[1], [0], [0], [1], [0, 0, 1, 1], [], []>} : vector<2x128xbf16>, vector<128x256xbf16>, vector<2x256xf32> -> vector<2x256xf32>
    %7 = arith.addf %3, %6 : vector<2x256xf32>
    %c0_6 = arith.constant 0 : index
    %c0_7 = arith.constant 0 : index
    %8 = vector.load %arg8[%c0_6, %c0_7] : memref<2x256xf32, #tpu.memory_space<vmem>>, vector<2x256xf32>
    tpu.vector_store %arg8[%c0_6, %c0_7], %7 {strides = array<i32>} : memref<2x256xf32, #tpu.memory_space<vmem>>, vector<2x256xf32>,
    %c0_i32_8 = arith.constant 0 : i32
    %9 = arith.cmpi eq, %arg2, %c0_i32_8 : i32
    %10 = arith.extui %9 : i1 to i32
    %c0_i32_9 = arith.constant 0 : i32
    %11 = arith.cmpi ne, %10, %c0_i32_9 : i32
    scf.if %11 {
      %c0_10 = arith.constant 0 : index
      %c0_11 = arith.constant 0 : index
      %12 = vector.load %arg8[%c0_10, %c0_11] : memref<2x256xf32, #tpu.memory_space<vmem>>, vector<2x256xf32>
      %c0_12 = arith.constant 0 : index
      %c0_13 = arith.constant 0 : index
      %13 = vector.load %arg5[%c0_12, %c0_13] : memref<1x256xf32, #tpu.memory_space<vmem>>, vector<1x256xf32>
      %14 = vector.broadcast %13 : vector<1x256xf32> to vector<2x256xf32>
      %15 = arith.mulf %12, %14 : vector<2x256xf32>
      %c0_14 = arith.constant 0 : index
      %c0_15 = arith.constant 0 : index
      %16 = vector.load %arg6[%c0_14, %c0_15] : memref<1x256xf32, #tpu.memory_space<vmem>>, vector<1x256xf32>
      %17 = vector.broadcast %16 : vector<1x256xf32> to vector<2x256xf32>
      %18 = arith.addf %15, %17 : vector<2x256xf32>
      %19 = arith.truncf %18 : vector<2x256xf32> to vector<2x256xbf16>
      %c0_16 = arith.constant 0 : index
      %c0_17 = arith.constant 0 : index
      %20 = vector.load %arg7[%c0_16, %c0_17] : memref<2x256xbf16, #tpu.memory_space<vmem>>, vector<2x256xbf16>
      tpu.vector_store %arg7[%c0_16, %c0_17], %19 {strides = array<i32>} : memref<2x256xbf16, #tpu.memory_space<vmem>>, vector<2x256xbf16>,
    } else {
    }
    return
  }
  func.func @transform_0(%arg0: i32, %arg1: i32, %arg2: i32) -> (i32, i32) {
    %c0_i32 = arith.constant 0 : i32
    return %arg0, %arg2 : i32, i32
  }
  func.func @transform_1(%arg0: i32, %arg1: i32, %arg2: i32) -> (i32, i32) {
    %c0_i32 = arith.constant 0 : i32
    return %arg2, %arg1 : i32, i32
  }
  func.func @transform_2(%arg0: i32, %arg1: i32, %arg2: i32) -> (i32, i32) {
    %c0_i32 = arith.constant 0 : i32
    %c0_i32_0 = arith.constant 0 : i32
    return %c0_i32, %arg1 : i32, i32
  }
  func.func @transform_3(%arg0: i32, %arg1: i32, %arg2: i32) -> (i32, i32) {
    %c0_i32 = arith.constant 0 : i32
    %c0_i32_0 = arith.constant 0 : i32
    return %c0_i32, %arg1 : i32, i32
  }
  func.func @transform_4(%arg0: i32, %arg1: i32, %arg2: i32) -> (i32, i32) {
    %c0_i32 = arith.constant 0 : i32
    return %arg0, %arg1 : i32, i32
  }
}

module attributes {stable_mosaic.version = 11 : i64} {
  func.func @_matmul_kernel(%arg0: i32, %arg1: i32, %arg2: i32, %arg3: memref<2x768xbf16, #tpu.memory_space<vmem>>, %arg4: memref<768x256xbf16, #tpu.memory_space<vmem>>, %arg5: memref<1x256xf32, #tpu.memory_space<vmem>>, %arg6: memref<1x256xf32, #tpu.memory_space<vmem>>, %arg7: memref<2x256xbf16, #tpu.memory_space<vmem>>, %arg8: memref<2x256xbf16, #tpu.memory_space<vmem>>, %arg9: memref<2x256xf32, #tpu.memory_space<vmem>>) attributes {dimension_semantics = [#tpu.dimension_semantics<parallel>, #tpu.dimension_semantics<parallel>, #tpu.dimension_semantics<arbitrary>], iteration_bounds = array<i64: 1, 1, 3>, scalar_prefetch = 0 : i64, scratch_operands = 1 : i64, tpu.core_type = #tpu.core_type<tc>, window_params = [{transform_indices = @transform_0, window_bounds = array<i64: 2, 768>}, {transform_indices = @transform_1, window_bounds = array<i64: 768, 256>}, {transform_indices = @transform_2, window_bounds = array<i64: 1, 256>}, {transform_indices = @transform_3, window_bounds = array<i64: 1, 256>}, {transform_indices = @transform_4, window_bounds = array<i64: 2, 256>}, {transform_indices = @transform_5, window_bounds = array<i64: 2, 256>}]} {
    %c0_i32 = arith.constant 0 : i32
    %0 = arith.cmpi eq, %arg2, %c0_i32 : i32
    %1 = arith.extui %0 : i1 to i32
    %c0_i32_0 = arith.constant 0 : i32
    %2 = arith.cmpi ne, %1, %c0_i32_0 : i32
    scf.if %2 {
      %cst_9 = arith.constant 0.000000e+00 : f32
      %12 = vector.broadcast %cst_9 : f32 to vector<2x256xf32>
      %c0_10 = arith.constant 0 : index
      %c0_11 = arith.constant 0 : index
      %13 = vector.load %arg9[%c0_10, %c0_11] : memref<2x256xf32, #tpu.memory_space<vmem>>, vector<2x256xf32>
      tpu.vector_store %arg9[%c0_10, %c0_11], %12 {strides = array<i32>} : memref<2x256xf32, #tpu.memory_space<vmem>>, vector<2x256xf32>,
    } else {
    }
    %c0 = arith.constant 0 : index
    %c0_1 = arith.constant 0 : index
    %3 = vector.load %arg9[%c0, %c0_1] : memref<2x256xf32, #tpu.memory_space<vmem>>, vector<2x256xf32>
    %c0_2 = arith.constant 0 : index
    %c0_3 = arith.constant 0 : index
    %4 = vector.load %arg3[%c0_2, %c0_3] : memref<2x768xbf16, #tpu.memory_space<vmem>>, vector<2x768xbf16>
    %c0_4 = arith.constant 0 : index
    %c0_5 = arith.constant 0 : index
    %5 = vector.load %arg4[%c0_4, %c0_5] : memref<768x256xbf16, #tpu.memory_space<vmem>>, vector<768x256xbf16>
    %cst = arith.constant dense<0.000000e+00> : vector<2x256xf32>
    %6 = tpu.matmul %4, %5, %cst {dimension_numbers = #tpu.dot_dimension_numbers<[1], [0], [0], [1], [0, 0, 1, 1], [], []>} : vector<2x768xbf16>, vector<768x256xbf16>, vector<2x256xf32> -> vector<2x256xf32>
    %7 = arith.addf %3, %6 : vector<2x256xf32>
    %c0_6 = arith.constant 0 : index
    %c0_7 = arith.constant 0 : index
    %8 = vector.load %arg9[%c0_6, %c0_7] : memref<2x256xf32, #tpu.memory_space<vmem>>, vector<2x256xf32>
    tpu.vector_store %arg9[%c0_6, %c0_7], %7 {strides = array<i32>} : memref<2x256xf32, #tpu.memory_space<vmem>>, vector<2x256xf32>,
    %c2_i32 = arith.constant 2 : i32
    %9 = arith.cmpi eq, %arg2, %c2_i32 : i32
    %10 = arith.extui %9 : i1 to i32
    %c0_i32_8 = arith.constant 0 : i32
    %11 = arith.cmpi ne, %10, %c0_i32_8 : i32
    scf.if %11 {
      %c0_9 = arith.constant 0 : index
      %c0_10 = arith.constant 0 : index
      %12 = vector.load %arg9[%c0_9, %c0_10] : memref<2x256xf32, #tpu.memory_space<vmem>>, vector<2x256xf32>
      %c0_11 = arith.constant 0 : index
      %c0_12 = arith.constant 0 : index
      %13 = vector.load %arg5[%c0_11, %c0_12] : memref<1x256xf32, #tpu.memory_space<vmem>>, vector<1x256xf32>
      %14 = vector.broadcast %13 : vector<1x256xf32> to vector<2x256xf32>
      %15 = arith.mulf %12, %14 : vector<2x256xf32>
      %c0_13 = arith.constant 0 : index
      %c0_14 = arith.constant 0 : index
      %16 = vector.load %arg6[%c0_13, %c0_14] : memref<1x256xf32, #tpu.memory_space<vmem>>, vector<1x256xf32>
      %17 = vector.broadcast %16 : vector<1x256xf32> to vector<2x256xf32>
      %18 = arith.addf %15, %17 : vector<2x256xf32>
      %c0_15 = arith.constant 0 : index
      %c0_16 = arith.constant 0 : index
      %19 = vector.load %arg7[%c0_15, %c0_16] : memref<2x256xbf16, #tpu.memory_space<vmem>>, vector<2x256xbf16>
      %20 = arith.extf %19 : vector<2x256xbf16> to vector<2x256xf32>
      %21 = arith.addf %18, %20 : vector<2x256xf32>
      %cst_17 = arith.constant 0.000000e+00 : f32
      %22 = vector.broadcast %cst_17 : f32 to vector<2x256xf32>
      %23 = arith.maximumf %21, %22 : vector<2x256xf32>
      %24 = arith.truncf %23 : vector<2x256xf32> to vector<2x256xbf16>
      %c0_18 = arith.constant 0 : index
      %c0_19 = arith.constant 0 : index
      %25 = vector.load %arg8[%c0_18, %c0_19] : memref<2x256xbf16, #tpu.memory_space<vmem>>, vector<2x256xbf16>
      tpu.vector_store %arg8[%c0_18, %c0_19], %24 {strides = array<i32>} : memref<2x256xbf16, #tpu.memory_space<vmem>>, vector<2x256xbf16>,
    } else {
    }
    return
  }
  func.func @transform_0(%arg0: i32, %arg1: i32, %arg2: i32) -> (i32, i32) {
    %c0_i32 = arith.constant 0 : i32
    return %arg0, %arg2 : i32, i32
  }
  func.func @transform_1(%arg0: i32, %arg1: i32, %arg2: i32) -> (i32, i32) {
    %c0_i32 = arith.constant 0 : i32
    return %arg2, %arg1 : i32, i32
  }
  func.func @transform_2(%arg0: i32, %arg1: i32, %arg2: i32) -> (i32, i32) {
    %c0_i32 = arith.constant 0 : i32
    %c0_i32_0 = arith.constant 0 : i32
    return %c0_i32, %arg1 : i32, i32
  }
  func.func @transform_3(%arg0: i32, %arg1: i32, %arg2: i32) -> (i32, i32) {
    %c0_i32 = arith.constant 0 : i32
    %c0_i32_0 = arith.constant 0 : i32
    return %c0_i32, %arg1 : i32, i32
  }
  func.func @transform_4(%arg0: i32, %arg1: i32, %arg2: i32) -> (i32, i32) {
    %c0_i32 = arith.constant 0 : i32
    return %arg0, %arg1 : i32, i32
  }
  func.func @transform_5(%arg0: i32, %arg1: i32, %arg2: i32) -> (i32, i32) {
    %c0_i32 = arith.constant 0 : i32
    return %arg0, %arg1 : i32, i32
  }
}

module attributes {stable_mosaic.version = 11 : i64} {
  func.func @_matmul_kernel(%arg0: i32, %arg1: i32, %arg2: i32, %arg3: memref<2x768xbf16, #tpu.memory_space<vmem>>, %arg4: memref<768x256xbf16, #tpu.memory_space<vmem>>, %arg5: memref<1x256xf32, #tpu.memory_space<vmem>>, %arg6: memref<1x256xf32, #tpu.memory_space<vmem>>, %arg7: memref<2x256xbf16, #tpu.memory_space<vmem>>, %arg8: memref<2x256xf32, #tpu.memory_space<vmem>>) attributes {dimension_semantics = [#tpu.dimension_semantics<parallel>, #tpu.dimension_semantics<parallel>, #tpu.dimension_semantics<arbitrary>], iteration_bounds = array<i64: 1, 1, 3>, scalar_prefetch = 0 : i64, scratch_operands = 1 : i64, tpu.core_type = #tpu.core_type<tc>, window_params = [{transform_indices = @transform_0, window_bounds = array<i64: 2, 768>}, {transform_indices = @transform_1, window_bounds = array<i64: 768, 256>}, {transform_indices = @transform_2, window_bounds = array<i64: 1, 256>}, {transform_indices = @transform_3, window_bounds = array<i64: 1, 256>}, {transform_indices = @transform_4, window_bounds = array<i64: 2, 256>}]} {
    %c0_i32 = arith.constant 0 : i32
    %0 = arith.cmpi eq, %arg2, %c0_i32 : i32
    %1 = arith.extui %0 : i1 to i32
    %c0_i32_0 = arith.constant 0 : i32
    %2 = arith.cmpi ne, %1, %c0_i32_0 : i32
    scf.if %2 {
      %cst_9 = arith.constant 0.000000e+00 : f32
      %12 = vector.broadcast %cst_9 : f32 to vector<2x256xf32>
      %c0_10 = arith.constant 0 : index
      %c0_11 = arith.constant 0 : index
      %13 = vector.load %arg8[%c0_10, %c0_11] : memref<2x256xf32, #tpu.memory_space<vmem>>, vector<2x256xf32>
      tpu.vector_store %arg8[%c0_10, %c0_11], %12 {strides = array<i32>} : memref<2x256xf32, #tpu.memory_space<vmem>>, vector<2x256xf32>,
    } else {
    }
    %c0 = arith.constant 0 : index
    %c0_1 = arith.constant 0 : index
    %3 = vector.load %arg8[%c0, %c0_1] : memref<2x256xf32, #tpu.memory_space<vmem>>, vector<2x256xf32>
    %c0_2 = arith.constant 0 : index
    %c0_3 = arith.constant 0 : index
    %4 = vector.load %arg3[%c0_2, %c0_3] : memref<2x768xbf16, #tpu.memory_space<vmem>>, vector<2x768xbf16>
    %c0_4 = arith.constant 0 : index
    %c0_5 = arith.constant 0 : index
    %5 = vector.load %arg4[%c0_4, %c0_5] : memref<768x256xbf16, #tpu.memory_space<vmem>>, vector<768x256xbf16>
    %cst = arith.constant dense<0.000000e+00> : vector<2x256xf32>
    %6 = tpu.matmul %4, %5, %cst {dimension_numbers = #tpu.dot_dimension_numbers<[1], [0], [0], [1], [0, 0, 1, 1], [], []>} : vector<2x768xbf16>, vector<768x256xbf16>, vector<2x256xf32> -> vector<2x256xf32>
    %7 = arith.addf %3, %6 : vector<2x256xf32>
    %c0_6 = arith.constant 0 : index
    %c0_7 = arith.constant 0 : index
    %8 = vector.load %arg8[%c0_6, %c0_7] : memref<2x256xf32, #tpu.memory_space<vmem>>, vector<2x256xf32>
    tpu.vector_store %arg8[%c0_6, %c0_7], %7 {strides = array<i32>} : memref<2x256xf32, #tpu.memory_space<vmem>>, vector<2x256xf32>,
    %c2_i32 = arith.constant 2 : i32
    %9 = arith.cmpi eq, %arg2, %c2_i32 : i32
    %10 = arith.extui %9 : i1 to i32
    %c0_i32_8 = arith.constant 0 : i32
    %11 = arith.cmpi ne, %10, %c0_i32_8 : i32
    scf.if %11 {
      %c0_9 = arith.constant 0 : index
      %c0_10 = arith.constant 0 : index
      %12 = vector.load %arg8[%c0_9, %c0_10] : memref<2x256xf32, #tpu.memory_space<vmem>>, vector<2x256xf32>
      %c0_11 = arith.constant 0 : index
      %c0_12 = arith.constant 0 : index
      %13 = vector.load %arg5[%c0_11, %c0_12] : memref<1x256xf32, #tpu.memory_space<vmem>>, vector<1x256xf32>
      %14 = vector.broadcast %13 : vector<1x256xf32> to vector<2x256xf32>
      %15 = arith.mulf %12, %14 : vector<2x256xf32>
      %c0_13 = arith.constant 0 : index
      %c0_14 = arith.constant 0 : index
      %16 = vector.load %arg6[%c0_13, %c0_14] : memref<1x256xf32, #tpu.memory_space<vmem>>, vector<1x256xf32>
      %17 = vector.broadcast %16 : vector<1x256xf32> to vector<2x256xf32>
      %18 = arith.addf %15, %17 : vector<2x256xf32>
      %cst_15 = arith.constant 0.000000e+00 : f32
      %19 = vector.broadcast %cst_15 : f32 to vector<2x256xf32>
      %20 = arith.maximumf %18, %19 : vector<2x256xf32>
      %21 = arith.truncf %20 : vector<2x256xf32> to vector<2x256xbf16>
      %c0_16 = arith.constant 0 : index
      %c0_17 = arith.constant 0 : index
      %22 = vector.load %arg7[%c0_16, %c0_17] : memref<2x256xbf16, #tpu.memory_space<vmem>>, vector<2x256xbf16>
      tpu.vector_store %arg7[%c0_16, %c0_17], %21 {strides = array<i32>} : memref<2x256xbf16, #tpu.memory_space<vmem>>, vector<2x256xbf16>,
    } else {
    }
    return
  }
  func.func @transform_0(%arg0: i32, %arg1: i32, %arg2: i32) -> (i32, i32) {
    %c0_i32 = arith.constant 0 : i32
    return %arg0, %arg2 : i32, i32
  }
  func.func @transform_1(%arg0: i32, %arg1: i32, %arg2: i32) -> (i32, i32) {
    %c0_i32 = arith.constant 0 : i32
    return %arg2, %arg1 : i32, i32
  }
  func.func @transform_2(%arg0: i32, %arg1: i32, %arg2: i32) -> (i32, i32) {
    %c0_i32 = arith.constant 0 : i32
    %c0_i32_0 = arith.constant 0 : i32
    return %c0_i32, %arg1 : i32, i32
  }
  func.func @transform_3(%arg0: i32, %arg1: i32, %arg2: i32) -> (i32, i32) {
    %c0_i32 = arith.constant 0 : i32
    %c0_i32_0 = arith.constant 0 : i32
    return %c0_i32, %arg1 : i32, i32
  }
  func.func @transform_4(%arg0: i32, %arg1: i32, %arg2: i32) -> (i32, i32) {
    %c0_i32 = arith.constant 0 : i32
    return %arg0, %arg1 : i32, i32
  }
}

module attributes {stable_mosaic.version = 11 : i64} {
  func.func @_matmul_kernel(%arg0: i32, %arg1: i32, %arg2: i32, %arg3: memref<2x768xbf16, #tpu.memory_space<vmem>>, %arg4: memref<768x256xbf16, #tpu.memory_space<vmem>>, %arg5: memref<1x256xf32, #tpu.memory_space<vmem>>, %arg6: memref<1x256xf32, #tpu.memory_space<vmem>>, %arg7: memref<2x256xbf16, #tpu.memory_space<vmem>>, %arg8: memref<2x256xf32, #tpu.memory_space<vmem>>) attributes {dimension_semantics = [#tpu.dimension_semantics<parallel>, #tpu.dimension_semantics<parallel>, #tpu.dimension_semantics<arbitrary>], iteration_bounds = array<i64: 1, 2, 3>, scalar_prefetch = 0 : i64, scratch_operands = 1 : i64, tpu.core_type = #tpu.core_type<tc>, window_params = [{transform_indices = @transform_0, window_bounds = array<i64: 2, 768>}, {transform_indices = @transform_1, window_bounds = array<i64: 768, 256>}, {transform_indices = @transform_2, window_bounds = array<i64: 1, 256>}, {transform_indices = @transform_3, window_bounds = array<i64: 1, 256>}, {transform_indices = @transform_4, window_bounds = array<i64: 2, 256>}]} {
    %c0_i32 = arith.constant 0 : i32
    %0 = arith.cmpi eq, %arg2, %c0_i32 : i32
    %1 = arith.extui %0 : i1 to i32
    %c0_i32_0 = arith.constant 0 : i32
    %2 = arith.cmpi ne, %1, %c0_i32_0 : i32
    scf.if %2 {
      %cst_9 = arith.constant 0.000000e+00 : f32
      %12 = vector.broadcast %cst_9 : f32 to vector<2x256xf32>
      %c0_10 = arith.constant 0 : index
      %c0_11 = arith.constant 0 : index
      %13 = vector.load %arg8[%c0_10, %c0_11] : memref<2x256xf32, #tpu.memory_space<vmem>>, vector<2x256xf32>
      tpu.vector_store %arg8[%c0_10, %c0_11], %12 {strides = array<i32>} : memref<2x256xf32, #tpu.memory_space<vmem>>, vector<2x256xf32>,
    } else {
    }
    %c0 = arith.constant 0 : index
    %c0_1 = arith.constant 0 : index
    %3 = vector.load %arg8[%c0, %c0_1] : memref<2x256xf32, #tpu.memory_space<vmem>>, vector<2x256xf32>
    %c0_2 = arith.constant 0 : index
    %c0_3 = arith.constant 0 : index
    %4 = vector.load %arg3[%c0_2, %c0_3] : memref<2x768xbf16, #tpu.memory_space<vmem>>, vector<2x768xbf16>
    %c0_4 = arith.constant 0 : index
    %c0_5 = arith.constant 0 : index
    %5 = vector.load %arg4[%c0_4, %c0_5] : memref<768x256xbf16, #tpu.memory_space<vmem>>, vector<768x256xbf16>
    %cst = arith.constant dense<0.000000e+00> : vector<2x256xf32>
    %6 = tpu.matmul %4, %5, %cst {dimension_numbers = #tpu.dot_dimension_numbers<[1], [0], [0], [1], [0, 0, 1, 1], [], []>} : vector<2x768xbf16>, vector<768x256xbf16>, vector<2x256xf32> -> vector<2x256xf32>
    %7 = arith.addf %3, %6 : vector<2x256xf32>
    %c0_6 = arith.constant 0 : index
    %c0_7 = arith.constant 0 : index
    %8 = vector.load %arg8[%c0_6, %c0_7] : memref<2x256xf32, #tpu.memory_space<vmem>>, vector<2x256xf32>
    tpu.vector_store %arg8[%c0_6, %c0_7], %7 {strides = array<i32>} : memref<2x256xf32, #tpu.memory_space<vmem>>, vector<2x256xf32>,
    %c2_i32 = arith.constant 2 : i32
    %9 = arith.cmpi eq, %arg2, %c2_i32 : i32
    %10 = arith.extui %9 : i1 to i32
    %c0_i32_8 = arith.constant 0 : i32
    %11 = arith.cmpi ne, %10, %c0_i32_8 : i32
    scf.if %11 {
      %c0_9 = arith.constant 0 : index
      %c0_10 = arith.constant 0 : index
      %12 = vector.load %arg8[%c0_9, %c0_10] : memref<2x256xf32, #tpu.memory_space<vmem>>, vector<2x256xf32>
      %c0_11 = arith.constant 0 : index
      %c0_12 = arith.constant 0 : index
      %13 = vector.load %arg5[%c0_11, %c0_12] : memref<1x256xf32, #tpu.memory_space<vmem>>, vector<1x256xf32>
      %14 = vector.broadcast %13 : vector<1x256xf32> to vector<2x256xf32>
      %15 = arith.mulf %12, %14 : vector<2x256xf32>
      %c0_13 = arith.constant 0 : index
      %c0_14 = arith.constant 0 : index
      %16 = vector.load %arg6[%c0_13, %c0_14] : memref<1x256xf32, #tpu.memory_space<vmem>>, vector<1x256xf32>
      %17 = vector.broadcast %16 : vector<1x256xf32> to vector<2x256xf32>
      %18 = arith.addf %15, %17 : vector<2x256xf32>
      %cst_15 = arith.constant 0.000000e+00 : f32
      %19 = vector.broadcast %cst_15 : f32 to vector<2x256xf32>
      %20 = arith.maximumf %18, %19 : vector<2x256xf32>
      %21 = arith.truncf %20 : vector<2x256xf32> to vector<2x256xbf16>
      %c0_16 = arith.constant 0 : index
      %c0_17 = arith.constant 0 : index
      %22 = vector.load %arg7[%c0_16, %c0_17] : memref<2x256xbf16, #tpu.memory_space<vmem>>, vector<2x256xbf16>
      tpu.vector_store %arg7[%c0_16, %c0_17], %21 {strides = array<i32>} : memref<2x256xbf16, #tpu.memory_space<vmem>>, vector<2x256xbf16>,
    } else {
    }
    return
  }
  func.func @transform_0(%arg0: i32, %arg1: i32, %arg2: i32) -> (i32, i32) {
    %c0_i32 = arith.constant 0 : i32
    return %arg0, %arg2 : i32, i32
  }
  func.func @transform_1(%arg0: i32, %arg1: i32, %arg2: i32) -> (i32, i32) {
    %c0_i32 = arith.constant 0 : i32
    return %arg2, %arg1 : i32, i32
  }
  func.func @transform_2(%arg0: i32, %arg1: i32, %arg2: i32) -> (i32, i32) {
    %c0_i32 = arith.constant 0 : i32
    %c0_i32_0 = arith.constant 0 : i32
    return %c0_i32, %arg1 : i32, i32
  }
  func.func @transform_3(%arg0: i32, %arg1: i32, %arg2: i32) -> (i32, i32) {
    %c0_i32 = arith.constant 0 : i32
    %c0_i32_0 = arith.constant 0 : i32
    return %c0_i32, %arg1 : i32, i32
  }
  func.func @transform_4(%arg0: i32, %arg1: i32, %arg2: i32) -> (i32, i32) {
    %c0_i32 = arith.constant 0 : i32
    return %arg0, %arg1 : i32, i32
  }
}

module attributes {stable_mosaic.version = 11 : i64} {
  func.func @_matmul_kernel(%arg0: i32, %arg1: i32, %arg2: i32, %arg3: memref<2x256xbf16, #tpu.memory_space<vmem>>, %arg4: memref<256x256xbf16, #tpu.memory_space<vmem>>, %arg5: memref<1x256xf32, #tpu.memory_space<vmem>>, %arg6: memref<1x256xf32, #tpu.memory_space<vmem>>, %arg7: memref<2x256xbf16, #tpu.memory_space<vmem>>, %arg8: memref<2x256xf32, #tpu.memory_space<vmem>>) attributes {dimension_semantics = [#tpu.dimension_semantics<parallel>, #tpu.dimension_semantics<parallel>, #tpu.dimension_semantics<arbitrary>], iteration_bounds = array<i64: 1, 2, 1>, scalar_prefetch = 0 : i64, scratch_operands = 1 : i64, tpu.core_type = #tpu.core_type<tc>, window_params = [{transform_indices = @transform_0, window_bounds = array<i64: 2, 256>}, {transform_indices = @transform_1, window_bounds = array<i64: 256, 256>}, {transform_indices = @transform_2, window_bounds = array<i64: 1, 256>}, {transform_indices = @transform_3, window_bounds = array<i64: 1, 256>}, {transform_indices = @transform_4, window_bounds = array<i64: 2, 256>}]} {
    %c0_i32 = arith.constant 0 : i32
    %0 = arith.cmpi eq, %arg2, %c0_i32 : i32
    %1 = arith.extui %0 : i1 to i32
    %c0_i32_0 = arith.constant 0 : i32
    %2 = arith.cmpi ne, %1, %c0_i32_0 : i32
    scf.if %2 {
      %cst_10 = arith.constant 0.000000e+00 : f32
      %12 = vector.broadcast %cst_10 : f32 to vector<2x256xf32>
      %c0_11 = arith.constant 0 : index
      %c0_12 = arith.constant 0 : index
      %13 = vector.load %arg8[%c0_11, %c0_12] : memref<2x256xf32, #tpu.memory_space<vmem>>, vector<2x256xf32>
      tpu.vector_store %arg8[%c0_11, %c0_12], %12 {strides = array<i32>} : memref<2x256xf32, #tpu.memory_space<vmem>>, vector<2x256xf32>,
    } else {
    }
    %c0 = arith.constant 0 : index
    %c0_1 = arith.constant 0 : index
    %3 = vector.load %arg8[%c0, %c0_1] : memref<2x256xf32, #tpu.memory_space<vmem>>, vector<2x256xf32>
    %c0_2 = arith.constant 0 : index
    %c0_3 = arith.constant 0 : index
    %4 = vector.load %arg3[%c0_2, %c0_3] : memref<2x256xbf16, #tpu.memory_space<vmem>>, vector<2x256xbf16>
    %c0_4 = arith.constant 0 : index
    %c0_5 = arith.constant 0 : index
    %5 = vector.load %arg4[%c0_4, %c0_5] : memref<256x256xbf16, #tpu.memory_space<vmem>>, vector<256x256xbf16>
    %cst = arith.constant dense<0.000000e+00> : vector<2x256xf32>
    %6 = tpu.matmul %4, %5, %cst {dimension_numbers = #tpu.dot_dimension_numbers<[1], [0], [0], [1], [0, 0, 1, 1], [], []>} : vector<2x256xbf16>, vector<256x256xbf16>, vector<2x256xf32> -> vector<2x256xf32>
    %7 = arith.addf %3, %6 : vector<2x256xf32>
    %c0_6 = arith.constant 0 : index
    %c0_7 = arith.constant 0 : index
    %8 = vector.load %arg8[%c0_6, %c0_7] : memref<2x256xf32, #tpu.memory_space<vmem>>, vector<2x256xf32>
    tpu.vector_store %arg8[%c0_6, %c0_7], %7 {strides = array<i32>} : memref<2x256xf32, #tpu.memory_space<vmem>>, vector<2x256xf32>,
    %c0_i32_8 = arith.constant 0 : i32
    %9 = arith.cmpi eq, %arg2, %c0_i32_8 : i32
    %10 = arith.extui %9 : i1 to i32
    %c0_i32_9 = arith.constant 0 : i32
    %11 = arith.cmpi ne, %10, %c0_i32_9 : i32
    scf.if %11 {
      %c0_10 = arith.constant 0 : index
      %c0_11 = arith.constant 0 : index
      %12 = vector.load %arg8[%c0_10, %c0_11] : memref<2x256xf32, #tpu.memory_space<vmem>>, vector<2x256xf32>
      %c0_12 = arith.constant 0 : index
      %c0_13 = arith.constant 0 : index
      %13 = vector.load %arg5[%c0_12, %c0_13] : memref<1x256xf32, #tpu.memory_space<vmem>>, vector<1x256xf32>
      %14 = vector.broadcast %13 : vector<1x256xf32> to vector<2x256xf32>
      %15 = arith.mulf %12, %14 : vector<2x256xf32>
      %c0_14 = arith.constant 0 : index
      %c0_15 = arith.constant 0 : index
      %16 = vector.load %arg6[%c0_14, %c0_15] : memref<1x256xf32, #tpu.memory_space<vmem>>, vector<1x256xf32>
      %17 = vector.broadcast %16 : vector<1x256xf32> to vector<2x256xf32>
      %18 = arith.addf %15, %17 : vector<2x256xf32>
      %19 = arith.truncf %18 : vector<2x256xf32> to vector<2x256xbf16>
      %c0_16 = arith.constant 0 : index
      %c0_17 = arith.constant 0 : index
      %20 = vector.load %arg7[%c0_16, %c0_17] : memref<2x256xbf16, #tpu.memory_space<vmem>>, vector<2x256xbf16>
      tpu.vector_store %arg7[%c0_16, %c0_17], %19 {strides = array<i32>} : memref<2x256xbf16, #tpu.memory_space<vmem>>, vector<2x256xbf16>,
    } else {
    }
    return
  }
  func.func @transform_0(%arg0: i32, %arg1: i32, %arg2: i32) -> (i32, i32) {
    %c0_i32 = arith.constant 0 : i32
    return %arg0, %arg2 : i32, i32
  }
  func.func @transform_1(%arg0: i32, %arg1: i32, %arg2: i32) -> (i32, i32) {
    %c0_i32 = arith.constant 0 : i32
    return %arg2, %arg1 : i32, i32
  }
  func.func @transform_2(%arg0: i32, %arg1: i32, %arg2: i32) -> (i32, i32) {
    %c0_i32 = arith.constant 0 : i32
    %c0_i32_0 = arith.constant 0 : i32
    return %c0_i32, %arg1 : i32, i32
  }
  func.func @transform_3(%arg0: i32, %arg1: i32, %arg2: i32) -> (i32, i32) {
    %c0_i32 = arith.constant 0 : i32
    %c0_i32_0 = arith.constant 0 : i32
    return %c0_i32, %arg1 : i32, i32
  }
  func.func @transform_4(%arg0: i32, %arg1: i32, %arg2: i32) -> (i32, i32) {
    %c0_i32 = arith.constant 0 : i32
    return %arg0, %arg1 : i32, i32
  }
}

module attributes {stable_mosaic.version = 11 : i64} {
  func.func @_matmul_kernel(%arg0: i32, %arg1: i32, %arg2: i32, %arg3: memref<2x768xbf16, #tpu.memory_space<vmem>>, %arg4: memref<768x256xbf16, #tpu.memory_space<vmem>>, %arg5: memref<1x256xf32, #tpu.memory_space<vmem>>, %arg6: memref<1x256xf32, #tpu.memory_space<vmem>>, %arg7: memref<2x256xbf16, #tpu.memory_space<vmem>>, %arg8: memref<2x256xbf16, #tpu.memory_space<vmem>>, %arg9: memref<2x256xf32, #tpu.memory_space<vmem>>) attributes {dimension_semantics = [#tpu.dimension_semantics<parallel>, #tpu.dimension_semantics<parallel>, #tpu.dimension_semantics<arbitrary>], iteration_bounds = array<i64: 1, 2, 6>, scalar_prefetch = 0 : i64, scratch_operands = 1 : i64, tpu.core_type = #tpu.core_type<tc>, window_params = [{transform_indices = @transform_0, window_bounds = array<i64: 2, 768>}, {transform_indices = @transform_1, window_bounds = array<i64: 768, 256>}, {transform_indices = @transform_2, window_bounds = array<i64: 1, 256>}, {transform_indices = @transform_3, window_bounds = array<i64: 1, 256>}, {transform_indices = @transform_4, window_bounds = array<i64: 2, 256>}, {transform_indices = @transform_5, window_bounds = array<i64: 2, 256>}]} {
    %c0_i32 = arith.constant 0 : i32
    %0 = arith.cmpi eq, %arg2, %c0_i32 : i32
    %1 = arith.extui %0 : i1 to i32
    %c0_i32_0 = arith.constant 0 : i32
    %2 = arith.cmpi ne, %1, %c0_i32_0 : i32
    scf.if %2 {
      %cst_9 = arith.constant 0.000000e+00 : f32
      %12 = vector.broadcast %cst_9 : f32 to vector<2x256xf32>
      %c0_10 = arith.constant 0 : index
      %c0_11 = arith.constant 0 : index
      %13 = vector.load %arg9[%c0_10, %c0_11] : memref<2x256xf32, #tpu.memory_space<vmem>>, vector<2x256xf32>
      tpu.vector_store %arg9[%c0_10, %c0_11], %12 {strides = array<i32>} : memref<2x256xf32, #tpu.memory_space<vmem>>, vector<2x256xf32>,
    } else {
    }
    %c0 = arith.constant 0 : index
    %c0_1 = arith.constant 0 : index
    %3 = vector.load %arg9[%c0, %c0_1] : memref<2x256xf32, #tpu.memory_space<vmem>>, vector<2x256xf32>
    %c0_2 = arith.constant 0 : index
    %c0_3 = arith.constant 0 : index
    %4 = vector.load %arg3[%c0_2, %c0_3] : memref<2x768xbf16, #tpu.memory_space<vmem>>, vector<2x768xbf16>
    %c0_4 = arith.constant 0 : index
    %c0_5 = arith.constant 0 : index
    %5 = vector.load %arg4[%c0_4, %c0_5] : memref<768x256xbf16, #tpu.memory_space<vmem>>, vector<768x256xbf16>
    %cst = arith.constant dense<0.000000e+00> : vector<2x256xf32>
    %6 = tpu.matmul %4, %5, %cst {dimension_numbers = #tpu.dot_dimension_numbers<[1], [0], [0], [1], [0, 0, 1, 1], [], []>} : vector<2x768xbf16>, vector<768x256xbf16>, vector<2x256xf32> -> vector<2x256xf32>
    %7 = arith.addf %3, %6 : vector<2x256xf32>
    %c0_6 = arith.constant 0 : index
    %c0_7 = arith.constant 0 : index
    %8 = vector.load %arg9[%c0_6, %c0_7] : memref<2x256xf32, #tpu.memory_space<vmem>>, vector<2x256xf32>
    tpu.vector_store %arg9[%c0_6, %c0_7], %7 {strides = array<i32>} : memref<2x256xf32, #tpu.memory_space<vmem>>, vector<2x256xf32>,
    %c5_i32 = arith.constant 5 : i32
    %9 = arith.cmpi eq, %arg2, %c5_i32 : i32
    %10 = arith.extui %9 : i1 to i32
    %c0_i32_8 = arith.constant 0 : i32
    %11 = arith.cmpi ne, %10, %c0_i32_8 : i32
    scf.if %11 {
      %c0_9 = arith.constant 0 : index
      %c0_10 = arith.constant 0 : index
      %12 = vector.load %arg9[%c0_9, %c0_10] : memref<2x256xf32, #tpu.memory_space<vmem>>, vector<2x256xf32>
      %c0_11 = arith.constant 0 : index
      %c0_12 = arith.constant 0 : index
      %13 = vector.load %arg5[%c0_11, %c0_12] : memref<1x256xf32, #tpu.memory_space<vmem>>, vector<1x256xf32>
      %14 = vector.broadcast %13 : vector<1x256xf32> to vector<2x256xf32>
      %15 = arith.mulf %12, %14 : vector<2x256xf32>
      %c0_13 = arith.constant 0 : index
      %c0_14 = arith.constant 0 : index
      %16 = vector.load %arg6[%c0_13, %c0_14] : memref<1x256xf32, #tpu.memory_space<vmem>>, vector<1x256xf32>
      %17 = vector.broadcast %16 : vector<1x256xf32> to vector<2x256xf32>
      %18 = arith.addf %15, %17 : vector<2x256xf32>
      %c0_15 = arith.constant 0 : index
      %c0_16 = arith.constant 0 : index
      %19 = vector.load %arg7[%c0_15, %c0_16] : memref<2x256xbf16, #tpu.memory_space<vmem>>, vector<2x256xbf16>
      %20 = arith.extf %19 : vector<2x256xbf16> to vector<2x256xf32>
      %21 = arith.addf %18, %20 : vector<2x256xf32>
      %cst_17 = arith.constant 0.000000e+00 : f32
      %22 = vector.broadcast %cst_17 : f32 to vector<2x256xf32>
      %23 = arith.maximumf %21, %22 : vector<2x256xf32>
      %24 = arith.truncf %23 : vector<2x256xf32> to vector<2x256xbf16>
      %c0_18 = arith.constant 0 : index
      %c0_19 = arith.constant 0 : index
      %25 = vector.load %arg8[%c0_18, %c0_19] : memref<2x256xbf16, #tpu.memory_space<vmem>>, vector<2x256xbf16>
      tpu.vector_store %arg8[%c0_18, %c0_19], %24 {strides = array<i32>} : memref<2x256xbf16, #tpu.memory_space<vmem>>, vector<2x256xbf16>,
    } else {
    }
    return
  }
  func.func @transform_0(%arg0: i32, %arg1: i32, %arg2: i32) -> (i32, i32) {
    %c0_i32 = arith.constant 0 : i32
    return %arg0, %arg2 : i32, i32
  }
  func.func @transform_1(%arg0: i32, %arg1: i32, %arg2: i32) -> (i32, i32) {
    %c0_i32 = arith.constant 0 : i32
    return %arg2, %arg1 : i32, i32
  }
  func.func @transform_2(%arg0: i32, %arg1: i32, %arg2: i32) -> (i32, i32) {
    %c0_i32 = arith.constant 0 : i32
    %c0_i32_0 = arith.constant 0 : i32
    return %c0_i32, %arg1 : i32, i32
  }
  func.func @transform_3(%arg0: i32, %arg1: i32, %arg2: i32) -> (i32, i32) {
    %c0_i32 = arith.constant 0 : i32
    %c0_i32_0 = arith.constant 0 : i32
    return %c0_i32, %arg1 : i32, i32
  }
  func.func @transform_4(%arg0: i32, %arg1: i32, %arg2: i32) -> (i32, i32) {
    %c0_i32 = arith.constant 0 : i32
    return %arg0, %arg1 : i32, i32
  }
  func.func @transform_5(%arg0: i32, %arg1: i32, %arg2: i32) -> (i32, i32) {
    %c0_i32 = arith.constant 0 : i32
    return %arg0, %arg1 : i32, i32
  }
}

module attributes {stable_mosaic.version = 11 : i64} {
  func.func @_matmul_kernel(%arg0: i32, %arg1: i32, %arg2: i32, %arg3: memref<2x768xbf16, #tpu.memory_space<vmem>>, %arg4: memref<768x256xbf16, #tpu.memory_space<vmem>>, %arg5: memref<1x256xf32, #tpu.memory_space<vmem>>, %arg6: memref<1x256xf32, #tpu.memory_space<vmem>>, %arg7: memref<2x256xbf16, #tpu.memory_space<vmem>>, %arg8: memref<2x256xf32, #tpu.memory_space<vmem>>) attributes {dimension_semantics = [#tpu.dimension_semantics<parallel>, #tpu.dimension_semantics<parallel>, #tpu.dimension_semantics<arbitrary>], iteration_bounds = array<i64: 1, 2, 6>, scalar_prefetch = 0 : i64, scratch_operands = 1 : i64, tpu.core_type = #tpu.core_type<tc>, window_params = [{transform_indices = @transform_0, window_bounds = array<i64: 2, 768>}, {transform_indices = @transform_1, window_bounds = array<i64: 768, 256>}, {transform_indices = @transform_2, window_bounds = array<i64: 1, 256>}, {transform_indices = @transform_3, window_bounds = array<i64: 1, 256>}, {transform_indices = @transform_4, window_bounds = array<i64: 2, 256>}]} {
    %c0_i32 = arith.constant 0 : i32
    %0 = arith.cmpi eq, %arg2, %c0_i32 : i32
    %1 = arith.extui %0 : i1 to i32
    %c0_i32_0 = arith.constant 0 : i32
    %2 = arith.cmpi ne, %1, %c0_i32_0 : i32
    scf.if %2 {
      %cst_9 = arith.constant 0.000000e+00 : f32
      %12 = vector.broadcast %cst_9 : f32 to vector<2x256xf32>
      %c0_10 = arith.constant 0 : index
      %c0_11 = arith.constant 0 : index
      %13 = vector.load %arg8[%c0_10, %c0_11] : memref<2x256xf32, #tpu.memory_space<vmem>>, vector<2x256xf32>
      tpu.vector_store %arg8[%c0_10, %c0_11], %12 {strides = array<i32>} : memref<2x256xf32, #tpu.memory_space<vmem>>, vector<2x256xf32>,
    } else {
    }
    %c0 = arith.constant 0 : index
    %c0_1 = arith.constant 0 : index
    %3 = vector.load %arg8[%c0, %c0_1] : memref<2x256xf32, #tpu.memory_space<vmem>>, vector<2x256xf32>
    %c0_2 = arith.constant 0 : index
    %c0_3 = arith.constant 0 : index
    %4 = vector.load %arg3[%c0_2, %c0_3] : memref<2x768xbf16, #tpu.memory_space<vmem>>, vector<2x768xbf16>
    %c0_4 = arith.constant 0 : index
    %c0_5 = arith.constant 0 : index
    %5 = vector.load %arg4[%c0_4, %c0_5] : memref<768x256xbf16, #tpu.memory_space<vmem>>, vector<768x256xbf16>
    %cst = arith.constant dense<0.000000e+00> : vector<2x256xf32>
    %6 = tpu.matmul %4, %5, %cst {dimension_numbers = #tpu.dot_dimension_numbers<[1], [0], [0], [1], [0, 0, 1, 1], [], []>} : vector<2x768xbf16>, vector<768x256xbf16>, vector<2x256xf32> -> vector<2x256xf32>
    %7 = arith.addf %3, %6 : vector<2x256xf32>
    %c0_6 = arith.constant 0 : index
    %c0_7 = arith.constant 0 : index
    %8 = vector.load %arg8[%c0_6, %c0_7] : memref<2x256xf32, #tpu.memory_space<vmem>>, vector<2x256xf32>
    tpu.vector_store %arg8[%c0_6, %c0_7], %7 {strides = array<i32>} : memref<2x256xf32, #tpu.memory_space<vmem>>, vector<2x256xf32>,
    %c5_i32 = arith.constant 5 : i32
    %9 = arith.cmpi eq, %arg2, %c5_i32 : i32
    %10 = arith.extui %9 : i1 to i32
    %c0_i32_8 = arith.constant 0 : i32
    %11 = arith.cmpi ne, %10, %c0_i32_8 : i32
    scf.if %11 {
      %c0_9 = arith.constant 0 : index
      %c0_10 = arith.constant 0 : index
      %12 = vector.load %arg8[%c0_9, %c0_10] : memref<2x256xf32, #tpu.memory_space<vmem>>, vector<2x256xf32>
      %c0_11 = arith.constant 0 : index
      %c0_12 = arith.constant 0 : index
      %13 = vector.load %arg5[%c0_11, %c0_12] : memref<1x256xf32, #tpu.memory_space<vmem>>, vector<1x256xf32>
      %14 = vector.broadcast %13 : vector<1x256xf32> to vector<2x256xf32>
      %15 = arith.mulf %12, %14 : vector<2x256xf32>
      %c0_13 = arith.constant 0 : index
      %c0_14 = arith.constant 0 : index
      %16 = vector.load %arg6[%c0_13, %c0_14] : memref<1x256xf32, #tpu.memory_space<vmem>>, vector<1x256xf32>
      %17 = vector.broadcast %16 : vector<1x256xf32> to vector<2x256xf32>
      %18 = arith.addf %15, %17 : vector<2x256xf32>
      %cst_15 = arith.constant 0.000000e+00 : f32
      %19 = vector.broadcast %cst_15 : f32 to vector<2x256xf32>
      %20 = arith.maximumf %18, %19 : vector<2x256xf32>
      %21 = arith.truncf %20 : vector<2x256xf32> to vector<2x256xbf16>
      %c0_16 = arith.constant 0 : index
      %c0_17 = arith.constant 0 : index
      %22 = vector.load %arg7[%c0_16, %c0_17] : memref<2x256xbf16, #tpu.memory_space<vmem>>, vector<2x256xbf16>
      tpu.vector_store %arg7[%c0_16, %c0_17], %21 {strides = array<i32>} : memref<2x256xbf16, #tpu.memory_space<vmem>>, vector<2x256xbf16>,
    } else {
    }
    return
  }
  func.func @transform_0(%arg0: i32, %arg1: i32, %arg2: i32) -> (i32, i32) {
    %c0_i32 = arith.constant 0 : i32
    return %arg0, %arg2 : i32, i32
  }
  func.func @transform_1(%arg0: i32, %arg1: i32, %arg2: i32) -> (i32, i32) {
    %c0_i32 = arith.constant 0 : i32
    return %arg2, %arg1 : i32, i32
  }
  func.func @transform_2(%arg0: i32, %arg1: i32, %arg2: i32) -> (i32, i32) {
    %c0_i32 = arith.constant 0 : i32
    %c0_i32_0 = arith.constant 0 : i32
    return %c0_i32, %arg1 : i32, i32
  }
  func.func @transform_3(%arg0: i32, %arg1: i32, %arg2: i32) -> (i32, i32) {
    %c0_i32 = arith.constant 0 : i32
    %c0_i32_0 = arith.constant 0 : i32
    return %c0_i32, %arg1 : i32, i32
  }
  func.func @transform_4(%arg0: i32, %arg1: i32, %arg2: i32) -> (i32, i32) {
    %c0_i32 = arith.constant 0 : i32
    return %arg0, %arg1 : i32, i32
  }
}

module attributes {stable_mosaic.version = 11 : i64} {
  func.func @_avgpool_fc_kernel(%arg0: memref<2x1x512xbf16, #tpu.memory_space<vmem>>, %arg1: memref<512x10xf32, #tpu.memory_space<vmem>>, %arg2: memref<1x10xf32, #tpu.memory_space<vmem>>, %arg3: memref<2x10xf32, #tpu.memory_space<vmem>>) attributes {dimension_semantics = [], scalar_prefetch = 0 : i64, scratch_operands = 0 : i64, tpu.core_type = #tpu.core_type<tc>} {
    %c0 = arith.constant 0 : index
    %c0_0 = arith.constant 0 : index
    %c0_1 = arith.constant 0 : index
    %0 = vector.load %arg0[%c0, %c0_0, %c0_1] : memref<2x1x512xbf16, #tpu.memory_space<vmem>>, vector<2x1x512xbf16>
    %1 = arith.extf %0 : vector<2x1x512xbf16> to vector<2x1x512xf32>
    %cst = arith.constant dense<0.000000e+00> : vector<2x512xf32>
    %2 = vector.multi_reduction <add>, %1, %cst [1] : vector<2x1x512xf32> to vector<2x512xf32>
    %cst_2 = arith.constant 1.000000e+00 : f32
    %3 = vector.broadcast %cst_2 : f32 to vector<2x512xf32>
    %4 = arith.mulf %2, %3 : vector<2x512xf32>
    %c0_3 = arith.constant 0 : index
    %c0_4 = arith.constant 0 : index
    %5 = vector.load %arg1[%c0_3, %c0_4] : memref<512x10xf32, #tpu.memory_space<vmem>>, vector<512x10xf32>
    %cst_5 = arith.constant dense<0.000000e+00> : vector<2x10xf32>
    %6 = tpu.matmul %4, %5, %cst_5 {dimension_numbers = #tpu.dot_dimension_numbers<[1], [0], [0], [1], [0, 0, 1, 1], [], []>} : vector<2x512xf32>, vector<512x10xf32>, vector<2x10xf32> -> vector<2x10xf32>
    %c0_6 = arith.constant 0 : index
    %c0_7 = arith.constant 0 : index
    %7 = vector.load %arg2[%c0_6, %c0_7] : memref<1x10xf32, #tpu.memory_space<vmem>>, vector<1x10xf32>
    %8 = vector.broadcast %7 : vector<1x10xf32> to vector<2x10xf32>
    %9 = arith.addf %6, %8 : vector<2x10xf32>
    %c0_8 = arith.constant 0 : index
    %c0_9 = arith.constant 0 : index
    %10 = vector.load %arg3[%c0_8, %c0_9] : memref<2x10xf32, #tpu.memory_space<vmem>>, vector<2x10xf32>
    tpu.vector_store %arg3[%c0_8, %c0_9], %9 {strides = array<i32>} : memref<2x10xf32, #tpu.memory_space<vmem>>, vector<2x10xf32>,
    return
  }
}

</mosaic_0001>

<bundles_post_ra>
// kernel: resnet18_forward.29
= control target key start
LH: loop header
LB: loop body
LE: loop exit
PB: predicated region body
PF: predicated region fallthrough
CT: control target
= control target key end

     0   :  { %vm58_vm0 = vcmask 519168   ;;  %s144_s0 = inlined_call_operand.vmem [shape: bf16[32,64], index: 0, kind: input, shape index: {}]   ;;  %s145_s1 = inlined_call_operand.vmem [shape: bf16[32,64], index: 1, kind: input, shape index: {}]   ;;  %s146_s2 = inlined_call_operand.vmem [shape: bf16[32,64], index: 2, kind: input, shape index: {}]   ;;  %s147_s3 = inlined_call_operand.vmem [shape: bf16[32,64], index: 3, kind: output, shape index: {}]  }
   0x1   :  { %v68_v0 = vld [vmem:[%s144_s0] sm:$0xff]   ;;  %v91_v7 = vld [vmem:[%s144_s0 + $0x8] sm:$0xff]  }
   0x2   :  { %v76_v1 = vld [vmem:[%s145_s1] sm:$0xff]   ;;  %v69_v3 = vunpack.c.l.bf16 %v68_v0  ;;  %v70_v6 = vunpack.c.h.bf16 %v68_v0  ;;  %v92_v8 = vld [vmem:[%s145_s1 + $0x8] sm:$0xff]   ;;  %v73_v12 = vunpack.c.l.bf16 %v91_v7  ;;  %v74_v16 = vunpack.c.h.bf16 %v91_v7 }
   0x3   :  { %v84_v2 = vld [vmem:[%s146_s2] sm:$0xff]   ;;  %v77_v4 = vunpack.c.l.bf16 %v76_v1  ;;  %v93_v9 = vld [vmem:[%s146_s2 + $0x8] sm:$0xff]   ;;  %v78_v10 = vunpack.c.h.bf16 %v76_v1  ;;  %v81_v13 = vunpack.c.l.bf16 %v92_v8  ;;  %v82_v17 = vunpack.c.h.bf16 %v92_v8 }
   0x4   :  { %v85_v5 = vunpack.c.l.bf16 %v84_v2  ;;  %v86_v11 = vunpack.c.h.bf16 %v84_v2  ;;  %v89_v15 = vunpack.c.l.bf16 %v93_v9  ;;  %v90_v20 = vunpack.c.h.bf16 %v93_v9 }
   0x5   :  { %v30_v14 = vmax.f32 %v69_v3, %v77_v4  ;;  %v31_v18 = vmax.f32 %v70_v6, %v78_v10  ;;  %v32_v19 = vmax.f32 %v73_v12, %v81_v13  ;;  %v33_v22 = vmax.f32 %v74_v16, %v82_v17 }
   0x7   :  { %v50_v21 = vmax.f32 %v30_v14, %v85_v5  ;;  %v51_v23 = vmax.f32 %v31_v18, %v86_v11  ;;  %v52_v24 = vmax.f32 %v32_v19, %v89_v15  ;;  %v53_v26 = vmax.f32 %v33_v22, %v90_v20 }
   0x9   :  { %v54_v25 = vpack.c.bf16 %v50_v21, %v50_v21  ;;  %v55_v27 = vpack.c.bf16 %v51_v23, %v51_v23  ;;  %v56_v28 = vpack.c.bf16 %v52_v24, %v52_v24  ;;  %v57_v29 = vpack.c.bf16 %v53_v26, %v53_v26 }
   0xb   :  { %59 = vst.msk [vmem:[%s147_s3] sm:$0xf] %vm58_vm0, %v54_v25 }
   0xc   :  { %60 = vst.msk [vmem:[%s147_s3 + $0x4] sm:$0xf] %vm58_vm0, %v55_v27 }
   0xd   :  { %61 = vst.msk [vmem:[%s147_s3 + $0x8] sm:$0xf] %vm58_vm0, %v56_v28 }
   0xe   :  { %62 = vst.msk [vmem:[%s147_s3 + $0xc] sm:$0xf] %vm58_vm0, %v57_v29 }

// kernel: resnet18_forward.28
= control target key start
LH: loop header
LB: loop body
LE: loop exit
PB: predicated region body
PF: predicated region fallthrough
CT: control target
= control target key end

     0   :  { %vm124_vm0 = vcmask 519168   ;;  %s316_s0 = inlined_call_operand.vmem [shape: bf16[80,64], index: 0, kind: input, shape index: {}]   ;;  %s317_s1 = inlined_call_operand.vmem [shape: bf16[80,64], index: 1, kind: input, shape index: {}]   ;;  %s318_s2 = inlined_call_operand.vmem [shape: bf16[80,64], index: 2, kind: input, shape index: {}]   ;;  %s319_s3 = inlined_call_operand.vmem [shape: bf16[80,64], index: 3, kind: output, shape index: {}]  }
   0x1   :  { %v140_v0 = vld [vmem:[%s316_s0] sm:$0xff]   ;;  %v199_v7 = vld [vmem:[%s316_s0 + $0x8] sm:$0xff]   ;;  %v200_v14 = vld [vmem:[%s316_s0 + $0x10] sm:$0xff]  }
   0x2   :  { %v160_v1 = vld [vmem:[%s317_s1] sm:$0xff]   ;;  %v141_v3 = vunpack.c.l.bf16 %v140_v0  ;;  %v142_v6 = vunpack.c.h.bf16 %v140_v0  ;;  %v203_v8 = vld [vmem:[%s317_s1 + $0x8] sm:$0xff]   ;;  %v145_v12 = vunpack.c.l.bf16 %v199_v7  ;;  %v204_v15 = vld [vmem:[%s317_s1 + $0x10] sm:$0xff]   ;;  %v146_v19 = vunpack.c.h.bf16 %v199_v7 }
   0x3   :  { %v180_v2 = vld [vmem:[%s318_s2] sm:$0xff]   ;;  %v161_v4 = vunpack.c.l.bf16 %v160_v1  ;;  %v207_v9 = vld [vmem:[%s318_s2 + $0x8] sm:$0xff]   ;;  %v162_v10 = vunpack.c.h.bf16 %v160_v1  ;;  %v165_v13 = vunpack.c.l.bf16 %v203_v8  ;;  %v208_v16 = vld [vmem:[%s318_s2 + $0x10] sm:$0xff]   ;;  %v166_v20 = vunpack.c.h.bf16 %v203_v8 }
   0x4   :  { %v181_v5 = vunpack.c.l.bf16 %v180_v2  ;;  %v182_v11 = vunpack.c.h.bf16 %v180_v2  ;;  %v185_v18 = vunpack.c.l.bf16 %v207_v9  ;;  %v186_v23 = vunpack.c.h.bf16 %v207_v9  ;;  %v201_v29 = vld [vmem:[%s316_s0 + $0x18] sm:$0xff]   ;;  %v202_v44 = vld [vmem:[%s316_s0 + $0x20] sm:$0xff]  }
   0x5   :  { %v54_v17 = vmax.f32 %v141_v3, %v161_v4  ;;  %v55_v21 = vmax.f32 %v142_v6, %v162_v10  ;;  %v56_v22 = vmax.f32 %v145_v12, %v165_v13  ;;  %v149_v24 = vunpack.c.l.bf16 %v200_v14  ;;  %v205_v34 = vld [vmem:[%s317_s1 + $0x18] sm:$0xff]   ;;  %v206_v45 = vld [vmem:[%s317_s1 + $0x20] sm:$0xff]  }
   0x6   :  { %v57_v26 = vmax.f32 %v146_v19, %v166_v20  ;;  %v169_v27 = vunpack.c.l.bf16 %v204_v15  ;;  %v189_v28 = vunpack.c.l.bf16 %v208_v16  ;;  %v150_v32 = vunpack.c.h.bf16 %v200_v14  ;;  %v209_v35 = vld [vmem:[%s318_s2 + $0x18] sm:$0xff]   ;;  %v210_v50 = vld [vmem:[%s318_s2 + $0x20] sm:$0xff]  }
   0x7   :  { %v104_v25 = vmax.f32 %v54_v17, %v181_v5  ;;  %v105_v30 = vmax.f32 %v55_v21, %v182_v11  ;;  %v106_v31 = vmax.f32 %v56_v22, %v185_v18  ;;  %v170_v33 = vunpack.c.h.bf16 %v204_v15 }
   0x8   :  { %v107_v37 = vmax.f32 %v57_v26, %v186_v23  ;;  %v58_v38 = vmax.f32 %v149_v24, %v169_v27  ;;  %v190_v39 = vunpack.c.h.bf16 %v208_v16  ;;  %v153_v43 = vunpack.c.l.bf16 %v201_v29 }
   0x9   :  { %v114_v36 = vpack.c.bf16 %v104_v25, %v104_v25  ;;  %v115_v40 = vpack.c.bf16 %v105_v30, %v105_v30  ;;  %v116_v41 = vpack.c.bf16 %v106_v31, %v106_v31  ;;  %v59_v42 = vmax.f32 %v150_v32, %v170_v33 }
   0xa   :  { %v117_v46 = vpack.c.bf16 %v107_v37, %v107_v37  ;;  %v108_v47 = vmax.f32 %v58_v38, %v189_v28  ;;  %v173_v48 = vunpack.c.l.bf16 %v205_v34  ;;  %v193_v49 = vunpack.c.l.bf16 %v209_v35 }
   0xb   :  { %125 = vst.msk [vmem:[%s319_s3] sm:$0xf] %vm124_vm0, %v114_v36  ;;  %v109_v51 = vmax.f32 %v59_v42, %v190_v39  ;;  %v154_v52 = vunpack.c.h.bf16 %v201_v29  ;;  %v174_v53 = vunpack.c.h.bf16 %v205_v34  ;;  %v194_v54 = vunpack.c.h.bf16 %v209_v35 }
   0xc   :  { %126 = vst.msk [vmem:[%s319_s3 + $0x4] sm:$0xf] %vm124_vm0, %v115_v40  ;;  %v118_v55 = vpack.c.bf16 %v108_v47, %v108_v47  ;;  %v60_v56 = vmax.f32 %v153_v43, %v173_v48  ;;  %v157_v57 = vunpack.c.l.bf16 %v202_v44  ;;  %v177_v58 = vunpack.c.l.bf16 %v206_v45 }
   0xd   :  { %127 = vst.msk [vmem:[%s319_s3 + $0x8] sm:$0xf] %vm124_vm0, %v116_v41  ;;  %v119_v59 = vpack.c.bf16 %v109_v51, %v109_v51  ;;  %v61_v60 = vmax.f32 %v154_v52, %v174_v53  ;;  %v197_v61 = vunpack.c.l.bf16 %v210_v50  ;;  %v158_v62 = vunpack.c.h.bf16 %v202_v44 }
   0xe   :  { %128 = vst.msk [vmem:[%s319_s3 + $0xc] sm:$0xf] %vm124_vm0, %v117_v46  ;;  %v110_v63 = vmax.f32 %v60_v56, %v193_v49  ;;  %v62_v0 = vmax.f32 %v157_v57, %v177_v58  ;;  %v178_v1 = vunpack.c.h.bf16 %v206_v45  ;;  %v198_v2 = vunpack.c.h.bf16 %v210_v50 }
   0xf   :  { %129 = vst.msk [vmem:[%s319_s3 + $0x10] sm:$0xf] %vm124_vm0, %v118_v55  ;;  %v111_v3 = vmax.f32 %v61_v60, %v194_v54 }
  0x10   :  { %130 = vst.msk [vmem:[%s319_s3 + $0x14] sm:$0xf] %vm124_vm0, %v119_v59  ;;  %v120_v4 = vpack.c.bf16 %v110_v63, %v110_v63  ;;  %v112_v5 = vmax.f32 %v62_v0, %v197_v61  ;;  %v63_v6 = vmax.f32 %v158_v62, %v178_v1 }
  0x11   :  { %v121_v7 = vpack.c.bf16 %v111_v3, %v111_v3 }
  0x12   :  { %131 = vst.msk [vmem:[%s319_s3 + $0x18] sm:$0xf] %vm124_vm0, %v120_v4  ;;  %v122_v8 = vpack.c.bf16 %v112_v5, %v112_v5  ;;  %v113_v9 = vmax.f32 %v63_v6, %v198_v2 }
  0x13   :  { %132 = vst.msk [vmem:[%s319_s3 + $0x1c] sm:$0xf] %vm124_vm0, %v121_v7 }
  0x14   :  { %133 = vst.msk [vmem:[%s319_s3 + $0x20] sm:$0xf] %vm124_vm0, %v122_v8  ;;  %v123_v10 = vpack.c.bf16 %v113_v9, %v113_v9 }
  0x16   :  { %134 = vst.msk [vmem:[%s319_s3 + $0x24] sm:$0xf] %vm124_vm0, %v123_v10 }

// kernel: resnet18_forward.27
= control target key start
LH: loop header
LB: loop body
LE: loop exit
PB: predicated region body
PF: predicated region fallthrough
CT: control target
= control target key end

     0   :  { %vm244_vm0 = vcmask 1040384   ;;  %vm245_vm1 = vcmask 1041408   ;;  %v641_v2 = vmov 65535   ;;  %vm219_vm2 = vcmask 154624   ;;  %s949_s1 = inlined_call_operand.vmem [shape: bf16[147,64], index: 1, kind: input, shape index: {}]   ;;  %s950_s0 = inlined_call_operand.vmem [shape: bf16[128,147], index: 0, kind: input, shape index: {}]   ;;  %s951_s2 = inlined_call_operand.vmem [shape: f32[1,64], index: 2, kind: input, shape index: {}]   ;;  %s952_s3 = inlined_call_operand.vmem [shape: f32[1,64], index: 3, kind: input, shape index: {}]   ;;  %s953_s4 = inlined_call_operand.vmem [shape: bf16[128,64], index: 4, kind: output, shape index: {}]  }
   0x1   :  { %v625_v0 = vld [vmem:[%s949_s1 + $0x38] sm:$0xff]  ;;  %v89_v1 = vld [vmem:[%s949_s1 + $0x48] sm:$0x3]  ;;  %v246_v3 = vsel %vm244_vm0, 4294967295, %v641_v2  ;;  %v624_v5 = vld [vmem:[%s949_s1 + $0x30] sm:$0xff]  ;;  %vm22_vm3 = vcmask 523264  }
   0x2   :  { %v199_v4 = vunpack.c.l.b16 %v89_v1  ;;  %251 = vmatpush.bf16.msra.mxu0 %v625_v0  ;;  %627 = vmatpush.bf16.msra.mxu2 %v625_v0  ;;  %v247_v6 = vsel %vm245_vm1, %v246_v3, 0  ;;  %v623_v9 = vld [vmem:[%s949_s1 + $0x28] sm:$0xff]  ;;  %v626_v10 = vld [vmem:[%s949_s1 + $0x40] sm:$0xff]  ;;  %v612_v13 = vld [vmem:[%s950_s0 + $0x54] sm:$0xf]  ;;  %v642_v0 = vmov 0.0  }
   0x3   :  { %v602_v11 = vld [vmem:[%s950_s0 + $0x4] sm:$0xf]  ;;  %v498_v12 = vld [vmem:[%s950_s0 + $0x8] sm:$0xf0]  ;;  %v538_v14 = vld [vmem:[%s950_s0 + $0x58] sm:$0xf0] }
   0x4   :  { %v209_v7 = vpack.c.b16 %v199_v4, %v199_v4  ;;  %v501_v15 = vor.u32 %v602_v11, %v498_v12  ;;  %v622_v16 = vld [vmem:[%s949_s1 + $0x20] sm:$0xff]  ;;  %v541_v17 = vor.u32 %v612_v13, %v538_v14  ;;  %v621_v18 = vld [vmem:[%s949_s1 + $0x18] sm:$0xff]  ;;  %v620_v19 = vld [vmem:[%s949_s1 + $0x10] sm:$0xff]  ;;  %23 = vst.msk [vmem:[#allocation2] sm:$0xff] %vm22_vm3, %v642_v0  ;;  %vm473_vm4 = vcmask 519168  }
   0x5   :  { %v619_v20 = vld [vmem:[%s949_s1 + $0x8] sm:$0xff]  ;;  %v604_v21 = vld [vmem:[%s950_s0 + $0x14] sm:$0xf]  ;;  %v506_v22 = vld [vmem:[%s950_s0 + $0x18] sm:$0xf0]  ;;  %24 = vst.msk [vmem:[#allocation2 + $0x8] sm:$0xff] %vm22_vm3, %v642_v0 }
   0x6   :  { %v249_v8 = vand.u32 %v247_v6, %v209_v7  ;;  %252 = vmatpush.bf16.msra.mxu0 %v624_v5  ;;  %628 = vmatpush.bf16.msra.mxu2 %v624_v5  ;;  %v614_v23 = vld [vmem:[%s950_s0 + $0x64] sm:$0xf]  ;;  %v546_v24 = vld [vmem:[%s950_s0 + $0x68] sm:$0xf0]  ;;  %v509_v25 = vor.u32 %v604_v21, %v506_v22  ;;  %v496_v27 = vld [vmem:[%s950_s0] sm:$0xf] }
   0x7   :  { %v618_v26 = vld [vmem:[%s949_s1] sm:$0xff]  ;;  %v603_v28 = vld [vmem:[%s950_s0 + $0x4] sm:$0xf0]  ;;  %v549_v31 = vor.u32 %v614_v23, %v546_v24  ;;  %v514_v35 = vld [vmem:[%s950_s0 + $0x28] sm:$0xf0]  ;;  %25 = vst.msk [vmem:[#allocation2 + $0x10] sm:$0xff] %vm22_vm3, %v642_v0 }
   0x8   :  { %306 = vmatpush.bf16.msra.mxu1 %v249_v8  ;;  %635 = vmatpush.bf16.msra.mxu3 %v249_v8  ;;  %v528_v29 = vld [vmem:[%s950_s0 + $0x40] sm:$0xf]  ;;  %v611_v30 = vld [vmem:[%s950_s0 + $0x44] sm:$0xf0]  ;;  %v497_v32 = vor.u32 %v603_v28, %v496_v27  ;;  %v606_v34 = vld [vmem:[%s950_s0 + $0x24] sm:$0xf] }
   0x9   :  { %v529_v33 = vor.u32 %v611_v30, %v528_v29  ;;  %v616_v36 = vld [vmem:[%s950_s0 + $0x74] sm:$0xf]  ;;  %v554_v37 = vld [vmem:[%s950_s0 + $0x78] sm:$0xf0]  ;;  %v517_v38 = vor.u32 %v606_v34, %v514_v35  ;;  %v504_v39 = vld [vmem:[%s950_s0 + $0x10] sm:$0xf] }
   0xa   :  { %253 = vmatpush.bf16.msra.mxu0 %v623_v9  ;;  %629 = vmatpush.bf16.msra.mxu2 %v623_v9  ;;  %v605_v40 = vld [vmem:[%s950_s0 + $0x14] sm:$0xf0]  ;;  %v536_v41 = vld [vmem:[%s950_s0 + $0x50] sm:$0xf]  ;;  %v557_v43 = vor.u32 %v616_v36, %v554_v37  ;;  %v608_v46 = vld [vmem:[%s950_s0 + $0x34] sm:$0xf] }
   0xb   :  { %v613_v42 = vld [vmem:[%s950_s0 + $0x54] sm:$0xf0]  ;;  %v505_v44 = vor.u32 %v605_v40, %v504_v39  ;;  %v522_v47 = vld [vmem:[%s950_s0 + $0x38] sm:$0xf0]  ;;  %v512_v49 = vld [vmem:[%s950_s0 + $0x20] sm:$0xf] }
   0xc   :  { %307 = vmatpush.bf16.msra.mxu1 %v626_v10  ;;  %636 = vmatpush.bf16.msra.mxu3 %v626_v10  ;;  %v537_v45 = vor.u32 %v613_v42, %v536_v41  ;;  %v525_v48 = vor.u32 %v608_v46, %v522_v47  ;;  %v607_v50 = vld [vmem:[%s950_s0 + $0x24] sm:$0xf0]  ;;  %v544_v51 = vld [vmem:[%s950_s0 + $0x60] sm:$0xf]  ;;  %v610_v55 = vld [vmem:[%s950_s0 + $0x44] sm:$0xf] }
   0xd   :  { %v615_v52 = vld [vmem:[%s950_s0 + $0x64] sm:$0xf0]  ;;  %v513_v53 = vor.u32 %v607_v50, %v512_v49  ;;  %v530_v56 = vld [vmem:[%s950_s0 + $0x48] sm:$0xf0]  ;;  %v520_v58 = vld [vmem:[%s950_s0 + $0x30] sm:$0xf] }
   0xe   :  { %254 = vmatpush.bf16.msra.mxu0 %v622_v16  ;;  %630 = vmatpush.bf16.msra.mxu2 %v622_v16  ;;  %v545_v54 = vor.u32 %v615_v52, %v544_v51  ;;  %v533_v57 = vor.u32 %v610_v55, %v530_v56  ;;  %v609_v59 = vld [vmem:[%s950_s0 + $0x34] sm:$0xf0]  ;;  %v552_v60 = vld [vmem:[%s950_s0 + $0x70] sm:$0xf]  ;;  %26 = vst.msk [vmem:[#allocation2 + $0x18] sm:$0xff] %vm22_vm3, %v642_v0  ;;  %v39_v4 = vld [vmem:[#allocation2] sm:$0xff] }
   0xf   :  { %594 = vmatmul.msk.bf16.vlgmr.msra.gmra.mxu1 %vm219_vm2, %v501_v15  ;;  %599 = vmatmul.msk.bf16.vlgmr.msra.gmra.mxu3 %vm219_vm2, %v541_v17  ;;  %v617_v61 = vld [vmem:[%s950_s0 + $0x74] sm:$0xf0]  ;;  %v521_v62 = vor.u32 %v609_v59, %v520_v58  ;;  %27 = vst.msk [vmem:[#allocation2 + $0x20] sm:$0xff] %vm22_vm3, %v642_v0  ;;  %v40_v10 = vld [vmem:[#allocation2 + $0x8] sm:$0xff]  ;;  %v824_v12 = vld [vmem:[%s951_s2] ss:$0 sm:$0xff] }
  0x10   :  { %v553_v63 = vor.u32 %v617_v61, %v552_v60  ;;  %28 = vst.msk [vmem:[#allocation2 + $0x28] sm:$0xff] %vm22_vm3, %v642_v0  ;;  %v829_v14 = vld [vmem:[%s952_s3] ss:$0 sm:$0xff]  ;;  %v41_v22 = vld [vmem:[#allocation2 + $0x10] sm:$0xff] }
  0x11   :  { %29 = vst.msk [vmem:[#allocation2 + $0x30] sm:$0xff] %vm22_vm3, %v642_v0 }
  0x12   :  { %255 = vmatpush.bf16.msra.mxu0 %v621_v18  ;;  %631 = vmatpush.bf16.msra.mxu2 %v621_v18  ;;  %30 = vst.msk [vmem:[#allocation2 + $0x38] sm:$0xff] %vm22_vm3, %v642_v0 }
  0x13   :  { %31 = vst.msk [vmem:[#allocation2 + $0x40] sm:$0xff] %vm22_vm3, %v642_v0 }
  0x14   :  { %32 = vst.msk [vmem:[#allocation2 + $0x48] sm:$0xff] %vm22_vm3, %v642_v0 }
  0x15   :  { %33 = vst.msk [vmem:[#allocation2 + $0x50] sm:$0xff] %vm22_vm3, %v642_v0  ;;  %v42_v36 = vld [vmem:[#allocation2 + $0x18] sm:$0xff] }
  0x16   :  { %256 = vmatpush.bf16.msra.mxu0 %v620_v19  ;;  %632 = vmatpush.bf16.msra.mxu2 %v620_v19  ;;  %34 = vst.msk [vmem:[#allocation2 + $0x58] sm:$0xff] %vm22_vm3, %v642_v0  ;;  %v43_v50 = vld [vmem:[#allocation2 + $0x20] sm:$0xff] }
  0x17   :  { %35 = vst.msk [vmem:[#allocation2 + $0x60] sm:$0xff] %vm22_vm3, %v642_v0 }
  0x18   :  { %36 = vst.msk [vmem:[#allocation2 + $0x68] sm:$0xff] %vm22_vm3, %v642_v0 }
  0x19   :  { %37 = vst.msk [vmem:[#allocation2 + $0x70] sm:$0xff] %vm22_vm3, %v642_v0 }
  0x1a   :  { %257 = vmatpush.bf16.msra.mxu0 %v619_v20  ;;  %633 = vmatpush.bf16.msra.mxu2 %v619_v20  ;;  %38 = vst.msk [vmem:[#allocation2 + $0x78] sm:$0xff] %vm22_vm3, %v642_v0 }
  0x1d   :  { %v50_v46 = vld [vmem:[#allocation2 + $0x58] sm:$0xff] }
  0x1e   :  { %258 = vmatpush.bf16.msra.mxu0 %v618_v26  ;;  %634 = vmatpush.bf16.msra.mxu2 %v618_v26  ;;  %v51_v0 = vld [vmem:[#allocation2 + $0x60] sm:$0xff] }
  0x1f   :  { %595 = vmatmul.msk.bf16.gmra.mxu1 %vm219_vm2, %v509_v25  ;;  %600 = vmatmul.msk.bf16.gmra.mxu3 %vm219_vm2, %v549_v31 }
  0x21   :  { %259 = vmatmul.bf16.vlgmr.msra.gmra.mxu0 %v497_v32  ;;  %279 = vmatmul.bf16.vlgmr.msra.gmra.mxu2 %v529_v33  ;;  %v49_v32 = vld [vmem:[#allocation2 + $0x50] sm:$0xff] }
  0x2f   :  { %596 = vmatmul.msk.bf16.gmra.mxu1 %vm219_vm2, %v517_v38  ;;  %601 = vmatmul.msk.bf16.gmra.mxu3 %vm219_vm2, %v557_v43 }
  0x31   :  { %264 = vmatmul.bf16.gmra.mxu0 %v505_v44  ;;  %284 = vmatmul.bf16.gmra.mxu2 %v537_v45 }
  0x3f   :  { %597 = vmatmul.msk.bf16.gmra.mxu1 %vm219_vm2, %v525_v48 }
  0x41   :  { %269 = vmatmul.bf16.gmra.mxu0 %v513_v53  ;;  %289 = vmatmul.bf16.gmra.mxu2 %v545_v54 }
  0x4f   :  { %598 = vmatmul.msk.bf16.gmra.mxu1 %vm219_vm2, %v533_v57 }
  0x51   :  { %274 = vmatmul.bf16.gmra.mxu0 %v521_v62  ;;  %294 = vmatmul.bf16.gmra.mxu2 %v553_v63 }
  0x8c   :  { %v309_v1 = vpop.f32.mrf.mxu1 }
  0x92   :  { %v334_v19 = vpop.f32.mrf.mxu3 }
  0x94   :  { %v311_v2 = vpop.f32.mrf.mxu1 }
  0x9a   :  { %v336_v34 = vpop.f32.mrf.mxu3 }
  0x9c   :  { %v314_v3 = vpop.f32.mrf.mxu1 }
  0x9e   :  { %v260_v5 = vpop.f32.mrf.mxu0 }
  0x9f   :  { %v310_v6 = vadd.f32 %v309_v1, %v260_v5  ;;  %v44_v5 = vld [vmem:[#allocation2 + $0x28] sm:$0xff] }
  0xa1   :  { %v349_v7 = vadd.f32 %v310_v6, %v39_v4 }
  0xa2   :  { %v339_v52 = vpop.f32.mrf.mxu3 }
  0xa3   :  { %366 = vst.msk [vmem:[#allocation2] sm:$0xff] %vm22_vm3, %v349_v7 }
  0xa4   :  { %v316_v8 = vpop.f32.mrf.mxu1  ;;  %v819_v9 = vpop.f32.mrf.mxu2 }
  0xa6   :  { %v262_v11 = vpop.f32.mrf.mxu0 }
  0xa7   :  { %v312_v13 = vadd.f32 %v311_v2, %v262_v11 }
  0xa9   :  { %v350_v15 = vadd.f32 %v312_v13, %v40_v10 }
  0xaa   :  { %v385_v16 = vld [vmem:[#allocation2] sm:$0xff] }
  0xab   :  { %v405_v17 = vmul.f32 %v824_v12, %v385_v16  ;;  %367 = vst.msk [vmem:[#allocation2 + $0x8] sm:$0xff] %vm22_vm3, %v350_v15  ;;  %v341_v15 = vpop.f32.mrf.mxu3 }
  0xac   :  { %v319_v18 = vpop.f32.mrf.mxu1  ;;  %v834_v21 = vpop.f32.mrf.mxu2 }
  0xad   :  { %v425_v20 = vadd.f32 %v829_v14, %v405_v17 }
  0xae   :  { %v265_v23 = vpop.f32.mrf.mxu0 }
  0xaf   :  { %v441_v24 = vmax.f32 %v425_v20, 0.0  ;;  %v315_v25 = vadd.f32 %v314_v3, %v265_v23 }
  0xb1   :  { %v457_v26 = vpack.c.bf16 %v441_v24, %v441_v24  ;;  %v351_v27 = vadd.f32 %v315_v25, %v41_v22  ;;  %v47_v22 = vld [vmem:[#allocation2 + $0x40] sm:$0xff] }
  0xb2   :  { %v386_v28 = vld [vmem:[#allocation2 + $0x8] sm:$0xff] }
  0xb3   :  { %474 = vst.msk [vmem:[%s953_s4] sm:$0xf] %vm473_vm4, %v457_v26  ;;  %v406_v29 = vmul.f32 %v824_v12, %v386_v28 }
  0xb4   :  { %v321_v30 = vpop.f32.mrf.mxu1  ;;  %368 = vst.msk [vmem:[#allocation2 + $0x10] sm:$0xff] %vm22_vm3, %v351_v27  ;;  %v285_v33 = vpop.f32.mrf.mxu2  ;;  %v52_v27 = vld [vmem:[#allocation2 + $0x68] sm:$0xff] }
  0xb5   :  { %v426_v31 = vadd.f32 %v829_v14, %v406_v29  ;;  %v335_v35 = vadd.f32 %v334_v19, %v285_v33 }
  0xb6   :  { %v267_v37 = vpop.f32.mrf.mxu0 }
  0xb7   :  { %v442_v38 = vmax.f32 %v426_v31, 0.0  ;;  %v317_v39 = vadd.f32 %v316_v8, %v267_v37  ;;  %v359_v40 = vadd.f32 %v335_v35, %v49_v32  ;;  %v45_v32 = vld [vmem:[#allocation2 + $0x30] sm:$0xff] }
  0xb9   :  { %v458_v41 = vpack.c.bf16 %v442_v38, %v442_v38  ;;  %v352_v42 = vadd.f32 %v317_v39, %v42_v36  ;;  %376 = vst.msk [vmem:[#allocation2 + $0x50] sm:$0xff] %vm22_vm3, %v359_v40 }
  0xbb   :  { %475 = vst.msk [vmem:[%s953_s4 + $0x4] sm:$0xf] %vm473_vm4, %v458_v41  ;;  %v387_v43 = vld [vmem:[#allocation2 + $0x10] sm:$0xff]  ;;  %v344_v41 = vpop.f32.mrf.mxu3 }
  0xbc   :  { %v324_v44 = vpop.f32.mrf.mxu1  ;;  %v407_v45 = vmul.f32 %v824_v12, %v387_v43  ;;  %369 = vst.msk [vmem:[#allocation2 + $0x18] sm:$0xff] %vm22_vm3, %v352_v42  ;;  %v287_v47 = vpop.f32.mrf.mxu2  ;;  %v48_v42 = vld [vmem:[#allocation2 + $0x48] sm:$0xff] }
  0xbd   :  { %v337_v49 = vadd.f32 %v336_v34, %v287_v47 }
  0xbe   :  { %v427_v48 = vadd.f32 %v829_v14, %v407_v45  ;;  %v270_v51 = vpop.f32.mrf.mxu0 }
  0xbf   :  { %v320_v53 = vadd.f32 %v319_v18, %v270_v51  ;;  %v360_v55 = vadd.f32 %v337_v49, %v50_v46 }
  0xc0   :  { %v443_v54 = vmax.f32 %v427_v48, 0.0  ;;  %v395_v56 = vld [vmem:[#allocation2 + $0x50] sm:$0xff] }
  0xc1   :  { %v353_v57 = vadd.f32 %v320_v53, %v43_v50  ;;  %v415_v59 = vmul.f32 %v824_v12, %v395_v56  ;;  %377 = vst.msk [vmem:[#allocation2 + $0x58] sm:$0xff] %vm22_vm3, %v360_v55  ;;  %v53_v48 = vld [vmem:[#allocation2 + $0x70] sm:$0xff] }
  0xc2   :  { %v459_v58 = vpack.c.bf16 %v443_v54, %v443_v54 }
  0xc3   :  { %v388_v60 = vld [vmem:[#allocation2 + $0x18] sm:$0xff]  ;;  %370 = vst.msk [vmem:[#allocation2 + $0x20] sm:$0xff] %vm22_vm3, %v353_v57  ;;  %v435_v62 = vadd.f32 %v829_v14, %v415_v59 }
  0xc4   :  { %v854_v61 = vpop.f32.mrf.mxu1  ;;  %476 = vst.msk [vmem:[%s953_s4 + $0x8] sm:$0xf] %vm473_vm4, %v459_v58  ;;  %v408_v63 = vmul.f32 %v824_v12, %v388_v60  ;;  %v290_v1 = vpop.f32.mrf.mxu2 }
  0xc5   :  { %v451_v2 = vmax.f32 %v435_v62, 0.0  ;;  %v340_v4 = vadd.f32 %v339_v52, %v290_v1  ;;  %v46_v52 = vld [vmem:[#allocation2 + $0x38] sm:$0xff] }
  0xc6   :  { %v428_v3 = vadd.f32 %v829_v14, %v408_v63  ;;  %v272_v6 = vpop.f32.mrf.mxu0 }
  0xc7   :  { %v322_v7 = vadd.f32 %v321_v30, %v272_v6  ;;  %v467_v8 = vpack.c.bf16 %v451_v2, %v451_v2  ;;  %v361_v11 = vadd.f32 %v340_v4, %v51_v0  ;;  %v54_v6 = vld [vmem:[#allocation2 + $0x78] sm:$0xff] }
  0xc8   :  { %v444_v10 = vmax.f32 %v428_v3, 0.0  ;;  %v396_v13 = vld [vmem:[#allocation2 + $0x58] sm:$0xff] }
  0xc9   :  { %v354_v16 = vadd.f32 %v322_v7, %v44_v5  ;;  %484 = vst.msk [vmem:[%s953_s4 + $0x28] sm:$0xf] %vm473_vm4, %v467_v8  ;;  %v416_v18 = vmul.f32 %v824_v12, %v396_v13  ;;  %v346_v5 = vpop.f32.mrf.mxu3 }
  0xca   :  { %v460_v17 = vpack.c.bf16 %v444_v10, %v444_v10  ;;  %v389_v19 = vld [vmem:[#allocation2 + $0x20] sm:$0xff]  ;;  %378 = vst.msk [vmem:[#allocation2 + $0x60] sm:$0xff] %vm22_vm3, %v361_v11 }
  0xcb   :  { %v409_v20 = vmul.f32 %v824_v12, %v389_v19  ;;  %v436_v24 = vadd.f32 %v829_v14, %v416_v18  ;;  %371 = vst.msk [vmem:[#allocation2 + $0x28] sm:$0xff] %vm22_vm3, %v354_v16 }
  0xcc   :  { %v329_v23 = vpop.f32.mrf.mxu1  ;;  %477 = vst.msk [vmem:[%s953_s4 + $0xc] sm:$0xf] %vm473_vm4, %v460_v17  ;;  %v292_v28 = vpop.f32.mrf.mxu2 }
  0xcd   :  { %v330_v25 = vadd.f32 %v329_v23, %v819_v9  ;;  %v429_v26 = vadd.f32 %v829_v14, %v409_v20  ;;  %v452_v29 = vmax.f32 %v436_v24, 0.0  ;;  %v342_v31 = vadd.f32 %v341_v15, %v292_v28 }
  0xce   :  { %v275_v33 = vpop.f32.mrf.mxu0 }
  0xcf   :  { %v357_v30 = vadd.f32 %v330_v25, %v47_v22  ;;  %v445_v34 = vmax.f32 %v429_v26, 0.0  ;;  %v325_v35 = vadd.f32 %v324_v44, %v275_v33  ;;  %v468_v36 = vpack.c.bf16 %v452_v29, %v452_v29 }
  0xd0   :  { %v362_v37 = vadd.f32 %v342_v31, %v52_v27 }
  0xd1   :  { %374 = vst.msk [vmem:[#allocation2 + $0x40] sm:$0xff] %vm22_vm3, %v357_v30  ;;  %v461_v38 = vpack.c.bf16 %v445_v34, %v445_v34  ;;  %v355_v39 = vadd.f32 %v325_v35, %v45_v32  ;;  %v397_v9 = vld [vmem:[#allocation2 + $0x60] sm:$0xff] }
  0xd2   :  { %485 = vst.msk [vmem:[%s953_s4 + $0x2c] sm:$0xf] %vm473_vm4, %v468_v36  ;;  %v417_v40 = vmul.f32 %v824_v12, %v397_v9  ;;  %v390_v44 = vld [vmem:[#allocation2 + $0x28] sm:$0xff] }
  0xd3   :  { %478 = vst.msk [vmem:[%s953_s4 + $0x10] sm:$0xf] %vm473_vm4, %v461_v38  ;;  %v410_v47 = vmul.f32 %v824_v12, %v390_v44 }
  0xd4   :  { %v331_v43 = vpop.f32.mrf.mxu1  ;;  %379 = vst.msk [vmem:[#allocation2 + $0x68] sm:$0xff] %vm22_vm3, %v362_v37  ;;  %v437_v46 = vadd.f32 %v829_v14, %v417_v40  ;;  %v295_v49 = vpop.f32.mrf.mxu2 }
  0xd5   :  { %v332_v45 = vadd.f32 %v331_v43, %v834_v21  ;;  %372 = vst.msk [vmem:[#allocation2 + $0x30] sm:$0xff] %vm22_vm3, %v355_v39  ;;  %v345_v51 = vadd.f32 %v344_v41, %v295_v49  ;;  %v430_v55 = vadd.f32 %v829_v14, %v410_v47 }
  0xd6   :  { %v277_v53 = vpop.f32.mrf.mxu0  ;;  %v453_v54 = vmax.f32 %v437_v46, 0.0 }
  0xd7   :  { %v358_v50 = vadd.f32 %v332_v45, %v48_v42  ;;  %v327_v57 = vadd.f32 %v854_v61, %v277_v53  ;;  %v363_v58 = vadd.f32 %v345_v51, %v53_v48  ;;  %v446_v60 = vmax.f32 %v430_v55, 0.0 }
  0xd8   :  { %v393_v56 = vld [vmem:[#allocation2 + $0x40] sm:$0xff]  ;;  %v469_v59 = vpack.c.bf16 %v453_v54, %v453_v54 }
  0xd9   :  { %v413_v21 = vmul.f32 %v824_v12, %v393_v56  ;;  %375 = vst.msk [vmem:[#allocation2 + $0x48] sm:$0xff] %vm22_vm3, %v358_v50  ;;  %v356_v62 = vadd.f32 %v327_v57, %v46_v52  ;;  %v462_v0 = vpack.c.bf16 %v446_v60, %v446_v60 }
  0xda   :  { %380 = vst.msk [vmem:[#allocation2 + $0x70] sm:$0xff] %vm22_vm3, %v363_v58 }
  0xdb   :  { %v433_v63 = vadd.f32 %v829_v14, %v413_v21  ;;  %486 = vst.msk [vmem:[%s953_s4 + $0x30] sm:$0xf] %vm473_vm4, %v469_v59  ;;  %v398_v1 = vld [vmem:[#allocation2 + $0x68] sm:$0xff] }
  0xdc   :  { %v418_v2 = vmul.f32 %v824_v12, %v398_v1  ;;  %v391_v3 = vld [vmem:[#allocation2 + $0x30] sm:$0xff]  ;;  %373 = vst.msk [vmem:[#allocation2 + $0x38] sm:$0xff] %vm22_vm3, %v356_v62  ;;  %v297_v7 = vpop.f32.mrf.mxu2 }
  0xdd   :  { %v449_v61 = vmax.f32 %v433_v63, 0.0  ;;  %479 = vst.msk [vmem:[%s953_s4 + $0x14] sm:$0xf] %vm473_vm4, %v462_v0  ;;  %v411_v4 = vmul.f32 %v824_v12, %v391_v3  ;;  %v347_v11 = vadd.f32 %v346_v5, %v297_v7 }
  0xde   :  { %v438_v10 = vadd.f32 %v829_v14, %v418_v2 }
  0xdf   :  { %v465_v8 = vpack.c.bf16 %v449_v61, %v449_v61  ;;  %v431_v13 = vadd.f32 %v829_v14, %v411_v4  ;;  %v364_v18 = vadd.f32 %v347_v11, %v54_v6 }
  0xe0   :  { %v394_v15 = vld [vmem:[#allocation2 + $0x48] sm:$0xff]  ;;  %v454_v16 = vmax.f32 %v438_v10, 0.0 }
  0xe1   :  { %482 = vst.msk [vmem:[%s953_s4 + $0x20] sm:$0xf] %vm473_vm4, %v465_v8  ;;  %v414_v17 = vmul.f32 %v824_v12, %v394_v15  ;;  %v447_v19 = vmax.f32 %v431_v13, 0.0  ;;  %v399_v20 = vld [vmem:[#allocation2 + $0x70] sm:$0xff] }
  0xe2   :  { %v470_v22 = vpack.c.bf16 %v454_v16, %v454_v16  ;;  %v419_v24 = vmul.f32 %v824_v12, %v399_v20  ;;  %381 = vst.msk [vmem:[#allocation2 + $0x78] sm:$0xff] %vm22_vm3, %v364_v18 }
  0xe3   :  { %v434_v23 = vadd.f32 %v829_v14, %v414_v17  ;;  %v463_v25 = vpack.c.bf16 %v447_v19, %v447_v19  ;;  %v392_v26 = vld [vmem:[#allocation2 + $0x38] sm:$0xff] }
  0xe4   :  { %487 = vst.msk [vmem:[%s953_s4 + $0x34] sm:$0xf] %vm473_vm4, %v470_v22  ;;  %v439_v28 = vadd.f32 %v829_v14, %v419_v24  ;;  %v412_v29 = vmul.f32 %v824_v12, %v392_v26 }
  0xe5   :  { %v450_v27 = vmax.f32 %v434_v23, 0.0  ;;  %480 = vst.msk [vmem:[%s953_s4 + $0x18] sm:$0xf] %vm473_vm4, %v463_v25 }
  0xe6   :  { %v455_v31 = vmax.f32 %v439_v28, 0.0  ;;  %v432_v32 = vadd.f32 %v829_v14, %v412_v29 }
  0xe7   :  { %v466_v30 = vpack.c.bf16 %v450_v27, %v450_v27 }
  0xe8   :  { %v471_v33 = vpack.c.bf16 %v455_v31, %v455_v31  ;;  %v448_v34 = vmax.f32 %v432_v32, 0.0 }
  0xe9   :  { %483 = vst.msk [vmem:[%s953_s4 + $0x24] sm:$0xf] %vm473_vm4, %v466_v30  ;;  %v400_v35 = vld [vmem:[#allocation2 + $0x78] sm:$0xff] }
  0xea   :  { %488 = vst.msk [vmem:[%s953_s4 + $0x38] sm:$0xf] %vm473_vm4, %v471_v33  ;;  %v464_v36 = vpack.c.bf16 %v448_v34, %v448_v34  ;;  %v420_v37 = vmul.f32 %v824_v12, %v400_v35 }
  0xec   :  { %481 = vst.msk [vmem:[%s953_s4 + $0x1c] sm:$0xf] %vm473_vm4, %v464_v36  ;;  %v440_v38 = vadd.f32 %v829_v14, %v420_v37 }
  0xee   :  { %v456_v39 = vmax.f32 %v440_v38, 0.0 }
  0xf0   :  { %v472_v9 = vpack.c.bf16 %v456_v39, %v456_v39 }
  0xf2   :  { %489 = vst.msk [vmem:[%s953_s4 + $0x3c] sm:$0xf] %vm473_vm4, %v472_v9 }

// kernel: resnet18_forward.30
= control target key start
LH: loop header
LB: loop body
LE: loop exit
PB: predicated region body
PF: predicated region fallthrough
CT: control target
= control target key end

     0   :  { %vm22_vm0 = vcmask 523264   ;;  %vm522_vm1 = vcmask 519168   ;;  %s996_s1 = inlined_call_operand.vmem [shape: bf16[576,64], index: 1, kind: input, shape index: {}]   ;;  %s997_s0 = inlined_call_operand.vmem [shape: bf16[32,576], index: 0, kind: input, shape index: {}]   ;;  %s998_s2 = inlined_call_operand.vmem [shape: f32[1,64], index: 2, kind: input, shape index: {}]   ;;  %s999_s3 = inlined_call_operand.vmem [shape: f32[1,64], index: 3, kind: input, shape index: {}]   ;;  %s1000_s4 = inlined_call_operand.vmem [shape: bf16[32,64], index: 4, kind: output, shape index: {}]  }
   0x1   :  { %v734_v0 = vld [vmem:[%s996_s1 + $0x38] sm:$0xff]  ;;  %v733_v4 = vld [vmem:[%s996_s1 + $0x30] sm:$0xff]  ;;  %v732_v8 = vld [vmem:[%s996_s1 + $0x28] sm:$0xff] }
   0x2   :  { %v742_v1 = vld [vmem:[%s996_s1 + $0x78] sm:$0xff]  ;;  %388 = vmatpush.bf16.msra.mxu0 %v734_v0  ;;  %v741_v5 = vld [vmem:[%s996_s1 + $0x70] sm:$0xff]  ;;  %v740_v9 = vld [vmem:[%s996_s1 + $0x68] sm:$0xff] }
   0x3   :  { %v750_v2 = vld [vmem:[%s996_s1 + $0xb8] sm:$0xff]  ;;  %407 = vmatpush.bf16.msra.mxu1 %v742_v1  ;;  %v749_v6 = vld [vmem:[%s996_s1 + $0xb0] sm:$0xff]  ;;  %v748_v10 = vld [vmem:[%s996_s1 + $0xa8] sm:$0xff] }
   0x4   :  { %v758_v3 = vld [vmem:[%s996_s1 + $0xf8] sm:$0xff]  ;;  %426 = vmatpush.bf16.msra.mxu2 %v750_v2  ;;  %v757_v7 = vld [vmem:[%s996_s1 + $0xf0] sm:$0xff]  ;;  %v756_v11 = vld [vmem:[%s996_s1 + $0xe8] sm:$0xff]  ;;  %v770_v2 = vmov 0.0  }
   0x5   :  { %445 = vmatpush.bf16.msra.mxu3 %v758_v3  ;;  %v731_v12 = vld [vmem:[%s996_s1 + $0x20] sm:$0xff]  ;;  %v730_v16 = vld [vmem:[%s996_s1 + $0x18] sm:$0xff]  ;;  %v729_v20 = vld [vmem:[%s996_s1 + $0x10] sm:$0xff]  ;;  %23 = vst.msk [vmem:[#allocation2] sm:$0xff] %vm22_vm0, %v770_v2 }
   0x6   :  { %389 = vmatpush.bf16.msra.mxu0 %v733_v4  ;;  %v739_v13 = vld [vmem:[%s996_s1 + $0x60] sm:$0xff]  ;;  %v738_v17 = vld [vmem:[%s996_s1 + $0x58] sm:$0xff]  ;;  %v737_v21 = vld [vmem:[%s996_s1 + $0x50] sm:$0xff]  ;;  %24 = vst.msk [vmem:[#allocation2 + $0x8] sm:$0xff] %vm22_vm0, %v770_v2 }
   0x7   :  { %408 = vmatpush.bf16.msra.mxu1 %v741_v5  ;;  %v747_v14 = vld [vmem:[%s996_s1 + $0xa0] sm:$0xff]  ;;  %v746_v18 = vld [vmem:[%s996_s1 + $0x98] sm:$0xff]  ;;  %v745_v22 = vld [vmem:[%s996_s1 + $0x90] sm:$0xff]  ;;  %25 = vst.msk [vmem:[#allocation2 + $0x10] sm:$0xff] %vm22_vm0, %v770_v2 }
   0x8   :  { %427 = vmatpush.bf16.msra.mxu2 %v749_v6  ;;  %v755_v15 = vld [vmem:[%s996_s1 + $0xe0] sm:$0xff]  ;;  %v754_v19 = vld [vmem:[%s996_s1 + $0xd8] sm:$0xff]  ;;  %v753_v23 = vld [vmem:[%s996_s1 + $0xd0] sm:$0xff]  ;;  %26 = vst.msk [vmem:[#allocation2 + $0x18] sm:$0xff] %vm22_vm0, %v770_v2 }
   0x9   :  { %446 = vmatpush.bf16.msra.mxu3 %v757_v7  ;;  %v728_v24 = vld [vmem:[%s996_s1 + $0x8] sm:$0xff]  ;;  %v727_v28 = vld [vmem:[%s996_s1] sm:$0xff]  ;;  %v719_v33 = vld [vmem:[%s997_s0 + $0x10] sm:$0xf0] }
   0xa   :  { %390 = vmatpush.bf16.msra.mxu0 %v732_v8  ;;  %v736_v25 = vld [vmem:[%s996_s1 + $0x48] sm:$0xff]  ;;  %v735_v29 = vld [vmem:[%s996_s1 + $0x40] sm:$0xff]  ;;  %v535_v35 = vld [vmem:[%s997_s0 + $0x14] sm:$0xf0] }
   0xb   :  { %409 = vmatpush.bf16.msra.mxu1 %v740_v9  ;;  %v744_v26 = vld [vmem:[%s996_s1 + $0x88] sm:$0xff]  ;;  %v743_v30 = vld [vmem:[%s996_s1 + $0x80] sm:$0xff]  ;;  %v720_v37 = vld [vmem:[%s997_s0 + $0x18] sm:$0xf0] }
   0xc   :  { %428 = vmatpush.bf16.msra.mxu2 %v748_v10  ;;  %v752_v27 = vld [vmem:[%s996_s1 + $0xc8] sm:$0xff]  ;;  %v751_v31 = vld [vmem:[%s996_s1 + $0xc0] sm:$0xff]  ;;  %v762_v40 = vld [vmem:[%s996_s1 + $0x118] sm:$0xff] }
   0xd   :  { %447 = vmatpush.bf16.msra.mxu3 %v756_v11  ;;  %v533_v32 = vld [vmem:[%s997_s0] sm:$0xf]  ;;  %v717_v34 = vld [vmem:[%s997_s0 + $0x4] sm:$0xf]  ;;  %v541_v36 = vld [vmem:[%s997_s0 + $0x8] sm:$0xf] }
   0xe   :  { %391 = vmatpush.bf16.msra.mxu0 %v731_v12  ;;  %v718_v38 = vld [vmem:[%s997_s0 + $0xc] sm:$0xf]  ;;  %v543_v39 = vld [vmem:[%s997_s0 + $0x1c] sm:$0xf0]  ;;  %v534_v41 = vor.u32 %v719_v33, %v533_v32  ;;  %v538_v42 = vor.u32 %v717_v34, %v535_v35  ;;  %v542_v43 = vor.u32 %v720_v37, %v541_v36  ;;  %v761_v45 = vld [vmem:[%s996_s1 + $0x110] sm:$0xff] }
   0xf   :  { %410 = vmatpush.bf16.msra.mxu1 %v739_v13  ;;  %v546_v44 = vor.u32 %v718_v38, %v543_v39  ;;  %v760_v46 = vld [vmem:[%s996_s1 + $0x108] sm:$0xff]  ;;  %v759_v47 = vld [vmem:[%s996_s1 + $0x100] sm:$0xff]  ;;  %v724_v49 = vld [vmem:[%s997_s0 + $0x38] sm:$0xf0] }
  0x10   :  { %429 = vmatpush.bf16.msra.mxu2 %v747_v14  ;;  %v553_v48 = vld [vmem:[%s997_s0 + $0x28] sm:$0xf]  ;;  %v722_v50 = vld [vmem:[%s997_s0 + $0x2c] sm:$0xf]  ;;  %v555_v51 = vld [vmem:[%s997_s0 + $0x3c] sm:$0xf0] }
  0x11   :  { %448 = vmatpush.bf16.msra.mxu3 %v755_v15  ;;  %v561_v52 = vld [vmem:[%s997_s0 + $0x30] sm:$0xf]  ;;  %v725_v53 = vld [vmem:[%s997_s0 + $0x40] sm:$0xf0]  ;;  %v723_v54 = vld [vmem:[%s997_s0 + $0x34] sm:$0xf]  ;;  %v554_v56 = vor.u32 %v724_v49, %v553_v48  ;;  %v558_v57 = vor.u32 %v722_v50, %v555_v51 }
  0x12   :  { %392 = vmatpush.bf16.msra.mxu0 %v730_v16  ;;  %v563_v55 = vld [vmem:[%s997_s0 + $0x44] sm:$0xf0]  ;;  %v562_v58 = vor.u32 %v725_v53, %v561_v52  ;;  %v549_v60 = vld [vmem:[%s997_s0 + $0x10] sm:$0xf]  ;;  %v721_v61 = vld [vmem:[%s997_s0 + $0x20] sm:$0xf0] }
  0x13   :  { %411 = vmatpush.bf16.msra.mxu1 %v738_v17  ;;  %v566_v59 = vor.u32 %v723_v54, %v563_v55  ;;  %v569_v62 = vld [vmem:[%s997_s0 + $0x38] sm:$0xf]  ;;  %v726_v63 = vld [vmem:[%s997_s0 + $0x48] sm:$0xf0]  ;;  %v550_v0 = vor.u32 %v721_v61, %v549_v60 }
  0x14   :  { %430 = vmatpush.bf16.msra.mxu2 %v746_v18  ;;  %v570_v1 = vor.u32 %v726_v63, %v569_v62  ;;  %v28_v39 = vld [vmem:[#allocation2 + $0x8] sm:$0xff] }
  0x15   :  { %449 = vmatpush.bf16.msra.mxu3 %v754_v19 }
  0x16   :  { %393 = vmatpush.bf16.msra.mxu0 %v729_v20 }
  0x17   :  { %412 = vmatpush.bf16.msra.mxu1 %v737_v21 }
  0x18   :  { %431 = vmatpush.bf16.msra.mxu2 %v745_v22 }
  0x19   :  { %450 = vmatpush.bf16.msra.mxu3 %v753_v23 }
  0x1a   :  { %394 = vmatpush.bf16.msra.mxu0 %v728_v24  ;;  %v27_v24 = vld [vmem:[#allocation2] sm:$0xff] }
  0x1b   :  { %413 = vmatpush.bf16.msra.mxu1 %v736_v25 }
  0x1c   :  { %432 = vmatpush.bf16.msra.mxu2 %v744_v26  ;;  %v29_v26 = vld [vmem:[#allocation2 + $0x10] sm:$0xff] }
  0x1d   :  { %451 = vmatpush.bf16.msra.mxu3 %v752_v27 }
  0x1e   :  { %395 = vmatpush.bf16.msra.mxu0 %v727_v28 }
  0x1f   :  { %414 = vmatpush.bf16.msra.mxu1 %v735_v29 }
  0x20   :  { %433 = vmatpush.bf16.msra.mxu2 %v743_v30 }
  0x21   :  { %452 = vmatpush.bf16.msra.mxu3 %v751_v31  ;;  %396 = vmatmul.bf16.vlgmr.msra.gmra.mxu0 %v534_v41  ;;  %v30_v41 = vld [vmem:[#allocation2 + $0x18] sm:$0xff] }
  0x22   :  { %468 = vmatpush.bf16.msrb.mxu0 %v762_v40  ;;  %415 = vmatmul.bf16.vlgmr.msra.gmra.mxu1 %v538_v42 }
  0x23   :  { %763 = vmatpush.bf16.msrb.mxu1 %v762_v40  ;;  %434 = vmatmul.bf16.vlgmr.msra.gmra.mxu2 %v542_v43  ;;  %v768_v43 = vld [vmem:[%s998_s2] ss:$0 sm:$0xff] }
  0x24   :  { %453 = vmatmul.bf16.vlgmr.msra.gmra.mxu3 %v546_v44 }
  0x26   :  { %469 = vmatpush.bf16.msrb.mxu0 %v761_v45 }
  0x27   :  { %764 = vmatpush.bf16.msrb.mxu1 %v761_v45 }
  0x2a   :  { %470 = vmatpush.bf16.msrb.mxu0 %v760_v46 }
  0x2b   :  { %765 = vmatpush.bf16.msrb.mxu1 %v760_v46  ;;  %v769_v46 = vld [vmem:[%s999_s3] ss:$0 sm:$0xff] }
  0x2e   :  { %471 = vmatpush.bf16.msrb.mxu0 %v759_v47 }
  0x2f   :  { %766 = vmatpush.bf16.msrb.mxu1 %v759_v47 }
  0x31   :  { %401 = vmatmul.bf16.gmra.mxu0 %v554_v56 }
  0x32   :  { %420 = vmatmul.bf16.gmra.mxu1 %v558_v57 }
  0x33   :  { %439 = vmatmul.bf16.gmra.mxu2 %v562_v58 }
  0x34   :  { %458 = vmatmul.bf16.gmra.mxu3 %v566_v59 }
  0x41   :  { %715 = vmatmul.msk.bf16.vlgmr.msrb.gmra.mxu0 %vm22_vm0, %v550_v0 }
  0x42   :  { %716 = vmatmul.msk.bf16.vlgmr.msrb.gmra.mxu1 %vm22_vm0, %v570_v1 }
  0x9e   :  { %v397_v3 = vpop.f32.mrf.mxu0 }
  0x9f   :  { %v416_v4 = vpop.f32.mrf.mxu1 }
  0xa0   :  { %v417_v16 = vadd.f32 %v416_v4, %v397_v3 }
  0xa6   :  { %v435_v5 = vpop.f32.mrf.mxu2  ;;  %v399_v7 = vpop.f32.mrf.mxu0 }
  0xa7   :  { %v454_v6 = vpop.f32.mrf.mxu3  ;;  %v418_v8 = vpop.f32.mrf.mxu1  ;;  %v436_v18 = vadd.f32 %v435_v5, %v417_v16 }
  0xa8   :  { %v419_v28 = vadd.f32 %v418_v8, %v399_v7 }
  0xa9   :  { %v455_v21 = vadd.f32 %v454_v6, %v436_v18 }
  0xae   :  { %v437_v9 = vpop.f32.mrf.mxu2  ;;  %v402_v10 = vpop.f32.mrf.mxu0 }
  0xaf   :  { %v421_v11 = vpop.f32.mrf.mxu1  ;;  %v456_v12 = vpop.f32.mrf.mxu3  ;;  %v438_v32 = vadd.f32 %v437_v9, %v419_v28 }
  0xb0   :  { %v422_v17 = vadd.f32 %v421_v11, %v402_v10 }
  0xb1   :  { %v457_v37 = vadd.f32 %v456_v12, %v438_v32 }
  0xb6   :  { %v440_v13 = vpop.f32.mrf.mxu2  ;;  %v404_v14 = vpop.f32.mrf.mxu0 }
  0xb7   :  { %v423_v15 = vpop.f32.mrf.mxu1  ;;  %v441_v19 = vadd.f32 %v440_v13, %v422_v17  ;;  %v459_v20 = vpop.f32.mrf.mxu3 }
  0xb8   :  { %v424_v29 = vadd.f32 %v423_v15, %v404_v14 }
  0xb9   :  { %v460_v22 = vadd.f32 %v459_v20, %v441_v19 }
  0xbe   :  { %v442_v23 = vpop.f32.mrf.mxu2  ;;  %v473_v25 = vpop.f32.mrf.mxu0 }
  0xbf   :  { %v478_v27 = vpop.f32.mrf.mxu1  ;;  %v474_v30 = vadd.f32 %v473_v25, %v455_v21  ;;  %v443_v33 = vadd.f32 %v442_v23, %v424_v29  ;;  %v461_v36 = vpop.f32.mrf.mxu3 }
  0xc0   :  { %v479_v31 = vadd.f32 %v478_v27, %v460_v22 }
  0xc1   :  { %v483_v34 = vadd.f32 %v474_v30, %v27_v24  ;;  %v462_v38 = vadd.f32 %v461_v36, %v443_v33 }
  0xc2   :  { %v485_v35 = vadd.f32 %v479_v31, %v29_v26 }
  0xc3   :  { %487 = vst.msk [vmem:[#allocation2] sm:$0xff] %vm22_vm0, %v483_v34 }
  0xc4   :  { %489 = vst.msk [vmem:[#allocation2 + $0x10] sm:$0xff] %vm22_vm0, %v485_v35 }
  0xc6   :  { %v475_v40 = vpop.f32.mrf.mxu0 }
  0xc7   :  { %v480_v42 = vpop.f32.mrf.mxu1  ;;  %v476_v44 = vadd.f32 %v475_v40, %v457_v37 }
  0xc8   :  { %v481_v45 = vadd.f32 %v480_v42, %v462_v38 }
  0xc9   :  { %v484_v47 = vadd.f32 %v476_v44, %v28_v39 }
  0xca   :  { %v486_v48 = vadd.f32 %v481_v45, %v30_v41  ;;  %v494_v49 = vld [vmem:[#allocation2] sm:$0xff] }
  0xcb   :  { %v502_v50 = vmul.f32 %v768_v43, %v494_v49  ;;  %v496_v51 = vld [vmem:[#allocation2 + $0x10] sm:$0xff]  ;;  %488 = vst.msk [vmem:[#allocation2 + $0x8] sm:$0xff] %vm22_vm0, %v484_v47 }
  0xcc   :  { %v504_v52 = vmul.f32 %v768_v43, %v496_v51  ;;  %490 = vst.msk [vmem:[#allocation2 + $0x18] sm:$0xff] %vm22_vm0, %v486_v48 }
  0xcd   :  { %v510_v53 = vadd.f32 %v769_v46, %v502_v50 }
  0xce   :  { %v512_v54 = vadd.f32 %v769_v46, %v504_v52 }
  0xcf   :  { %v514_v55 = vmax.f32 %v510_v53, 0.0 }
  0xd0   :  { %v516_v56 = vmax.f32 %v512_v54, 0.0 }
  0xd1   :  { %v518_v57 = vpack.c.bf16 %v514_v55, %v514_v55 }
  0xd2   :  { %v520_v58 = vpack.c.bf16 %v516_v56, %v516_v56  ;;  %v495_v59 = vld [vmem:[#allocation2 + $0x8] sm:$0xff] }
  0xd3   :  { %523 = vst.msk [vmem:[%s1000_s4] sm:$0xf] %vm522_vm1, %v518_v57  ;;  %v503_v60 = vmul.f32 %v768_v43, %v495_v59  ;;  %v497_v61 = vld [vmem:[#allocation2 + $0x18] sm:$0xff] }
  0xd4   :  { %525 = vst.msk [vmem:[%s1000_s4 + $0x8] sm:$0xf] %vm522_vm1, %v520_v58  ;;  %v505_v62 = vmul.f32 %v768_v43, %v497_v61 }
  0xd5   :  { %v511_v63 = vadd.f32 %v769_v46, %v503_v60 }
  0xd6   :  { %v513_v0 = vadd.f32 %v769_v46, %v505_v62 }
  0xd7   :  { %v515_v1 = vmax.f32 %v511_v63, 0.0 }
  0xd8   :  { %v517_v2 = vmax.f32 %v513_v0, 0.0 }
  0xd9   :  { %v519_v3 = vpack.c.bf16 %v515_v1, %v515_v1 }
  0xda   :  { %v521_v4 = vpack.c.bf16 %v517_v2, %v517_v2 }
  0xdb   :  { %524 = vst.msk [vmem:[%s1000_s4 + $0x4] sm:$0xf] %vm522_vm1, %v519_v3 }
  0xdc   :  { %526 = vst.msk [vmem:[%s1000_s4 + $0xc] sm:$0xf] %vm522_vm1, %v521_v4 }

// kernel: resnet18_forward.31
= control target key start
LH: loop header
LB: loop body
LE: loop exit
PB: predicated region body
PF: predicated region fallthrough
CT: control target
= control target key end

     0   :  { %vm25_vm0 = vcmask 523264   ;;  %vm537_vm1 = vcmask 519168   ;;  %s1031_s1 = inlined_call_operand.vmem [shape: bf16[576,64], index: 1, kind: input, shape index: {}]   ;;  %s1032_s0 = inlined_call_operand.vmem [shape: bf16[32,576], index: 0, kind: input, shape index: {}]   ;;  %s1033_s2 = inlined_call_operand.vmem [shape: f32[1,64], index: 2, kind: input, shape index: {}]   ;;  %s1034_s3 = inlined_call_operand.vmem [shape: f32[1,64], index: 3, kind: input, shape index: {}]   ;;  %s1035_s4 = inlined_call_operand.vmem [shape: bf16[32,64], index: 4, kind: input, shape index: {}]   ;;  %s1036_s5 = inlined_call_operand.vmem [shape: bf16[32,64], index: 5, kind: output, shape index: {}]  }
   0x1   :  { %v749_v0 = vld [vmem:[%s1031_s1 + $0x38] sm:$0xff]  ;;  %v748_v4 = vld [vmem:[%s1031_s1 + $0x30] sm:$0xff]  ;;  %v747_v8 = vld [vmem:[%s1031_s1 + $0x28] sm:$0xff] }
   0x2   :  { %v757_v1 = vld [vmem:[%s1031_s1 + $0x78] sm:$0xff]  ;;  %391 = vmatpush.bf16.msra.mxu0 %v749_v0  ;;  %v756_v5 = vld [vmem:[%s1031_s1 + $0x70] sm:$0xff]  ;;  %v755_v9 = vld [vmem:[%s1031_s1 + $0x68] sm:$0xff] }
   0x3   :  { %v765_v2 = vld [vmem:[%s1031_s1 + $0xb8] sm:$0xff]  ;;  %410 = vmatpush.bf16.msra.mxu1 %v757_v1  ;;  %v764_v6 = vld [vmem:[%s1031_s1 + $0xb0] sm:$0xff]  ;;  %v763_v10 = vld [vmem:[%s1031_s1 + $0xa8] sm:$0xff] }
   0x4   :  { %v773_v3 = vld [vmem:[%s1031_s1 + $0xf8] sm:$0xff]  ;;  %429 = vmatpush.bf16.msra.mxu2 %v765_v2  ;;  %v772_v7 = vld [vmem:[%s1031_s1 + $0xf0] sm:$0xff]  ;;  %v771_v11 = vld [vmem:[%s1031_s1 + $0xe8] sm:$0xff]  ;;  %v794_v2 = vmov 0.0  }
   0x5   :  { %448 = vmatpush.bf16.msra.mxu3 %v773_v3  ;;  %v746_v12 = vld [vmem:[%s1031_s1 + $0x20] sm:$0xff]  ;;  %v745_v16 = vld [vmem:[%s1031_s1 + $0x18] sm:$0xff]  ;;  %v744_v20 = vld [vmem:[%s1031_s1 + $0x10] sm:$0xff]  ;;  %26 = vst.msk [vmem:[#allocation2] sm:$0xff] %vm25_vm0, %v794_v2 }
   0x6   :  { %392 = vmatpush.bf16.msra.mxu0 %v748_v4  ;;  %v754_v13 = vld [vmem:[%s1031_s1 + $0x60] sm:$0xff]  ;;  %v753_v17 = vld [vmem:[%s1031_s1 + $0x58] sm:$0xff]  ;;  %v752_v21 = vld [vmem:[%s1031_s1 + $0x50] sm:$0xff]  ;;  %27 = vst.msk [vmem:[#allocation2 + $0x8] sm:$0xff] %vm25_vm0, %v794_v2 }
   0x7   :  { %411 = vmatpush.bf16.msra.mxu1 %v756_v5  ;;  %v762_v14 = vld [vmem:[%s1031_s1 + $0xa0] sm:$0xff]  ;;  %v761_v18 = vld [vmem:[%s1031_s1 + $0x98] sm:$0xff]  ;;  %v760_v22 = vld [vmem:[%s1031_s1 + $0x90] sm:$0xff]  ;;  %28 = vst.msk [vmem:[#allocation2 + $0x10] sm:$0xff] %vm25_vm0, %v794_v2 }
   0x8   :  { %430 = vmatpush.bf16.msra.mxu2 %v764_v6  ;;  %v770_v15 = vld [vmem:[%s1031_s1 + $0xe0] sm:$0xff]  ;;  %v769_v19 = vld [vmem:[%s1031_s1 + $0xd8] sm:$0xff]  ;;  %v768_v23 = vld [vmem:[%s1031_s1 + $0xd0] sm:$0xff]  ;;  %29 = vst.msk [vmem:[#allocation2 + $0x18] sm:$0xff] %vm25_vm0, %v794_v2 }
   0x9   :  { %449 = vmatpush.bf16.msra.mxu3 %v772_v7  ;;  %v743_v24 = vld [vmem:[%s1031_s1 + $0x8] sm:$0xff]  ;;  %v742_v28 = vld [vmem:[%s1031_s1] sm:$0xff]  ;;  %v734_v33 = vld [vmem:[%s1032_s0 + $0x10] sm:$0xf0] }
   0xa   :  { %393 = vmatpush.bf16.msra.mxu0 %v747_v8  ;;  %v751_v25 = vld [vmem:[%s1031_s1 + $0x48] sm:$0xff]  ;;  %v750_v29 = vld [vmem:[%s1031_s1 + $0x40] sm:$0xff]  ;;  %v550_v35 = vld [vmem:[%s1032_s0 + $0x14] sm:$0xf0] }
   0xb   :  { %412 = vmatpush.bf16.msra.mxu1 %v755_v9  ;;  %v759_v26 = vld [vmem:[%s1031_s1 + $0x88] sm:$0xff]  ;;  %v758_v30 = vld [vmem:[%s1031_s1 + $0x80] sm:$0xff]  ;;  %v735_v37 = vld [vmem:[%s1032_s0 + $0x18] sm:$0xf0] }
   0xc   :  { %431 = vmatpush.bf16.msra.mxu2 %v763_v10  ;;  %v767_v27 = vld [vmem:[%s1031_s1 + $0xc8] sm:$0xff]  ;;  %v766_v31 = vld [vmem:[%s1031_s1 + $0xc0] sm:$0xff]  ;;  %v777_v40 = vld [vmem:[%s1031_s1 + $0x118] sm:$0xff] }
   0xd   :  { %450 = vmatpush.bf16.msra.mxu3 %v771_v11  ;;  %v548_v32 = vld [vmem:[%s1032_s0] sm:$0xf]  ;;  %v732_v34 = vld [vmem:[%s1032_s0 + $0x4] sm:$0xf]  ;;  %v556_v36 = vld [vmem:[%s1032_s0 + $0x8] sm:$0xf] }
   0xe   :  { %394 = vmatpush.bf16.msra.mxu0 %v746_v12  ;;  %v733_v38 = vld [vmem:[%s1032_s0 + $0xc] sm:$0xf]  ;;  %v558_v39 = vld [vmem:[%s1032_s0 + $0x1c] sm:$0xf0]  ;;  %v549_v41 = vor.u32 %v734_v33, %v548_v32  ;;  %v553_v42 = vor.u32 %v732_v34, %v550_v35  ;;  %v557_v43 = vor.u32 %v735_v37, %v556_v36  ;;  %v776_v45 = vld [vmem:[%s1031_s1 + $0x110] sm:$0xff] }
   0xf   :  { %413 = vmatpush.bf16.msra.mxu1 %v754_v13  ;;  %v561_v44 = vor.u32 %v733_v38, %v558_v39  ;;  %v775_v46 = vld [vmem:[%s1031_s1 + $0x108] sm:$0xff]  ;;  %v774_v47 = vld [vmem:[%s1031_s1 + $0x100] sm:$0xff]  ;;  %v739_v49 = vld [vmem:[%s1032_s0 + $0x38] sm:$0xf0] }
  0x10   :  { %432 = vmatpush.bf16.msra.mxu2 %v762_v14  ;;  %v568_v48 = vld [vmem:[%s1032_s0 + $0x28] sm:$0xf]  ;;  %v737_v50 = vld [vmem:[%s1032_s0 + $0x2c] sm:$0xf]  ;;  %v570_v51 = vld [vmem:[%s1032_s0 + $0x3c] sm:$0xf0] }
  0x11   :  { %451 = vmatpush.bf16.msra.mxu3 %v770_v15  ;;  %v576_v52 = vld [vmem:[%s1032_s0 + $0x30] sm:$0xf]  ;;  %v740_v53 = vld [vmem:[%s1032_s0 + $0x40] sm:$0xf0]  ;;  %v738_v54 = vld [vmem:[%s1032_s0 + $0x34] sm:$0xf]  ;;  %v569_v56 = vor.u32 %v739_v49, %v568_v48  ;;  %v573_v57 = vor.u32 %v737_v50, %v570_v51 }
  0x12   :  { %395 = vmatpush.bf16.msra.mxu0 %v745_v16  ;;  %v578_v55 = vld [vmem:[%s1032_s0 + $0x44] sm:$0xf0]  ;;  %v577_v58 = vor.u32 %v740_v53, %v576_v52  ;;  %v564_v60 = vld [vmem:[%s1032_s0 + $0x10] sm:$0xf]  ;;  %v736_v61 = vld [vmem:[%s1032_s0 + $0x20] sm:$0xf0] }
  0x13   :  { %414 = vmatpush.bf16.msra.mxu1 %v753_v17  ;;  %v581_v59 = vor.u32 %v738_v54, %v578_v55  ;;  %v584_v62 = vld [vmem:[%s1032_s0 + $0x38] sm:$0xf]  ;;  %v741_v63 = vld [vmem:[%s1032_s0 + $0x48] sm:$0xf0]  ;;  %v565_v0 = vor.u32 %v736_v61, %v564_v60 }
  0x14   :  { %433 = vmatpush.bf16.msra.mxu2 %v761_v18  ;;  %v585_v1 = vor.u32 %v741_v63, %v584_v62  ;;  %v31_v39 = vld [vmem:[#allocation2 + $0x8] sm:$0xff] }
  0x15   :  { %452 = vmatpush.bf16.msra.mxu3 %v769_v19  ;;  %v786_v48 = vld [vmem:[%s1035_s4 + $0x8] sm:$0xff]  }
  0x16   :  { %396 = vmatpush.bf16.msra.mxu0 %v744_v20 }
  0x17   :  { %415 = vmatpush.bf16.msra.mxu1 %v752_v21 }
  0x18   :  { %434 = vmatpush.bf16.msra.mxu2 %v760_v22 }
  0x19   :  { %453 = vmatpush.bf16.msra.mxu3 %v768_v23 }
  0x1a   :  { %397 = vmatpush.bf16.msra.mxu0 %v743_v24  ;;  %v30_v24 = vld [vmem:[#allocation2] sm:$0xff] }
  0x1b   :  { %416 = vmatpush.bf16.msra.mxu1 %v751_v25 }
  0x1c   :  { %435 = vmatpush.bf16.msra.mxu2 %v759_v26  ;;  %v32_v26 = vld [vmem:[#allocation2 + $0x10] sm:$0xff] }
  0x1d   :  { %454 = vmatpush.bf16.msra.mxu3 %v767_v27 }
  0x1e   :  { %398 = vmatpush.bf16.msra.mxu0 %v742_v28 }
  0x1f   :  { %417 = vmatpush.bf16.msra.mxu1 %v750_v29 }
  0x20   :  { %436 = vmatpush.bf16.msra.mxu2 %v758_v30 }
  0x21   :  { %455 = vmatpush.bf16.msra.mxu3 %v766_v31  ;;  %399 = vmatmul.bf16.vlgmr.msra.gmra.mxu0 %v549_v41  ;;  %v33_v41 = vld [vmem:[#allocation2 + $0x18] sm:$0xff] }
  0x22   :  { %471 = vmatpush.bf16.msrb.mxu0 %v777_v40  ;;  %418 = vmatmul.bf16.vlgmr.msra.gmra.mxu1 %v553_v42 }
  0x23   :  { %787 = vmatpush.bf16.msrb.mxu1 %v777_v40  ;;  %437 = vmatmul.bf16.vlgmr.msra.gmra.mxu2 %v557_v43  ;;  %v792_v43 = vld [vmem:[%s1033_s2] ss:$0 sm:$0xff] }
  0x24   :  { %456 = vmatmul.bf16.vlgmr.msra.gmra.mxu3 %v561_v44 }
  0x26   :  { %472 = vmatpush.bf16.msrb.mxu0 %v776_v45 }
  0x27   :  { %788 = vmatpush.bf16.msrb.mxu1 %v776_v45 }
  0x2a   :  { %473 = vmatpush.bf16.msrb.mxu0 %v775_v46 }
  0x2b   :  { %789 = vmatpush.bf16.msrb.mxu1 %v775_v46  ;;  %v779_v46 = vld [vmem:[%s1035_s4] sm:$0xff]  }
  0x2c   :  { %v780_v53 = vunpack.c.l.bf16 %v779_v46  ;;  %v781_v2 = vunpack.c.h.bf16 %v779_v46 }
  0x2e   :  { %474 = vmatpush.bf16.msrb.mxu0 %v774_v47 }
  0x2f   :  { %790 = vmatpush.bf16.msrb.mxu1 %v774_v47  ;;  %v793_v47 = vld [vmem:[%s1034_s3] ss:$0 sm:$0xff] }
  0x31   :  { %404 = vmatmul.bf16.gmra.mxu0 %v569_v56  ;;  %v784_v56 = vunpack.c.l.bf16 %v786_v48 }
  0x32   :  { %423 = vmatmul.bf16.gmra.mxu1 %v573_v57 }
  0x33   :  { %442 = vmatmul.bf16.gmra.mxu2 %v577_v58 }
  0x34   :  { %461 = vmatmul.bf16.gmra.mxu3 %v581_v59 }
  0x41   :  { %730 = vmatmul.msk.bf16.vlgmr.msrb.gmra.mxu0 %vm25_vm0, %v565_v0 }
  0x42   :  { %731 = vmatmul.msk.bf16.vlgmr.msrb.gmra.mxu1 %vm25_vm0, %v585_v1 }
  0x9e   :  { %v400_v3 = vpop.f32.mrf.mxu0 }
  0x9f   :  { %v419_v4 = vpop.f32.mrf.mxu1 }
  0xa0   :  { %v420_v16 = vadd.f32 %v419_v4, %v400_v3 }
  0xa6   :  { %v438_v5 = vpop.f32.mrf.mxu2  ;;  %v402_v7 = vpop.f32.mrf.mxu0 }
  0xa7   :  { %v457_v6 = vpop.f32.mrf.mxu3  ;;  %v421_v8 = vpop.f32.mrf.mxu1  ;;  %v439_v18 = vadd.f32 %v438_v5, %v420_v16 }
  0xa8   :  { %v422_v28 = vadd.f32 %v421_v8, %v402_v7 }
  0xa9   :  { %v458_v21 = vadd.f32 %v457_v6, %v439_v18  ;;  %v785_v6 = vunpack.c.h.bf16 %v786_v48 }
  0xae   :  { %v440_v9 = vpop.f32.mrf.mxu2  ;;  %v405_v10 = vpop.f32.mrf.mxu0 }
  0xaf   :  { %v424_v11 = vpop.f32.mrf.mxu1  ;;  %v459_v12 = vpop.f32.mrf.mxu3  ;;  %v441_v32 = vadd.f32 %v440_v9, %v422_v28 }
  0xb0   :  { %v425_v17 = vadd.f32 %v424_v11, %v405_v10 }
  0xb1   :  { %v460_v37 = vadd.f32 %v459_v12, %v441_v32 }
  0xb6   :  { %v443_v13 = vpop.f32.mrf.mxu2  ;;  %v407_v14 = vpop.f32.mrf.mxu0 }
  0xb7   :  { %v426_v15 = vpop.f32.mrf.mxu1  ;;  %v444_v19 = vadd.f32 %v443_v13, %v425_v17  ;;  %v462_v20 = vpop.f32.mrf.mxu3 }
  0xb8   :  { %v427_v29 = vadd.f32 %v426_v15, %v407_v14 }
  0xb9   :  { %v463_v22 = vadd.f32 %v462_v20, %v444_v19 }
  0xbe   :  { %v445_v23 = vpop.f32.mrf.mxu2  ;;  %v476_v25 = vpop.f32.mrf.mxu0 }
  0xbf   :  { %v481_v27 = vpop.f32.mrf.mxu1  ;;  %v477_v30 = vadd.f32 %v476_v25, %v458_v21  ;;  %v446_v33 = vadd.f32 %v445_v23, %v427_v29  ;;  %v464_v36 = vpop.f32.mrf.mxu3 }
  0xc0   :  { %v482_v31 = vadd.f32 %v481_v27, %v463_v22 }
  0xc1   :  { %v486_v34 = vadd.f32 %v477_v30, %v30_v24  ;;  %v465_v38 = vadd.f32 %v464_v36, %v446_v33 }
  0xc2   :  { %v488_v35 = vadd.f32 %v482_v31, %v32_v26 }
  0xc3   :  { %490 = vst.msk [vmem:[#allocation2] sm:$0xff] %vm25_vm0, %v486_v34 }
  0xc4   :  { %492 = vst.msk [vmem:[#allocation2 + $0x10] sm:$0xff] %vm25_vm0, %v488_v35 }
  0xc6   :  { %v478_v40 = vpop.f32.mrf.mxu0 }
  0xc7   :  { %v483_v42 = vpop.f32.mrf.mxu1  ;;  %v479_v44 = vadd.f32 %v478_v40, %v460_v37 }
  0xc8   :  { %v484_v45 = vadd.f32 %v483_v42, %v465_v38 }
  0xc9   :  { %v487_v49 = vadd.f32 %v479_v44, %v31_v39 }
  0xca   :  { %v489_v50 = vadd.f32 %v484_v45, %v33_v41  ;;  %v497_v51 = vld [vmem:[#allocation2] sm:$0xff] }
  0xcb   :  { %v505_v52 = vmul.f32 %v792_v43, %v497_v51  ;;  %v499_v54 = vld [vmem:[#allocation2 + $0x10] sm:$0xff]  ;;  %491 = vst.msk [vmem:[#allocation2 + $0x8] sm:$0xff] %vm25_vm0, %v487_v49 }
  0xcc   :  { %v507_v55 = vmul.f32 %v792_v43, %v499_v54  ;;  %493 = vst.msk [vmem:[#allocation2 + $0x18] sm:$0xff] %vm25_vm0, %v489_v50 }
  0xcd   :  { %v513_v57 = vadd.f32 %v793_v47, %v505_v52 }
  0xce   :  { %v515_v58 = vadd.f32 %v793_v47, %v507_v55 }
  0xcf   :  { %v525_v59 = vadd.f32 %v780_v53, %v513_v57 }
  0xd0   :  { %v527_v60 = vadd.f32 %v784_v56, %v515_v58 }
  0xd1   :  { %v529_v61 = vmax.f32 %v525_v59, 0.0 }
  0xd2   :  { %v531_v62 = vmax.f32 %v527_v60, 0.0  ;;  %v498_v63 = vld [vmem:[#allocation2 + $0x8] sm:$0xff] }
  0xd3   :  { %v533_v0 = vpack.c.bf16 %v529_v61, %v529_v61  ;;  %v506_v1 = vmul.f32 %v792_v43, %v498_v63  ;;  %v500_v3 = vld [vmem:[#allocation2 + $0x18] sm:$0xff] }
  0xd4   :  { %v535_v4 = vpack.c.bf16 %v531_v62, %v531_v62  ;;  %v508_v5 = vmul.f32 %v792_v43, %v500_v3 }
  0xd5   :  { %538 = vst.msk [vmem:[%s1036_s5] sm:$0xf] %vm537_vm1, %v533_v0  ;;  %v514_v7 = vadd.f32 %v793_v47, %v506_v1 }
  0xd6   :  { %540 = vst.msk [vmem:[%s1036_s5 + $0x8] sm:$0xf] %vm537_vm1, %v535_v4  ;;  %v516_v8 = vadd.f32 %v793_v47, %v508_v5 }
  0xd7   :  { %v526_v9 = vadd.f32 %v781_v2, %v514_v7 }
  0xd8   :  { %v528_v10 = vadd.f32 %v785_v6, %v516_v8 }
  0xd9   :  { %v530_v11 = vmax.f32 %v526_v9, 0.0 }
  0xda   :  { %v532_v12 = vmax.f32 %v528_v10, 0.0 }
  0xdb   :  { %v534_v13 = vpack.c.bf16 %v530_v11, %v530_v11 }
  0xdc   :  { %v536_v14 = vpack.c.bf16 %v532_v12, %v532_v12 }
  0xdd   :  { %539 = vst.msk [vmem:[%s1036_s5 + $0x4] sm:$0xf] %vm537_vm1, %v534_v13 }
  0xde   :  { %541 = vst.msk [vmem:[%s1036_s5 + $0xc] sm:$0xf] %vm537_vm1, %v536_v14 }

// kernel: resnet18_forward.35
= control target key start
LH: loop header
LB: loop body
LE: loop exit
PB: predicated region body
PF: predicated region fallthrough
CT: control target
= control target key end

     0   :  { %vm332_vm0 = vcmask 523264   ;;  %s758_s1 = inlined_call_operand.vmem [shape: bf16[576,128], index: 1, kind: input, shape index: {}]   ;;  %s759_s0 = inlined_call_operand.vmem [shape: bf16[8,576], index: 0, kind: input, shape index: {}]   ;;  %s760_s2 = inlined_call_operand.vmem [shape: f32[1,128], index: 2, kind: input, shape index: {}]   ;;  %s761_s3 = inlined_call_operand.vmem [shape: f32[1,128], index: 3, kind: input, shape index: {}]   ;;  %s762_s4 = inlined_call_operand.vmem [shape: bf16[8,128], index: 4, kind: output, shape index: {}]  }
   0x1   :  { %v576_v0 = vld [vmem:[%s758_s1 + $0x38] sm:$0xff]  ;;  %v575_v4 = vld [vmem:[%s758_s1 + $0x30] sm:$0xff]  ;;  %v574_v8 = vld [vmem:[%s758_s1 + $0x28] sm:$0xff] }
   0x2   :  { %v584_v1 = vld [vmem:[%s758_s1 + $0x78] sm:$0xff]  ;;  %336 = vmatpush.bf16.msra.mxu0 %v576_v0  ;;  %v583_v5 = vld [vmem:[%s758_s1 + $0x70] sm:$0xff]  ;;  %v582_v9 = vld [vmem:[%s758_s1 + $0x68] sm:$0xff] }
   0x3   :  { %v592_v2 = vld [vmem:[%s758_s1 + $0xb8] sm:$0xff]  ;;  %349 = vmatpush.bf16.msra.mxu1 %v584_v1  ;;  %v591_v6 = vld [vmem:[%s758_s1 + $0xb0] sm:$0xff]  ;;  %v590_v10 = vld [vmem:[%s758_s1 + $0xa8] sm:$0xff] }
   0x4   :  { %v600_v3 = vld [vmem:[%s758_s1 + $0xf8] sm:$0xff]  ;;  %362 = vmatpush.bf16.msra.mxu2 %v592_v2  ;;  %v599_v7 = vld [vmem:[%s758_s1 + $0xf0] sm:$0xff]  ;;  %v598_v11 = vld [vmem:[%s758_s1 + $0xe8] sm:$0xff] }
   0x5   :  { %375 = vmatpush.bf16.msra.mxu3 %v600_v3  ;;  %v573_v12 = vld [vmem:[%s758_s1 + $0x20] sm:$0xff]  ;;  %v572_v16 = vld [vmem:[%s758_s1 + $0x18] sm:$0xff]  ;;  %v571_v20 = vld [vmem:[%s758_s1 + $0x10] sm:$0xff] }
   0x6   :  { %337 = vmatpush.bf16.msra.mxu0 %v575_v4  ;;  %v581_v13 = vld [vmem:[%s758_s1 + $0x60] sm:$0xff]  ;;  %v580_v17 = vld [vmem:[%s758_s1 + $0x58] sm:$0xff]  ;;  %v579_v21 = vld [vmem:[%s758_s1 + $0x50] sm:$0xff] }
   0x7   :  { %350 = vmatpush.bf16.msra.mxu1 %v583_v5  ;;  %v589_v14 = vld [vmem:[%s758_s1 + $0xa0] sm:$0xff]  ;;  %v588_v18 = vld [vmem:[%s758_s1 + $0x98] sm:$0xff]  ;;  %v587_v22 = vld [vmem:[%s758_s1 + $0x90] sm:$0xff] }
   0x8   :  { %363 = vmatpush.bf16.msra.mxu2 %v591_v6  ;;  %v597_v15 = vld [vmem:[%s758_s1 + $0xe0] sm:$0xff]  ;;  %v596_v19 = vld [vmem:[%s758_s1 + $0xd8] sm:$0xff]  ;;  %v595_v23 = vld [vmem:[%s758_s1 + $0xd0] sm:$0xff] }
   0x9   :  { %376 = vmatpush.bf16.msra.mxu3 %v599_v7  ;;  %v570_v24 = vld [vmem:[%s758_s1 + $0x8] sm:$0xff]  ;;  %v24_v26 = vld [vmem:[%s759_s0] sm:$0xff]  ;;  %v604_v38 = vld [vmem:[%s758_s1 + $0x118] sm:$0xff] }
   0xa   :  { %338 = vmatpush.bf16.msra.mxu0 %v574_v8  ;;  %v578_v25 = vld [vmem:[%s758_s1 + $0x48] sm:$0xff]  ;;  %v102_v30 = vunpack.c.l.b16 %v24_v26  ;;  %v103_v31 = vunpack.c.h.b16 %v24_v26  ;;  %v569_v32 = vld [vmem:[%s758_s1] sm:$0xff]  ;;  %v603_v43 = vld [vmem:[%s758_s1 + $0x110] sm:$0xff] }
   0xb   :  { %351 = vmatpush.bf16.msra.mxu1 %v582_v9  ;;  %v586_v27 = vld [vmem:[%s758_s1 + $0x88] sm:$0xff]  ;;  %v577_v33 = vld [vmem:[%s758_s1 + $0x40] sm:$0xff]  ;;  %v26_v45 = vld [vmem:[%s759_s0 + $0x10] sm:$0xf] }
   0xc   :  { %364 = vmatpush.bf16.msra.mxu2 %v590_v10  ;;  %v594_v28 = vld [vmem:[%s758_s1 + $0xc8] sm:$0xff]  ;;  %v585_v36 = vld [vmem:[%s758_s1 + $0x80] sm:$0xff]  ;;  %v107_v39 = vpack.c.b16 %v102_v30, %v102_v30  ;;  %v108_v40 = vpack.c.b16 %v103_v31, %v103_v31  ;;  %v106_v47 = vunpack.c.l.b16 %v26_v45 }
   0xd   :  { %377 = vmatpush.bf16.msra.mxu3 %v598_v11  ;;  %v25_v29 = vld [vmem:[%s759_s0 + $0x8] sm:$0xff]  ;;  %v593_v37 = vld [vmem:[%s758_s1 + $0xc0] sm:$0xff] }
   0xe   :  { %339 = vmatpush.bf16.msra.mxu0 %v573_v12  ;;  %v104_v34 = vunpack.c.l.b16 %v25_v29  ;;  %v105_v35 = vunpack.c.h.b16 %v25_v29  ;;  %v602_v44 = vld [vmem:[%s758_s1 + $0x108] sm:$0xff]  ;;  %v601_v46 = vld [vmem:[%s758_s1 + $0x100] sm:$0xff]  ;;  %v111_v48 = vpack.c.b16 %v106_v47, %v106_v47 }
   0xf   :  { %352 = vmatpush.bf16.msra.mxu1 %v581_v13  ;;  %v605_v60 = vld [vmem:[%s760_s2] ss:$0 sm:$0xff] }
  0x10   :  { %365 = vmatpush.bf16.msra.mxu2 %v589_v14  ;;  %v109_v41 = vpack.c.b16 %v104_v34, %v104_v34  ;;  %v110_v42 = vpack.c.b16 %v105_v35, %v105_v35  ;;  %v606_v63 = vld [vmem:[%s761_s3] ss:$0 sm:$0xff] }
  0x11   :  { %378 = vmatpush.bf16.msra.mxu3 %v597_v15 }
  0x12   :  { %340 = vmatpush.bf16.msra.mxu0 %v572_v16 }
  0x13   :  { %353 = vmatpush.bf16.msra.mxu1 %v580_v17 }
  0x14   :  { %366 = vmatpush.bf16.msra.mxu2 %v588_v18 }
  0x15   :  { %379 = vmatpush.bf16.msra.mxu3 %v596_v19 }
  0x16   :  { %341 = vmatpush.bf16.msra.mxu0 %v571_v20 }
  0x17   :  { %354 = vmatpush.bf16.msra.mxu1 %v579_v21 }
  0x18   :  { %367 = vmatpush.bf16.msra.mxu2 %v587_v22 }
  0x19   :  { %380 = vmatpush.bf16.msra.mxu3 %v595_v23 }
  0x1a   :  { %342 = vmatpush.bf16.msra.mxu0 %v570_v24 }
  0x1b   :  { %355 = vmatpush.bf16.msra.mxu1 %v578_v25 }
  0x1c   :  { %368 = vmatpush.bf16.msra.mxu2 %v586_v27 }
  0x1d   :  { %381 = vmatpush.bf16.msra.mxu3 %v594_v28 }
  0x1e   :  { %343 = vmatpush.bf16.msra.mxu0 %v569_v32 }
  0x1f   :  { %356 = vmatpush.bf16.msra.mxu1 %v577_v33 }
  0x20   :  { %369 = vmatpush.bf16.msra.mxu2 %v585_v36 }
  0x21   :  { %382 = vmatpush.bf16.msra.mxu3 %v593_v37  ;;  %344 = vmatmul.bf16.vlgmr.msra.gmra.mxu0 %v107_v39 }
  0x22   :  { %392 = vmatpush.bf16.msrb.mxu0 %v604_v38  ;;  %357 = vmatmul.bf16.vlgmr.msra.gmra.mxu1 %v108_v40 }
  0x23   :  { %370 = vmatmul.bf16.vlgmr.msra.gmra.mxu2 %v109_v41 }
  0x24   :  { %383 = vmatmul.bf16.vlgmr.msra.gmra.mxu3 %v110_v42 }
  0x26   :  { %393 = vmatpush.bf16.msrb.mxu0 %v603_v43 }
  0x2a   :  { %394 = vmatpush.bf16.msrb.mxu0 %v602_v44 }
  0x2e   :  { %395 = vmatpush.bf16.msrb.mxu0 %v601_v46 }
  0x31   :  { %568 = vmatmul.msk.bf16.vlgmr.msrb.gmra.mxu0 %vm332_vm0, %v111_v48 }
  0x9e   :  { %v345_v49 = vpop.f32.mrf.mxu0 }
  0x9f   :  { %v358_v50 = vpop.f32.mrf.mxu1 }
  0xa0   :  { %v359_v55 = vadd.f32 %v358_v50, %v345_v49 }
  0xa6   :  { %v371_v51 = vpop.f32.mrf.mxu2  ;;  %v347_v53 = vpop.f32.mrf.mxu0 }
  0xa7   :  { %v384_v52 = vpop.f32.mrf.mxu3  ;;  %v360_v54 = vpop.f32.mrf.mxu1  ;;  %v372_v56 = vadd.f32 %v371_v51, %v359_v55 }
  0xa9   :  { %v385_v57 = vadd.f32 %v384_v52, %v372_v56 }
  0xae   :  { %v373_v58 = vpop.f32.mrf.mxu2  ;;  %v397_v61 = vpop.f32.mrf.mxu0 }
  0xaf   :  { %v386_v59 = vpop.f32.mrf.mxu3  ;;  %v398_v62 = vadd.f32 %v397_v61, %v385_v57 }
  0xb1   :  { %v411_v0 = vmul.f32 %v605_v60, %v398_v62 }
  0xb3   :  { %v416_v1 = vadd.f32 %v606_v63, %v411_v0 }
  0xb5   :  { %v417_v2 = vmax.f32 %v416_v1, 0.0 }
  0xb6   :  { %v399_v3 = vpop.f32.mrf.mxu0 }
  0xb7   :  { %v418_v4 = vpack.c.bf16 %v417_v2, %v417_v2 }
  0xb9   :  { %419 = vst [vmem:[%s762_s4] sm:$0xf] %v418_v4 }

// kernel: resnet18_forward.34
= control target key start
LH: loop header
LB: loop body
LE: loop exit
PB: predicated region body
PF: predicated region fallthrough
CT: control target
= control target key end

     0   :  { %vm57_vm0 = vcmask 523264   ;;  %s168_s1 = inlined_call_operand.vmem [shape: bf16[64,128], index: 1, kind: input, shape index: {}]   ;;  %s169_s2 = inlined_call_operand.vmem [shape: f32[1,128], index: 2, kind: input, shape index: {}]   ;;  %s170_s3 = inlined_call_operand.vmem [shape: f32[1,128], index: 3, kind: input, shape index: {}]   ;;  %s171_s0 = inlined_call_operand.vmem [shape: bf16[8,64], index: 0, kind: input, shape index: {}]   ;;  %s172_s4 = inlined_call_operand.vmem [shape: bf16[8,128], index: 4, kind: output, shape index: {}]  }
   0x1   :  { %v116_v0 = vld [vmem:[%s168_s1 + $0x18] sm:$0xff]  ;;  %v115_v1 = vld [vmem:[%s168_s1 + $0x10] sm:$0xff]  ;;  %v114_v2 = vld [vmem:[%s168_s1 + $0x8] sm:$0xff] }
   0x2   :  { %65 = vmatpush.bf16.msra.mxu0 %v116_v0  ;;  %v113_v3 = vld [vmem:[%s168_s1] sm:$0xff] }
   0x3   :  { %v24_v4 = vld [vmem:[%s171_s0] sm:$0xf] }
   0x4   :  { %v117_v5 = vld [vmem:[%s169_s2] ss:$0 sm:$0xff] }
   0x5   :  { %v118_v6 = vld [vmem:[%s170_s3] ss:$0 sm:$0xff] }
   0x6   :  { %66 = vmatpush.bf16.msra.mxu0 %v115_v1 }
   0xa   :  { %67 = vmatpush.bf16.msra.mxu0 %v114_v2 }
   0xe   :  { %68 = vmatpush.bf16.msra.mxu0 %v113_v3 }
  0x11   :  { %112 = vmatmul.msk.bf16.vlgmr.msra.gmra.mxu0 %vm57_vm0, %v24_v4 }
  0x8e   :  { %v70_v7 = vpop.f32.mrf.mxu0 }
  0x8f   :  { %v84_v8 = vmul.f32 %v117_v5, %v70_v7 }
  0x91   :  { %v89_v9 = vadd.f32 %v118_v6, %v84_v8 }
  0x93   :  { %v90_v10 = vpack.c.bf16 %v89_v9, %v89_v9 }
  0x95   :  { %91 = vst [vmem:[%s172_s4] sm:$0xf] %v90_v10 }
  0x96   :  { %v72_v11 = vpop.f32.mrf.mxu0 }

// kernel: resnet18_forward.36
= control target key start
LH: loop header
LB: loop body
LE: loop exit
PB: predicated region body
PF: predicated region fallthrough
CT: control target
= control target key end

     0   :  { %s979_s18 = smov 0   ;;  %s981_s19 = smov 0   ;;  %s1060_s0 = inlined_call_operand.vmem [shape: bf16[8,1152], index: 0, kind: input, shape index: {}]   ;;  %s1061_s1 = inlined_call_operand.vmem [shape: bf16[1152,128], index: 1, kind: input, shape index: {}]   ;;  %s1062_s2 = inlined_call_operand.vmem [shape: f32[1,128], index: 2, kind: input, shape index: {}]   ;;  %s1063_s3 = inlined_call_operand.vmem [shape: f32[1,128], index: 3, kind: input, shape index: {}]   ;;  %s1064_s4 = inlined_call_operand.vmem [shape: bf16[8,128], index: 4, kind: input, shape index: {}]   ;;  %s1065_s5 = inlined_call_operand.vmem [shape: bf16[8,128], index: 5, kind: output, shape index: {}]  }
   0x1   :  { %s983_s20 = smov 0  }
   0x2 LB: > { %s27_s21 = sadd.s32 1, %s942_s19  ;;  %p769_p0 = scmp.ge.s32.totalorder %s946_s20, 1  ;;  %s946_s20 = sphi %s983_s20, %s15_s20   ;;  %s942_s19 = sphi %s981_s19, %s1067_s19   ;;  %s938_s18 = sphi %s979_s18, %s1066_s18  }
   0x3   : > { %p28_p1 = scmp.ge.s32.totalorder %s27_s21, 3  ;;  %p261_p2 = scmp.lt.s32.totalorder %s946_s20, 4 }
   0x5   : > { %s1069_s21 = smov (%p28_p1, %s27_s21), 0  ;;  %p262_p3 = pnand %p769_p0, %p261_p2 }
   0x6   : > { %s316_s22 = smul.u32 (!%p262_p3), 3, %s938_s18  ;;  %p772_p6 = scmp.ne.s32.totalorder (!%p262_p3), %s938_s18, 0 }
   0x7   : > { %265 = sbr.rel (%p262_p3) target bundleno = 211 (0xd3), region = 40 }
   0x8   : > { %s326_s23 = smul.u32 (!%p262_p3), 48, %s938_s18  ;;  %p319_p4 = scmp.lt.s32.totalorder (!%p262_p3), %s316_s22, 8 }
   0xa   : > { %p327_p5 = scmp.lt.s32.totalorder (!%p262_p3), %s326_s23, 143 }
   0xc   : > { %s1071_s22 = smov (!%p319_p4, %s316_s22), 8  ;;  %s1073_s23 = smov (!%p327_p5, %s326_s23), 143 }
   0xd   : > { %s770_s24 = sshll.u32 %s1071_s22, 2  ;;  %s771_s28 = sshll.u32 %s1073_s23, 2 }
   0xe   : > { %s1004_s27 = scalar_lea.vmem %s1060_s0, %s770_s24  ;;  %s1009_s6 = scalar_lea.vmem %s1061_s1, %s771_s28 }
   0xf   : > { %358 = sbr.rel (%p772_p6) target bundleno = 22 (0x16), region = 44 }
  0x14   : > { %v948_v0 = vmov 0.0  }
  0x15   : > { %359 = vst [vmem:[#allocation2] sm:$0xff] %v948_v0 }
  0x16 PF: > { %v880_v1 = vld [vmem:[%s1009_s6 + $0x38] sm:$0xff]  ;;  %v879_v4 = vld [vmem:[%s1009_s6 + $0x30] sm:$0xff]  ;;  %v878_v7 = vld [vmem:[%s1009_s6 + $0x28] sm:$0xff]  ;;  %p869_p7 = scmp.ne.s32.totalorder %s938_s18, 2 }
  0x17   : > { %v888_v2 = vld [vmem:[%s1009_s6 + $0x78] sm:$0xff]  ;;  %566 = vmatpush.bf16.msra.mxu0 %v880_v1  ;;  %v887_v5 = vld [vmem:[%s1009_s6 + $0x70] sm:$0xff]  ;;  %v886_v8 = vld [vmem:[%s1009_s6 + $0x68] sm:$0xff] }
  0x18   : > { %v896_v3 = vld [vmem:[%s1009_s6 + $0xb8] sm:$0xff]  ;;  %579 = vmatpush.bf16.msra.mxu1 %v888_v2  ;;  %v895_v6 = vld [vmem:[%s1009_s6 + $0xb0] sm:$0xff]  ;;  %v894_v9 = vld [vmem:[%s1009_s6 + $0xa8] sm:$0xff] }
  0x19   : > { %592 = vmatpush.bf16.msra.mxu2 %v896_v3  ;;  %v877_v10 = vld [vmem:[%s1009_s6 + $0x20] sm:$0xff]  ;;  %v876_v13 = vld [vmem:[%s1009_s6 + $0x18] sm:$0xff]  ;;  %v875_v16 = vld [vmem:[%s1009_s6 + $0x10] sm:$0xff] }
  0x1a   : > { %v885_v11 = vld [vmem:[%s1009_s6 + $0x60] sm:$0xff]  ;;  %v884_v14 = vld [vmem:[%s1009_s6 + $0x58] sm:$0xff]  ;;  %v883_v17 = vld [vmem:[%s1009_s6 + $0x50] sm:$0xff] }
  0x1b   : > { %567 = vmatpush.bf16.msra.mxu0 %v879_v4  ;;  %v893_v12 = vld [vmem:[%s1009_s6 + $0xa0] sm:$0xff]  ;;  %v892_v15 = vld [vmem:[%s1009_s6 + $0x98] sm:$0xff]  ;;  %v891_v18 = vld [vmem:[%s1009_s6 + $0x90] sm:$0xff] }
  0x1c   : > { %580 = vmatpush.bf16.msra.mxu1 %v887_v5  ;;  %v874_v19 = vld [vmem:[%s1009_s6 + $0x8] sm:$0xff]  ;;  %v361_v21 = vld [vmem:[%s1004_s27] sm:$0xff] }
  0x1d   : > { %593 = vmatpush.bf16.msra.mxu2 %v895_v6  ;;  %v882_v20 = vld [vmem:[%s1009_s6 + $0x48] sm:$0xff]  ;;  %v413_v24 = vunpack.c.l.b16 %v361_v21  ;;  %v414_v25 = vunpack.c.h.b16 %v361_v21  ;;  %v873_v26 = vld [vmem:[%s1009_s6] sm:$0xff] }
  0x1e   : > { %v890_v22 = vld [vmem:[%s1009_s6 + $0x88] sm:$0xff]  ;;  %v881_v27 = vld [vmem:[%s1009_s6 + $0x40] sm:$0xff] }
  0x1f   : > { %568 = vmatpush.bf16.msra.mxu0 %v878_v7  ;;  %v362_v23 = vld [vmem:[%s1004_s27 + $0x8] sm:$0xf]  ;;  %v889_v29 = vld [vmem:[%s1009_s6 + $0x80] sm:$0xff]  ;;  %v416_v30 = vpack.c.b16 %v413_v24, %v413_v24  ;;  %v417_v31 = vpack.c.b16 %v414_v25, %v414_v25 }
  0x20   : > { %581 = vmatpush.bf16.msra.mxu1 %v886_v8  ;;  %v415_v28 = vunpack.c.l.b16 %v362_v23  ;;  %v360_v36 = vld [vmem:[#allocation2] sm:$0xff] }
  0x21   : > { %594 = vmatpush.bf16.msra.mxu2 %v894_v9 }
  0x22   : > { %v418_v32 = vpack.c.b16 %v415_v28, %v415_v28 }
  0x23   : > { %569 = vmatpush.bf16.msra.mxu0 %v877_v10 }
  0x24   : > { %582 = vmatpush.bf16.msra.mxu1 %v885_v11 }
  0x25   : > { %595 = vmatpush.bf16.msra.mxu2 %v893_v12 }
  0x27   : > { %570 = vmatpush.bf16.msra.mxu0 %v876_v13 }
  0x28   : > { %583 = vmatpush.bf16.msra.mxu1 %v884_v14 }
  0x29   : > { %596 = vmatpush.bf16.msra.mxu2 %v892_v15 }
  0x2b   : > { %571 = vmatpush.bf16.msra.mxu0 %v875_v16 }
  0x2c   : > { %584 = vmatpush.bf16.msra.mxu1 %v883_v17 }
  0x2d   : > { %597 = vmatpush.bf16.msra.mxu2 %v891_v18 }
  0x2f   : > { %572 = vmatpush.bf16.msra.mxu0 %v874_v19 }
  0x30   : > { %585 = vmatpush.bf16.msra.mxu1 %v882_v20 }
  0x31   : > { %598 = vmatpush.bf16.msra.mxu2 %v890_v22 }
  0x33   : > { %573 = vmatpush.bf16.msra.mxu0 %v873_v26 }
  0x34   : > { %586 = vmatpush.bf16.msra.mxu1 %v881_v27 }
  0x35   : > { %599 = vmatpush.bf16.msra.mxu2 %v889_v29 }
  0x36   : > { %574 = vmatmul.bf16.vlgmr.msra.gmra.mxu0 %v416_v30 }
  0x37   : > { %587 = vmatmul.bf16.vlgmr.msra.gmra.mxu1 %v417_v31 }
  0x38   : > { %600 = vmatmul.bf16.vlgmr.msra.gmra.mxu2 %v418_v32 }
  0xb3   : > { %v575_v33 = vpop.f32.mrf.mxu0 }
  0xb4   : > { %v588_v34 = vpop.f32.mrf.mxu1 }
  0xb5   : > { %v589_v35 = vadd.f32 %v588_v34, %v575_v33 }
  0xbb   : > { %v601_v37 = vpop.f32.mrf.mxu2  ;;  %v577_v39 = vpop.f32.mrf.mxu0 }
  0xbc   : > { %v602_v38 = vadd.f32 %v601_v37, %v589_v35  ;;  %v590_v40 = vpop.f32.mrf.mxu1 }
  0xbe   : > { %v605_v41 = vadd.f32 %v602_v38, %v360_v36 }
  0xbf   : > { %610 = sbr.rel (%p869_p7) target bundleno = 211 (0xd3), region = 48 }
  0xc0   : > { %606 = vst [vmem:[#allocation2] sm:$0xff] %v605_v41 }
  0xc3   : > { %v603_v42 = vpop.f32.mrf.mxu2 }
  0xc4   : > { %v922_v44 = vld [vmem:[%s1062_s2] ss:$0 sm:$0xff] }
  0xc5   : > { %v923_v45 = vld [vmem:[%s1063_s3] ss:$0 sm:$0xff] }
  0xc6   : > { %v622_v46 = vld [vmem:[%s1064_s4] sm:$0xf] }
  0xc7   : > { %v611_v43 = vld [vmem:[#allocation2] sm:$0xff]  ;;  %v623_v48 = vunpack.c.l.bf16 %v622_v46 }
  0xc8   : > { %v616_v47 = vmul.f32 %v922_v44, %v611_v43 }
  0xca   : > { %v621_v49 = vadd.f32 %v923_v45, %v616_v47 }
  0xcc   : > { %v624_v50 = vadd.f32 %v623_v48, %v621_v49 }
  0xce   : > { %v625_v51 = vmax.f32 %v624_v50, 0.0 }
  0xd0   : > { %v626_v52 = vpack.c.bf16 %v625_v51, %v625_v51 }
  0xd2   : > { %627 = vst [vmem:[%s1065_s5] sm:$0xf] %v626_v52 }
  0xd3 PF: > { %s15_s20 = sadd.s32 1, %s946_s20   ;;  %s1066_s18 = smov %s942_s19 }
  0xd4   : > { %p12_p8 = scmp.ge.s32.totalorder %s15_s20, 5   ;;  %s1067_s19 = smov %s1069_s21 }
  0xd6   :  { %14 = sbr.rel (!%p12_p8) target bundleno = 2 (0x2), region = 90 }

// kernel: resnet18_forward.37
= control target key start
LH: loop header
LB: loop body
LE: loop exit
PB: predicated region body
PF: predicated region fallthrough
CT: control target
= control target key end

     0   :  { %s897_s15 = smov 0   ;;  %s899_s16 = smov 0   ;;  %s975_s0 = inlined_call_operand.vmem [shape: bf16[8,1152], index: 0, kind: input, shape index: {}]   ;;  %s976_s1 = inlined_call_operand.vmem [shape: bf16[1152,128], index: 1, kind: input, shape index: {}]   ;;  %s977_s2 = inlined_call_operand.vmem [shape: f32[1,128], index: 2, kind: input, shape index: {}]   ;;  %s978_s3 = inlined_call_operand.vmem [shape: f32[1,128], index: 3, kind: input, shape index: {}]   ;;  %s979_s4 = inlined_call_operand.vmem [shape: bf16[8,128], index: 4, kind: output, shape index: {}]  }
   0x1   :  { %s901_s17 = smov 0  }
   0x2 LB: > { %s26_s18 = sadd.s32 1, %s865_s16  ;;  %p692_p0 = scmp.ge.s32.totalorder %s869_s17, 1  ;;  %s869_s17 = sphi %s901_s17, %s14_s17   ;;  %s865_s16 = sphi %s899_s16, %s981_s16   ;;  %s861_s15 = sphi %s897_s15, %s980_s15  }
   0x3   : > { %p27_p1 = scmp.ge.s32.totalorder %s26_s18, 3  ;;  %p222_p2 = scmp.lt.s32.totalorder %s869_s17, 4 }
   0x5   : > { %s983_s18 = smov (%p27_p1, %s26_s18), 0  ;;  %p223_p3 = pnand %p692_p0, %p222_p2 }
   0x6   : > { %s268_s19 = smul.u32 (!%p223_p3), 3, %s861_s15  ;;  %p695_p6 = scmp.ne.s32.totalorder (!%p223_p3), %s861_s15, 0 }
   0x7   : > { %226 = sbr.rel (%p223_p3) target bundleno = 209 (0xd1), region = 36 }
   0x8   : > { %s278_s20 = smul.u32 (!%p223_p3), 48, %s861_s15  ;;  %p271_p4 = scmp.lt.s32.totalorder (!%p223_p3), %s268_s19, 8 }
   0xa   : > { %p279_p5 = scmp.lt.s32.totalorder (!%p223_p3), %s278_s20, 143 }
   0xc   : > { %s985_s19 = smov (!%p271_p4, %s268_s19), 8  ;;  %s987_s20 = smov (!%p279_p5, %s278_s20), 143 }
   0xd   : > { %s693_s21 = sshll.u32 %s985_s19, 2  ;;  %s694_s25 = sshll.u32 %s987_s20, 2 }
   0xe   : > { %s922_s24 = scalar_lea.vmem %s975_s0, %s693_s21  ;;  %s927_s28 = scalar_lea.vmem %s976_s1, %s694_s25 }
   0xf   : > { %303 = sbr.rel (%p695_p6) target bundleno = 22 (0x16), region = 40 }
  0x14   : > { %v871_v0 = vmov 0.0  }
  0x15   : > { %304 = vst [vmem:[#allocation2] sm:$0xff] %v871_v0 }
  0x16 PF: > { %v803_v1 = vld [vmem:[%s927_s28 + $0x38] sm:$0xff]  ;;  %v802_v4 = vld [vmem:[%s927_s28 + $0x30] sm:$0xff]  ;;  %v801_v7 = vld [vmem:[%s927_s28 + $0x28] sm:$0xff]  ;;  %p792_p7 = scmp.ne.s32.totalorder %s861_s15, 2 }
  0x17   : > { %v811_v2 = vld [vmem:[%s927_s28 + $0x78] sm:$0xff]  ;;  %511 = vmatpush.bf16.msra.mxu0 %v803_v1  ;;  %v810_v5 = vld [vmem:[%s927_s28 + $0x70] sm:$0xff]  ;;  %v809_v8 = vld [vmem:[%s927_s28 + $0x68] sm:$0xff] }
  0x18   : > { %v819_v3 = vld [vmem:[%s927_s28 + $0xb8] sm:$0xff]  ;;  %524 = vmatpush.bf16.msra.mxu1 %v811_v2  ;;  %v818_v6 = vld [vmem:[%s927_s28 + $0xb0] sm:$0xff]  ;;  %v817_v9 = vld [vmem:[%s927_s28 + $0xa8] sm:$0xff] }
  0x19   : > { %537 = vmatpush.bf16.msra.mxu2 %v819_v3  ;;  %v800_v10 = vld [vmem:[%s927_s28 + $0x20] sm:$0xff]  ;;  %v799_v13 = vld [vmem:[%s927_s28 + $0x18] sm:$0xff]  ;;  %v798_v16 = vld [vmem:[%s927_s28 + $0x10] sm:$0xff] }
  0x1a   : > { %v808_v11 = vld [vmem:[%s927_s28 + $0x60] sm:$0xff]  ;;  %v807_v14 = vld [vmem:[%s927_s28 + $0x58] sm:$0xff]  ;;  %v806_v17 = vld [vmem:[%s927_s28 + $0x50] sm:$0xff] }
  0x1b   : > { %512 = vmatpush.bf16.msra.mxu0 %v802_v4  ;;  %v816_v12 = vld [vmem:[%s927_s28 + $0xa0] sm:$0xff]  ;;  %v815_v15 = vld [vmem:[%s927_s28 + $0x98] sm:$0xff]  ;;  %v814_v18 = vld [vmem:[%s927_s28 + $0x90] sm:$0xff] }
  0x1c   : > { %525 = vmatpush.bf16.msra.mxu1 %v810_v5  ;;  %v797_v19 = vld [vmem:[%s927_s28 + $0x8] sm:$0xff]  ;;  %v306_v21 = vld [vmem:[%s922_s24] sm:$0xff] }
  0x1d   : > { %538 = vmatpush.bf16.msra.mxu2 %v818_v6  ;;  %v805_v20 = vld [vmem:[%s927_s28 + $0x48] sm:$0xff]  ;;  %v358_v24 = vunpack.c.l.b16 %v306_v21  ;;  %v359_v25 = vunpack.c.h.b16 %v306_v21  ;;  %v796_v26 = vld [vmem:[%s927_s28] sm:$0xff] }
  0x1e   : > { %v813_v22 = vld [vmem:[%s927_s28 + $0x88] sm:$0xff]  ;;  %v804_v27 = vld [vmem:[%s927_s28 + $0x40] sm:$0xff] }
  0x1f   : > { %513 = vmatpush.bf16.msra.mxu0 %v801_v7  ;;  %v307_v23 = vld [vmem:[%s922_s24 + $0x8] sm:$0xf]  ;;  %v812_v29 = vld [vmem:[%s927_s28 + $0x80] sm:$0xff]  ;;  %v361_v30 = vpack.c.b16 %v358_v24, %v358_v24  ;;  %v362_v31 = vpack.c.b16 %v359_v25, %v359_v25 }
  0x20   : > { %526 = vmatpush.bf16.msra.mxu1 %v809_v8  ;;  %v360_v28 = vunpack.c.l.b16 %v307_v23  ;;  %v305_v36 = vld [vmem:[#allocation2] sm:$0xff] }
  0x21   : > { %539 = vmatpush.bf16.msra.mxu2 %v817_v9 }
  0x22   : > { %v363_v32 = vpack.c.b16 %v360_v28, %v360_v28 }
  0x23   : > { %514 = vmatpush.bf16.msra.mxu0 %v800_v10 }
  0x24   : > { %527 = vmatpush.bf16.msra.mxu1 %v808_v11 }
  0x25   : > { %540 = vmatpush.bf16.msra.mxu2 %v816_v12 }
  0x27   : > { %515 = vmatpush.bf16.msra.mxu0 %v799_v13 }
  0x28   : > { %528 = vmatpush.bf16.msra.mxu1 %v807_v14 }
  0x29   : > { %541 = vmatpush.bf16.msra.mxu2 %v815_v15 }
  0x2b   : > { %516 = vmatpush.bf16.msra.mxu0 %v798_v16 }
  0x2c   : > { %529 = vmatpush.bf16.msra.mxu1 %v806_v17 }
  0x2d   : > { %542 = vmatpush.bf16.msra.mxu2 %v814_v18 }
  0x2f   : > { %517 = vmatpush.bf16.msra.mxu0 %v797_v19 }
  0x30   : > { %530 = vmatpush.bf16.msra.mxu1 %v805_v20 }
  0x31   : > { %543 = vmatpush.bf16.msra.mxu2 %v813_v22 }
  0x33   : > { %518 = vmatpush.bf16.msra.mxu0 %v796_v26 }
  0x34   : > { %531 = vmatpush.bf16.msra.mxu1 %v804_v27 }
  0x35   : > { %544 = vmatpush.bf16.msra.mxu2 %v812_v29 }
  0x36   : > { %519 = vmatmul.bf16.vlgmr.msra.gmra.mxu0 %v361_v30 }
  0x37   : > { %532 = vmatmul.bf16.vlgmr.msra.gmra.mxu1 %v362_v31 }
  0x38   : > { %545 = vmatmul.bf16.vlgmr.msra.gmra.mxu2 %v363_v32 }
  0xb3   : > { %v520_v33 = vpop.f32.mrf.mxu0 }
  0xb4   : > { %v533_v34 = vpop.f32.mrf.mxu1 }
  0xb5   : > { %v534_v35 = vadd.f32 %v533_v34, %v520_v33 }
  0xbb   : > { %v546_v37 = vpop.f32.mrf.mxu2  ;;  %v522_v39 = vpop.f32.mrf.mxu0 }
  0xbc   : > { %v547_v38 = vadd.f32 %v546_v37, %v534_v35  ;;  %v535_v40 = vpop.f32.mrf.mxu1 }
  0xbe   : > { %v550_v41 = vadd.f32 %v547_v38, %v305_v36 }
  0xbf   : > { %555 = sbr.rel (%p792_p7) target bundleno = 209 (0xd1), region = 44 }
  0xc0   : > { %551 = vst [vmem:[#allocation2] sm:$0xff] %v550_v41 }
  0xc3   : > { %v548_v42 = vpop.f32.mrf.mxu2 }
  0xc4   : > { %v845_v44 = vld [vmem:[%s977_s2] ss:$0 sm:$0xff] }
  0xc5   : > { %v846_v45 = vld [vmem:[%s978_s3] ss:$0 sm:$0xff] }
  0xc7   : > { %v556_v43 = vld [vmem:[#allocation2] sm:$0xff] }
  0xc8   : > { %v561_v46 = vmul.f32 %v845_v44, %v556_v43 }
  0xca   : > { %v566_v47 = vadd.f32 %v846_v45, %v561_v46 }
  0xcc   : > { %v567_v48 = vmax.f32 %v566_v47, 0.0 }
  0xce   : > { %v568_v49 = vpack.c.bf16 %v567_v48, %v567_v48 }
  0xd0   : > { %569 = vst [vmem:[%s979_s4] sm:$0xf] %v568_v49 }
  0xd1 PF: > { %s14_s17 = sadd.s32 1, %s869_s17   ;;  %s980_s15 = smov %s865_s16 }
  0xd2   : > { %p11_p8 = scmp.ge.s32.totalorder %s14_s17, 5   ;;  %s981_s16 = smov %s983_s18 }
  0xd4   :  { %13 = sbr.rel (!%p11_p8) target bundleno = 2 (0x2), region = 83 }

// kernel: resnet18_forward.46
= control target key start
LH: loop header
LB: loop body
LE: loop exit
PB: predicated region body
PF: predicated region fallthrough
CT: control target
= control target key end

     0   :  { %s1202_s18 = smov 0   ;;  %s1204_s19 = smov 0   ;;  %s1362_s0 = inlined_call_operand.vmem [shape: bf16[2,1,1,9,256], index: 0, kind: input, shape index: {}, may-alias: {0,5}]   ;;  %s1363_s1 = inlined_call_operand.vmem [shape: bf16[2,1152], index: 1, kind: input, shape index: {}]   ;;  %s1364_s2 = inlined_call_operand.vmem [shape: bf16[1152,256], index: 2, kind: input, shape index: {}]   ;;  %s1365_s3 = inlined_call_operand.vmem [shape: f32[1,256], index: 3, kind: input, shape index: {}]   ;;  %s1366_s4 = inlined_call_operand.vmem [shape: f32[1,256], index: 4, kind: input, shape index: {}]   ;;  %s1367_s5 = inlined_call_operand.vmem [shape: bf16[2,1,1,9,256], index: 5, kind: output, shape index: {}, may-alias: {0,5}]  }
   0x1   :  { %s1206_s0 = smov 0  }
   0x2 LB: > { %s867_s20 = sadd.s32 4294967295, %s1169_s0   ;;  %s28_s21 = sadd.s32 1, %s1165_s19  ;;  %s1169_s0 = sphi %s1206_s0, %s16_s0   ;;  %s1165_s19 = sphi %s1204_s19, %s1369_s19   ;;  %s1161_s18 = sphi %s1202_s18, %s1368_s18  }
   0x3   : > { %p29_p0 = scmp.ge.s32.totalorder %s28_s21, 3  ;;  %p872_p1 = scmp.ge.s32.totalorder %s1169_s0, 1 }
   0x4   : > { %p230_p2 = scmp.lt.s32.totalorder %s1169_s0, 4 }
   0x5   : > { %s1371_s21 = smov (%p29_p0, %s28_s21), 0 }
   0x6   : > { %p231_p3 = pnand %p872_p1, %p230_p2 }
   0x7   : > { %s272_s22 = smul.u32 (!%p231_p3), 3, %s1161_s18  ;;  %p875_p6 = scmp.ne.s32.totalorder (!%p231_p3), %s1161_s18, 0 }
   0x8   : > { %234 = sbr.rel (%p231_p3) target bundleno = 260 (0x104), region = 36 }
   0x9   : > { %s281_s23 = smul.u32 (!%p231_p3), 48, %s1161_s18  ;;  %p275_p4 = scmp.lt.s32.totalorder (!%p231_p3), %s272_s22, 8 }
   0xb   : > { %p283_p5 = scmp.lt.s32.totalorder (!%p231_p3), %s281_s23, 143 }
   0xd   : > { %s1373_s22 = smov (!%p275_p4, %s272_s22), 8  ;;  %s1375_s23 = smov (!%p283_p5, %s281_s23), 143 }
   0xe   : > { %s279_s26 = scalar_lea.vmem %s1363_s1, %s1373_s22  ;;  %s1073_s27 = sshll.u32 %s1375_s23, 3 }
   0xf   : > { %s1234_s30 = scalar_lea.vmem %s1364_s2, %s1073_s27  ;;  %307 = sbr.rel (%p875_p6) target bundleno = 22 (0x16), region = 40 }
  0x14   : > { %v1171_v0 = vmov 0.0  }
  0x15   : > { %308 = vst [vmem:[#allocation2] sm:$0xf] %v1171_v0 }
  0x16 PF: > { %v934_v1 = vld [vmem:[%s1234_s30 + $0x70] sm:$0xf]  ;;  %v1089_v2 = vld [vmem:[%s1234_s30 + $0x74] sm:$0xf0]  ;;  %v926_v6 = vld [vmem:[%s1234_s30 + $0x60] sm:$0xf] }
  0x17   : > { %v998_v3 = vld [vmem:[%s1234_s30 + $0xf0] sm:$0xf]  ;;  %v935_v4 = vor.u32 %v1089_v2, %v934_v1  ;;  %v1105_v5 = vld [vmem:[%s1234_s30 + $0xf4] sm:$0xf0]  ;;  %v1087_v7 = vld [vmem:[%s1234_s30 + $0x64] sm:$0xf0] }
  0x18   : > { %v999_v8 = vor.u32 %v1105_v5, %v998_v3  ;;  %v990_v9 = vld [vmem:[%s1234_s30 + $0xe0] sm:$0xf]  ;;  %v1103_v10 = vld [vmem:[%s1234_s30 + $0xe4] sm:$0xf0]  ;;  %v927_v11 = vor.u32 %v1087_v7, %v926_v6  ;;  %v918_v12 = vld [vmem:[%s1234_s30 + $0x50] sm:$0xf] }
  0x19   : > { %607 = vmatpush.bf16.msra.mxu0 %v935_v4  ;;  %v991_v13 = vor.u32 %v1103_v10, %v990_v9  ;;  %v1085_v14 = vld [vmem:[%s1234_s30 + $0x54] sm:$0xf0]  ;;  %v1062_v15 = vld [vmem:[%s1234_s30 + $0x170] sm:$0xf]  ;;  %v1054_v20 = vld [vmem:[%s1234_s30 + $0x160] sm:$0xf] }
  0x1a   : > { %620 = vmatpush.bf16.msra.mxu1 %v999_v8  ;;  %v1121_v16 = vld [vmem:[%s1234_s30 + $0x174] sm:$0xf0]  ;;  %v982_v17 = vld [vmem:[%s1234_s30 + $0xd0] sm:$0xf]  ;;  %v1119_v21 = vld [vmem:[%s1234_s30 + $0x164] sm:$0xf0]  ;;  %v919_v23 = vor.u32 %v1085_v14, %v918_v12 }
  0x1b   : > { %v1101_v18 = vld [vmem:[%s1234_s30 + $0xd4] sm:$0xf0]  ;;  %v1063_v19 = vor.u32 %v1121_v16, %v1062_v15  ;;  %v1088_v22 = vld [vmem:[%s1234_s30 + $0x74] sm:$0xf]  ;;  %v910_v24 = vld [vmem:[%s1234_s30 + $0x40] sm:$0xf]  ;;  %v1055_v26 = vor.u32 %v1119_v21, %v1054_v20 }
  0x1c   : > { %v1083_v25 = vld [vmem:[%s1234_s30 + $0x44] sm:$0xf0]  ;;  %v936_v27 = vld [vmem:[%s1234_s30 + $0x78] sm:$0xf0]  ;;  %v983_v28 = vor.u32 %v1101_v18, %v982_v17  ;;  %v974_v29 = vld [vmem:[%s1234_s30 + $0xc0] sm:$0xf] }
  0x1d   : > { %608 = vmatpush.bf16.msra.mxu0 %v927_v11  ;;  %633 = vmatpush.bf16.msra.mxu2 %v1063_v19  ;;  %v1099_v30 = vld [vmem:[%s1234_s30 + $0xc4] sm:$0xf0]  ;;  %v939_v31 = vor.u32 %v1088_v22, %v936_v27  ;;  %v1046_v32 = vld [vmem:[%s1234_s30 + $0x150] sm:$0xf]  ;;  %v1117_v33 = vld [vmem:[%s1234_s30 + $0x154] sm:$0xf0]  ;;  %v911_v37 = vor.u32 %v1083_v25, %v910_v24 }
  0x1e   : > { %621 = vmatpush.bf16.msra.mxu1 %v991_v13  ;;  %v1086_v34 = vld [vmem:[%s1234_s30 + $0x64] sm:$0xf]  ;;  %v928_v35 = vld [vmem:[%s1234_s30 + $0x68] sm:$0xf0]  ;;  %v902_v38 = vld [vmem:[%s1234_s30 + $0x30] sm:$0xf]  ;;  %v1047_v40 = vor.u32 %v1117_v33, %v1046_v32  ;;  %v975_v42 = vor.u32 %v1099_v30, %v974_v29 }
  0x1f   : > { %646 = vmatpush.bf16.msra.mxu3 %v939_v31  ;;  %v931_v36 = vor.u32 %v1086_v34, %v928_v35  ;;  %v1081_v39 = vld [vmem:[%s1234_s30 + $0x34] sm:$0xf0]  ;;  %v1038_v41 = vld [vmem:[%s1234_s30 + $0x140] sm:$0xf]  ;;  %v1115_v43 = vld [vmem:[%s1234_s30 + $0x144] sm:$0xf0] }
  0x20   : > { %v1084_v44 = vld [vmem:[%s1234_s30 + $0x54] sm:$0xf]  ;;  %v920_v45 = vld [vmem:[%s1234_s30 + $0x58] sm:$0xf0]  ;;  %v966_v46 = vld [vmem:[%s1234_s30 + $0xb0] sm:$0xf]  ;;  %v903_v49 = vor.u32 %v1081_v39, %v902_v38  ;;  %v1039_v51 = vor.u32 %v1115_v43, %v1038_v41 }
  0x21   : > { %609 = vmatpush.bf16.msra.mxu0 %v919_v23  ;;  %634 = vmatpush.bf16.msra.mxu2 %v1055_v26  ;;  %v1097_v47 = vld [vmem:[%s1234_s30 + $0xb4] sm:$0xf0]  ;;  %v923_v48 = vor.u32 %v1084_v44, %v920_v45  ;;  %v894_v50 = vld [vmem:[%s1234_s30 + $0x20] sm:$0xf]  ;;  %v1082_v52 = vld [vmem:[%s1234_s30 + $0x44] sm:$0xf] }
  0x22   : > { %622 = vmatpush.bf16.msra.mxu1 %v983_v28  ;;  %v912_v53 = vld [vmem:[%s1234_s30 + $0x48] sm:$0xf0]  ;;  %v967_v54 = vor.u32 %v1097_v47, %v966_v46  ;;  %v1079_v55 = vld [vmem:[%s1234_s30 + $0x24] sm:$0xf0]  ;;  %v1030_v56 = vld [vmem:[%s1234_s30 + $0x130] sm:$0xf] }
  0x23   : > { %647 = vmatpush.bf16.msra.mxu3 %v931_v36  ;;  %v1113_v57 = vld [vmem:[%s1234_s30 + $0x134] sm:$0xf0]  ;;  %v958_v58 = vld [vmem:[%s1234_s30 + $0xa0] sm:$0xf]  ;;  %v1095_v59 = vld [vmem:[%s1234_s30 + $0xa4] sm:$0xf0]  ;;  %v915_v60 = vor.u32 %v1082_v52, %v912_v53  ;;  %v895_v61 = vor.u32 %v1079_v55, %v894_v50 }
  0x24   : > { %v886_v62 = vld [vmem:[%s1234_s30 + $0x10] sm:$0xf]  ;;  %v1031_v63 = vor.u32 %v1113_v57, %v1030_v56  ;;  %v1080_v0 = vld [vmem:[%s1234_s30 + $0x34] sm:$0xf]  ;;  %v904_v1 = vld [vmem:[%s1234_s30 + $0x38] sm:$0xf0]  ;;  %v959_v2 = vor.u32 %v1095_v59, %v958_v58 }
  0x25   : > { %610 = vmatpush.bf16.msra.mxu0 %v911_v37  ;;  %635 = vmatpush.bf16.msra.mxu2 %v1047_v40  ;;  %v1077_v3 = vld [vmem:[%s1234_s30 + $0x14] sm:$0xf0]  ;;  %v1022_v4 = vld [vmem:[%s1234_s30 + $0x120] sm:$0xf]  ;;  %v1111_v5 = vld [vmem:[%s1234_s30 + $0x124] sm:$0xf0]  ;;  %v907_v10 = vor.u32 %v1080_v0, %v904_v1 }
  0x26   : > { %623 = vmatpush.bf16.msra.mxu1 %v975_v42  ;;  %v950_v6 = vld [vmem:[%s1234_s30 + $0x90] sm:$0xf]  ;;  %v1093_v7 = vld [vmem:[%s1234_s30 + $0x94] sm:$0xf0]  ;;  %v878_v8 = vld [vmem:[%s1234_s30] sm:$0xf]  ;;  %v887_v12 = vor.u32 %v1077_v3, %v886_v62  ;;  %v1023_v13 = vor.u32 %v1111_v5, %v1022_v4 }
  0x27   : > { %648 = vmatpush.bf16.msra.mxu3 %v923_v48  ;;  %v1075_v9 = vld [vmem:[%s1234_s30 + $0x4] sm:$0xf0]  ;;  %v310_v11 = vld [vmem:[%s279_s26] sm:$0x7]  ;;  %v1078_v14 = vld [vmem:[%s1234_s30 + $0x24] sm:$0xf]  ;;  %v951_v16 = vor.u32 %v1093_v7, %v950_v6 }
  0x28   : > { %v896_v15 = vld [vmem:[%s1234_s30 + $0x28] sm:$0xf0]  ;;  %360 = vst [vmem:[#allocation1] ss:$9 sm:$0xff] %v310_v11  ;;  %v942_v17 = vld [vmem:[%s1234_s30 + $0x80] sm:$0xf]  ;;  %v879_v26 = vor.u32 %v1075_v9, %v878_v8 }
  0x29   : > { %611 = vmatpush.bf16.msra.mxu0 %v903_v49  ;;  %636 = vmatpush.bf16.msra.mxu2 %v1039_v51  ;;  %v1014_v18 = vld [vmem:[%s1234_s30 + $0x110] sm:$0xf]  ;;  %v1109_v19 = vld [vmem:[%s1234_s30 + $0x114] sm:$0xf0]  ;;  %v1091_v20 = vld [vmem:[%s1234_s30 + $0x84] sm:$0xf0]  ;;  %v899_v25 = vor.u32 %v1078_v14, %v896_v15 }
  0x2a   : > { %624 = vmatpush.bf16.msra.mxu1 %v967_v54  ;;  %v1104_v21 = vld [vmem:[%s1234_s30 + $0xf4] sm:$0xf]  ;;  %v1000_v22 = vld [vmem:[%s1234_s30 + $0xf8] sm:$0xf0]  ;;  %v1015_v27 = vor.u32 %v1109_v19, %v1014_v18  ;;  %v943_v30 = vor.u32 %v1091_v20, %v942_v17  ;;  %v1006_v32 = vld [vmem:[%s1234_s30 + $0x100] sm:$0xf] }
  0x2b   : > { %649 = vmatpush.bf16.msra.mxu3 %v915_v60  ;;  %v1120_v23 = vld [vmem:[%s1234_s30 + $0x174] sm:$0xf]  ;;  %v1064_v24 = vld [vmem:[%s1234_s30 + $0x178] sm:$0xf0]  ;;  %v1003_v31 = vor.u32 %v1104_v21, %v1000_v22  ;;  %v1107_v33 = vld [vmem:[%s1234_s30 + $0x104] sm:$0xf0] }
  0x2c   : > { %v1076_v28 = vld [vmem:[%s1234_s30 + $0x14] sm:$0xf]  ;;  %v888_v29 = vld [vmem:[%s1234_s30 + $0x18] sm:$0xf0]  ;;  %v1067_v34 = vor.u32 %v1120_v23, %v1064_v24  ;;  %v1102_v35 = vld [vmem:[%s1234_s30 + $0xe4] sm:$0xf]  ;;  %v1007_v41 = vor.u32 %v1107_v33, %v1006_v32 }
  0x2d   : > { %612 = vmatpush.bf16.msra.mxu0 %v895_v61  ;;  %637 = vmatpush.bf16.msra.mxu2 %v1031_v63  ;;  %v992_v36 = vld [vmem:[%s1234_s30 + $0xe8] sm:$0xf0]  ;;  %v1118_v37 = vld [vmem:[%s1234_s30 + $0x164] sm:$0xf]  ;;  %v891_v39 = vor.u32 %v1076_v28, %v888_v29  ;;  %v1100_v47 = vld [vmem:[%s1234_s30 + $0xd4] sm:$0xf] }
  0x2e   : > { %625 = vmatpush.bf16.msra.mxu1 %v959_v2  ;;  %v1056_v38 = vld [vmem:[%s1234_s30 + $0x168] sm:$0xf0]  ;;  %v1074_v42 = vld [vmem:[%s1234_s30 + $0x4] sm:$0xf]  ;;  %v995_v44 = vor.u32 %v1102_v35, %v992_v36  ;;  %v984_v48 = vld [vmem:[%s1234_s30 + $0xd8] sm:$0xf0] }
  0x2f   : > { %650 = vmatpush.bf16.msra.mxu3 %v907_v10  ;;  %v361_v40 = vld [vmem:[#allocation1] sm:$0xff]  ;;  %v880_v43 = vld [vmem:[%s1234_s30 + $0x8] sm:$0xf0]  ;;  %v1059_v46 = vor.u32 %v1118_v37, %v1056_v38  ;;  %v1116_v49 = vld [vmem:[%s1234_s30 + $0x154] sm:$0xf]  ;;  %v987_v53 = vor.u32 %v1100_v47, %v984_v48  ;;  %vm688_vm0 = vcmask 1041408  }
  0x30   : > { %v362_v45 = vld [vmem:[#allocation1 + $0x9] sm:$0xff]  ;;  %v1048_v50 = vld [vmem:[%s1234_s30 + $0x158] sm:$0xf0]  ;;  %v883_v51 = vor.u32 %v1074_v42, %v880_v43  ;;  %v363_v52 = vld [vmem:[#allocation1 + $0x12] sm:$0xff]  ;;  %p1068_p7 = scmp.ne.s32.totalorder %s1161_s18, 2 }
  0x31   : > { %613 = vmatpush.bf16.msra.mxu0 %v887_v12  ;;  %638 = vmatpush.bf16.msra.mxu2 %v1023_v13  ;;  %v1051_v54 = vor.u32 %v1116_v49, %v1048_v50  ;;  %v1098_v55 = vld [vmem:[%s1234_s30 + $0xc4] sm:$0xf]  ;;  %v976_v56 = vld [vmem:[%s1234_s30 + $0xc8] sm:$0xf0]  ;;  %v1096_v61 = vld [vmem:[%s1234_s30 + $0xb4] sm:$0xf] }
  0x32   : > { %626 = vmatpush.bf16.msra.mxu1 %v951_v16  ;;  %v1114_v57 = vld [vmem:[%s1234_s30 + $0x144] sm:$0xf]  ;;  %v1040_v58 = vld [vmem:[%s1234_s30 + $0x148] sm:$0xf0]  ;;  %v979_v59 = vor.u32 %v1098_v55, %v976_v56  ;;  %v968_v62 = vld [vmem:[%s1234_s30 + $0xb8] sm:$0xf0] }
  0x33   : > { %651 = vmatpush.bf16.msra.mxu3 %v899_v25  ;;  %v1043_v60 = vor.u32 %v1114_v57, %v1040_v58  ;;  %v1112_v63 = vld [vmem:[%s1234_s30 + $0x134] sm:$0xf]  ;;  %v1032_v0 = vld [vmem:[%s1234_s30 + $0x138] sm:$0xf0]  ;;  %v971_v1 = vor.u32 %v1096_v61, %v968_v62  ;;  %v1094_v3 = vld [vmem:[%s1234_s30 + $0xa4] sm:$0xf] }
  0x34   : > { %v1035_v2 = vor.u32 %v1112_v63, %v1032_v0  ;;  %v960_v4 = vld [vmem:[%s1234_s30 + $0xa8] sm:$0xf0]  ;;  %v1110_v5 = vld [vmem:[%s1234_s30 + $0x124] sm:$0xf]  ;;  %v1092_v9 = vld [vmem:[%s1234_s30 + $0x94] sm:$0xf] }
  0x35   : > { %614 = vmatpush.bf16.msra.mxu0 %v879_v26  ;;  %639 = vmatpush.bf16.msra.mxu2 %v1015_v27  ;;  %v1024_v6 = vld [vmem:[%s1234_s30 + $0x128] sm:$0xf0]  ;;  %v963_v7 = vor.u32 %v1094_v3, %v960_v4  ;;  %v952_v10 = vld [vmem:[%s1234_s30 + $0x98] sm:$0xf0]  ;;  %v1108_v11 = vld [vmem:[%s1234_s30 + $0x114] sm:$0xf] }
  0x36   : > { %627 = vmatpush.bf16.msra.mxu1 %v943_v30  ;;  %v1027_v8 = vor.u32 %v1110_v5, %v1024_v6  ;;  %v1016_v12 = vld [vmem:[%s1234_s30 + $0x118] sm:$0xf0]  ;;  %v955_v13 = vor.u32 %v1092_v9, %v952_v10  ;;  %v1090_v15 = vld [vmem:[%s1234_s30 + $0x84] sm:$0xf]  ;;  %v944_v16 = vld [vmem:[%s1234_s30 + $0x88] sm:$0xf0] }
  0x37   : > { %652 = vmatpush.bf16.msra.mxu3 %v891_v39  ;;  %v1019_v14 = vor.u32 %v1108_v11, %v1016_v12  ;;  %v1106_v17 = vld [vmem:[%s1234_s30 + $0x104] sm:$0xf]  ;;  %v1008_v18 = vld [vmem:[%s1234_s30 + $0x108] sm:$0xf0]  ;;  %v947_v19 = vor.u32 %v1090_v15, %v944_v16  ;;  %v309_v35 = vld [vmem:[#allocation2] sm:$0xf] }
  0x38   : > { %615 = vmatmul.bf16.vlgmr.msra.gmra.mxu0 %v361_v40  ;;  %v1011_v20 = vor.u32 %v1106_v17, %v1008_v18 }
  0x39   : > { %659 = vmatpush.bf16.msrb.mxu0 %v1003_v31  ;;  %640 = vmatpush.bf16.msra.mxu2 %v1007_v41 }
  0x3a   : > { %672 = vmatpush.bf16.msrb.mxu1 %v1067_v34 }
  0x3b   : > { %628 = vmatmul.bf16.vlgmr.msra.gmra.mxu1 %v362_v45  ;;  %653 = vmatpush.bf16.msra.mxu3 %v883_v51 }
  0x3c   : > { %641 = vmatmul.bf16.vlgmr.msra.gmra.mxu2 %v363_v52 }
  0x3d   : > { %660 = vmatpush.bf16.msrb.mxu0 %v995_v44 }
  0x3e   : > { %673 = vmatpush.bf16.msrb.mxu1 %v1059_v46  ;;  %654 = vmatmul.bf16.vlgmr.msra.gmra.mxu3 %v361_v40 }
  0x41   : > { %661 = vmatpush.bf16.msrb.mxu0 %v987_v53 }
  0x42   : > { %674 = vmatpush.bf16.msrb.mxu1 %v1051_v54 }
  0x45   : > { %662 = vmatpush.bf16.msrb.mxu0 %v979_v59 }
  0x46   : > { %675 = vmatpush.bf16.msrb.mxu1 %v1043_v60 }
  0x49   : > { %663 = vmatpush.bf16.msrb.mxu0 %v971_v1 }
  0x4a   : > { %676 = vmatpush.bf16.msrb.mxu1 %v1035_v2 }
  0x4d   : > { %664 = vmatpush.bf16.msrb.mxu0 %v963_v7 }
  0x4e   : > { %677 = vmatpush.bf16.msrb.mxu1 %v1027_v8 }
  0x51   : > { %665 = vmatpush.bf16.msrb.mxu0 %v955_v13 }
  0x52   : > { %678 = vmatpush.bf16.msrb.mxu1 %v1019_v14 }
  0x55   : > { %666 = vmatpush.bf16.msrb.mxu0 %v947_v19 }
  0x56   : > { %679 = vmatpush.bf16.msrb.mxu1 %v1011_v20 }
  0x58   : > { %667 = vmatmul.bf16.vlgmr.msrb.gmra.mxu0 %v362_v45 }
  0x59   : > { %680 = vmatmul.bf16.vlgmr.msrb.gmra.mxu1 %v363_v52 }
  0xb5   : > { %v616_v21 = vpop.f32.mrf.mxu0 }
  0xb8   : > { %v629_v22 = vpop.f32.mrf.mxu1 }
  0xb9   : > { %v630_v30 = vadd.f32 %v629_v22, %v616_v21 }
  0xbd   : > { %v618_v23 = vpop.f32.mrf.mxu0 }
  0xbf   : > { %v642_v25 = vpop.f32.mrf.mxu2 }
  0xc0   : > { %v631_v24 = vpop.f32.mrf.mxu1  ;;  %v643_v34 = vadd.f32 %v642_v25, %v630_v30 }
  0xc1   : > { %v655_v26 = vpop.f32.mrf.mxu3 }
  0xc7   : > { %v644_v27 = vpop.f32.mrf.mxu2 }
  0xc9   : > { %v657_v28 = vpop.f32.mrf.mxu3 }
  0xd5   : > { %v668_v29 = vpop.f32.mrf.mxu0 }
  0xd6   : > { %v669_v31 = vadd.f32 %v668_v29, %v655_v26  ;;  %v681_v32 = vpop.f32.mrf.mxu1 }
  0xd8   : > { %v682_v33 = vadd.f32 %v681_v32, %v669_v31 }
  0xda   : > { %v687_v36 = vrot.slane %v682_v33, 6 }
  0xdb   : > { %696 = sbr.rel (%p1068_p7) target bundleno = 251 (0xfb), region = 44 }
  0xdc   : > { %v689_v37 = vsel %vm688_vm0, %v643_v34, %v687_v36 }
  0xdd   : > { %v691_v38 = vadd.f32 %v689_v37, %v309_v35  ;;  %v670_v39 = vpop.f32.mrf.mxu0 }
  0xde   : > { %v683_v40 = vpop.f32.mrf.mxu1 }
  0xdf   : > { %692 = vst [vmem:[#allocation2] sm:$0xf] %v691_v38 }
  0xe0   : > { %v698_v41 = vld [vmem:[%s1365_s3] sm:$0x3]  ;;  %vm724_vm1 = vcmask 1040384  }
  0xe1   : > { %v706_v42 = vld [vmem:[%s1366_s4] sm:$0x3]  ;;  %v700_v43 = vperm.slane %v698_v41, 0  ;;  %v701_v44 = vperm.slane %v698_v41, 1 }
  0xe2   : > { %v708_v45 = vperm.slane %v706_v42, 0  ;;  %v709_v46 = vperm.slane %v706_v42, 1 }
  0xe3   : > { %v702_v48 = vrot.slane %v701_v44, 6 }
  0xe4   : > { %v710_v49 = vrot.slane %v709_v46, 6 }
  0xe5   : > { %v703_v50 = vsel %vm688_vm0, %v700_v43, %v702_v48 }
  0xe6   : > { %v697_v47 = vld [vmem:[#allocation2] sm:$0xf]  ;;  %v711_v51 = vsel %vm688_vm0, %v708_v45, %v710_v49 }
  0xe7   : > { %v705_v52 = vmul.f32 %v703_v50, %v697_v47 }
  0xe9   : > { %v713_v53 = vadd.f32 %v711_v51, %v705_v52 }
  0xeb   : > { %v714_v54 = vmax.f32 %v713_v53, 0.0 }
  0xed   : > { %716 = vst [vmem:[#allocation1] ss:$4 sm:$0xff] %v714_v54 }
  0xf4   : > { %v717_v55 = vld.sshfl [vmem:[#allocation1] sm:$0xff pattern:$0x73625140]  ;;  %v718_v56 = vld.sshfl [vmem:[#allocation1 + $0x8] sm:$0xff pattern:$0x73625140] }
  0xf5   : > { %v721_v57 = vpack.c.bf16 %v718_v56, %v717_v55 }
  0xf7   : > { %v723_v58 = vrot.slane %v721_v57, 3 }
  0xf9   : > { %v727_v59 = vsel %vm724_vm1, %v721_v57, %v723_v58 }
  0xfa   : > { %729 = vst [vmem:[#allocation3] sm:$0x3] %v727_v59 }
  0xfb PF: > { %p1069_p8 = scmp.ne.s32.totalorder %s867_s20, 2 }
  0xfd   : > { %732 = sbr.rel (%p1069_p8) target bundleno = 260 (0x104), region = 48 }
 0x102   : > { %v753_v60 = vld [vmem:[#allocation3] sm:$0x3] }
 0x103   : > { %1070 = vst [vmem:[%s1367_s5 + $0x8] sm:$0x3] %v753_v60 }
 0x104 PF: > { %s16_s0 = sadd.s32 1, %s1169_s0   ;;  %s1368_s18 = smov %s1165_s19 }
 0x105   : > { %p13_p9 = scmp.ge.s32.totalorder %s16_s0, 5   ;;  %s1369_s19 = smov %s1371_s21 }
 0x107   :  { %15 = sbr.rel (!%p13_p9) target bundleno = 2 (0x2), region = 115 }

// kernel: resnet18_forward.39
= control target key start
LH: loop header
LB: loop body
LE: loop exit
PB: predicated region body
PF: predicated region fallthrough
CT: control target
= control target key end

     0   :  { %v274_v49 = vmov 0.0   ;;  %vm149_vm0 = vcmask 1041408   ;;  %vm183_vm1 = vcmask 1040384   ;;  %s411_s1 = inlined_call_operand.vmem [shape: bf16[128,256], index: 1, kind: input, shape index: {}]   ;;  %s412_s0 = inlined_call_operand.vmem [shape: bf16[2,128], index: 0, kind: input, shape index: {}]   ;;  %s413_s2 = inlined_call_operand.vmem [shape: f32[1,256], index: 2, kind: input, shape index: {}]   ;;  %s414_s3 = inlined_call_operand.vmem [shape: f32[1,256], index: 3, kind: input, shape index: {}]   ;;  %s415_s4 = inlined_call_operand.vmem [shape: bf16[2,256], index: 4, kind: output, shape index: {}]  }
   0x1   :  { %v251_v0 = vld [vmem:[%s411_s1 + $0x70] sm:$0xf]  ;;  %v272_v1 = vld [vmem:[%s411_s1 + $0x74] sm:$0xf0]  ;;  %v271_v2 = vld [vmem:[%s411_s1 + $0x74] sm:$0xf] }
   0x2   :  { %v252_v3 = vor.u32 %v272_v1, %v251_v0  ;;  %v253_v4 = vld [vmem:[%s411_s1 + $0x78] sm:$0xf0]  ;;  %v243_v5 = vld [vmem:[%s411_s1 + $0x60] sm:$0xf]  ;;  %v270_v6 = vld [vmem:[%s411_s1 + $0x64] sm:$0xf0] }
   0x3   :  { %v256_v7 = vor.u32 %v271_v2, %v253_v4  ;;  %v269_v8 = vld [vmem:[%s411_s1 + $0x64] sm:$0xf]  ;;  %v245_v9 = vld [vmem:[%s411_s1 + $0x68] sm:$0xf0]  ;;  %v244_v10 = vor.u32 %v270_v6, %v243_v5  ;;  %v235_v12 = vld [vmem:[%s411_s1 + $0x50] sm:$0xf] }
   0x4   :  { %120 = vmatpush.bf16.msra.mxu0 %v252_v3  ;;  %v248_v11 = vor.u32 %v269_v8, %v245_v9  ;;  %v268_v13 = vld [vmem:[%s411_s1 + $0x54] sm:$0xf0]  ;;  %v267_v14 = vld [vmem:[%s411_s1 + $0x54] sm:$0xf]  ;;  %v237_v15 = vld [vmem:[%s411_s1 + $0x58] sm:$0xf0] }
   0x5   :  { %133 = vmatpush.bf16.msra.mxu1 %v256_v7  ;;  %v236_v16 = vor.u32 %v268_v13, %v235_v12  ;;  %v240_v17 = vor.u32 %v267_v14, %v237_v15  ;;  %v227_v18 = vld [vmem:[%s411_s1 + $0x40] sm:$0xf]  ;;  %v266_v19 = vld [vmem:[%s411_s1 + $0x44] sm:$0xf0]  ;;  %v265_v20 = vld [vmem:[%s411_s1 + $0x44] sm:$0xf] }
   0x6   :  { %v229_v21 = vld [vmem:[%s411_s1 + $0x48] sm:$0xf0]  ;;  %v228_v22 = vor.u32 %v266_v19, %v227_v18  ;;  %v219_v24 = vld [vmem:[%s411_s1 + $0x30] sm:$0xf]  ;;  %v264_v25 = vld [vmem:[%s411_s1 + $0x34] sm:$0xf0] }
   0x7   :  { %v232_v23 = vor.u32 %v265_v20, %v229_v21  ;;  %v263_v26 = vld [vmem:[%s411_s1 + $0x34] sm:$0xf]  ;;  %v221_v27 = vld [vmem:[%s411_s1 + $0x38] sm:$0xf0]  ;;  %v220_v28 = vor.u32 %v264_v25, %v219_v24  ;;  %v211_v30 = vld [vmem:[%s411_s1 + $0x20] sm:$0xf] }
   0x8   :  { %121 = vmatpush.bf16.msra.mxu0 %v244_v10  ;;  %v224_v29 = vor.u32 %v263_v26, %v221_v27  ;;  %v262_v31 = vld [vmem:[%s411_s1 + $0x24] sm:$0xf0]  ;;  %v261_v32 = vld [vmem:[%s411_s1 + $0x24] sm:$0xf]  ;;  %v213_v33 = vld [vmem:[%s411_s1 + $0x28] sm:$0xf0] }
   0x9   :  { %134 = vmatpush.bf16.msra.mxu1 %v248_v11  ;;  %v212_v34 = vor.u32 %v262_v31, %v211_v30  ;;  %v216_v35 = vor.u32 %v261_v32, %v213_v33  ;;  %v203_v36 = vld [vmem:[%s411_s1 + $0x10] sm:$0xf]  ;;  %v260_v37 = vld [vmem:[%s411_s1 + $0x14] sm:$0xf0]  ;;  %v259_v38 = vld [vmem:[%s411_s1 + $0x14] sm:$0xf] }
   0xa   :  { %v205_v39 = vld [vmem:[%s411_s1 + $0x18] sm:$0xf0]  ;;  %v204_v40 = vor.u32 %v260_v37, %v203_v36  ;;  %v195_v42 = vld [vmem:[%s411_s1] sm:$0xf]  ;;  %v258_v43 = vld [vmem:[%s411_s1 + $0x4] sm:$0xf0] }
   0xb   :  { %v208_v41 = vor.u32 %v259_v38, %v205_v39  ;;  %v257_v44 = vld [vmem:[%s411_s1 + $0x4] sm:$0xf]  ;;  %v197_v45 = vld [vmem:[%s411_s1 + $0x8] sm:$0xf0]  ;;  %v196_v46 = vor.u32 %v258_v43, %v195_v42  ;;  %v23_v48 = vld [vmem:[%s412_s0] sm:$0x1] }
   0xc   :  { %122 = vmatpush.bf16.msra.mxu0 %v236_v16  ;;  %v200_v47 = vor.u32 %v257_v44, %v197_v45  ;;  %21 = vst [vmem:[#allocation2] sm:$0xf] %v274_v49  ;;  %v158_v52 = vld [vmem:[%s413_s2] sm:$0x3] }
   0xd   :  { %135 = vmatpush.bf16.msra.mxu1 %v240_v17  ;;  %v166_v55 = vld [vmem:[%s414_s3] sm:$0x3]  ;;  %v161_v57 = vperm.slane %v158_v52, 1  ;;  %v160_v60 = vperm.slane %v158_v52, 0 }
   0xe   :  { %v169_v59 = vperm.slane %v166_v55, 1  ;;  %v168_v0 = vperm.slane %v166_v55, 0 }
   0xf   :  { %v162_v61 = vrot.slane %v161_v57, 6 }
  0x10   :  { %123 = vmatpush.bf16.msra.mxu0 %v228_v22  ;;  %v170_v1 = vrot.slane %v169_v59, 6 }
  0x11   :  { %136 = vmatpush.bf16.msra.mxu1 %v232_v23  ;;  %v163_v2 = vsel %vm149_vm0, %v160_v60, %v162_v61 }
  0x12   :  { %v171_v4 = vsel %vm149_vm0, %v168_v0, %v170_v1 }
  0x13   :  { %v22_v53 = vld [vmem:[#allocation2] sm:$0xf] }
  0x14   :  { %124 = vmatpush.bf16.msra.mxu0 %v220_v28 }
  0x15   :  { %137 = vmatpush.bf16.msra.mxu1 %v224_v29 }
  0x18   :  { %125 = vmatpush.bf16.msra.mxu0 %v212_v34 }
  0x19   :  { %138 = vmatpush.bf16.msra.mxu1 %v216_v35 }
  0x1c   :  { %126 = vmatpush.bf16.msra.mxu0 %v204_v40 }
  0x1d   :  { %139 = vmatpush.bf16.msra.mxu1 %v208_v41 }
  0x20   :  { %127 = vmatpush.bf16.msra.mxu0 %v196_v46 }
  0x21   :  { %140 = vmatpush.bf16.msra.mxu1 %v200_v47 }
  0x23   :  { %128 = vmatmul.bf16.vlgmr.msra.gmra.mxu0 %v23_v48 }
  0x24   :  { %141 = vmatmul.bf16.vlgmr.msra.gmra.mxu1 %v23_v48 }
  0xa0   :  { %v129_v50 = vpop.f32.mrf.mxu0 }
  0xa1   :  { %v142_v51 = vpop.f32.mrf.mxu1 }
  0xa2   :  { %v148_v54 = vrot.slane %v142_v51, 6 }
  0xa4   :  { %v150_v56 = vsel %vm149_vm0, %v129_v50, %v148_v54 }
  0xa5   :  { %v152_v58 = vadd.f32 %v150_v56, %v22_v53 }
  0xa7   :  { %153 = vst [vmem:[#allocation2] sm:$0xf] %v152_v58 }
  0xa8   :  { %v131_v62 = vpop.f32.mrf.mxu0 }
  0xa9   :  { %v144_v63 = vpop.f32.mrf.mxu1 }
  0xae   :  { %v157_v3 = vld [vmem:[#allocation2] sm:$0xf] }
  0xaf   :  { %v165_v5 = vmul.f32 %v163_v2, %v157_v3 }
  0xb1   :  { %v173_v6 = vadd.f32 %v171_v4, %v165_v5 }
  0xb3   :  { %175 = vst [vmem:[#allocation1] ss:$4 sm:$0xff] %v173_v6 }
  0xba   :  { %v176_v7 = vld.sshfl [vmem:[#allocation1] sm:$0xff pattern:$0x73625140]  ;;  %v177_v8 = vld.sshfl [vmem:[#allocation1 + $0x8] sm:$0xff pattern:$0x73625140] }
  0xbb   :  { %v180_v9 = vpack.c.bf16 %v177_v8, %v176_v7 }
  0xbd   :  { %v182_v10 = vrot.slane %v180_v9, 3 }
  0xbf   :  { %v186_v11 = vsel %vm183_vm1, %v180_v9, %v182_v10 }
  0xc0   :  { %188 = vst [vmem:[%s415_s4] sm:$0x3] %v186_v11 }

// kernel: resnet18_forward.40
= control target key start
LH: loop header
LB: loop body
LE: loop exit
PB: predicated region body
PF: predicated region fallthrough
CT: control target
= control target key end

     0   :  { %s1893_s18 = smov 0   ;;  %s1895_s19 = smov 0   ;;  %s2173_s0 = inlined_call_operand.vmem [shape: bf16[2,2304], index: 0, kind: input, shape index: {}]   ;;  %s2174_s1 = inlined_call_operand.vmem [shape: bf16[2304,256], index: 1, kind: input, shape index: {}]   ;;  %s2175_s2 = inlined_call_operand.vmem [shape: f32[1,256], index: 2, kind: input, shape index: {}]   ;;  %s2176_s3 = inlined_call_operand.vmem [shape: f32[1,256], index: 3, kind: input, shape index: {}]   ;;  %s2177_s4 = inlined_call_operand.vmem [shape: bf16[2,256], index: 4, kind: input, shape index: {}]   ;;  %s2178_s5 = inlined_call_operand.vmem [shape: bf16[2,256], index: 5, kind: output, shape index: {}]  }
   0x1   :  { %s1897_s20 = smov 0  }
   0x2 LB: > { %s27_s21 = sadd.s32 1, %s1856_s19  ;;  %p1323_p0 = scmp.ge.s32.totalorder %s1860_s20, 1  ;;  %s1860_s20 = sphi %s1897_s20, %s15_s20   ;;  %s1856_s19 = sphi %s1895_s19, %s2180_s19   ;;  %s1852_s18 = sphi %s1893_s18, %s2179_s18  }
   0x3   : > { %p28_p1 = scmp.ge.s32.totalorder %s27_s21, 3  ;;  %p269_p2 = scmp.lt.s32.totalorder %s1860_s20, 4 }
   0x5   : > { %s2182_s21 = smov (%p28_p1, %s27_s21), 0  ;;  %p270_p3 = pnand %p1323_p0, %p269_p2 }
   0x6   : > { %s329_s22 = smul.u32 (!%p270_p3), 6, %s1852_s18  ;;  %p1326_p6 = scmp.ne.s32.totalorder (!%p270_p3), %s1852_s18, 0 }
   0x7   : > { %273 = sbr.rel (%p270_p3) target bundleno = 292 (0x124), region = 40 }
   0x8   : > { %s338_s23 = smul.u32 (!%p270_p3), 96, %s1852_s18  ;;  %p332_p4 = scmp.lt.s32.totalorder (!%p270_p3), %s329_s22, 17 }
   0xa   : > { %p340_p5 = scmp.lt.s32.totalorder (!%p270_p3), %s338_s23, 287 }
   0xc   : > { %s2184_s22 = smov (!%p332_p4, %s329_s22), 17  ;;  %s2186_s23 = smov (!%p340_p5, %s338_s23), 287 }
   0xd   : > { %s336_s26 = scalar_lea.vmem %s2173_s0, %s2184_s22  ;;  %s1716_s27 = sshll.u32 %s2186_s23, 3 }
   0xe   : > { %s1924_s30 = scalar_lea.vmem %s2174_s1, %s1716_s27  ;;  %381 = sbr.rel (%p1326_p6) target bundleno = 21 (0x15), region = 44 }
  0x13   : > { %v1862_v0 = vmov 0.0  }
  0x14   : > { %382 = vst [vmem:[#allocation2] sm:$0xf] %v1862_v0 }
  0x15 PF: > { %v1385_v1 = vld [vmem:[%s1924_s30 + $0x70] sm:$0xf]  ;;  %v1732_v2 = vld [vmem:[%s1924_s30 + $0x74] sm:$0xf0]  ;;  %v1377_v12 = vld [vmem:[%s1924_s30 + $0x60] sm:$0xf] }
  0x16   : > { %v1449_v3 = vld [vmem:[%s1924_s30 + $0xf0] sm:$0xf]  ;;  %v1386_v4 = vor.u32 %v1732_v2, %v1385_v1  ;;  %v1748_v5 = vld [vmem:[%s1924_s30 + $0xf4] sm:$0xf0]  ;;  %v1730_v14 = vld [vmem:[%s1924_s30 + $0x64] sm:$0xf0] }
  0x17   : > { %v1513_v6 = vld [vmem:[%s1924_s30 + $0x170] sm:$0xf]  ;;  %v1764_v7 = vld [vmem:[%s1924_s30 + $0x174] sm:$0xf0]  ;;  %v1450_v8 = vor.u32 %v1748_v5, %v1449_v3  ;;  %v1441_v15 = vld [vmem:[%s1924_s30 + $0xe0] sm:$0xf]  ;;  %v1378_v17 = vor.u32 %v1730_v14, %v1377_v12 }
  0x18   : > { %v1514_v9 = vor.u32 %v1764_v7, %v1513_v6  ;;  %v1577_v10 = vld [vmem:[%s1924_s30 + $0x1f0] sm:$0xf]  ;;  %v1780_v11 = vld [vmem:[%s1924_s30 + $0x1f4] sm:$0xf0]  ;;  %975 = vmatpush.bf16.msra.mxu0 %v1386_v4  ;;  %v1746_v16 = vld [vmem:[%s1924_s30 + $0xe4] sm:$0xf0] }
  0x19   : > { %v1578_v13 = vor.u32 %v1780_v11, %v1577_v10  ;;  %988 = vmatpush.bf16.msra.mxu1 %v1450_v8  ;;  %v1442_v18 = vor.u32 %v1746_v16, %v1441_v15  ;;  %v1505_v19 = vld [vmem:[%s1924_s30 + $0x160] sm:$0xf]  ;;  %v1762_v20 = vld [vmem:[%s1924_s30 + $0x164] sm:$0xf0]  ;;  %v1369_v24 = vld [vmem:[%s1924_s30 + $0x50] sm:$0xf] }
  0x1a   : > { %1001 = vmatpush.bf16.msra.mxu2 %v1514_v9  ;;  %v1569_v21 = vld [vmem:[%s1924_s30 + $0x1e0] sm:$0xf]  ;;  %v1506_v22 = vor.u32 %v1762_v20, %v1505_v19  ;;  %v1778_v23 = vld [vmem:[%s1924_s30 + $0x1e4] sm:$0xf0]  ;;  %v1728_v25 = vld [vmem:[%s1924_s30 + $0x54] sm:$0xf0] }
  0x1b   : > { %1014 = vmatpush.bf16.msra.mxu3 %v1578_v13  ;;  %v1570_v26 = vor.u32 %v1778_v23, %v1569_v21  ;;  %v1433_v27 = vld [vmem:[%s1924_s30 + $0xd0] sm:$0xf]  ;;  %v1744_v28 = vld [vmem:[%s1924_s30 + $0xd4] sm:$0xf0]  ;;  %v1370_v30 = vor.u32 %v1728_v25, %v1369_v24  ;;  %v1361_v36 = vld [vmem:[%s1924_s30 + $0x40] sm:$0xf] }
  0x1c   : > { %v1497_v29 = vld [vmem:[%s1924_s30 + $0x150] sm:$0xf]  ;;  %976 = vmatpush.bf16.msra.mxu0 %v1378_v17  ;;  %v1760_v31 = vld [vmem:[%s1924_s30 + $0x154] sm:$0xf0]  ;;  %v1434_v34 = vor.u32 %v1744_v28, %v1433_v27  ;;  %v1726_v37 = vld [vmem:[%s1924_s30 + $0x44] sm:$0xf0] }
  0x1d   : > { %v1561_v32 = vld [vmem:[%s1924_s30 + $0x1d0] sm:$0xf]  ;;  %v1776_v33 = vld [vmem:[%s1924_s30 + $0x1d4] sm:$0xf0]  ;;  %989 = vmatpush.bf16.msra.mxu1 %v1442_v18  ;;  %v1498_v35 = vor.u32 %v1760_v31, %v1497_v29  ;;  %v1425_v38 = vld [vmem:[%s1924_s30 + $0xc0] sm:$0xf]  ;;  %v1362_v45 = vor.u32 %v1726_v37, %v1361_v36 }
  0x1e   : > { %1002 = vmatpush.bf16.msra.mxu2 %v1506_v22  ;;  %v1562_v39 = vor.u32 %v1776_v33, %v1561_v32  ;;  %v1742_v40 = vld [vmem:[%s1924_s30 + $0xc4] sm:$0xf0]  ;;  %v1489_v41 = vld [vmem:[%s1924_s30 + $0x140] sm:$0xf]  ;;  %v1353_v48 = vld [vmem:[%s1924_s30 + $0x30] sm:$0xf] }
  0x1f   : > { %1015 = vmatpush.bf16.msra.mxu3 %v1570_v26  ;;  %v1758_v42 = vld [vmem:[%s1924_s30 + $0x144] sm:$0xf0]  ;;  %v1553_v43 = vld [vmem:[%s1924_s30 + $0x1c0] sm:$0xf]  ;;  %v1426_v46 = vor.u32 %v1742_v40, %v1425_v38  ;;  %v1724_v49 = vld [vmem:[%s1924_s30 + $0x34] sm:$0xf0] }
  0x20   : > { %v1774_v44 = vld [vmem:[%s1924_s30 + $0x1c4] sm:$0xf0]  ;;  %977 = vmatpush.bf16.msra.mxu0 %v1370_v30  ;;  %v1490_v47 = vor.u32 %v1758_v42, %v1489_v41  ;;  %v1417_v50 = vld [vmem:[%s1924_s30 + $0xb0] sm:$0xf]  ;;  %v1740_v52 = vld [vmem:[%s1924_s30 + $0xb4] sm:$0xf0]  ;;  %v1354_v57 = vor.u32 %v1724_v49, %v1353_v48 }
  0x21   : > { %990 = vmatpush.bf16.msra.mxu1 %v1434_v34  ;;  %v1554_v51 = vor.u32 %v1774_v44, %v1553_v43  ;;  %v1481_v53 = vld [vmem:[%s1924_s30 + $0x130] sm:$0xf]  ;;  %v1756_v54 = vld [vmem:[%s1924_s30 + $0x134] sm:$0xf0]  ;;  %v1418_v58 = vor.u32 %v1740_v52, %v1417_v50  ;;  %v1345_v60 = vld [vmem:[%s1924_s30 + $0x20] sm:$0xf] }
  0x22   : > { %1003 = vmatpush.bf16.msra.mxu2 %v1498_v35  ;;  %v1545_v55 = vld [vmem:[%s1924_s30 + $0x1b0] sm:$0xf]  ;;  %v1772_v56 = vld [vmem:[%s1924_s30 + $0x1b4] sm:$0xf0]  ;;  %v1482_v59 = vor.u32 %v1756_v54, %v1481_v53  ;;  %v1722_v61 = vld [vmem:[%s1924_s30 + $0x24] sm:$0xf0] }
  0x23   : > { %1016 = vmatpush.bf16.msra.mxu3 %v1562_v39  ;;  %v1409_v62 = vld [vmem:[%s1924_s30 + $0xa0] sm:$0xf]  ;;  %v1546_v63 = vor.u32 %v1772_v56, %v1545_v55  ;;  %v1738_v0 = vld [vmem:[%s1924_s30 + $0xa4] sm:$0xf0]  ;;  %v1346_v5 = vor.u32 %v1722_v61, %v1345_v60  ;;  %v1337_v8 = vld [vmem:[%s1924_s30 + $0x10] sm:$0xf] }
  0x24   : > { %978 = vmatpush.bf16.msra.mxu0 %v1362_v45  ;;  %v1473_v1 = vld [vmem:[%s1924_s30 + $0x120] sm:$0xf]  ;;  %v1754_v2 = vld [vmem:[%s1924_s30 + $0x124] sm:$0xf0]  ;;  %v1410_v6 = vor.u32 %v1738_v0, %v1409_v62  ;;  %v1720_v9 = vld [vmem:[%s1924_s30 + $0x14] sm:$0xf0] }
  0x25   : > { %991 = vmatpush.bf16.msra.mxu1 %v1426_v46  ;;  %v1537_v3 = vld [vmem:[%s1924_s30 + $0x1a0] sm:$0xf]  ;;  %v1770_v4 = vld [vmem:[%s1924_s30 + $0x1a4] sm:$0xf0]  ;;  %v1474_v7 = vor.u32 %v1754_v2, %v1473_v1  ;;  %v1401_v10 = vld [vmem:[%s1924_s30 + $0x90] sm:$0xf]  ;;  %v1338_v17 = vor.u32 %v1720_v9, %v1337_v8 }
  0x26   : > { %1004 = vmatpush.bf16.msra.mxu2 %v1490_v47  ;;  %v1538_v11 = vor.u32 %v1770_v4, %v1537_v3  ;;  %v1736_v12 = vld [vmem:[%s1924_s30 + $0x94] sm:$0xf0]  ;;  %v1465_v13 = vld [vmem:[%s1924_s30 + $0x110] sm:$0xf]  ;;  %v1329_v18 = vld [vmem:[%s1924_s30] sm:$0xf] }
  0x27   : > { %1017 = vmatpush.bf16.msra.mxu3 %v1554_v51  ;;  %v1752_v14 = vld [vmem:[%s1924_s30 + $0x114] sm:$0xf0]  ;;  %v1529_v15 = vld [vmem:[%s1924_s30 + $0x190] sm:$0xf]  ;;  %v1718_v19 = vld [vmem:[%s1924_s30 + $0x4] sm:$0xf0]  ;;  %v1402_v20 = vor.u32 %v1736_v12, %v1401_v10 }
  0x28   : > { %979 = vmatpush.bf16.msra.mxu0 %v1354_v57  ;;  %v1768_v16 = vld [vmem:[%s1924_s30 + $0x194] sm:$0xf0]  ;;  %v1466_v21 = vor.u32 %v1752_v14, %v1465_v13  ;;  %v1393_v22 = vld [vmem:[%s1924_s30 + $0x80] sm:$0xf]  ;;  %v1734_v23 = vld [vmem:[%s1924_s30 + $0x84] sm:$0xf0]  ;;  %v1330_v32 = vor.u32 %v1718_v19, %v1329_v18 }
  0x29   : > { %992 = vmatpush.bf16.msra.mxu1 %v1418_v58  ;;  %v1457_v24 = vld [vmem:[%s1924_s30 + $0x100] sm:$0xf]  ;;  %v1530_v25 = vor.u32 %v1768_v16, %v1529_v15  ;;  %v1750_v26 = vld [vmem:[%s1924_s30 + $0x104] sm:$0xf0]  ;;  %v1641_v29 = vld [vmem:[%s1924_s30 + $0x270] sm:$0xf]  ;;  %v1394_v36 = vor.u32 %v1734_v23, %v1393_v22 }
  0x2a   : > { %1005 = vmatpush.bf16.msra.mxu2 %v1482_v59  ;;  %v1521_v27 = vld [vmem:[%s1924_s30 + $0x180] sm:$0xf]  ;;  %v1766_v28 = vld [vmem:[%s1924_s30 + $0x184] sm:$0xf0]  ;;  %v1796_v30 = vld [vmem:[%s1924_s30 + $0x274] sm:$0xf0]  ;;  %v1458_v37 = vor.u32 %v1750_v26, %v1457_v24 }
  0x2b   : > { %1018 = vmatpush.bf16.msra.mxu3 %v1546_v63  ;;  %v1705_v31 = vld [vmem:[%s1924_s30 + $0x2f0] sm:$0xf]  ;;  %v1812_v33 = vld [vmem:[%s1924_s30 + $0x2f4] sm:$0xf0]  ;;  %v1731_v34 = vld [vmem:[%s1924_s30 + $0x74] sm:$0xf]  ;;  %v1522_v40 = vor.u32 %v1766_v28, %v1521_v27  ;;  %v1642_v41 = vor.u32 %v1796_v30, %v1641_v29 }
  0x2c   : > { %980 = vmatpush.bf16.msra.mxu0 %v1346_v5  ;;  %v1387_v35 = vld [vmem:[%s1924_s30 + $0x78] sm:$0xf0]  ;;  %v1747_v38 = vld [vmem:[%s1924_s30 + $0xf4] sm:$0xf]  ;;  %v1706_v42 = vor.u32 %v1812_v33, %v1705_v31  ;;  %v1633_v44 = vld [vmem:[%s1924_s30 + $0x260] sm:$0xf] }
  0x2d   : > { %993 = vmatpush.bf16.msra.mxu1 %v1410_v6  ;;  %v1451_v39 = vld [vmem:[%s1924_s30 + $0xf8] sm:$0xf0]  ;;  %v1390_v43 = vor.u32 %v1731_v34, %v1387_v35  ;;  %v1794_v45 = vld [vmem:[%s1924_s30 + $0x264] sm:$0xf0]  ;;  %v1697_v46 = vld [vmem:[%s1924_s30 + $0x2e0] sm:$0xf] }
  0x2e   : > { %1006 = vmatpush.bf16.msra.mxu2 %v1474_v7  ;;  %v1454_v47 = vor.u32 %v1747_v38, %v1451_v39  ;;  %v1810_v48 = vld [vmem:[%s1924_s30 + $0x2e4] sm:$0xf0]  ;;  %v1729_v49 = vld [vmem:[%s1924_s30 + $0x64] sm:$0xf]  ;;  %v1379_v50 = vld [vmem:[%s1924_s30 + $0x68] sm:$0xf0]  ;;  %v1634_v53 = vor.u32 %v1794_v45, %v1633_v44 }
  0x2f   : > { %1019 = vmatpush.bf16.msra.mxu3 %v1538_v11  ;;  %v1745_v51 = vld [vmem:[%s1924_s30 + $0xe4] sm:$0xf]  ;;  %v1443_v52 = vld [vmem:[%s1924_s30 + $0xe8] sm:$0xf0]  ;;  %v1625_v54 = vld [vmem:[%s1924_s30 + $0x250] sm:$0xf]  ;;  %v1698_v56 = vor.u32 %v1810_v48, %v1697_v46  ;;  %v1382_v57 = vor.u32 %v1729_v49, %v1379_v50 }
  0x30   : > { %981 = vmatpush.bf16.msra.mxu0 %v1338_v17  ;;  %v1792_v55 = vld [vmem:[%s1924_s30 + $0x254] sm:$0xf0]  ;;  %v1689_v58 = vld [vmem:[%s1924_s30 + $0x2d0] sm:$0xf]  ;;  %v384_v60 = vld [vmem:[%s336_s26] sm:$0x3f]  ;;  %v1446_v61 = vor.u32 %v1745_v51, %v1443_v52 }
  0x31   : > { %994 = vmatpush.bf16.msra.mxu1 %v1402_v20  ;;  %v1808_v59 = vld [vmem:[%s1924_s30 + $0x2d4] sm:$0xf0]  ;;  %v1727_v62 = vld [vmem:[%s1924_s30 + $0x54] sm:$0xf]  ;;  %v1371_v63 = vld [vmem:[%s1924_s30 + $0x58] sm:$0xf0]  ;;  %v1626_v2 = vor.u32 %v1792_v55, %v1625_v54 }
  0x32   : > { %1007 = vmatpush.bf16.msra.mxu2 %v1466_v21  ;;  %482 = vst [vmem:[#allocation1] ss:$9 sm:$0xff] %v384_v60  ;;  %v1743_v0 = vld [vmem:[%s1924_s30 + $0xd4] sm:$0xf]  ;;  %v1435_v1 = vld [vmem:[%s1924_s30 + $0xd8] sm:$0xf0]  ;;  %v1690_v3 = vor.u32 %v1808_v59, %v1689_v58  ;;  %v1374_v4 = vor.u32 %v1727_v62, %v1371_v63 }
  0x33   : > { %1020 = vmatpush.bf16.msra.mxu3 %v1530_v25  ;;  %v1617_v5 = vld [vmem:[%s1924_s30 + $0x240] sm:$0xf]  ;;  %v1790_v6 = vld [vmem:[%s1924_s30 + $0x244] sm:$0xf0]  ;;  %v1438_v8 = vor.u32 %v1743_v0, %v1435_v1  ;;  %v1725_v10 = vld [vmem:[%s1924_s30 + $0x44] sm:$0xf] }
  0x34   : > { %982 = vmatpush.bf16.msra.mxu0 %v1330_v32  ;;  %v1681_v7 = vld [vmem:[%s1924_s30 + $0x2c0] sm:$0xf]  ;;  %v1806_v9 = vld [vmem:[%s1924_s30 + $0x2c4] sm:$0xf0]  ;;  %v1363_v11 = vld [vmem:[%s1924_s30 + $0x48] sm:$0xf0]  ;;  %v1618_v15 = vor.u32 %v1790_v6, %v1617_v5 }
  0x35   : > { %995 = vmatpush.bf16.msra.mxu1 %v1394_v36  ;;  %v1741_v12 = vld [vmem:[%s1924_s30 + $0xc4] sm:$0xf]  ;;  %v1427_v13 = vld [vmem:[%s1924_s30 + $0xc8] sm:$0xf0]  ;;  %v1609_v14 = vld [vmem:[%s1924_s30 + $0x230] sm:$0xf]  ;;  %v1682_v19 = vor.u32 %v1806_v9, %v1681_v7  ;;  %v1366_v20 = vor.u32 %v1725_v10, %v1363_v11 }
  0x36   : > { %1008 = vmatpush.bf16.msra.mxu2 %v1458_v37  ;;  %v1788_v16 = vld [vmem:[%s1924_s30 + $0x234] sm:$0xf0]  ;;  %v1673_v17 = vld [vmem:[%s1924_s30 + $0x2b0] sm:$0xf]  ;;  %v1430_v24 = vor.u32 %v1741_v12, %v1427_v13  ;;  %v1723_v25 = vld [vmem:[%s1924_s30 + $0x34] sm:$0xf] }
  0x37   : > { %1021 = vmatpush.bf16.msra.mxu3 %v1522_v40  ;;  %v1804_v18 = vld [vmem:[%s1924_s30 + $0x2b4] sm:$0xf0]  ;;  %v1355_v26 = vld [vmem:[%s1924_s30 + $0x38] sm:$0xf0]  ;;  %v1739_v28 = vld [vmem:[%s1924_s30 + $0xb4] sm:$0xf]  ;;  %v1610_v30 = vor.u32 %v1788_v16, %v1609_v14 }
  0x38   : > { %1027 = vmatpush.bf16.msrb.mxu0 %v1642_v41  ;;  %v1419_v29 = vld [vmem:[%s1924_s30 + $0xb8] sm:$0xf0]  ;;  %v1674_v31 = vor.u32 %v1804_v18, %v1673_v17  ;;  %v1358_v32 = vor.u32 %v1723_v25, %v1355_v26  ;;  %v1601_v33 = vld [vmem:[%s1924_s30 + $0x220] sm:$0xf]  ;;  %v1786_v34 = vld [vmem:[%s1924_s30 + $0x224] sm:$0xf0] }
  0x39   : > { %1040 = vmatpush.bf16.msrb.mxu1 %v1706_v42  ;;  %v2032_v21 = vld [vmem:[#allocation1] sm:$0xff]  ;;  %v2034_v22 = vld [vmem:[#allocation1 + $0x12] sm:$0xff]  ;;  %v2036_v23 = vld [vmem:[#allocation1 + $0x9] sm:$0xff]  ;;  %v1422_v36 = vor.u32 %v1739_v28, %v1419_v29  ;;  %v1602_v42 = vor.u32 %v1786_v34, %v1601_v33  ;;  %vm1134_vm0 = vcmask 1041408   ;;  %p1711_p7 = scmp.ne.s32.totalorder %s1852_s18, 2 }
  0x3a   : > { %1053 = vmatpush.bf16.msrb.mxu2 %v1390_v43  ;;  %983 = vmatmul.bf16.vlgmr.msra.gmra.mxu0 %v2032_v21  ;;  %v2041_v27 = vld [vmem:[#allocation1 + $0x1b] sm:$0xff]  ;;  %v1802_v37 = vld [vmem:[%s1924_s30 + $0x2a4] sm:$0xf0]  ;;  %v1721_v38 = vld [vmem:[%s1924_s30 + $0x24] sm:$0xf] }
  0x3b   : > { %1066 = vmatpush.bf16.msrb.mxu3 %v1454_v47  ;;  %1009 = vmatmul.bf16.vlgmr.msra.gmra.mxu2 %v2034_v22  ;;  %v1665_v35 = vld [vmem:[%s1924_s30 + $0x2a0] sm:$0xf]  ;;  %v1347_v39 = vld [vmem:[%s1924_s30 + $0x28] sm:$0xf0]  ;;  %v1737_v40 = vld [vmem:[%s1924_s30 + $0xa4] sm:$0xf] }
  0x3c   : > { %1028 = vmatpush.bf16.msrb.mxu0 %v1634_v53  ;;  %996 = vmatmul.bf16.vlgmr.msra.gmra.mxu1 %v2036_v23  ;;  %v1411_v41 = vld [vmem:[%s1924_s30 + $0xa8] sm:$0xf0]  ;;  %v1666_v43 = vor.u32 %v1802_v37, %v1665_v35  ;;  %v1350_v44 = vor.u32 %v1721_v38, %v1347_v39  ;;  %v1593_v45 = vld [vmem:[%s1924_s30 + $0x210] sm:$0xf]  ;;  %v1784_v46 = vld [vmem:[%s1924_s30 + $0x214] sm:$0xf0] }
  0x3d   : > { %1041 = vmatpush.bf16.msrb.mxu1 %v1698_v56  ;;  %1022 = vmatmul.bf16.vlgmr.msra.gmra.mxu3 %v2041_v27  ;;  %v1657_v47 = vld [vmem:[%s1924_s30 + $0x290] sm:$0xf]  ;;  %v1414_v48 = vor.u32 %v1737_v40, %v1411_v41  ;;  %v1800_v49 = vld [vmem:[%s1924_s30 + $0x294] sm:$0xf0]  ;;  %v1719_v50 = vld [vmem:[%s1924_s30 + $0x14] sm:$0xf]  ;;  %v1594_v54 = vor.u32 %v1784_v46, %v1593_v45 }
  0x3e   : > { %1054 = vmatpush.bf16.msrb.mxu2 %v1382_v57  ;;  %v1339_v51 = vld [vmem:[%s1924_s30 + $0x18] sm:$0xf0]  ;;  %v1735_v52 = vld [vmem:[%s1924_s30 + $0x94] sm:$0xf]  ;;  %v1585_v55 = vld [vmem:[%s1924_s30 + $0x200] sm:$0xf]  ;;  %v1658_v57 = vor.u32 %v1800_v49, %v1657_v47 }
  0x3f   : > { %1067 = vmatpush.bf16.msrb.mxu3 %v1446_v61  ;;  %v1403_v53 = vld [vmem:[%s1924_s30 + $0x98] sm:$0xf0]  ;;  %v1782_v56 = vld [vmem:[%s1924_s30 + $0x204] sm:$0xf0]  ;;  %v1342_v58 = vor.u32 %v1719_v50, %v1339_v51  ;;  %v1649_v59 = vld [vmem:[%s1924_s30 + $0x280] sm:$0xf] }
  0x40   : > { %1029 = vmatpush.bf16.msrb.mxu0 %v1626_v2  ;;  %v1798_v60 = vld [vmem:[%s1924_s30 + $0x284] sm:$0xf0]  ;;  %v1717_v61 = vld [vmem:[%s1924_s30 + $0x4] sm:$0xf]  ;;  %v1406_v62 = vor.u32 %v1735_v52, %v1403_v53  ;;  %v1331_v63 = vld [vmem:[%s1924_s30 + $0x8] sm:$0xf0]  ;;  %v1586_v5 = vor.u32 %v1782_v56, %v1585_v55 }
  0x41   : > { %1042 = vmatpush.bf16.msrb.mxu1 %v1690_v3  ;;  %v1733_v0 = vld [vmem:[%s1924_s30 + $0x84] sm:$0xf]  ;;  %v1395_v1 = vld [vmem:[%s1924_s30 + $0x88] sm:$0xf0]  ;;  %v1763_v2 = vld [vmem:[%s1924_s30 + $0x174] sm:$0xf]  ;;  %v1650_v9 = vor.u32 %v1798_v60, %v1649_v59  ;;  %v1334_v10 = vor.u32 %v1717_v61, %v1331_v63 }
  0x42   : > { %1055 = vmatpush.bf16.msrb.mxu2 %v1374_v4  ;;  %v1515_v3 = vld [vmem:[%s1924_s30 + $0x178] sm:$0xf0]  ;;  %v1779_v4 = vld [vmem:[%s1924_s30 + $0x1f4] sm:$0xf]  ;;  %v1398_v13 = vor.u32 %v1733_v0, %v1395_v1  ;;  %v1761_v17 = vld [vmem:[%s1924_s30 + $0x164] sm:$0xf] }
  0x43   : > { %1068 = vmatpush.bf16.msrb.mxu3 %v1438_v8  ;;  %v1579_v6 = vld [vmem:[%s1924_s30 + $0x1f8] sm:$0xf0]  ;;  %v1795_v7 = vld [vmem:[%s1924_s30 + $0x274] sm:$0xf]  ;;  %v1518_v14 = vor.u32 %v1763_v2, %v1515_v3  ;;  %v1507_v18 = vld [vmem:[%s1924_s30 + $0x168] sm:$0xf0] }
  0x44   : > { %1030 = vmatpush.bf16.msrb.mxu0 %v1618_v15  ;;  %v1643_v8 = vld [vmem:[%s1924_s30 + $0x278] sm:$0xf0]  ;;  %v1811_v11 = vld [vmem:[%s1924_s30 + $0x2f4] sm:$0xf]  ;;  %v1582_v15 = vor.u32 %v1779_v4, %v1579_v6  ;;  %v1793_v25 = vld [vmem:[%s1924_s30 + $0x264] sm:$0xf] }
  0x45   : > { %1043 = vmatpush.bf16.msrb.mxu1 %v1682_v19  ;;  %v1707_v12 = vld [vmem:[%s1924_s30 + $0x2f8] sm:$0xf0]  ;;  %v1646_v16 = vor.u32 %v1795_v7, %v1643_v8  ;;  %v1777_v19 = vld [vmem:[%s1924_s30 + $0x1e4] sm:$0xf]  ;;  %v1635_v26 = vld [vmem:[%s1924_s30 + $0x268] sm:$0xf0] }
  0x46   : > { %1056 = vmatpush.bf16.msrb.mxu2 %v1366_v20  ;;  %v1710_v20 = vor.u32 %v1811_v11, %v1707_v12  ;;  %v1809_v28 = vld [vmem:[%s1924_s30 + $0x2e4] sm:$0xf]  ;;  %v1699_v29 = vld [vmem:[%s1924_s30 + $0x2e8] sm:$0xf0]  ;;  %v1638_v34 = vor.u32 %v1793_v25, %v1635_v26  ;;  %v1759_v35 = vld [vmem:[%s1924_s30 + $0x154] sm:$0xf] }
  0x47   : > { %1069 = vmatpush.bf16.msrb.mxu3 %v1430_v24  ;;  %v1571_v24 = vld [vmem:[%s1924_s30 + $0x1e8] sm:$0xf0]  ;;  %v1775_v37 = vld [vmem:[%s1924_s30 + $0x1d4] sm:$0xf]  ;;  %v1702_v38 = vor.u32 %v1809_v28, %v1699_v29  ;;  %v1563_v39 = vld [vmem:[%s1924_s30 + $0x1d8] sm:$0xf0] }
  0x48   : > { %1031 = vmatpush.bf16.msrb.mxu0 %v1610_v30  ;;  %v2088_v30 = vld [vmem:[#allocation1 + $0x24] sm:$0xff]  ;;  %v1574_v33 = vor.u32 %v1777_v19, %v1571_v24  ;;  %v1791_v40 = vld [vmem:[%s1924_s30 + $0x254] sm:$0xf]  ;;  %v1627_v41 = vld [vmem:[%s1924_s30 + $0x258] sm:$0xf0]  ;;  %v1566_v45 = vor.u32 %v1775_v37, %v1563_v39 }
  0x49   : > { %1044 = vmatpush.bf16.msrb.mxu1 %v1674_v31  ;;  %v1510_v31 = vor.u32 %v1761_v17, %v1507_v18  ;;  %v1630_v46 = vor.u32 %v1791_v40, %v1627_v41  ;;  %v1757_v47 = vld [vmem:[%s1924_s30 + $0x144] sm:$0xf]  ;;  %v1555_v50 = vld [vmem:[%s1924_s30 + $0x1c8] sm:$0xf0]  ;;  %v1771_v59 = vld [vmem:[%s1924_s30 + $0x1b4] sm:$0xf] }
  0x4a   : > { %1057 = vmatpush.bf16.msrb.mxu2 %v1358_v32  ;;  %v2090_v32 = vld [vmem:[#allocation1 + $0x2d] sm:$0xff]  ;;  %v1789_v51 = vld [vmem:[%s1924_s30 + $0x244] sm:$0xf]  ;;  %v1547_v61 = vld [vmem:[%s1924_s30 + $0x1b8] sm:$0xf0] }
  0x4b   : > { %1070 = vmatpush.bf16.msrb.mxu3 %v1422_v36  ;;  %v1499_v36 = vld [vmem:[%s1924_s30 + $0x158] sm:$0xf0]  ;;  %v1619_v52 = vld [vmem:[%s1924_s30 + $0x248] sm:$0xf0]  ;;  %v1805_v53 = vld [vmem:[%s1924_s30 + $0x2c4] sm:$0xf]  ;;  %v1550_v3 = vor.u32 %v1771_v59, %v1547_v61 }
  0x4c   : > { %1032 = vmatpush.bf16.msrb.mxu0 %v1602_v42  ;;  %v1807_v42 = vld [vmem:[%s1924_s30 + $0x2d4] sm:$0xf]  ;;  %v1622_v56 = vor.u32 %v1789_v51, %v1619_v52  ;;  %v1611_v63 = vld [vmem:[%s1924_s30 + $0x238] sm:$0xf0]  ;;  %v1475_v6 = vld [vmem:[%s1924_s30 + $0x128] sm:$0xf0] }
  0x4d   : > { %1045 = vmatpush.bf16.msrb.mxu1 %v1666_v43  ;;  %v1691_v43 = vld [vmem:[%s1924_s30 + $0x2d8] sm:$0xf0]  ;;  %v1803_v0 = vld [vmem:[%s1924_s30 + $0x2b4] sm:$0xf]  ;;  %v1769_v7 = vld [vmem:[%s1924_s30 + $0x1a4] sm:$0xf] }
  0x4e   : > { %1058 = vmatpush.bf16.msrb.mxu2 %v1350_v44  ;;  %v1502_v44 = vor.u32 %v1759_v35, %v1499_v36  ;;  %v1694_v49 = vor.u32 %v1807_v42, %v1691_v43  ;;  %v1675_v1 = vld [vmem:[%s1924_s30 + $0x2b8] sm:$0xf0]  ;;  %v1603_v11 = vld [vmem:[%s1924_s30 + $0x228] sm:$0xf0]  ;;  %v1801_v12 = vld [vmem:[%s1924_s30 + $0x2a4] sm:$0xf] }
  0x4f   : > { %1071 = vmatpush.bf16.msrb.mxu3 %v1414_v48  ;;  %v1773_v48 = vld [vmem:[%s1924_s30 + $0x1c4] sm:$0xf]  ;;  %v1678_v8 = vor.u32 %v1803_v0, %v1675_v1  ;;  %v1751_v17 = vld [vmem:[%s1924_s30 + $0x114] sm:$0xf]  ;;  %v1467_v18 = vld [vmem:[%s1924_s30 + $0x118] sm:$0xf0] }
  0x50   : > { %1033 = vmatpush.bf16.msrb.mxu0 %v1594_v54  ;;  %v1558_v55 = vor.u32 %v1773_v48, %v1555_v50  ;;  %v1767_v19 = vld [vmem:[%s1924_s30 + $0x194] sm:$0xf]  ;;  %v1531_v24 = vld [vmem:[%s1924_s30 + $0x198] sm:$0xf0]  ;;  %v1749_v35 = vld [vmem:[%s1924_s30 + $0x104] sm:$0xf] }
  0x51   : > { %1046 = vmatpush.bf16.msrb.mxu1 %v1658_v57  ;;  %v1755_v57 = vld [vmem:[%s1924_s30 + $0x134] sm:$0xf]  ;;  %v1595_v26 = vld [vmem:[%s1924_s30 + $0x218] sm:$0xf0]  ;;  %v1459_v36 = vld [vmem:[%s1924_s30 + $0x108] sm:$0xf0] }
  0x52   : > { %1059 = vmatpush.bf16.msrb.mxu2 %v1342_v58  ;;  %v1483_v58 = vld [vmem:[%s1924_s30 + $0x138] sm:$0xf0]  ;;  %v1783_v25 = vld [vmem:[%s1924_s30 + $0x214] sm:$0xf]  ;;  %v1765_v37 = vld [vmem:[%s1924_s30 + $0x184] sm:$0xf] }
  0x53   : > { %1072 = vmatpush.bf16.msrb.mxu3 %v1406_v62  ;;  %v1787_v62 = vld [vmem:[%s1924_s30 + $0x234] sm:$0xf]  ;;  %v1486_v2 = vor.u32 %v1755_v57, %v1483_v58  ;;  %v1659_v29 = vld [vmem:[%s1924_s30 + $0x298] sm:$0xf0]  ;;  %v1523_v39 = vld [vmem:[%s1924_s30 + $0x188] sm:$0xf0] }
  0x54   : > { %1034 = vmatpush.bf16.msrb.mxu0 %v1586_v5  ;;  %v1614_v4 = vor.u32 %v1787_v62, %v1611_v63  ;;  %v1753_v5 = vld [vmem:[%s1924_s30 + $0x124] sm:$0xf]  ;;  %v1799_v28 = vld [vmem:[%s1924_s30 + $0x294] sm:$0xf]  ;;  %v1587_v41 = vld [vmem:[%s1924_s30 + $0x208] sm:$0xf0] }
  0x55   : > { %1047 = vmatpush.bf16.msrb.mxu1 %v1650_v9  ;;  %v1539_v9 = vld [vmem:[%s1924_s30 + $0x1a8] sm:$0xf0]  ;;  %v1781_v40 = vld [vmem:[%s1924_s30 + $0x204] sm:$0xf] }
  0x56   : > { %1060 = vmatpush.bf16.msrb.mxu2 %v1334_v10  ;;  %v1785_v10 = vld [vmem:[%s1924_s30 + $0x224] sm:$0xf]  ;;  %v1651_v43 = vld [vmem:[%s1924_s30 + $0x288] sm:$0xf0] }
  0x57   : > { %1073 = vmatpush.bf16.msrb.mxu3 %v1398_v13  ;;  %1035 = vmatmul.bf16.vlgmr.msrb.gmra.mxu0 %v2088_v30  ;;  %v1667_v13 = vld [vmem:[%s1924_s30 + $0x2a8] sm:$0xf0]  ;;  %v1797_v42 = vld [vmem:[%s1924_s30 + $0x284] sm:$0xf] }
  0x58   : > { %1079 = vmatpush.bf16.msra.mxu0 %v1518_v14  ;;  %1048 = vmatmul.bf16.vlgmr.msrb.gmra.mxu1 %v2090_v32  ;;  %v1478_v14 = vor.u32 %v1753_v5, %v1475_v6 }
  0x59   : > { %1092 = vmatpush.bf16.msra.mxu1 %v1582_v15  ;;  %1061 = vmatmul.bf16.vlgmr.msrb.gmra.mxu2 %v2032_v21  ;;  %v1491_v21 = vld [vmem:[%s1924_s30 + $0x148] sm:$0xf0]  ;;  %v1542_v15 = vor.u32 %v1769_v7, %v1539_v9 }
  0x5a   : > { %1105 = vmatpush.bf16.msra.mxu2 %v1646_v16  ;;  %1074 = vmatmul.bf16.vlgmr.msrb.gmra.mxu3 %v2036_v23  ;;  %v1683_v23 = vld [vmem:[%s1924_s30 + $0x2c8] sm:$0xf0]  ;;  %v1494_v54 = vor.u32 %v1757_v47, %v1491_v21  ;;  %v1606_v16 = vor.u32 %v1785_v10, %v1603_v11  ;;  %v1654_v47 = vor.u32 %v1797_v42, %v1651_v43  ;;  %v383_v10 = vld [vmem:[#allocation2] sm:$0xf] }
  0x5b   : > { %1118 = vmatpush.bf16.msra.mxu3 %v1710_v20  ;;  %v1686_v60 = vor.u32 %v1805_v53, %v1683_v23  ;;  %v1670_v20 = vor.u32 %v1801_v12, %v1667_v13 }
  0x5c   : > { %1080 = vmatpush.bf16.msra.mxu0 %v1510_v31  ;;  %v1470_v31 = vor.u32 %v1751_v17, %v1467_v18 }
  0x5d   : > { %1093 = vmatpush.bf16.msra.mxu1 %v1574_v33  ;;  %v1534_v33 = vor.u32 %v1767_v19, %v1531_v24 }
  0x5e   : > { %1106 = vmatpush.bf16.msra.mxu2 %v1638_v34  ;;  %v1598_v34 = vor.u32 %v1783_v25, %v1595_v26 }
  0x5f   : > { %1119 = vmatpush.bf16.msra.mxu3 %v1702_v38  ;;  %v1662_v38 = vor.u32 %v1799_v28, %v1659_v29 }
  0x60   : > { %1081 = vmatpush.bf16.msra.mxu0 %v1502_v44  ;;  %v1462_v44 = vor.u32 %v1749_v35, %v1459_v36 }
  0x61   : > { %1094 = vmatpush.bf16.msra.mxu1 %v1566_v45  ;;  %v1526_v45 = vor.u32 %v1765_v37, %v1523_v39 }
  0x62   : > { %1107 = vmatpush.bf16.msra.mxu2 %v1630_v46  ;;  %v1590_v46 = vor.u32 %v1781_v40, %v1587_v41 }
  0x63   : > { %1120 = vmatpush.bf16.msra.mxu3 %v1694_v49 }
  0x64   : > { %1082 = vmatpush.bf16.msra.mxu0 %v1494_v54 }
  0x65   : > { %1095 = vmatpush.bf16.msra.mxu1 %v1558_v55 }
  0x66   : > { %1108 = vmatpush.bf16.msra.mxu2 %v1622_v56 }
  0x67   : > { %1121 = vmatpush.bf16.msra.mxu3 %v1686_v60 }
  0x68   : > { %1083 = vmatpush.bf16.msra.mxu0 %v1486_v2 }
  0x69   : > { %1096 = vmatpush.bf16.msra.mxu1 %v1550_v3 }
  0x6a   : > { %1109 = vmatpush.bf16.msra.mxu2 %v1614_v4 }
  0x6b   : > { %1122 = vmatpush.bf16.msra.mxu3 %v1678_v8 }
  0x6c   : > { %1084 = vmatpush.bf16.msra.mxu0 %v1478_v14 }
  0x6d   : > { %1097 = vmatpush.bf16.msra.mxu1 %v1542_v15 }
  0x6e   : > { %1110 = vmatpush.bf16.msra.mxu2 %v1606_v16 }
  0x6f   : > { %1123 = vmatpush.bf16.msra.mxu3 %v1670_v20 }
  0x70   : > { %1085 = vmatpush.bf16.msra.mxu0 %v1470_v31 }
  0x71   : > { %1098 = vmatpush.bf16.msra.mxu1 %v1534_v33 }
  0x72   : > { %1111 = vmatpush.bf16.msra.mxu2 %v1598_v34 }
  0x73   : > { %1124 = vmatpush.bf16.msra.mxu3 %v1662_v38 }
  0x74   : > { %1086 = vmatpush.bf16.msra.mxu0 %v1462_v44 }
  0x75   : > { %1099 = vmatpush.bf16.msra.mxu1 %v1526_v45 }
  0x76   : > { %1112 = vmatpush.bf16.msra.mxu2 %v1590_v46 }
  0x77   : > { %1125 = vmatpush.bf16.msra.mxu3 %v1654_v47  ;;  %1087 = vmatmul.bf16.vlgmr.msra.gmra.mxu0 %v2034_v22 }
  0x78   : > { %1100 = vmatmul.bf16.vlgmr.msra.gmra.mxu1 %v2041_v27 }
  0x79   : > { %1113 = vmatmul.bf16.vlgmr.msra.gmra.mxu2 %v2088_v30 }
  0x7a   : > { %1126 = vmatmul.bf16.vlgmr.msra.gmra.mxu3 %v2090_v32 }
  0xb7   : > { %v984_v21 = vpop.f32.mrf.mxu0 }
  0xb9   : > { %v997_v48 = vpop.f32.mrf.mxu1 }
  0xba   : > { %v998_v60 = vadd.f32 %v997_v48, %v984_v21 }
  0xbe   : > { %v1010_v49 = vpop.f32.mrf.mxu2 }
  0xbf   : > { %v986_v50 = vpop.f32.mrf.mxu0  ;;  %v1011_v30 = vadd.f32 %v1010_v49, %v998_v60 }
  0xc0   : > { %v1023_v51 = vpop.f32.mrf.mxu3 }
  0xc1   : > { %v999_v52 = vpop.f32.mrf.mxu1  ;;  %v1024_v0 = vadd.f32 %v1023_v51, %v1011_v30 }
  0xc6   : > { %v1012_v53 = vpop.f32.mrf.mxu2 }
  0xc8   : > { %v1025_v23 = vpop.f32.mrf.mxu3 }
  0xd4   : > { %v1036_v54 = vpop.f32.mrf.mxu0 }
  0xd5   : > { %v1049_v55 = vpop.f32.mrf.mxu1  ;;  %v1037_v3 = vadd.f32 %v1036_v54, %v1024_v0 }
  0xd7   : > { %v1050_v9 = vadd.f32 %v1049_v55, %v1037_v3 }
  0xdc   : > { %v1062_v56 = vpop.f32.mrf.mxu2  ;;  %v1038_v58 = vpop.f32.mrf.mxu0 }
  0xdd   : > { %v1075_v57 = vpop.f32.mrf.mxu3  ;;  %v1051_v22 = vpop.f32.mrf.mxu1 }
  0xde   : > { %v1076_v61 = vadd.f32 %v1075_v57, %v1062_v56 }
  0xe4   : > { %v1064_v59 = vpop.f32.mrf.mxu2 }
  0xe5   : > { %v1077_v27 = vpop.f32.mrf.mxu3 }
  0xf4   : > { %v1088_v32 = vpop.f32.mrf.mxu0 }
  0xf5   : > { %v1101_v62 = vpop.f32.mrf.mxu1  ;;  %v1089_v63 = vadd.f32 %v1088_v32, %v1076_v61 }
  0xf7   : > { %v1102_v1 = vadd.f32 %v1101_v62, %v1089_v63 }
  0xfc   : > { %v1114_v2 = vpop.f32.mrf.mxu2  ;;  %v1090_v6 = vpop.f32.mrf.mxu0 }
  0xfd   : > { %v1115_v4 = vadd.f32 %v1114_v2, %v1102_v1  ;;  %v1127_v5 = vpop.f32.mrf.mxu3  ;;  %v1103_v7 = vpop.f32.mrf.mxu1 }
  0xff   : > { %v1128_v8 = vadd.f32 %v1127_v5, %v1115_v4 }
 0x101   : > { %v1133_v11 = vrot.slane %v1128_v8, 6 }
 0x102   : > { %1142 = sbr.rel (%p1711_p7) target bundleno = 292 (0x124), region = 48 }
 0x103   : > { %v1135_v12 = vsel %vm1134_vm0, %v1050_v9, %v1133_v11 }
 0x104   : > { %v1137_v13 = vadd.f32 %v1135_v12, %v383_v10  ;;  %v1116_v14 = vpop.f32.mrf.mxu2 }
 0x105   : > { %v1129_v15 = vpop.f32.mrf.mxu3 }
 0x106   : > { %1138 = vst [vmem:[#allocation2] sm:$0xf] %v1137_v13 }
 0x107   : > { %v1144_v16 = vld [vmem:[%s2175_s2] sm:$0x3]  ;;  %vm1173_vm1 = vcmask 1040384  }
 0x108   : > { %v1152_v17 = vld [vmem:[%s2176_s3] sm:$0x3]  ;;  %v1146_v18 = vperm.slane %v1144_v16, 0  ;;  %v1147_v19 = vperm.slane %v1144_v16, 1 }
 0x109   : > { %v1154_v20 = vperm.slane %v1152_v17, 0  ;;  %v1155_v24 = vperm.slane %v1152_v17, 1  ;;  %v1160_v29 = vld [vmem:[%s2177_s4] sm:$0x3] }
 0x10a   : > { %v1148_v26 = vrot.slane %v1147_v19, 6  ;;  %v1161_v35 = vunpack.c.l.bf16 %v1160_v29 }
 0x10b   : > { %v1156_v28 = vrot.slane %v1155_v24, 6 }
 0x10c   : > { %v1149_v31 = vsel %vm1134_vm0, %v1146_v18, %v1148_v26 }
 0x10d   : > { %v1143_v25 = vld [vmem:[#allocation2] sm:$0xf]  ;;  %v1157_v33 = vsel %vm1134_vm0, %v1154_v20, %v1156_v28 }
 0x10e   : > { %v1151_v34 = vmul.f32 %v1149_v31, %v1143_v25 }
 0x110   : > { %v1159_v36 = vadd.f32 %v1157_v33, %v1151_v34 }
 0x112   : > { %v1162_v37 = vadd.f32 %v1161_v35, %v1159_v36 }
 0x114   : > { %v1163_v38 = vmax.f32 %v1162_v37, 0.0 }
 0x116   : > { %1165 = vst [vmem:[#allocation1] ss:$4 sm:$0xff] %v1163_v38 }
 0x11d   : > { %v1166_v39 = vld.sshfl [vmem:[#allocation1] sm:$0xff pattern:$0x73625140]  ;;  %v1167_v40 = vld.sshfl [vmem:[#allocation1 + $0x8] sm:$0xff pattern:$0x73625140] }
 0x11e   : > { %v1170_v41 = vpack.c.bf16 %v1167_v40, %v1166_v39 }
 0x120   : > { %v1172_v42 = vrot.slane %v1170_v41, 3 }
 0x122   : > { %v1176_v43 = vsel %vm1173_vm1, %v1170_v41, %v1172_v42 }
 0x123   : > { %1178 = vst [vmem:[%s2178_s5] sm:$0x3] %v1176_v43 }
 0x124 PF: > { %s15_s20 = sadd.s32 1, %s1860_s20   ;;  %s2179_s18 = smov %s1856_s19 }
 0x125   : > { %p12_p8 = scmp.ge.s32.totalorder %s15_s20, 5   ;;  %s2180_s19 = smov %s2182_s21 }
 0x127   :  { %14 = sbr.rel (!%p12_p8) target bundleno = 2 (0x2), region = 90 }

// kernel: resnet18_forward.47
= control target key start
LH: loop header
LB: loop body
LE: loop exit
PB: predicated region body
PF: predicated region fallthrough
CT: control target
= control target key end

     0   :  { %s1814_s18 = smov 0   ;;  %s1816_s19 = smov 0   ;;  %s2094_s0 = inlined_call_operand.vmem [shape: bf16[2,1,1,9,256], index: 0, kind: input, shape index: {}, may-alias: {0,5}]   ;;  %s2095_s1 = inlined_call_operand.vmem [shape: bf16[2,2304], index: 1, kind: input, shape index: {}]   ;;  %s2096_s2 = inlined_call_operand.vmem [shape: bf16[2304,256], index: 2, kind: input, shape index: {}]   ;;  %s2097_s3 = inlined_call_operand.vmem [shape: f32[1,256], index: 3, kind: input, shape index: {}]   ;;  %s2098_s4 = inlined_call_operand.vmem [shape: f32[1,256], index: 4, kind: input, shape index: {}]   ;;  %s2099_s5 = inlined_call_operand.vmem [shape: bf16[2,1,1,9,256], index: 5, kind: output, shape index: {}, may-alias: {0,5}]  }
   0x1   :  { %s1818_s0 = smov 0  }
   0x2 LB: > { %s1239_s20 = sadd.s32 4294967295, %s1781_s0   ;;  %s28_s21 = sadd.s32 1, %s1777_s19  ;;  %s1781_s0 = sphi %s1818_s0, %s16_s0   ;;  %s1777_s19 = sphi %s1816_s19, %s2101_s19   ;;  %s1773_s18 = sphi %s1814_s18, %s2100_s18  }
   0x3   : > { %p29_p0 = scmp.ge.s32.totalorder %s28_s21, 3  ;;  %p1244_p1 = scmp.ge.s32.totalorder %s1781_s0, 1 }
   0x4   : > { %p230_p2 = scmp.lt.s32.totalorder %s1781_s0, 4 }
   0x5   : > { %s2103_s21 = smov (%p29_p0, %s28_s21), 0 }
   0x6   : > { %p231_p3 = pnand %p1244_p1, %p230_p2 }
   0x7   : > { %s272_s22 = smul.u32 (!%p231_p3), 6, %s1773_s18  ;;  %p1247_p6 = scmp.ne.s32.totalorder (!%p231_p3), %s1773_s18, 0 }
   0x8   : > { %234 = sbr.rel (%p231_p3) target bundleno = 300 (0x12c), region = 36 }
   0x9   : > { %s281_s23 = smul.u32 (!%p231_p3), 96, %s1773_s18  ;;  %p275_p4 = scmp.lt.s32.totalorder (!%p231_p3), %s272_s22, 17 }
   0xb   : > { %p283_p5 = scmp.lt.s32.totalorder (!%p231_p3), %s281_s23, 287 }
   0xd   : > { %s2105_s22 = smov (!%p275_p4, %s272_s22), 17  ;;  %s2107_s23 = smov (!%p283_p5, %s281_s23), 287 }
   0xe   : > { %s279_s26 = scalar_lea.vmem %s2095_s1, %s2105_s22  ;;  %s1637_s27 = sshll.u32 %s2107_s23, 3 }
   0xf   : > { %s1846_s30 = scalar_lea.vmem %s2096_s2, %s1637_s27  ;;  %307 = sbr.rel (%p1247_p6) target bundleno = 22 (0x16), region = 40 }
  0x14   : > { %v1783_v0 = vmov 0.0  }
  0x15   : > { %308 = vst [vmem:[#allocation2] sm:$0xf] %v1783_v0 }
  0x16 PF: > { %v1306_v1 = vld [vmem:[%s1846_s30 + $0x70] sm:$0xf]  ;;  %v1653_v2 = vld [vmem:[%s1846_s30 + $0x74] sm:$0xf0]  ;;  %v1298_v12 = vld [vmem:[%s1846_s30 + $0x60] sm:$0xf] }
  0x17   : > { %v1370_v3 = vld [vmem:[%s1846_s30 + $0xf0] sm:$0xf]  ;;  %v1307_v4 = vor.u32 %v1653_v2, %v1306_v1  ;;  %v1669_v5 = vld [vmem:[%s1846_s30 + $0xf4] sm:$0xf0]  ;;  %v1651_v14 = vld [vmem:[%s1846_s30 + $0x64] sm:$0xf0] }
  0x18   : > { %v1434_v6 = vld [vmem:[%s1846_s30 + $0x170] sm:$0xf]  ;;  %v1685_v7 = vld [vmem:[%s1846_s30 + $0x174] sm:$0xf0]  ;;  %v1371_v8 = vor.u32 %v1669_v5, %v1370_v3  ;;  %v1362_v15 = vld [vmem:[%s1846_s30 + $0xe0] sm:$0xf]  ;;  %v1299_v17 = vor.u32 %v1651_v14, %v1298_v12 }
  0x19   : > { %v1435_v9 = vor.u32 %v1685_v7, %v1434_v6  ;;  %v1498_v10 = vld [vmem:[%s1846_s30 + $0x1f0] sm:$0xf]  ;;  %v1701_v11 = vld [vmem:[%s1846_s30 + $0x1f4] sm:$0xf0]  ;;  %901 = vmatpush.bf16.msra.mxu0 %v1307_v4  ;;  %v1667_v16 = vld [vmem:[%s1846_s30 + $0xe4] sm:$0xf0] }
  0x1a   : > { %v1499_v13 = vor.u32 %v1701_v11, %v1498_v10  ;;  %914 = vmatpush.bf16.msra.mxu1 %v1371_v8  ;;  %v1363_v18 = vor.u32 %v1667_v16, %v1362_v15  ;;  %v1426_v19 = vld [vmem:[%s1846_s30 + $0x160] sm:$0xf]  ;;  %v1683_v20 = vld [vmem:[%s1846_s30 + $0x164] sm:$0xf0]  ;;  %v1290_v24 = vld [vmem:[%s1846_s30 + $0x50] sm:$0xf] }
  0x1b   : > { %927 = vmatpush.bf16.msra.mxu2 %v1435_v9  ;;  %v1490_v21 = vld [vmem:[%s1846_s30 + $0x1e0] sm:$0xf]  ;;  %v1427_v22 = vor.u32 %v1683_v20, %v1426_v19  ;;  %v1699_v23 = vld [vmem:[%s1846_s30 + $0x1e4] sm:$0xf0]  ;;  %v1649_v25 = vld [vmem:[%s1846_s30 + $0x54] sm:$0xf0] }
  0x1c   : > { %940 = vmatpush.bf16.msra.mxu3 %v1499_v13  ;;  %v1491_v26 = vor.u32 %v1699_v23, %v1490_v21  ;;  %v1354_v27 = vld [vmem:[%s1846_s30 + $0xd0] sm:$0xf]  ;;  %v1665_v28 = vld [vmem:[%s1846_s30 + $0xd4] sm:$0xf0]  ;;  %v1291_v30 = vor.u32 %v1649_v25, %v1290_v24  ;;  %v1282_v36 = vld [vmem:[%s1846_s30 + $0x40] sm:$0xf] }
  0x1d   : > { %v1418_v29 = vld [vmem:[%s1846_s30 + $0x150] sm:$0xf]  ;;  %902 = vmatpush.bf16.msra.mxu0 %v1299_v17  ;;  %v1681_v31 = vld [vmem:[%s1846_s30 + $0x154] sm:$0xf0]  ;;  %v1355_v34 = vor.u32 %v1665_v28, %v1354_v27  ;;  %v1647_v37 = vld [vmem:[%s1846_s30 + $0x44] sm:$0xf0] }
  0x1e   : > { %v1482_v32 = vld [vmem:[%s1846_s30 + $0x1d0] sm:$0xf]  ;;  %v1697_v33 = vld [vmem:[%s1846_s30 + $0x1d4] sm:$0xf0]  ;;  %915 = vmatpush.bf16.msra.mxu1 %v1363_v18  ;;  %v1419_v35 = vor.u32 %v1681_v31, %v1418_v29  ;;  %v1346_v38 = vld [vmem:[%s1846_s30 + $0xc0] sm:$0xf]  ;;  %v1283_v45 = vor.u32 %v1647_v37, %v1282_v36 }
  0x1f   : > { %928 = vmatpush.bf16.msra.mxu2 %v1427_v22  ;;  %v1483_v39 = vor.u32 %v1697_v33, %v1482_v32  ;;  %v1663_v40 = vld [vmem:[%s1846_s30 + $0xc4] sm:$0xf0]  ;;  %v1410_v41 = vld [vmem:[%s1846_s30 + $0x140] sm:$0xf]  ;;  %v1274_v48 = vld [vmem:[%s1846_s30 + $0x30] sm:$0xf] }
  0x20   : > { %941 = vmatpush.bf16.msra.mxu3 %v1491_v26  ;;  %v1679_v42 = vld [vmem:[%s1846_s30 + $0x144] sm:$0xf0]  ;;  %v1474_v43 = vld [vmem:[%s1846_s30 + $0x1c0] sm:$0xf]  ;;  %v1347_v46 = vor.u32 %v1663_v40, %v1346_v38  ;;  %v1645_v49 = vld [vmem:[%s1846_s30 + $0x34] sm:$0xf0] }
  0x21   : > { %v1695_v44 = vld [vmem:[%s1846_s30 + $0x1c4] sm:$0xf0]  ;;  %903 = vmatpush.bf16.msra.mxu0 %v1291_v30  ;;  %v1411_v47 = vor.u32 %v1679_v42, %v1410_v41  ;;  %v1338_v50 = vld [vmem:[%s1846_s30 + $0xb0] sm:$0xf]  ;;  %v1661_v52 = vld [vmem:[%s1846_s30 + $0xb4] sm:$0xf0]  ;;  %v1275_v57 = vor.u32 %v1645_v49, %v1274_v48 }
  0x22   : > { %916 = vmatpush.bf16.msra.mxu1 %v1355_v34  ;;  %v1475_v51 = vor.u32 %v1695_v44, %v1474_v43  ;;  %v1402_v53 = vld [vmem:[%s1846_s30 + $0x130] sm:$0xf]  ;;  %v1677_v54 = vld [vmem:[%s1846_s30 + $0x134] sm:$0xf0]  ;;  %v1339_v58 = vor.u32 %v1661_v52, %v1338_v50  ;;  %v1266_v60 = vld [vmem:[%s1846_s30 + $0x20] sm:$0xf] }
  0x23   : > { %929 = vmatpush.bf16.msra.mxu2 %v1419_v35  ;;  %v1466_v55 = vld [vmem:[%s1846_s30 + $0x1b0] sm:$0xf]  ;;  %v1693_v56 = vld [vmem:[%s1846_s30 + $0x1b4] sm:$0xf0]  ;;  %v1403_v59 = vor.u32 %v1677_v54, %v1402_v53  ;;  %v1643_v61 = vld [vmem:[%s1846_s30 + $0x24] sm:$0xf0] }
  0x24   : > { %942 = vmatpush.bf16.msra.mxu3 %v1483_v39  ;;  %v1330_v62 = vld [vmem:[%s1846_s30 + $0xa0] sm:$0xf]  ;;  %v1467_v63 = vor.u32 %v1693_v56, %v1466_v55  ;;  %v1659_v0 = vld [vmem:[%s1846_s30 + $0xa4] sm:$0xf0]  ;;  %v1267_v5 = vor.u32 %v1643_v61, %v1266_v60  ;;  %v1258_v8 = vld [vmem:[%s1846_s30 + $0x10] sm:$0xf] }
  0x25   : > { %904 = vmatpush.bf16.msra.mxu0 %v1283_v45  ;;  %v1394_v1 = vld [vmem:[%s1846_s30 + $0x120] sm:$0xf]  ;;  %v1675_v2 = vld [vmem:[%s1846_s30 + $0x124] sm:$0xf0]  ;;  %v1331_v6 = vor.u32 %v1659_v0, %v1330_v62  ;;  %v1641_v9 = vld [vmem:[%s1846_s30 + $0x14] sm:$0xf0] }
  0x26   : > { %917 = vmatpush.bf16.msra.mxu1 %v1347_v46  ;;  %v1458_v3 = vld [vmem:[%s1846_s30 + $0x1a0] sm:$0xf]  ;;  %v1691_v4 = vld [vmem:[%s1846_s30 + $0x1a4] sm:$0xf0]  ;;  %v1395_v7 = vor.u32 %v1675_v2, %v1394_v1  ;;  %v1322_v10 = vld [vmem:[%s1846_s30 + $0x90] sm:$0xf]  ;;  %v1259_v17 = vor.u32 %v1641_v9, %v1258_v8 }
  0x27   : > { %930 = vmatpush.bf16.msra.mxu2 %v1411_v47  ;;  %v1459_v11 = vor.u32 %v1691_v4, %v1458_v3  ;;  %v1657_v12 = vld [vmem:[%s1846_s30 + $0x94] sm:$0xf0]  ;;  %v1386_v13 = vld [vmem:[%s1846_s30 + $0x110] sm:$0xf]  ;;  %v1250_v18 = vld [vmem:[%s1846_s30] sm:$0xf] }
  0x28   : > { %943 = vmatpush.bf16.msra.mxu3 %v1475_v51  ;;  %v1673_v14 = vld [vmem:[%s1846_s30 + $0x114] sm:$0xf0]  ;;  %v1450_v15 = vld [vmem:[%s1846_s30 + $0x190] sm:$0xf]  ;;  %v1639_v19 = vld [vmem:[%s1846_s30 + $0x4] sm:$0xf0]  ;;  %v1323_v20 = vor.u32 %v1657_v12, %v1322_v10 }
  0x29   : > { %905 = vmatpush.bf16.msra.mxu0 %v1275_v57  ;;  %v1689_v16 = vld [vmem:[%s1846_s30 + $0x194] sm:$0xf0]  ;;  %v1387_v21 = vor.u32 %v1673_v14, %v1386_v13  ;;  %v1314_v22 = vld [vmem:[%s1846_s30 + $0x80] sm:$0xf]  ;;  %v1655_v23 = vld [vmem:[%s1846_s30 + $0x84] sm:$0xf0]  ;;  %v1251_v32 = vor.u32 %v1639_v19, %v1250_v18 }
  0x2a   : > { %918 = vmatpush.bf16.msra.mxu1 %v1339_v58  ;;  %v1378_v24 = vld [vmem:[%s1846_s30 + $0x100] sm:$0xf]  ;;  %v1451_v25 = vor.u32 %v1689_v16, %v1450_v15  ;;  %v1671_v26 = vld [vmem:[%s1846_s30 + $0x104] sm:$0xf0]  ;;  %v1562_v29 = vld [vmem:[%s1846_s30 + $0x270] sm:$0xf]  ;;  %v1315_v36 = vor.u32 %v1655_v23, %v1314_v22 }
  0x2b   : > { %931 = vmatpush.bf16.msra.mxu2 %v1403_v59  ;;  %v1442_v27 = vld [vmem:[%s1846_s30 + $0x180] sm:$0xf]  ;;  %v1687_v28 = vld [vmem:[%s1846_s30 + $0x184] sm:$0xf0]  ;;  %v1717_v30 = vld [vmem:[%s1846_s30 + $0x274] sm:$0xf0]  ;;  %v1379_v37 = vor.u32 %v1671_v26, %v1378_v24 }
  0x2c   : > { %944 = vmatpush.bf16.msra.mxu3 %v1467_v63  ;;  %v1626_v31 = vld [vmem:[%s1846_s30 + $0x2f0] sm:$0xf]  ;;  %v1733_v33 = vld [vmem:[%s1846_s30 + $0x2f4] sm:$0xf0]  ;;  %v1652_v34 = vld [vmem:[%s1846_s30 + $0x74] sm:$0xf]  ;;  %v1443_v40 = vor.u32 %v1687_v28, %v1442_v27  ;;  %v1563_v41 = vor.u32 %v1717_v30, %v1562_v29 }
  0x2d   : > { %906 = vmatpush.bf16.msra.mxu0 %v1267_v5  ;;  %v1308_v35 = vld [vmem:[%s1846_s30 + $0x78] sm:$0xf0]  ;;  %v1668_v38 = vld [vmem:[%s1846_s30 + $0xf4] sm:$0xf]  ;;  %v1627_v42 = vor.u32 %v1733_v33, %v1626_v31  ;;  %v1554_v44 = vld [vmem:[%s1846_s30 + $0x260] sm:$0xf] }
  0x2e   : > { %919 = vmatpush.bf16.msra.mxu1 %v1331_v6  ;;  %v1372_v39 = vld [vmem:[%s1846_s30 + $0xf8] sm:$0xf0]  ;;  %v1311_v43 = vor.u32 %v1652_v34, %v1308_v35  ;;  %v1715_v45 = vld [vmem:[%s1846_s30 + $0x264] sm:$0xf0]  ;;  %v1618_v46 = vld [vmem:[%s1846_s30 + $0x2e0] sm:$0xf] }
  0x2f   : > { %932 = vmatpush.bf16.msra.mxu2 %v1395_v7  ;;  %v1375_v47 = vor.u32 %v1668_v38, %v1372_v39  ;;  %v1731_v48 = vld [vmem:[%s1846_s30 + $0x2e4] sm:$0xf0]  ;;  %v1650_v49 = vld [vmem:[%s1846_s30 + $0x64] sm:$0xf]  ;;  %v1300_v50 = vld [vmem:[%s1846_s30 + $0x68] sm:$0xf0]  ;;  %v1555_v53 = vor.u32 %v1715_v45, %v1554_v44 }
  0x30   : > { %945 = vmatpush.bf16.msra.mxu3 %v1459_v11  ;;  %v1666_v51 = vld [vmem:[%s1846_s30 + $0xe4] sm:$0xf]  ;;  %v1364_v52 = vld [vmem:[%s1846_s30 + $0xe8] sm:$0xf0]  ;;  %v1546_v54 = vld [vmem:[%s1846_s30 + $0x250] sm:$0xf]  ;;  %v1619_v56 = vor.u32 %v1731_v48, %v1618_v46  ;;  %v1303_v57 = vor.u32 %v1650_v49, %v1300_v50 }
  0x31   : > { %907 = vmatpush.bf16.msra.mxu0 %v1259_v17  ;;  %v1713_v55 = vld [vmem:[%s1846_s30 + $0x254] sm:$0xf0]  ;;  %v1610_v58 = vld [vmem:[%s1846_s30 + $0x2d0] sm:$0xf]  ;;  %v310_v60 = vld [vmem:[%s279_s26] sm:$0x3f]  ;;  %v1367_v61 = vor.u32 %v1666_v51, %v1364_v52 }
  0x32   : > { %920 = vmatpush.bf16.msra.mxu1 %v1323_v20  ;;  %v1729_v59 = vld [vmem:[%s1846_s30 + $0x2d4] sm:$0xf0]  ;;  %v1648_v62 = vld [vmem:[%s1846_s30 + $0x54] sm:$0xf]  ;;  %v1292_v63 = vld [vmem:[%s1846_s30 + $0x58] sm:$0xf0]  ;;  %v1547_v2 = vor.u32 %v1713_v55, %v1546_v54 }
  0x33   : > { %933 = vmatpush.bf16.msra.mxu2 %v1387_v21  ;;  %408 = vst [vmem:[#allocation1] ss:$9 sm:$0xff] %v310_v60  ;;  %v1664_v0 = vld [vmem:[%s1846_s30 + $0xd4] sm:$0xf]  ;;  %v1356_v1 = vld [vmem:[%s1846_s30 + $0xd8] sm:$0xf0]  ;;  %v1611_v3 = vor.u32 %v1729_v59, %v1610_v58  ;;  %v1295_v4 = vor.u32 %v1648_v62, %v1292_v63 }
  0x34   : > { %946 = vmatpush.bf16.msra.mxu3 %v1451_v25  ;;  %v1538_v5 = vld [vmem:[%s1846_s30 + $0x240] sm:$0xf]  ;;  %v1711_v6 = vld [vmem:[%s1846_s30 + $0x244] sm:$0xf0]  ;;  %v1359_v8 = vor.u32 %v1664_v0, %v1356_v1  ;;  %v1646_v10 = vld [vmem:[%s1846_s30 + $0x44] sm:$0xf] }
  0x35   : > { %908 = vmatpush.bf16.msra.mxu0 %v1251_v32  ;;  %v1602_v7 = vld [vmem:[%s1846_s30 + $0x2c0] sm:$0xf]  ;;  %v1727_v9 = vld [vmem:[%s1846_s30 + $0x2c4] sm:$0xf0]  ;;  %v1284_v11 = vld [vmem:[%s1846_s30 + $0x48] sm:$0xf0]  ;;  %v1539_v15 = vor.u32 %v1711_v6, %v1538_v5 }
  0x36   : > { %921 = vmatpush.bf16.msra.mxu1 %v1315_v36  ;;  %v1662_v12 = vld [vmem:[%s1846_s30 + $0xc4] sm:$0xf]  ;;  %v1348_v13 = vld [vmem:[%s1846_s30 + $0xc8] sm:$0xf0]  ;;  %v1530_v14 = vld [vmem:[%s1846_s30 + $0x230] sm:$0xf]  ;;  %v1603_v19 = vor.u32 %v1727_v9, %v1602_v7  ;;  %v1287_v20 = vor.u32 %v1646_v10, %v1284_v11 }
  0x37   : > { %934 = vmatpush.bf16.msra.mxu2 %v1379_v37  ;;  %v1709_v16 = vld [vmem:[%s1846_s30 + $0x234] sm:$0xf0]  ;;  %v1594_v17 = vld [vmem:[%s1846_s30 + $0x2b0] sm:$0xf]  ;;  %v1351_v24 = vor.u32 %v1662_v12, %v1348_v13  ;;  %v1644_v25 = vld [vmem:[%s1846_s30 + $0x34] sm:$0xf] }
  0x38   : > { %947 = vmatpush.bf16.msra.mxu3 %v1443_v40  ;;  %v1725_v18 = vld [vmem:[%s1846_s30 + $0x2b4] sm:$0xf0]  ;;  %v1276_v26 = vld [vmem:[%s1846_s30 + $0x38] sm:$0xf0]  ;;  %v1660_v28 = vld [vmem:[%s1846_s30 + $0xb4] sm:$0xf]  ;;  %v1531_v30 = vor.u32 %v1709_v16, %v1530_v14 }
  0x39   : > { %953 = vmatpush.bf16.msrb.mxu0 %v1563_v41  ;;  %v1340_v29 = vld [vmem:[%s1846_s30 + $0xb8] sm:$0xf0]  ;;  %v1595_v31 = vor.u32 %v1725_v18, %v1594_v17  ;;  %v1279_v32 = vor.u32 %v1644_v25, %v1276_v26  ;;  %v1522_v33 = vld [vmem:[%s1846_s30 + $0x220] sm:$0xf]  ;;  %v1707_v34 = vld [vmem:[%s1846_s30 + $0x224] sm:$0xf0] }
  0x3a   : > { %966 = vmatpush.bf16.msrb.mxu1 %v1627_v42  ;;  %v1954_v21 = vld [vmem:[#allocation1] sm:$0xff]  ;;  %v1956_v22 = vld [vmem:[#allocation1 + $0x12] sm:$0xff]  ;;  %v1958_v23 = vld [vmem:[#allocation1 + $0x9] sm:$0xff]  ;;  %v1343_v36 = vor.u32 %v1660_v28, %v1340_v29  ;;  %v1523_v42 = vor.u32 %v1707_v34, %v1522_v33  ;;  %vm1060_vm0 = vcmask 1041408   ;;  %p1632_p7 = scmp.ne.s32.totalorder %s1773_s18, 2 }
  0x3b   : > { %979 = vmatpush.bf16.msrb.mxu2 %v1311_v43  ;;  %909 = vmatmul.bf16.vlgmr.msra.gmra.mxu0 %v1954_v21  ;;  %v1963_v27 = vld [vmem:[#allocation1 + $0x1b] sm:$0xff]  ;;  %v1723_v37 = vld [vmem:[%s1846_s30 + $0x2a4] sm:$0xf0]  ;;  %v1642_v38 = vld [vmem:[%s1846_s30 + $0x24] sm:$0xf] }
  0x3c   : > { %992 = vmatpush.bf16.msrb.mxu3 %v1375_v47  ;;  %935 = vmatmul.bf16.vlgmr.msra.gmra.mxu2 %v1956_v22  ;;  %v1586_v35 = vld [vmem:[%s1846_s30 + $0x2a0] sm:$0xf]  ;;  %v1268_v39 = vld [vmem:[%s1846_s30 + $0x28] sm:$0xf0]  ;;  %v1658_v40 = vld [vmem:[%s1846_s30 + $0xa4] sm:$0xf] }
  0x3d   : > { %954 = vmatpush.bf16.msrb.mxu0 %v1555_v53  ;;  %922 = vmatmul.bf16.vlgmr.msra.gmra.mxu1 %v1958_v23  ;;  %v1332_v41 = vld [vmem:[%s1846_s30 + $0xa8] sm:$0xf0]  ;;  %v1587_v43 = vor.u32 %v1723_v37, %v1586_v35  ;;  %v1271_v44 = vor.u32 %v1642_v38, %v1268_v39  ;;  %v1514_v45 = vld [vmem:[%s1846_s30 + $0x210] sm:$0xf]  ;;  %v1705_v46 = vld [vmem:[%s1846_s30 + $0x214] sm:$0xf0] }
  0x3e   : > { %967 = vmatpush.bf16.msrb.mxu1 %v1619_v56  ;;  %948 = vmatmul.bf16.vlgmr.msra.gmra.mxu3 %v1963_v27  ;;  %v1578_v47 = vld [vmem:[%s1846_s30 + $0x290] sm:$0xf]  ;;  %v1335_v48 = vor.u32 %v1658_v40, %v1332_v41  ;;  %v1721_v49 = vld [vmem:[%s1846_s30 + $0x294] sm:$0xf0]  ;;  %v1640_v50 = vld [vmem:[%s1846_s30 + $0x14] sm:$0xf]  ;;  %v1515_v54 = vor.u32 %v1705_v46, %v1514_v45 }
  0x3f   : > { %980 = vmatpush.bf16.msrb.mxu2 %v1303_v57  ;;  %v1260_v51 = vld [vmem:[%s1846_s30 + $0x18] sm:$0xf0]  ;;  %v1656_v52 = vld [vmem:[%s1846_s30 + $0x94] sm:$0xf]  ;;  %v1506_v55 = vld [vmem:[%s1846_s30 + $0x200] sm:$0xf]  ;;  %v1579_v57 = vor.u32 %v1721_v49, %v1578_v47 }
  0x40   : > { %993 = vmatpush.bf16.msrb.mxu3 %v1367_v61  ;;  %v1324_v53 = vld [vmem:[%s1846_s30 + $0x98] sm:$0xf0]  ;;  %v1703_v56 = vld [vmem:[%s1846_s30 + $0x204] sm:$0xf0]  ;;  %v1263_v58 = vor.u32 %v1640_v50, %v1260_v51  ;;  %v1570_v59 = vld [vmem:[%s1846_s30 + $0x280] sm:$0xf] }
  0x41   : > { %955 = vmatpush.bf16.msrb.mxu0 %v1547_v2  ;;  %v1719_v60 = vld [vmem:[%s1846_s30 + $0x284] sm:$0xf0]  ;;  %v1638_v61 = vld [vmem:[%s1846_s30 + $0x4] sm:$0xf]  ;;  %v1327_v62 = vor.u32 %v1656_v52, %v1324_v53  ;;  %v1252_v63 = vld [vmem:[%s1846_s30 + $0x8] sm:$0xf0]  ;;  %v1507_v5 = vor.u32 %v1703_v56, %v1506_v55 }
  0x42   : > { %968 = vmatpush.bf16.msrb.mxu1 %v1611_v3  ;;  %v1654_v0 = vld [vmem:[%s1846_s30 + $0x84] sm:$0xf]  ;;  %v1316_v1 = vld [vmem:[%s1846_s30 + $0x88] sm:$0xf0]  ;;  %v1684_v2 = vld [vmem:[%s1846_s30 + $0x174] sm:$0xf]  ;;  %v1571_v9 = vor.u32 %v1719_v60, %v1570_v59  ;;  %v1255_v10 = vor.u32 %v1638_v61, %v1252_v63 }
  0x43   : > { %981 = vmatpush.bf16.msrb.mxu2 %v1295_v4  ;;  %v1436_v3 = vld [vmem:[%s1846_s30 + $0x178] sm:$0xf0]  ;;  %v1700_v4 = vld [vmem:[%s1846_s30 + $0x1f4] sm:$0xf]  ;;  %v1319_v13 = vor.u32 %v1654_v0, %v1316_v1  ;;  %v1682_v17 = vld [vmem:[%s1846_s30 + $0x164] sm:$0xf] }
  0x44   : > { %994 = vmatpush.bf16.msrb.mxu3 %v1359_v8  ;;  %v1500_v6 = vld [vmem:[%s1846_s30 + $0x1f8] sm:$0xf0]  ;;  %v1716_v7 = vld [vmem:[%s1846_s30 + $0x274] sm:$0xf]  ;;  %v1439_v14 = vor.u32 %v1684_v2, %v1436_v3  ;;  %v1428_v18 = vld [vmem:[%s1846_s30 + $0x168] sm:$0xf0] }
  0x45   : > { %956 = vmatpush.bf16.msrb.mxu0 %v1539_v15  ;;  %v1564_v8 = vld [vmem:[%s1846_s30 + $0x278] sm:$0xf0]  ;;  %v1732_v11 = vld [vmem:[%s1846_s30 + $0x2f4] sm:$0xf]  ;;  %v1503_v15 = vor.u32 %v1700_v4, %v1500_v6  ;;  %v1714_v25 = vld [vmem:[%s1846_s30 + $0x264] sm:$0xf] }
  0x46   : > { %969 = vmatpush.bf16.msrb.mxu1 %v1603_v19  ;;  %v1628_v12 = vld [vmem:[%s1846_s30 + $0x2f8] sm:$0xf0]  ;;  %v1567_v16 = vor.u32 %v1716_v7, %v1564_v8  ;;  %v1698_v19 = vld [vmem:[%s1846_s30 + $0x1e4] sm:$0xf]  ;;  %v1556_v26 = vld [vmem:[%s1846_s30 + $0x268] sm:$0xf0] }
  0x47   : > { %982 = vmatpush.bf16.msrb.mxu2 %v1287_v20  ;;  %v1631_v20 = vor.u32 %v1732_v11, %v1628_v12  ;;  %v1730_v28 = vld [vmem:[%s1846_s30 + $0x2e4] sm:$0xf]  ;;  %v1620_v29 = vld [vmem:[%s1846_s30 + $0x2e8] sm:$0xf0]  ;;  %v1559_v34 = vor.u32 %v1714_v25, %v1556_v26  ;;  %v1680_v35 = vld [vmem:[%s1846_s30 + $0x154] sm:$0xf] }
  0x48   : > { %995 = vmatpush.bf16.msrb.mxu3 %v1351_v24  ;;  %v1492_v24 = vld [vmem:[%s1846_s30 + $0x1e8] sm:$0xf0]  ;;  %v1696_v37 = vld [vmem:[%s1846_s30 + $0x1d4] sm:$0xf]  ;;  %v1623_v38 = vor.u32 %v1730_v28, %v1620_v29  ;;  %v1484_v39 = vld [vmem:[%s1846_s30 + $0x1d8] sm:$0xf0] }
  0x49   : > { %957 = vmatpush.bf16.msrb.mxu0 %v1531_v30  ;;  %v2010_v30 = vld [vmem:[#allocation1 + $0x24] sm:$0xff]  ;;  %v1495_v33 = vor.u32 %v1698_v19, %v1492_v24  ;;  %v1712_v40 = vld [vmem:[%s1846_s30 + $0x254] sm:$0xf]  ;;  %v1548_v41 = vld [vmem:[%s1846_s30 + $0x258] sm:$0xf0]  ;;  %v1487_v45 = vor.u32 %v1696_v37, %v1484_v39 }
  0x4a   : > { %970 = vmatpush.bf16.msrb.mxu1 %v1595_v31  ;;  %v1431_v31 = vor.u32 %v1682_v17, %v1428_v18  ;;  %v1551_v46 = vor.u32 %v1712_v40, %v1548_v41  ;;  %v1678_v47 = vld [vmem:[%s1846_s30 + $0x144] sm:$0xf]  ;;  %v1476_v50 = vld [vmem:[%s1846_s30 + $0x1c8] sm:$0xf0]  ;;  %v1692_v59 = vld [vmem:[%s1846_s30 + $0x1b4] sm:$0xf] }
  0x4b   : > { %983 = vmatpush.bf16.msrb.mxu2 %v1279_v32  ;;  %v2012_v32 = vld [vmem:[#allocation1 + $0x2d] sm:$0xff]  ;;  %v1710_v51 = vld [vmem:[%s1846_s30 + $0x244] sm:$0xf]  ;;  %v1468_v61 = vld [vmem:[%s1846_s30 + $0x1b8] sm:$0xf0] }
  0x4c   : > { %996 = vmatpush.bf16.msrb.mxu3 %v1343_v36  ;;  %v1420_v36 = vld [vmem:[%s1846_s30 + $0x158] sm:$0xf0]  ;;  %v1540_v52 = vld [vmem:[%s1846_s30 + $0x248] sm:$0xf0]  ;;  %v1726_v53 = vld [vmem:[%s1846_s30 + $0x2c4] sm:$0xf]  ;;  %v1471_v3 = vor.u32 %v1692_v59, %v1468_v61 }
  0x4d   : > { %958 = vmatpush.bf16.msrb.mxu0 %v1523_v42  ;;  %v1728_v42 = vld [vmem:[%s1846_s30 + $0x2d4] sm:$0xf]  ;;  %v1543_v56 = vor.u32 %v1710_v51, %v1540_v52  ;;  %v1532_v63 = vld [vmem:[%s1846_s30 + $0x238] sm:$0xf0]  ;;  %v1396_v6 = vld [vmem:[%s1846_s30 + $0x128] sm:$0xf0] }
  0x4e   : > { %971 = vmatpush.bf16.msrb.mxu1 %v1587_v43  ;;  %v1612_v43 = vld [vmem:[%s1846_s30 + $0x2d8] sm:$0xf0]  ;;  %v1724_v0 = vld [vmem:[%s1846_s30 + $0x2b4] sm:$0xf]  ;;  %v1690_v7 = vld [vmem:[%s1846_s30 + $0x1a4] sm:$0xf] }
  0x4f   : > { %984 = vmatpush.bf16.msrb.mxu2 %v1271_v44  ;;  %v1423_v44 = vor.u32 %v1680_v35, %v1420_v36  ;;  %v1615_v49 = vor.u32 %v1728_v42, %v1612_v43  ;;  %v1596_v1 = vld [vmem:[%s1846_s30 + $0x2b8] sm:$0xf0]  ;;  %v1524_v11 = vld [vmem:[%s1846_s30 + $0x228] sm:$0xf0]  ;;  %v1722_v12 = vld [vmem:[%s1846_s30 + $0x2a4] sm:$0xf] }
  0x50   : > { %997 = vmatpush.bf16.msrb.mxu3 %v1335_v48  ;;  %v1694_v48 = vld [vmem:[%s1846_s30 + $0x1c4] sm:$0xf]  ;;  %v1599_v8 = vor.u32 %v1724_v0, %v1596_v1  ;;  %v1672_v17 = vld [vmem:[%s1846_s30 + $0x114] sm:$0xf]  ;;  %v1388_v18 = vld [vmem:[%s1846_s30 + $0x118] sm:$0xf0] }
  0x51   : > { %959 = vmatpush.bf16.msrb.mxu0 %v1515_v54  ;;  %v1479_v55 = vor.u32 %v1694_v48, %v1476_v50  ;;  %v1688_v19 = vld [vmem:[%s1846_s30 + $0x194] sm:$0xf]  ;;  %v1452_v24 = vld [vmem:[%s1846_s30 + $0x198] sm:$0xf0]  ;;  %v1670_v35 = vld [vmem:[%s1846_s30 + $0x104] sm:$0xf] }
  0x52   : > { %972 = vmatpush.bf16.msrb.mxu1 %v1579_v57  ;;  %v1676_v57 = vld [vmem:[%s1846_s30 + $0x134] sm:$0xf]  ;;  %v1516_v26 = vld [vmem:[%s1846_s30 + $0x218] sm:$0xf0]  ;;  %v1380_v36 = vld [vmem:[%s1846_s30 + $0x108] sm:$0xf0] }
  0x53   : > { %985 = vmatpush.bf16.msrb.mxu2 %v1263_v58  ;;  %v1404_v58 = vld [vmem:[%s1846_s30 + $0x138] sm:$0xf0]  ;;  %v1704_v25 = vld [vmem:[%s1846_s30 + $0x214] sm:$0xf]  ;;  %v1686_v37 = vld [vmem:[%s1846_s30 + $0x184] sm:$0xf] }
  0x54   : > { %998 = vmatpush.bf16.msrb.mxu3 %v1327_v62  ;;  %v1708_v62 = vld [vmem:[%s1846_s30 + $0x234] sm:$0xf]  ;;  %v1407_v2 = vor.u32 %v1676_v57, %v1404_v58  ;;  %v1580_v29 = vld [vmem:[%s1846_s30 + $0x298] sm:$0xf0]  ;;  %v1444_v39 = vld [vmem:[%s1846_s30 + $0x188] sm:$0xf0] }
  0x55   : > { %960 = vmatpush.bf16.msrb.mxu0 %v1507_v5  ;;  %v1535_v4 = vor.u32 %v1708_v62, %v1532_v63  ;;  %v1674_v5 = vld [vmem:[%s1846_s30 + $0x124] sm:$0xf]  ;;  %v1720_v28 = vld [vmem:[%s1846_s30 + $0x294] sm:$0xf]  ;;  %v1508_v41 = vld [vmem:[%s1846_s30 + $0x208] sm:$0xf0] }
  0x56   : > { %973 = vmatpush.bf16.msrb.mxu1 %v1571_v9  ;;  %v1460_v9 = vld [vmem:[%s1846_s30 + $0x1a8] sm:$0xf0]  ;;  %v1702_v40 = vld [vmem:[%s1846_s30 + $0x204] sm:$0xf] }
  0x57   : > { %986 = vmatpush.bf16.msrb.mxu2 %v1255_v10  ;;  %v1706_v10 = vld [vmem:[%s1846_s30 + $0x224] sm:$0xf]  ;;  %v1572_v43 = vld [vmem:[%s1846_s30 + $0x288] sm:$0xf0] }
  0x58   : > { %999 = vmatpush.bf16.msrb.mxu3 %v1319_v13  ;;  %961 = vmatmul.bf16.vlgmr.msrb.gmra.mxu0 %v2010_v30  ;;  %v1588_v13 = vld [vmem:[%s1846_s30 + $0x2a8] sm:$0xf0]  ;;  %v1718_v42 = vld [vmem:[%s1846_s30 + $0x284] sm:$0xf] }
  0x59   : > { %1005 = vmatpush.bf16.msra.mxu0 %v1439_v14  ;;  %974 = vmatmul.bf16.vlgmr.msrb.gmra.mxu1 %v2012_v32  ;;  %v1399_v14 = vor.u32 %v1674_v5, %v1396_v6 }
  0x5a   : > { %1018 = vmatpush.bf16.msra.mxu1 %v1503_v15  ;;  %987 = vmatmul.bf16.vlgmr.msrb.gmra.mxu2 %v1954_v21  ;;  %v1412_v21 = vld [vmem:[%s1846_s30 + $0x148] sm:$0xf0]  ;;  %v1463_v15 = vor.u32 %v1690_v7, %v1460_v9 }
  0x5b   : > { %1031 = vmatpush.bf16.msra.mxu2 %v1567_v16  ;;  %1000 = vmatmul.bf16.vlgmr.msrb.gmra.mxu3 %v1958_v23  ;;  %v1604_v23 = vld [vmem:[%s1846_s30 + $0x2c8] sm:$0xf0]  ;;  %v1415_v54 = vor.u32 %v1678_v47, %v1412_v21  ;;  %v1527_v16 = vor.u32 %v1706_v10, %v1524_v11  ;;  %v1575_v47 = vor.u32 %v1718_v42, %v1572_v43  ;;  %v309_v10 = vld [vmem:[#allocation2] sm:$0xf] }
  0x5c   : > { %1044 = vmatpush.bf16.msra.mxu3 %v1631_v20  ;;  %v1607_v60 = vor.u32 %v1726_v53, %v1604_v23  ;;  %v1591_v20 = vor.u32 %v1722_v12, %v1588_v13 }
  0x5d   : > { %1006 = vmatpush.bf16.msra.mxu0 %v1431_v31  ;;  %v1391_v31 = vor.u32 %v1672_v17, %v1388_v18 }
  0x5e   : > { %1019 = vmatpush.bf16.msra.mxu1 %v1495_v33  ;;  %v1455_v33 = vor.u32 %v1688_v19, %v1452_v24 }
  0x5f   : > { %1032 = vmatpush.bf16.msra.mxu2 %v1559_v34  ;;  %v1519_v34 = vor.u32 %v1704_v25, %v1516_v26 }
  0x60   : > { %1045 = vmatpush.bf16.msra.mxu3 %v1623_v38  ;;  %v1583_v38 = vor.u32 %v1720_v28, %v1580_v29 }
  0x61   : > { %1007 = vmatpush.bf16.msra.mxu0 %v1423_v44  ;;  %v1383_v44 = vor.u32 %v1670_v35, %v1380_v36 }
  0x62   : > { %1020 = vmatpush.bf16.msra.mxu1 %v1487_v45  ;;  %v1447_v45 = vor.u32 %v1686_v37, %v1444_v39 }
  0x63   : > { %1033 = vmatpush.bf16.msra.mxu2 %v1551_v46  ;;  %v1511_v46 = vor.u32 %v1702_v40, %v1508_v41 }
  0x64   : > { %1046 = vmatpush.bf16.msra.mxu3 %v1615_v49 }
  0x65   : > { %1008 = vmatpush.bf16.msra.mxu0 %v1415_v54 }
  0x66   : > { %1021 = vmatpush.bf16.msra.mxu1 %v1479_v55 }
  0x67   : > { %1034 = vmatpush.bf16.msra.mxu2 %v1543_v56 }
  0x68   : > { %1047 = vmatpush.bf16.msra.mxu3 %v1607_v60 }
  0x69   : > { %1009 = vmatpush.bf16.msra.mxu0 %v1407_v2 }
  0x6a   : > { %1022 = vmatpush.bf16.msra.mxu1 %v1471_v3 }
  0x6b   : > { %1035 = vmatpush.bf16.msra.mxu2 %v1535_v4 }
  0x6c   : > { %1048 = vmatpush.bf16.msra.mxu3 %v1599_v8 }
  0x6d   : > { %1010 = vmatpush.bf16.msra.mxu0 %v1399_v14 }
  0x6e   : > { %1023 = vmatpush.bf16.msra.mxu1 %v1463_v15 }
  0x6f   : > { %1036 = vmatpush.bf16.msra.mxu2 %v1527_v16 }
  0x70   : > { %1049 = vmatpush.bf16.msra.mxu3 %v1591_v20 }
  0x71   : > { %1011 = vmatpush.bf16.msra.mxu0 %v1391_v31 }
  0x72   : > { %1024 = vmatpush.bf16.msra.mxu1 %v1455_v33 }
  0x73   : > { %1037 = vmatpush.bf16.msra.mxu2 %v1519_v34 }
  0x74   : > { %1050 = vmatpush.bf16.msra.mxu3 %v1583_v38 }
  0x75   : > { %1012 = vmatpush.bf16.msra.mxu0 %v1383_v44 }
  0x76   : > { %1025 = vmatpush.bf16.msra.mxu1 %v1447_v45 }
  0x77   : > { %1038 = vmatpush.bf16.msra.mxu2 %v1511_v46 }
  0x78   : > { %1051 = vmatpush.bf16.msra.mxu3 %v1575_v47  ;;  %1013 = vmatmul.bf16.vlgmr.msra.gmra.mxu0 %v1956_v22 }
  0x79   : > { %1026 = vmatmul.bf16.vlgmr.msra.gmra.mxu1 %v1963_v27 }
  0x7a   : > { %1039 = vmatmul.bf16.vlgmr.msra.gmra.mxu2 %v2010_v30 }
  0x7b   : > { %1052 = vmatmul.bf16.vlgmr.msra.gmra.mxu3 %v2012_v32 }
  0xb8   : > { %v910_v21 = vpop.f32.mrf.mxu0 }
  0xba   : > { %v923_v48 = vpop.f32.mrf.mxu1 }
  0xbb   : > { %v924_v60 = vadd.f32 %v923_v48, %v910_v21 }
  0xbf   : > { %v936_v49 = vpop.f32.mrf.mxu2 }
  0xc0   : > { %v912_v50 = vpop.f32.mrf.mxu0  ;;  %v937_v30 = vadd.f32 %v936_v49, %v924_v60 }
  0xc1   : > { %v949_v51 = vpop.f32.mrf.mxu3 }
  0xc2   : > { %v925_v52 = vpop.f32.mrf.mxu1  ;;  %v950_v0 = vadd.f32 %v949_v51, %v937_v30 }
  0xc7   : > { %v938_v53 = vpop.f32.mrf.mxu2 }
  0xc9   : > { %v951_v23 = vpop.f32.mrf.mxu3 }
  0xd5   : > { %v962_v54 = vpop.f32.mrf.mxu0 }
  0xd6   : > { %v975_v55 = vpop.f32.mrf.mxu1  ;;  %v963_v3 = vadd.f32 %v962_v54, %v950_v0 }
  0xd8   : > { %v976_v9 = vadd.f32 %v975_v55, %v963_v3 }
  0xdd   : > { %v988_v56 = vpop.f32.mrf.mxu2  ;;  %v964_v58 = vpop.f32.mrf.mxu0 }
  0xde   : > { %v1001_v57 = vpop.f32.mrf.mxu3  ;;  %v977_v22 = vpop.f32.mrf.mxu1 }
  0xdf   : > { %v1002_v61 = vadd.f32 %v1001_v57, %v988_v56 }
  0xe5   : > { %v990_v59 = vpop.f32.mrf.mxu2 }
  0xe6   : > { %v1003_v27 = vpop.f32.mrf.mxu3 }
  0xf5   : > { %v1014_v32 = vpop.f32.mrf.mxu0 }
  0xf6   : > { %v1027_v62 = vpop.f32.mrf.mxu1  ;;  %v1015_v63 = vadd.f32 %v1014_v32, %v1002_v61 }
  0xf8   : > { %v1028_v1 = vadd.f32 %v1027_v62, %v1015_v63 }
  0xfd   : > { %v1040_v2 = vpop.f32.mrf.mxu2  ;;  %v1016_v6 = vpop.f32.mrf.mxu0 }
  0xfe   : > { %v1041_v4 = vadd.f32 %v1040_v2, %v1028_v1  ;;  %v1053_v5 = vpop.f32.mrf.mxu3  ;;  %v1029_v7 = vpop.f32.mrf.mxu1 }
 0x100   : > { %v1054_v8 = vadd.f32 %v1053_v5, %v1041_v4 }
 0x102   : > { %v1059_v11 = vrot.slane %v1054_v8, 6 }
 0x103   : > { %1068 = sbr.rel (%p1632_p7) target bundleno = 291 (0x123), region = 44 }
 0x104   : > { %v1061_v12 = vsel %vm1060_vm0, %v976_v9, %v1059_v11 }
 0x105   : > { %v1063_v13 = vadd.f32 %v1061_v12, %v309_v10  ;;  %v1042_v14 = vpop.f32.mrf.mxu2 }
 0x106   : > { %v1055_v15 = vpop.f32.mrf.mxu3 }
 0x107   : > { %1064 = vst [vmem:[#allocation2] sm:$0xf] %v1063_v13 }
 0x108   : > { %v1070_v16 = vld [vmem:[%s2097_s3] sm:$0x3]  ;;  %vm1096_vm1 = vcmask 1040384  }
 0x109   : > { %v1078_v17 = vld [vmem:[%s2098_s4] sm:$0x3]  ;;  %v1072_v18 = vperm.slane %v1070_v16, 0  ;;  %v1073_v19 = vperm.slane %v1070_v16, 1 }
 0x10a   : > { %v1080_v20 = vperm.slane %v1078_v17, 0  ;;  %v1081_v24 = vperm.slane %v1078_v17, 1 }
 0x10b   : > { %v1074_v26 = vrot.slane %v1073_v19, 6 }
 0x10c   : > { %v1082_v28 = vrot.slane %v1081_v24, 6 }
 0x10d   : > { %v1075_v29 = vsel %vm1060_vm0, %v1072_v18, %v1074_v26 }
 0x10e   : > { %v1069_v25 = vld [vmem:[#allocation2] sm:$0xf]  ;;  %v1083_v31 = vsel %vm1060_vm0, %v1080_v20, %v1082_v28 }
 0x10f   : > { %v1077_v33 = vmul.f32 %v1075_v29, %v1069_v25 }
 0x111   : > { %v1085_v34 = vadd.f32 %v1083_v31, %v1077_v33 }
 0x113   : > { %v1086_v35 = vmax.f32 %v1085_v34, 0.0 }
 0x115   : > { %1088 = vst [vmem:[#allocation1] ss:$4 sm:$0xff] %v1086_v35 }
 0x11c   : > { %v1089_v36 = vld.sshfl [vmem:[#allocation1] sm:$0xff pattern:$0x73625140]  ;;  %v1090_v37 = vld.sshfl [vmem:[#allocation1 + $0x8] sm:$0xff pattern:$0x73625140] }
 0x11d   : > { %v1093_v38 = vpack.c.bf16 %v1090_v37, %v1089_v36 }
 0x11f   : > { %v1095_v39 = vrot.slane %v1093_v38, 3 }
 0x121   : > { %v1099_v40 = vsel %vm1096_vm1, %v1093_v38, %v1095_v39 }
 0x122   : > { %1101 = vst [vmem:[#allocation3] sm:$0x3] %v1099_v40 }
 0x123 PF: > { %p1633_p8 = scmp.ne.s32.totalorder %s1239_s20, 2 }
 0x125   : > { %1104 = sbr.rel (%p1633_p8) target bundleno = 300 (0x12c), region = 48 }
 0x12a   : > { %v1125_v41 = vld [vmem:[#allocation3] sm:$0x3] }
 0x12b   : > { %1634 = vst [vmem:[%s2099_s5 + $0x8] sm:$0x3] %v1125_v41 }
 0x12c PF: > { %s16_s0 = sadd.s32 1, %s1781_s0   ;;  %s2100_s18 = smov %s1777_s19 }
 0x12d   : > { %p13_p9 = scmp.ge.s32.totalorder %s16_s0, 5   ;;  %s2101_s19 = smov %s2103_s21 }
 0x12f   :  { %15 = sbr.rel (!%p13_p9) target bundleno = 2 (0x2), region = 115 }

// kernel: resnet18_forward.42
= control target key start
LH: loop header
LB: loop body
LE: loop exit
PB: predicated region body
PF: predicated region fallthrough
CT: control target
= control target key end

     0   :  { %s1170_s15 = smov 0   ;;  %s1172_s16 = smov 0   ;;  %s1386_s0 = inlined_call_operand.vmem [shape: bf16[2,256], index: 0, kind: input, shape index: {}]   ;;  %s1387_s1 = inlined_call_operand.vmem [shape: bf16[256,512], index: 1, kind: input, shape index: {}]   ;;  %s1388_s2 = inlined_call_operand.vmem [shape: f32[1,512], index: 2, kind: input, shape index: {}]   ;;  %s1389_s3 = inlined_call_operand.vmem [shape: f32[1,512], index: 3, kind: input, shape index: {}]   ;;  %s1390_s4 = inlined_call_operand.vmem [shape: bf16[2,512], index: 4, kind: output, shape index: {}]  }
   0x1   :  { %s1174_s17 = smov 0   ;;  %s1176_s18 = smov 0  }
   0x2   :  { %s1178_s19 = smov 0  }
   0x3 LB: > { %s29_s20 = sadd.s32 1, %s1138_s18  ;;  %p77_p1 = scmp.ne.s32.totalorder %s1130_s16, %s1126_s15  ;;  %s1142_s19 = sphi %s1178_s19, %s14_s19   ;;  %s1138_s18 = sphi %s1176_s18, %s1394_s18   ;;  %s1134_s17 = sphi %s1174_s17, %s1393_s17   ;;  %s1130_s16 = sphi %s1172_s16, %s1392_s16   ;;  %s1126_s15 = sphi %s1170_s15, %s1391_s15  }
   0x4   : > { %p31_p0 = scmp.ge.s32.totalorder %s29_s20, 2  ;;  %p78_p2 = scmp.eq.s32.totalorder %s1142_s19, 0 }
   0x5   : > { %s70_s22 = sadd.s32 1, %s1130_s16  ;;  %p891_p5 = scmp.ge.s32.totalorder %s1142_s19, 2 }
   0x6   : > { %s1396_s20 = smov (%p31_p0, %s29_s20), 0  ;;  %p79_p3 = por %p78_p2, %p77_p1 }
   0x7   : > { %s66_s21 = ssub.s32 %s1138_s18, %s1396_s20  ;;  %195 = sbr.rel (%p891_p5) target bundleno = 48 (0x30), region = 20 }
   0x8   : > { %p68_p4 = scmp.eq.s32.totalorder %s66_s21, 0 }
   0xa   : > { %s1205_s23 = scalar_select %p68_p4, %s1130_s16, %s70_s22  }
   0xc   : > { %198 = sbr.rel (!%p79_p3) target bundleno = 48 (0x30), region = 24  ;;  %s200_s24 = sand.u32 (%p79_p3), 1, %s1130_s16  }
   0xd   : > { %s1030_s25 = sshll.u32 (%p79_p3), %s1138_s18, 3  ;;  %s892_s26 = sshll.u32 (%p79_p3), %s200_s24, 8 }
   0xe   : > { %s1213_s29 = scalar_lea.vmem (%p79_p3), %s1387_s1, %s1030_s25  ;;  %s1218_s30 = scalar_lea.vmem (%p79_p3), [#allocation3], %s892_s26 }
   0xf   : > { %v299_v0 = vld [vmem:[%s1213_s29] sm:$0xff] (%p79_p3)  ;;  %v301_v1 = vld [vmem:[%s1213_s29 + $0x10] sm:$0xff] (%p79_p3) }
  0x10   : > { %v303_v2 = vld [vmem:[%s1213_s29 + $0x20] sm:$0xff] (%p79_p3)  ;;  %300 = vst [vmem:[%s1218_s30] sm:$0xff] (%p79_p3), %v299_v0  ;;  %v305_v3 = vld [vmem:[%s1213_s29 + $0x30] sm:$0xff] (%p79_p3) }
  0x11   : > { %302 = vst [vmem:[%s1218_s30 + $0x8] sm:$0xff] %v301_v1  ;;  %v307_v4 = vld [vmem:[%s1213_s29 + $0x40] sm:$0xff]  ;;  %v309_v5 = vld [vmem:[%s1213_s29 + $0x50] sm:$0xff] }
  0x12   : > { %304 = vst [vmem:[%s1218_s30 + $0x10] sm:$0xff] %v303_v2  ;;  %v311_v6 = vld [vmem:[%s1213_s29 + $0x60] sm:$0xff]  ;;  %v313_v7 = vld [vmem:[%s1213_s29 + $0x70] sm:$0xff] }
  0x13   : > { %306 = vst [vmem:[%s1218_s30 + $0x18] sm:$0xff] %v305_v3  ;;  %v315_v8 = vld [vmem:[%s1213_s29 + $0x80] sm:$0xff]  ;;  %v317_v9 = vld [vmem:[%s1213_s29 + $0x90] sm:$0xff] }
  0x14   : > { %308 = vst [vmem:[%s1218_s30 + $0x20] sm:$0xff] %v307_v4  ;;  %v319_v10 = vld [vmem:[%s1213_s29 + $0xa0] sm:$0xff]  ;;  %v321_v11 = vld [vmem:[%s1213_s29 + $0xb0] sm:$0xff] }
  0x15   : > { %310 = vst [vmem:[%s1218_s30 + $0x28] sm:$0xff] %v309_v5  ;;  %v323_v12 = vld [vmem:[%s1213_s29 + $0xc0] sm:$0xff]  ;;  %v325_v13 = vld [vmem:[%s1213_s29 + $0xd0] sm:$0xff] }
  0x16   : > { %312 = vst [vmem:[%s1218_s30 + $0x30] sm:$0xff] %v311_v6  ;;  %v327_v14 = vld [vmem:[%s1213_s29 + $0xe0] sm:$0xff]  ;;  %v329_v15 = vld [vmem:[%s1213_s29 + $0xf0] sm:$0xff] }
  0x17   : > { %314 = vst [vmem:[%s1218_s30 + $0x38] sm:$0xff] %v313_v7  ;;  %v331_v16 = vld [vmem:[%s1213_s29 + $0x100] sm:$0xff]  ;;  %v333_v17 = vld [vmem:[%s1213_s29 + $0x110] sm:$0xff] }
  0x18   : > { %316 = vst [vmem:[%s1218_s30 + $0x40] sm:$0xff] %v315_v8  ;;  %v335_v18 = vld [vmem:[%s1213_s29 + $0x120] sm:$0xff]  ;;  %v337_v19 = vld [vmem:[%s1213_s29 + $0x130] sm:$0xff] }
  0x19   : > { %318 = vst [vmem:[%s1218_s30 + $0x48] sm:$0xff] %v317_v9  ;;  %v339_v20 = vld [vmem:[%s1213_s29 + $0x140] sm:$0xff]  ;;  %v341_v21 = vld [vmem:[%s1213_s29 + $0x150] sm:$0xff] }
  0x1a   : > { %320 = vst [vmem:[%s1218_s30 + $0x50] sm:$0xff] %v319_v10  ;;  %v343_v22 = vld [vmem:[%s1213_s29 + $0x160] sm:$0xff]  ;;  %v345_v23 = vld [vmem:[%s1213_s29 + $0x170] sm:$0xff] }
  0x1b   : > { %322 = vst [vmem:[%s1218_s30 + $0x58] sm:$0xff] %v321_v11  ;;  %v347_v24 = vld [vmem:[%s1213_s29 + $0x180] sm:$0xff]  ;;  %v349_v25 = vld [vmem:[%s1213_s29 + $0x190] sm:$0xff] }
  0x1c   : > { %324 = vst [vmem:[%s1218_s30 + $0x60] sm:$0xff] %v323_v12  ;;  %v351_v26 = vld [vmem:[%s1213_s29 + $0x1a0] sm:$0xff]  ;;  %v353_v27 = vld [vmem:[%s1213_s29 + $0x1b0] sm:$0xff] }
  0x1d   : > { %326 = vst [vmem:[%s1218_s30 + $0x68] sm:$0xff] %v325_v13  ;;  %v355_v28 = vld [vmem:[%s1213_s29 + $0x1c0] sm:$0xff]  ;;  %v357_v29 = vld [vmem:[%s1213_s29 + $0x1d0] sm:$0xff] }
  0x1e   : > { %328 = vst [vmem:[%s1218_s30 + $0x70] sm:$0xff] %v327_v14  ;;  %v359_v30 = vld [vmem:[%s1213_s29 + $0x1e0] sm:$0xff]  ;;  %v361_v31 = vld [vmem:[%s1213_s29 + $0x1f0] sm:$0xff] }
  0x1f   : > { %330 = vst [vmem:[%s1218_s30 + $0x78] sm:$0xff] %v329_v15 }
  0x20   : > { %332 = vst [vmem:[%s1218_s30 + $0x80] sm:$0xff] %v331_v16 }
  0x21   : > { %334 = vst [vmem:[%s1218_s30 + $0x88] sm:$0xff] %v333_v17 }
  0x22   : > { %336 = vst [vmem:[%s1218_s30 + $0x90] sm:$0xff] %v335_v18 }
  0x23   : > { %338 = vst [vmem:[%s1218_s30 + $0x98] sm:$0xff] %v337_v19 }
  0x24   : > { %340 = vst [vmem:[%s1218_s30 + $0xa0] sm:$0xff] %v339_v20 }
  0x25   : > { %342 = vst [vmem:[%s1218_s30 + $0xa8] sm:$0xff] %v341_v21 }
  0x26   : > { %344 = vst [vmem:[%s1218_s30 + $0xb0] sm:$0xff] %v343_v22 }
  0x27   : > { %346 = vst [vmem:[%s1218_s30 + $0xb8] sm:$0xff] %v345_v23 }
  0x28   : > { %348 = vst [vmem:[%s1218_s30 + $0xc0] sm:$0xff] %v347_v24 }
  0x29   : > { %350 = vst [vmem:[%s1218_s30 + $0xc8] sm:$0xff] %v349_v25 }
  0x2a   : > { %352 = vst [vmem:[%s1218_s30 + $0xd0] sm:$0xff] %v351_v26 }
  0x2b   : > { %354 = vst [vmem:[%s1218_s30 + $0xd8] sm:$0xff] %v353_v27 }
  0x2c   : > { %356 = vst [vmem:[%s1218_s30 + $0xe0] sm:$0xff] %v355_v28 }
  0x2d   : > { %358 = vst [vmem:[%s1218_s30 + $0xe8] sm:$0xff] %v357_v29 }
  0x2e   : > { %360 = vst [vmem:[%s1218_s30 + $0xf0] sm:$0xff] %v359_v30 }
  0x2f   : > { %362 = vst [vmem:[%s1218_s30 + $0xf8] sm:$0xff] %v361_v31 }
  0x30 PF: > { %p895_p6 = scmp.ge.s32.totalorder %s1142_s19, 1  ;;  %p383_p7 = scmp.lt.s32.totalorder %s1142_s19, 3 }
  0x32   : > { %p384_p8 = pnand %p895_p6, %p383_p7 }
  0x33   : > { %s390_s5 = sand.u32 (!%p384_p8), 1, %s1126_s15   ;;  %s897_s10 = sshll.u32 (!%p384_p8), %s1134_s17, 1 }
  0x34   : > { %387 = sbr.rel (%p384_p8) target bundleno = 259 (0x103), region = 70  ;;  %s896_s8 = sshll.u32 (!%p384_p8), %s390_s5, 8 }
  0x35   : > { %s1287_s9 = scalar_lea.vmem (!%p384_p8), [#allocation3], %s896_s8  ;;  %p446_p9 = scmp.lt.s32.totalorder (!%p384_p8), %s897_s10, 3 }
  0x39   : > { %v470_v32 = vld [vmem:[%s1386_s0] sm:$0x3]  ;;  %v958_v33 = vld [vmem:[%s1287_s9 + $0x70] sm:$0xf]  ;;  %v1046_v34 = vld [vmem:[%s1287_s9 + $0x74] sm:$0xf0] }
  0x3a   : > { %504 = vst [vmem:[#allocation1] ss:$9 sm:$0xff] %v470_v32  ;;  %v1022_v35 = vld [vmem:[%s1287_s9 + $0xf0] sm:$0xf]  ;;  %v959_v36 = vor.u32 %v1046_v34, %v958_v33  ;;  %v1062_v37 = vld [vmem:[%s1287_s9 + $0xf4] sm:$0xf0] }
  0x3b   : > { %v1045_v38 = vld [vmem:[%s1287_s9 + $0x74] sm:$0xf]  ;;  %v960_v39 = vld [vmem:[%s1287_s9 + $0x78] sm:$0xf0]  ;;  %v1023_v40 = vor.u32 %v1062_v37, %v1022_v35  ;;  %v950_v44 = vld [vmem:[%s1287_s9 + $0x60] sm:$0xf] }
  0x3c   : > { %v963_v41 = vor.u32 %v1045_v38, %v960_v39  ;;  %v1061_v42 = vld [vmem:[%s1287_s9 + $0xf4] sm:$0xf]  ;;  %v1024_v43 = vld [vmem:[%s1287_s9 + $0xf8] sm:$0xf0]  ;;  %669 = vmatpush.bf16.msra.mxu0 %v959_v36  ;;  %v1044_v46 = vld [vmem:[%s1287_s9 + $0x64] sm:$0xf0] }
  0x3d   : > { %v1027_v45 = vor.u32 %v1061_v42, %v1024_v43  ;;  %v1014_v47 = vld [vmem:[%s1287_s9 + $0xe0] sm:$0xf]  ;;  %v1060_v48 = vld [vmem:[%s1287_s9 + $0xe4] sm:$0xf0]  ;;  %682 = vmatpush.bf16.msra.mxu1 %v1023_v40  ;;  %v951_v49 = vor.u32 %v1044_v46, %v950_v44  ;;  %v1043_v51 = vld [vmem:[%s1287_s9 + $0x64] sm:$0xf] }
  0x3e   : > { %695 = vmatpush.bf16.msra.mxu2 %v963_v41  ;;  %v1015_v50 = vor.u32 %v1060_v48, %v1014_v47  ;;  %v952_v52 = vld [vmem:[%s1287_s9 + $0x68] sm:$0xf0]  ;;  %v1059_v53 = vld [vmem:[%s1287_s9 + $0xe4] sm:$0xf]  ;;  %v942_v56 = vld [vmem:[%s1287_s9 + $0x50] sm:$0xf] }
  0x3f   : > { %708 = vmatpush.bf16.msra.mxu3 %v1027_v45  ;;  %v955_v54 = vor.u32 %v1043_v51, %v952_v52  ;;  %v1016_v55 = vld [vmem:[%s1287_s9 + $0xe8] sm:$0xf0]  ;;  %v1042_v57 = vld [vmem:[%s1287_s9 + $0x54] sm:$0xf0]  ;;  %v1006_v59 = vld [vmem:[%s1287_s9 + $0xd0] sm:$0xf] }
  0x40   : > { %v1019_v58 = vor.u32 %v1059_v53, %v1016_v55  ;;  %v1058_v60 = vld [vmem:[%s1287_s9 + $0xd4] sm:$0xf0]  ;;  %v1041_v61 = vld [vmem:[%s1287_s9 + $0x54] sm:$0xf]  ;;  %670 = vmatpush.bf16.msra.mxu0 %v951_v49  ;;  %v943_v62 = vor.u32 %v1042_v57, %v942_v56  ;;  %v944_v63 = vld [vmem:[%s1287_s9 + $0x58] sm:$0xf0] }
  0x41   : > { %v1057_v0 = vld [vmem:[%s1287_s9 + $0xd4] sm:$0xf]  ;;  %v1008_v1 = vld [vmem:[%s1287_s9 + $0xd8] sm:$0xf0]  ;;  %683 = vmatpush.bf16.msra.mxu1 %v1015_v50  ;;  %v1007_v2 = vor.u32 %v1058_v60, %v1006_v59  ;;  %v947_v3 = vor.u32 %v1041_v61, %v944_v63  ;;  %v934_v4 = vld [vmem:[%s1287_s9 + $0x40] sm:$0xf] }
  0x42   : > { %696 = vmatpush.bf16.msra.mxu2 %v955_v54  ;;  %v1040_v5 = vld [vmem:[%s1287_s9 + $0x44] sm:$0xf0]  ;;  %v998_v6 = vld [vmem:[%s1287_s9 + $0xc0] sm:$0xf]  ;;  %v1011_v7 = vor.u32 %v1057_v0, %v1008_v1  ;;  %v1039_v9 = vld [vmem:[%s1287_s9 + $0x44] sm:$0xf] }
  0x43   : > { %709 = vmatpush.bf16.msra.mxu3 %v1019_v58  ;;  %v1056_v8 = vld [vmem:[%s1287_s9 + $0xc4] sm:$0xf0]  ;;  %v936_v10 = vld [vmem:[%s1287_s9 + $0x48] sm:$0xf0]  ;;  %v1055_v11 = vld [vmem:[%s1287_s9 + $0xc4] sm:$0xf]  ;;  %v935_v13 = vor.u32 %v1040_v5, %v934_v4 }
  0x44   : > { %v1000_v12 = vld [vmem:[%s1287_s9 + $0xc8] sm:$0xf0]  ;;  %671 = vmatpush.bf16.msra.mxu0 %v943_v62  ;;  %v999_v14 = vor.u32 %v1056_v8, %v998_v6  ;;  %v939_v15 = vor.u32 %v1039_v9, %v936_v10  ;;  %v926_v16 = vld [vmem:[%s1287_s9 + $0x30] sm:$0xf]  ;;  %v1038_v17 = vld [vmem:[%s1287_s9 + $0x34] sm:$0xf0] }
  0x45   : > { %684 = vmatpush.bf16.msra.mxu1 %v1007_v2  ;;  %v990_v18 = vld [vmem:[%s1287_s9 + $0xb0] sm:$0xf]  ;;  %v1003_v19 = vor.u32 %v1055_v11, %v1000_v12  ;;  %v1054_v20 = vld [vmem:[%s1287_s9 + $0xb4] sm:$0xf0]  ;;  %v1037_v21 = vld [vmem:[%s1287_s9 + $0x34] sm:$0xf]  ;;  %v927_v25 = vor.u32 %v1038_v17, %v926_v16 }
  0x46   : > { %697 = vmatpush.bf16.msra.mxu2 %v947_v3  ;;  %v928_v22 = vld [vmem:[%s1287_s9 + $0x38] sm:$0xf0]  ;;  %v1053_v23 = vld [vmem:[%s1287_s9 + $0xb4] sm:$0xf]  ;;  %v991_v26 = vor.u32 %v1054_v20, %v990_v18  ;;  %v918_v28 = vld [vmem:[%s1287_s9 + $0x20] sm:$0xf] }
  0x47   : > { %710 = vmatpush.bf16.msra.mxu3 %v1011_v7  ;;  %v992_v24 = vld [vmem:[%s1287_s9 + $0xb8] sm:$0xf0]  ;;  %v931_v27 = vor.u32 %v1037_v21, %v928_v22  ;;  %v1036_v29 = vld [vmem:[%s1287_s9 + $0x24] sm:$0xf0]  ;;  %v982_v30 = vld [vmem:[%s1287_s9 + $0xa0] sm:$0xf] }
  0x48   : > { %672 = vmatpush.bf16.msra.mxu0 %v935_v13  ;;  %v995_v31 = vor.u32 %v1053_v23, %v992_v24  ;;  %v1052_v32 = vld [vmem:[%s1287_s9 + $0xa4] sm:$0xf0]  ;;  %v1035_v33 = vld [vmem:[%s1287_s9 + $0x24] sm:$0xf]  ;;  %v920_v34 = vld [vmem:[%s1287_s9 + $0x28] sm:$0xf0]  ;;  %v919_v37 = vor.u32 %v1036_v29, %v918_v28 }
  0x49   : > { %685 = vmatpush.bf16.msra.mxu1 %v999_v14  ;;  %v1051_v35 = vld [vmem:[%s1287_s9 + $0xa4] sm:$0xf]  ;;  %v984_v36 = vld [vmem:[%s1287_s9 + $0xa8] sm:$0xf0]  ;;  %v983_v38 = vor.u32 %v1052_v32, %v982_v30  ;;  %v923_v39 = vor.u32 %v1035_v33, %v920_v34  ;;  %v910_v40 = vld [vmem:[%s1287_s9 + $0x10] sm:$0xf] }
  0x4a   : > { %698 = vmatpush.bf16.msra.mxu2 %v939_v15  ;;  %v1034_v41 = vld [vmem:[%s1287_s9 + $0x14] sm:$0xf0]  ;;  %v974_v42 = vld [vmem:[%s1287_s9 + $0x90] sm:$0xf]  ;;  %v987_v43 = vor.u32 %v1051_v35, %v984_v36  ;;  %v1033_v45 = vld [vmem:[%s1287_s9 + $0x14] sm:$0xf] }
  0x4b   : > { %711 = vmatpush.bf16.msra.mxu3 %v1003_v19  ;;  %v1050_v44 = vld [vmem:[%s1287_s9 + $0x94] sm:$0xf0]  ;;  %v912_v46 = vld [vmem:[%s1287_s9 + $0x18] sm:$0xf0]  ;;  %v1049_v47 = vld [vmem:[%s1287_s9 + $0x94] sm:$0xf]  ;;  %v911_v49 = vor.u32 %v1034_v41, %v910_v40 }
  0x4c   : > { %673 = vmatpush.bf16.msra.mxu0 %v927_v25  ;;  %v976_v48 = vld [vmem:[%s1287_s9 + $0x98] sm:$0xf0]  ;;  %v975_v50 = vor.u32 %v1050_v44, %v974_v42  ;;  %v915_v51 = vor.u32 %v1033_v45, %v912_v46  ;;  %v902_v52 = vld [vmem:[%s1287_s9] sm:$0xf]  ;;  %v1032_v53 = vld [vmem:[%s1287_s9 + $0x4] sm:$0xf0] }
  0x4d   : > { %686 = vmatpush.bf16.msra.mxu1 %v991_v26  ;;  %v966_v54 = vld [vmem:[%s1287_s9 + $0x80] sm:$0xf]  ;;  %v979_v55 = vor.u32 %v1049_v47, %v976_v48  ;;  %v1048_v56 = vld [vmem:[%s1287_s9 + $0x84] sm:$0xf0]  ;;  %v1031_v57 = vld [vmem:[%s1287_s9 + $0x4] sm:$0xf]  ;;  %v903_v61 = vor.u32 %v1032_v53, %v902_v52 }
  0x4e   : > { %699 = vmatpush.bf16.msra.mxu2 %v931_v27  ;;  %v904_v58 = vld [vmem:[%s1287_s9 + $0x8] sm:$0xf0]  ;;  %v1047_v59 = vld [vmem:[%s1287_s9 + $0x84] sm:$0xf]  ;;  %v967_v62 = vor.u32 %v1048_v56, %v966_v54  ;;  %v505_v1 = vld [vmem:[#allocation1] sm:$0xff]  ;;  %v1144_v3 = vmov 0.0  }
  0x4f   : > { %712 = vmatpush.bf16.msra.mxu3 %v995_v31  ;;  %v968_v60 = vld [vmem:[%s1287_s9 + $0x88] sm:$0xf0]  ;;  %v907_v63 = vor.u32 %v1031_v57, %v904_v58  ;;  %v506_v2 = vld [vmem:[#allocation1 + $0x9] sm:$0xff]  ;;  %468 = vst [vmem:[#allocation2] sm:$0xf] %v1144_v3  ;;  %s1398_s10 = smov (!%p446_p9, %s897_s10), 3 }
  0x50   : > { %674 = vmatpush.bf16.msra.mxu0 %v919_v37  ;;  %v971_v0 = vor.u32 %v1047_v59, %v968_v60  ;;  %s448_s13 = scalar_lea.vmem %s1388_s2, %s1398_s10  ;;  %s453_s21 = scalar_lea.vmem %s1389_s3, %s1398_s10  ;;  %vm724_vm0 = vcmask 1041408   ;;  %vm758_vm1 = vcmask 1040384  }
  0x51   : > { %687 = vmatpush.bf16.msra.mxu1 %v983_v38  ;;  %v733_v12 = vld [vmem:[%s448_s13] sm:$0x3]  ;;  %s462_s24 = scalar_lea.vmem %s1390_s4, %s1398_s10 }
  0x52   : > { %700 = vmatpush.bf16.msra.mxu2 %v923_v39  ;;  %v741_v15 = vld [vmem:[%s453_s21] sm:$0x3]  ;;  %v736_v17 = vperm.slane %v733_v12, 1  ;;  %v735_v22 = vperm.slane %v733_v12, 0 }
  0x53   : > { %713 = vmatpush.bf16.msra.mxu3 %v987_v43  ;;  %v744_v19 = vperm.slane %v741_v15, 1  ;;  %v743_v24 = vperm.slane %v741_v15, 0 }
  0x54   : > { %675 = vmatpush.bf16.msra.mxu0 %v911_v49  ;;  %v737_v23 = vrot.slane %v736_v17, 6 }
  0x55   : > { %688 = vmatpush.bf16.msra.mxu1 %v975_v50  ;;  %v745_v25 = vrot.slane %v744_v19, 6 }
  0x56   : > { %701 = vmatpush.bf16.msra.mxu2 %v915_v51  ;;  %v469_v13 = vld [vmem:[#allocation2] sm:$0xf]  ;;  %v738_v26 = vsel %vm724_vm0, %v735_v22, %v737_v23 }
  0x57   : > { %714 = vmatpush.bf16.msra.mxu3 %v979_v55  ;;  %v746_v28 = vsel %vm724_vm0, %v743_v24, %v745_v25 }
  0x58   : > { %676 = vmatpush.bf16.msra.mxu0 %v903_v61 }
  0x59   : > { %689 = vmatpush.bf16.msra.mxu1 %v967_v62 }
  0x5a   : > { %702 = vmatpush.bf16.msra.mxu2 %v907_v63 }
  0x5b   : > { %715 = vmatpush.bf16.msra.mxu3 %v971_v0  ;;  %677 = vmatmul.bf16.vlgmr.msra.gmra.mxu0 %v505_v1 }
  0x5c   : > { %690 = vmatmul.bf16.vlgmr.msra.gmra.mxu1 %v506_v2 }
  0x5d   : > { %703 = vmatmul.bf16.vlgmr.msra.gmra.mxu2 %v505_v1 }
  0x5e   : > { %716 = vmatmul.bf16.vlgmr.msra.gmra.mxu3 %v506_v2 }
  0xd8   : > { %v678_v4 = vpop.f32.mrf.mxu0 }
  0xd9   : > { %v691_v5 = vpop.f32.mrf.mxu1 }
  0xda   : > { %v692_v9 = vadd.f32 %v691_v5, %v678_v4 }
  0xe0   : > { %v704_v6 = vpop.f32.mrf.mxu2  ;;  %v680_v8 = vpop.f32.mrf.mxu0 }
  0xe1   : > { %v717_v7 = vpop.f32.mrf.mxu3  ;;  %v693_v11 = vpop.f32.mrf.mxu1 }
  0xe2   : > { %v718_v10 = vadd.f32 %v717_v7, %v704_v6 }
  0xe4   : > { %v723_v14 = vrot.slane %v718_v10, 6 }
  0xe6   : > { %v725_v16 = vsel %vm724_vm0, %v692_v9, %v723_v14 }
  0xe7   : > { %v727_v18 = vadd.f32 %v725_v16, %v469_v13 }
  0xe8   : > { %v706_v20 = vpop.f32.mrf.mxu2 }
  0xe9   : > { %728 = vst [vmem:[#allocation2] sm:$0xf] %v727_v18  ;;  %v719_v21 = vpop.f32.mrf.mxu3 }
  0xf0   : > { %v732_v27 = vld [vmem:[#allocation2] sm:$0xf] }
  0xf1   : > { %v740_v29 = vmul.f32 %v738_v26, %v732_v27 }
  0xf3   : > { %v748_v30 = vadd.f32 %v746_v28, %v740_v29 }
  0xf5   : > { %750 = vst [vmem:[#allocation1] ss:$4 sm:$0xff] %v748_v30 }
  0xfc   : > { %v751_v31 = vld.sshfl [vmem:[#allocation1] sm:$0xff pattern:$0x73625140]  ;;  %v752_v32 = vld.sshfl [vmem:[#allocation1 + $0x8] sm:$0xff pattern:$0x73625140] }
  0xfd   : > { %v755_v33 = vpack.c.bf16 %v752_v32, %v751_v31 }
  0xff   : > { %v757_v34 = vrot.slane %v755_v33, 3 }
 0x101   : > { %v761_v35 = vsel %vm758_vm1, %v755_v33, %v757_v34 }
 0x102   : > { %763 = vst [vmem:[%s462_s24] sm:$0x3] %v761_v35 }
 0x103 PF: > { %s14_s19 = sadd.s32 1, %s1142_s19   ;;  %s1391_s15 = smov %s1130_s16 }
 0x104   : > { %p11_p10 = scmp.ge.s32.totalorder %s14_s19, 4   ;;  %s1392_s16 = smov %s1205_s23 }
 0x105   : > { %s1393_s17 = smov %s1138_s18  ;;  %s1394_s18 = smov %s1396_s20 }
 0x106   :  { %13 = sbr.rel (!%p11_p10) target bundleno = 3 (0x3), region = 126 }

// kernel: resnet18_forward.48
= control target key start
LH: loop header
LB: loop body
LE: loop exit
PB: predicated region body
PF: predicated region fallthrough
CT: control target
= control target key end

     0   :  { %s2926_s0 = inlined_call_operand.vmem [shape: bf16[2,1,1,9,512], index: 0, kind: input, shape index: {}, may-alias: {0,5}]   ;;  %s2927_s1 = inlined_call_operand.vmem [shape: bf16[2,2304], index: 1, kind: input, shape index: {}]   ;;  %s2928_s2 = inlined_call_operand.vmem [shape: bf16[2304,512], index: 2, kind: input, shape index: {}]   ;;  %s2929_s3 = inlined_call_operand.vmem [shape: f32[1,512], index: 3, kind: input, shape index: {}]   ;;  %s2930_s4 = inlined_call_operand.vmem [shape: f32[1,512], index: 4, kind: input, shape index: {}]   ;;  %s2931_s5 = inlined_call_operand.vmem [shape: bf16[2,1,1,9,512], index: 5, kind: output, shape index: {}, may-alias: {0,5}]  }
   0x1   :  { %2932 = sst [smem:[#allocation5_spill]] %s2928_s2 }
   0x2   :  { %s2339_s18 = smov 0   ;;  %s2341_s19 = smov 0  }
   0x3   :  { %s2343_s0 = smov 0   ;;  %s2345_s20 = smov 0  }
   0x4   :  { %s2347_s21 = smov 0   ;;  %s2349_s22 = smov 0  }
   0x5   :  { %s2351_s23 = smov 0   ;;  %s2353_s24 = smov 0  }
   0x6   :  { %s2355_s25 = smov 0  }
   0x7 LB: > { %s28_s26 = sadd.s32 1, %s2298_s23  ;;  %s31_s27 = sadd.s32 1, %s2302_s24  ;;  %s2306_s25 = sphi %s2355_s25, %s16_s25   ;;  %s2302_s24 = sphi %s2353_s24, %s2943_s24   ;;  %s2298_s23 = sphi %s2351_s23, %s2942_s23   ;;  %s2294_s22 = sphi %s2349_s22, %s2941_s22   ;;  %s2290_s21 = sphi %s2347_s21, %s2940_s21   ;;  %s2286_s20 = sphi %s2345_s20, %s2939_s20   ;;  %s2282_s0 = sphi %s2343_s0, %s2938_s0   ;;  %s2278_s19 = sphi %s2341_s19, %s2937_s19   ;;  %s2274_s18 = sphi %s2339_s18, %s2936_s18  }
   0x8   : > { %p29_p0 = scmp.ge.s32.totalorder %s28_s26, 3  ;;  %p79_p1 = scmp.ne.s32.totalorder %s2286_s20, %s2282_s0 }
   0x9   : > { %s1662_s28 = sadd.s32 4294967295, %s2306_s25   ;;  %p80_p2 = scmp.eq.s32.totalorder %s2306_s25, 0 }
   0xa   : > { %s2945_s26 = smov (%p29_p0, %s28_s26), 0  ;;  %s2947_s27 = smov (!%p29_p0, %s31_s27), %s2302_s24 }
   0xb   : > { %p33_p3 = scmp.ge.s32.totalorder %s2947_s27, 2  ;;  %s67_s29 = ssub.s32 %s2298_s23, %s2945_s26 }
   0xc   : > { %p2395_p4 = por %p80_p2, %p79_p1  ;;  %p162_p5 = scmp.ne.s32.totalorder %s2278_s19, %s2274_s18 }
   0xd   : > { %s2949_s27 = smov (%p33_p3, %s2947_s27), 0  ;;  %s72_s6 = sadd.s32 1, %s2286_s20 }
   0xe   : > { %p163_p6 = scmp.eq.s32.totalorder %s1662_s28, 5  ;;  %s68_s7 = ssub.s32 %s2302_s24, %s2949_s27 }
   0xf   : > { %s152_s8 = sadd.s32 1, %s2278_s19  ;;  %s69_s9 = sor.u32 %s68_s7, %s67_s29 }
  0x10   : > { %p150_p7 = scmp.eq.s32.totalorder %s68_s7, 0  ;;  %p70_p8 = scmp.eq.s32.totalorder %s69_s9, 0 }
  0x11   : > { %p2407_p9 = por %p163_p6, %p162_p5  ;;  %p1665_p10 = scmp.ge.s32.totalorder %s2306_s25, 6 }
  0x12   : > { %s2412_s11 = scalar_select %p150_p7, %s2278_s19, %s152_s8  }
  0x13   : > { %s2415_s12 = scalar_select %p70_p8, %s2286_s20, %s72_s6  }
  0x14   : > { %185 = sbr.rel (%p1665_p10) target bundleno = 131 (0x83), region = 16 }
  0x19   : > { %200 = sbr.rel (!%p2395_p4) target bundleno = 131 (0x83), region = 24  ;;  %s202_s13 = sand.u32 (%p2395_p4), 1, %s2286_s20  }
  0x1a   : > { %s2161_s14 = smul.u32 (%p2395_p4), 768, %s202_s13  ;;  %s1666_s15 = sshll.u32 (%p2395_p4), %s2302_s24, 1 }
  0x1b   : > { %s2064_s16 = smul.u32 (%p2395_p4), 384, %s2298_s23  ;;  %s2935_s2 = sld [smem:[#allocation5_spill]] (%p2395_p4) }
  0x1c   : > { %s2431_s30 = scalar_lea.vmem (%p2395_p4), [#allocation3], %s2161_s14 }
  0x1d   : > { %s208_s17 = sadd.s32 (%p2395_p4), %s2064_s16, %s1666_s15 }
  0x1e   : > { %s1668_s28 = sshll.u32 %s208_s17, 2 }
  0x21   : > { %s2426_s6 = scalar_lea.vmem %s2935_s2, %s1668_s28 }
  0x22   : > { %v429_v0 = vld [vmem:[%s2426_s6] sm:$0xff]  ;;  %v431_v1 = vld [vmem:[%s2426_s6 + $0x10] sm:$0xff] }
  0x23   : > { %v433_v2 = vld [vmem:[%s2426_s6 + $0x20] sm:$0xff]  ;;  %430 = vst [vmem:[%s2431_s30] sm:$0xff] %v429_v0  ;;  %v435_v3 = vld [vmem:[%s2426_s6 + $0x30] sm:$0xff] }
  0x24   : > { %432 = vst [vmem:[%s2431_s30 + $0x8] sm:$0xff] %v431_v1  ;;  %v437_v4 = vld [vmem:[%s2426_s6 + $0x40] sm:$0xff]  ;;  %v439_v5 = vld [vmem:[%s2426_s6 + $0x50] sm:$0xff] }
  0x25   : > { %434 = vst [vmem:[%s2431_s30 + $0x10] sm:$0xff] %v433_v2  ;;  %v441_v6 = vld [vmem:[%s2426_s6 + $0x60] sm:$0xff]  ;;  %v443_v7 = vld [vmem:[%s2426_s6 + $0x70] sm:$0xff] }
  0x26   : > { %436 = vst [vmem:[%s2431_s30 + $0x18] sm:$0xff] %v435_v3  ;;  %v445_v8 = vld [vmem:[%s2426_s6 + $0x80] sm:$0xff]  ;;  %v447_v9 = vld [vmem:[%s2426_s6 + $0x90] sm:$0xff] }
  0x27   : > { %438 = vst [vmem:[%s2431_s30 + $0x20] sm:$0xff] %v437_v4  ;;  %v449_v10 = vld [vmem:[%s2426_s6 + $0xa0] sm:$0xff]  ;;  %v451_v11 = vld [vmem:[%s2426_s6 + $0xb0] sm:$0xff] }
  0x28   : > { %440 = vst [vmem:[%s2431_s30 + $0x28] sm:$0xff] %v439_v5  ;;  %v453_v12 = vld [vmem:[%s2426_s6 + $0xc0] sm:$0xff]  ;;  %v455_v13 = vld [vmem:[%s2426_s6 + $0xd0] sm:$0xff] }
  0x29   : > { %442 = vst [vmem:[%s2431_s30 + $0x30] sm:$0xff] %v441_v6  ;;  %v457_v14 = vld [vmem:[%s2426_s6 + $0xe0] sm:$0xff]  ;;  %v459_v15 = vld [vmem:[%s2426_s6 + $0xf0] sm:$0xff] }
  0x2a   : > { %444 = vst [vmem:[%s2431_s30 + $0x38] sm:$0xff] %v443_v7  ;;  %v461_v16 = vld [vmem:[%s2426_s6 + $0x100] sm:$0xff]  ;;  %v463_v17 = vld [vmem:[%s2426_s6 + $0x110] sm:$0xff] }
  0x2b   : > { %446 = vst [vmem:[%s2431_s30 + $0x40] sm:$0xff] %v445_v8  ;;  %v465_v18 = vld [vmem:[%s2426_s6 + $0x120] sm:$0xff]  ;;  %v467_v19 = vld [vmem:[%s2426_s6 + $0x130] sm:$0xff] }
  0x2c   : > { %448 = vst [vmem:[%s2431_s30 + $0x48] sm:$0xff] %v447_v9  ;;  %v469_v20 = vld [vmem:[%s2426_s6 + $0x140] sm:$0xff]  ;;  %v471_v21 = vld [vmem:[%s2426_s6 + $0x150] sm:$0xff] }
  0x2d   : > { %450 = vst [vmem:[%s2431_s30 + $0x50] sm:$0xff] %v449_v10  ;;  %v473_v22 = vld [vmem:[%s2426_s6 + $0x160] sm:$0xff]  ;;  %v475_v23 = vld [vmem:[%s2426_s6 + $0x170] sm:$0xff] }
  0x2e   : > { %452 = vst [vmem:[%s2431_s30 + $0x58] sm:$0xff] %v451_v11  ;;  %v477_v24 = vld [vmem:[%s2426_s6 + $0x180] sm:$0xff]  ;;  %v479_v25 = vld [vmem:[%s2426_s6 + $0x190] sm:$0xff] }
  0x2f   : > { %454 = vst [vmem:[%s2431_s30 + $0x60] sm:$0xff] %v453_v12  ;;  %v481_v26 = vld [vmem:[%s2426_s6 + $0x1a0] sm:$0xff]  ;;  %v483_v27 = vld [vmem:[%s2426_s6 + $0x1b0] sm:$0xff] }
  0x30   : > { %456 = vst [vmem:[%s2431_s30 + $0x68] sm:$0xff] %v455_v13  ;;  %v485_v28 = vld [vmem:[%s2426_s6 + $0x1c0] sm:$0xff]  ;;  %v487_v29 = vld [vmem:[%s2426_s6 + $0x1d0] sm:$0xff] }
  0x31   : > { %458 = vst [vmem:[%s2431_s30 + $0x70] sm:$0xff] %v457_v14  ;;  %v489_v30 = vld [vmem:[%s2426_s6 + $0x1e0] sm:$0xff]  ;;  %v491_v31 = vld [vmem:[%s2426_s6 + $0x1f0] sm:$0xff] }
  0x32   : > { %460 = vst [vmem:[%s2431_s30 + $0x78] sm:$0xff] %v459_v15  ;;  %v493_v32 = vld [vmem:[%s2426_s6 + $0x200] sm:$0xff]  ;;  %v495_v33 = vld [vmem:[%s2426_s6 + $0x210] sm:$0xff] }
  0x33   : > { %462 = vst [vmem:[%s2431_s30 + $0x80] sm:$0xff] %v461_v16  ;;  %v497_v34 = vld [vmem:[%s2426_s6 + $0x220] sm:$0xff]  ;;  %v499_v35 = vld [vmem:[%s2426_s6 + $0x230] sm:$0xff] }
  0x34   : > { %464 = vst [vmem:[%s2431_s30 + $0x88] sm:$0xff] %v463_v17  ;;  %v501_v36 = vld [vmem:[%s2426_s6 + $0x240] sm:$0xff]  ;;  %v503_v37 = vld [vmem:[%s2426_s6 + $0x250] sm:$0xff] }
  0x35   : > { %466 = vst [vmem:[%s2431_s30 + $0x90] sm:$0xff] %v465_v18  ;;  %v505_v38 = vld [vmem:[%s2426_s6 + $0x260] sm:$0xff]  ;;  %v507_v39 = vld [vmem:[%s2426_s6 + $0x270] sm:$0xff] }
  0x36   : > { %468 = vst [vmem:[%s2431_s30 + $0x98] sm:$0xff] %v467_v19  ;;  %v509_v40 = vld [vmem:[%s2426_s6 + $0x280] sm:$0xff]  ;;  %v511_v41 = vld [vmem:[%s2426_s6 + $0x290] sm:$0xff] }
  0x37   : > { %470 = vst [vmem:[%s2431_s30 + $0xa0] sm:$0xff] %v469_v20  ;;  %v513_v42 = vld [vmem:[%s2426_s6 + $0x2a0] sm:$0xff]  ;;  %v515_v43 = vld [vmem:[%s2426_s6 + $0x2b0] sm:$0xff] }
  0x38   : > { %472 = vst [vmem:[%s2431_s30 + $0xa8] sm:$0xff] %v471_v21  ;;  %v517_v44 = vld [vmem:[%s2426_s6 + $0x2c0] sm:$0xff]  ;;  %v519_v45 = vld [vmem:[%s2426_s6 + $0x2d0] sm:$0xff] }
  0x39   : > { %474 = vst [vmem:[%s2431_s30 + $0xb0] sm:$0xff] %v473_v22  ;;  %v521_v46 = vld [vmem:[%s2426_s6 + $0x2e0] sm:$0xff]  ;;  %v523_v47 = vld [vmem:[%s2426_s6 + $0x2f0] sm:$0xff] }
  0x3a   : > { %476 = vst [vmem:[%s2431_s30 + $0xb8] sm:$0xff] %v475_v23  ;;  %v525_v48 = vld [vmem:[%s2426_s6 + $0x300] sm:$0xff]  ;;  %v527_v49 = vld [vmem:[%s2426_s6 + $0x310] sm:$0xff] }
  0x3b   : > { %478 = vst [vmem:[%s2431_s30 + $0xc0] sm:$0xff] %v477_v24  ;;  %v529_v50 = vld [vmem:[%s2426_s6 + $0x320] sm:$0xff]  ;;  %v531_v51 = vld [vmem:[%s2426_s6 + $0x330] sm:$0xff] }
  0x3c   : > { %480 = vst [vmem:[%s2431_s30 + $0xc8] sm:$0xff] %v479_v25  ;;  %v533_v52 = vld [vmem:[%s2426_s6 + $0x340] sm:$0xff]  ;;  %v535_v53 = vld [vmem:[%s2426_s6 + $0x350] sm:$0xff] }
  0x3d   : > { %482 = vst [vmem:[%s2431_s30 + $0xd0] sm:$0xff] %v481_v26  ;;  %v537_v54 = vld [vmem:[%s2426_s6 + $0x360] sm:$0xff]  ;;  %v539_v55 = vld [vmem:[%s2426_s6 + $0x370] sm:$0xff] }
  0x3e   : > { %484 = vst [vmem:[%s2431_s30 + $0xd8] sm:$0xff] %v483_v27  ;;  %v541_v56 = vld [vmem:[%s2426_s6 + $0x380] sm:$0xff]  ;;  %v543_v57 = vld [vmem:[%s2426_s6 + $0x390] sm:$0xff] }
  0x3f   : > { %486 = vst [vmem:[%s2431_s30 + $0xe0] sm:$0xff] %v485_v28  ;;  %v545_v58 = vld [vmem:[%s2426_s6 + $0x3a0] sm:$0xff]  ;;  %v547_v59 = vld [vmem:[%s2426_s6 + $0x3b0] sm:$0xff] }
  0x40   : > { %488 = vst [vmem:[%s2431_s30 + $0xe8] sm:$0xff] %v487_v29  ;;  %v549_v60 = vld [vmem:[%s2426_s6 + $0x3c0] sm:$0xff]  ;;  %v551_v61 = vld [vmem:[%s2426_s6 + $0x3d0] sm:$0xff] }
  0x41   : > { %490 = vst [vmem:[%s2431_s30 + $0xf0] sm:$0xff] %v489_v30  ;;  %v553_v62 = vld [vmem:[%s2426_s6 + $0x3e0] sm:$0xff]  ;;  %v555_v63 = vld [vmem:[%s2426_s6 + $0x3f0] sm:$0xff] }
  0x42   : > { %492 = vst [vmem:[%s2431_s30 + $0xf8] sm:$0xff] %v491_v31  ;;  %v557_v0 = vld [vmem:[%s2426_s6 + $0x400] sm:$0xff]  ;;  %v559_v1 = vld [vmem:[%s2426_s6 + $0x410] sm:$0xff] }
  0x43   : > { %494 = vst [vmem:[%s2431_s30 + $0x100] sm:$0xff] %v493_v32  ;;  %v561_v2 = vld [vmem:[%s2426_s6 + $0x420] sm:$0xff]  ;;  %v563_v3 = vld [vmem:[%s2426_s6 + $0x430] sm:$0xff] }
  0x44   : > { %496 = vst [vmem:[%s2431_s30 + $0x108] sm:$0xff] %v495_v33  ;;  %v565_v4 = vld [vmem:[%s2426_s6 + $0x440] sm:$0xff]  ;;  %v567_v5 = vld [vmem:[%s2426_s6 + $0x450] sm:$0xff] }
  0x45   : > { %498 = vst [vmem:[%s2431_s30 + $0x110] sm:$0xff] %v497_v34  ;;  %v569_v6 = vld [vmem:[%s2426_s6 + $0x460] sm:$0xff]  ;;  %v571_v7 = vld [vmem:[%s2426_s6 + $0x470] sm:$0xff] }
  0x46   : > { %500 = vst [vmem:[%s2431_s30 + $0x118] sm:$0xff] %v499_v35  ;;  %v573_v8 = vld [vmem:[%s2426_s6 + $0x480] sm:$0xff]  ;;  %v575_v9 = vld [vmem:[%s2426_s6 + $0x490] sm:$0xff] }
  0x47   : > { %502 = vst [vmem:[%s2431_s30 + $0x120] sm:$0xff] %v501_v36  ;;  %v577_v10 = vld [vmem:[%s2426_s6 + $0x4a0] sm:$0xff]  ;;  %v579_v11 = vld [vmem:[%s2426_s6 + $0x4b0] sm:$0xff] }
  0x48   : > { %504 = vst [vmem:[%s2431_s30 + $0x128] sm:$0xff] %v503_v37  ;;  %v581_v12 = vld [vmem:[%s2426_s6 + $0x4c0] sm:$0xff]  ;;  %v583_v13 = vld [vmem:[%s2426_s6 + $0x4d0] sm:$0xff] }
  0x49   : > { %506 = vst [vmem:[%s2431_s30 + $0x130] sm:$0xff] %v505_v38  ;;  %v585_v14 = vld [vmem:[%s2426_s6 + $0x4e0] sm:$0xff]  ;;  %v587_v15 = vld [vmem:[%s2426_s6 + $0x4f0] sm:$0xff] }
  0x4a   : > { %508 = vst [vmem:[%s2431_s30 + $0x138] sm:$0xff] %v507_v39  ;;  %v589_v16 = vld [vmem:[%s2426_s6 + $0x500] sm:$0xff]  ;;  %v591_v17 = vld [vmem:[%s2426_s6 + $0x510] sm:$0xff] }
  0x4b   : > { %510 = vst [vmem:[%s2431_s30 + $0x140] sm:$0xff] %v509_v40  ;;  %v593_v18 = vld [vmem:[%s2426_s6 + $0x520] sm:$0xff]  ;;  %v595_v19 = vld [vmem:[%s2426_s6 + $0x530] sm:$0xff] }
  0x4c   : > { %512 = vst [vmem:[%s2431_s30 + $0x148] sm:$0xff] %v511_v41  ;;  %v597_v20 = vld [vmem:[%s2426_s6 + $0x540] sm:$0xff]  ;;  %v599_v21 = vld [vmem:[%s2426_s6 + $0x550] sm:$0xff] }
  0x4d   : > { %514 = vst [vmem:[%s2431_s30 + $0x150] sm:$0xff] %v513_v42  ;;  %v601_v22 = vld [vmem:[%s2426_s6 + $0x560] sm:$0xff]  ;;  %v603_v23 = vld [vmem:[%s2426_s6 + $0x570] sm:$0xff] }
  0x4e   : > { %516 = vst [vmem:[%s2431_s30 + $0x158] sm:$0xff] %v515_v43  ;;  %v605_v24 = vld [vmem:[%s2426_s6 + $0x580] sm:$0xff]  ;;  %v607_v25 = vld [vmem:[%s2426_s6 + $0x590] sm:$0xff] }
  0x4f   : > { %518 = vst [vmem:[%s2431_s30 + $0x160] sm:$0xff] %v517_v44  ;;  %v609_v26 = vld [vmem:[%s2426_s6 + $0x5a0] sm:$0xff]  ;;  %v611_v27 = vld [vmem:[%s2426_s6 + $0x5b0] sm:$0xff] }
  0x50   : > { %520 = vst [vmem:[%s2431_s30 + $0x168] sm:$0xff] %v519_v45  ;;  %v613_v28 = vld [vmem:[%s2426_s6 + $0x5c0] sm:$0xff]  ;;  %v615_v29 = vld [vmem:[%s2426_s6 + $0x5d0] sm:$0xff] }
  0x51   : > { %522 = vst [vmem:[%s2431_s30 + $0x170] sm:$0xff] %v521_v46  ;;  %v617_v30 = vld [vmem:[%s2426_s6 + $0x5e0] sm:$0xff]  ;;  %v619_v31 = vld [vmem:[%s2426_s6 + $0x5f0] sm:$0xff] }
  0x52   : > { %524 = vst [vmem:[%s2431_s30 + $0x178] sm:$0xff] %v523_v47 }
  0x53   : > { %526 = vst [vmem:[%s2431_s30 + $0x180] sm:$0xff] %v525_v48 }
  0x54   : > { %528 = vst [vmem:[%s2431_s30 + $0x188] sm:$0xff] %v527_v49 }
  0x55   : > { %530 = vst [vmem:[%s2431_s30 + $0x190] sm:$0xff] %v529_v50 }
  0x56   : > { %532 = vst [vmem:[%s2431_s30 + $0x198] sm:$0xff] %v531_v51 }
  0x57   : > { %534 = vst [vmem:[%s2431_s30 + $0x1a0] sm:$0xff] %v533_v52 }
  0x58   : > { %536 = vst [vmem:[%s2431_s30 + $0x1a8] sm:$0xff] %v535_v53 }
  0x59   : > { %538 = vst [vmem:[%s2431_s30 + $0x1b0] sm:$0xff] %v537_v54 }
  0x5a   : > { %540 = vst [vmem:[%s2431_s30 + $0x1b8] sm:$0xff] %v539_v55 }
  0x5b   : > { %542 = vst [vmem:[%s2431_s30 + $0x1c0] sm:$0xff] %v541_v56 }
  0x5c   : > { %544 = vst [vmem:[%s2431_s30 + $0x1c8] sm:$0xff] %v543_v57 }
  0x5d   : > { %546 = vst [vmem:[%s2431_s30 + $0x1d0] sm:$0xff] %v545_v58 }
  0x5e   : > { %548 = vst [vmem:[%s2431_s30 + $0x1d8] sm:$0xff] %v547_v59 }
  0x5f   : > { %550 = vst [vmem:[%s2431_s30 + $0x1e0] sm:$0xff] %v549_v60 }
  0x60   : > { %552 = vst [vmem:[%s2431_s30 + $0x1e8] sm:$0xff] %v551_v61 }
  0x61   : > { %554 = vst [vmem:[%s2431_s30 + $0x1f0] sm:$0xff] %v553_v62 }
  0x62   : > { %556 = vst [vmem:[%s2431_s30 + $0x1f8] sm:$0xff] %v555_v63 }
  0x63   : > { %558 = vst [vmem:[%s2431_s30 + $0x200] sm:$0xff] %v557_v0 }
  0x64   : > { %560 = vst [vmem:[%s2431_s30 + $0x208] sm:$0xff] %v559_v1 }
  0x65   : > { %562 = vst [vmem:[%s2431_s30 + $0x210] sm:$0xff] %v561_v2 }
  0x66   : > { %564 = vst [vmem:[%s2431_s30 + $0x218] sm:$0xff] %v563_v3 }
  0x67   : > { %566 = vst [vmem:[%s2431_s30 + $0x220] sm:$0xff] %v565_v4 }
  0x68   : > { %568 = vst [vmem:[%s2431_s30 + $0x228] sm:$0xff] %v567_v5 }
  0x69   : > { %570 = vst [vmem:[%s2431_s30 + $0x230] sm:$0xff] %v569_v6 }
  0x6a   : > { %572 = vst [vmem:[%s2431_s30 + $0x238] sm:$0xff] %v571_v7 }
  0x6b   : > { %574 = vst [vmem:[%s2431_s30 + $0x240] sm:$0xff] %v573_v8 }
  0x6c   : > { %576 = vst [vmem:[%s2431_s30 + $0x248] sm:$0xff] %v575_v9 }
  0x6d   : > { %578 = vst [vmem:[%s2431_s30 + $0x250] sm:$0xff] %v577_v10 }
  0x6e   : > { %580 = vst [vmem:[%s2431_s30 + $0x258] sm:$0xff] %v579_v11 }
  0x6f   : > { %582 = vst [vmem:[%s2431_s30 + $0x260] sm:$0xff] %v581_v12 }
  0x70   : > { %584 = vst [vmem:[%s2431_s30 + $0x268] sm:$0xff] %v583_v13 }
  0x71   : > { %586 = vst [vmem:[%s2431_s30 + $0x270] sm:$0xff] %v585_v14 }
  0x72   : > { %588 = vst [vmem:[%s2431_s30 + $0x278] sm:$0xff] %v587_v15 }
  0x73   : > { %590 = vst [vmem:[%s2431_s30 + $0x280] sm:$0xff] %v589_v16 }
  0x74   : > { %592 = vst [vmem:[%s2431_s30 + $0x288] sm:$0xff] %v591_v17 }
  0x75   : > { %594 = vst [vmem:[%s2431_s30 + $0x290] sm:$0xff] %v593_v18 }
  0x76   : > { %596 = vst [vmem:[%s2431_s30 + $0x298] sm:$0xff] %v595_v19 }
  0x77   : > { %598 = vst [vmem:[%s2431_s30 + $0x2a0] sm:$0xff] %v597_v20 }
  0x78   : > { %600 = vst [vmem:[%s2431_s30 + $0x2a8] sm:$0xff] %v599_v21 }
  0x79   : > { %602 = vst [vmem:[%s2431_s30 + $0x2b0] sm:$0xff] %v601_v22 }
  0x7a   : > { %604 = vst [vmem:[%s2431_s30 + $0x2b8] sm:$0xff] %v603_v23 }
  0x7b   : > { %606 = vst [vmem:[%s2431_s30 + $0x2c0] sm:$0xff] %v605_v24 }
  0x7c   : > { %608 = vst [vmem:[%s2431_s30 + $0x2c8] sm:$0xff] %v607_v25 }
  0x7d   : > { %610 = vst [vmem:[%s2431_s30 + $0x2d0] sm:$0xff] %v609_v26 }
  0x7e   : > { %612 = vst [vmem:[%s2431_s30 + $0x2d8] sm:$0xff] %v611_v27 }
  0x7f   : > { %614 = vst [vmem:[%s2431_s30 + $0x2e0] sm:$0xff] %v613_v28 }
  0x80   : > { %616 = vst [vmem:[%s2431_s30 + $0x2e8] sm:$0xff] %v615_v29 }
  0x81   : > { %618 = vst [vmem:[%s2431_s30 + $0x2f0] sm:$0xff] %v617_v30 }
  0x82   : > { %620 = vst [vmem:[%s2431_s30 + $0x2f8] sm:$0xff] %v619_v31 }
  0x83 PF: > { %p1669_p11 = scmp.ge.s32.totalorder %s2306_s25, 1  ;;  %p641_p12 = scmp.lt.s32.totalorder %s2306_s25, 7 }
  0x85   : > { %p642_p13 = pnand %p1669_p11, %p641_p12 }
  0x86   : > { %s648_s8 = sand.u32 (!%p642_p13), 1, %s2282_s0   ;;  %s685_s9 = sand.u32 (!%p642_p13), 1, %s2274_s18  }
  0x87   : > { %645 = sbr.rel (%p642_p13) target bundleno = 425 (0x1a9), region = 70  ;;  %s2626_s14 = sshll.u32 (!%p642_p13), %s685_s9, 1 }
  0x88   : > { %s2162_s13 = smul.u32 (!%p642_p13), 768, %s648_s8  ;;  %s2630_s16 = sshll.u32 (!%p642_p13), %s2294_s22, 1 }
  0x89   : > { %s688_s15 = smul.u32 (!%p642_p13), 6, %s2290_s21  ;;  %p700_p1 = scmp.lt.s32.totalorder (!%p642_p13), %s2630_s16, 3 }
  0x8a   : > { %s2650_s9 = scalar_lea.vmem (!%p642_p13), [#allocation3], %s2162_s13  ;;  %s687_s2 = scalar_lea.vmem (!%p642_p13), [#allocation4], %s2626_s14 }
  0x8b   : > { %p691_p0 = scmp.lt.s32.totalorder (!%p642_p13), %s688_s15, 17  ;;  %p1673_p2 = scmp.ne.s32.totalorder (!%p642_p13), %s2290_s21, 0 }
  0x8c   : > { %s2636_s17 = scalar_select %p700_p1, %s2630_s16, 3 }
  0x8d   : > { %s2951_s15 = smov (!%p691_p0, %s688_s15), 17  ;;  %713 = sbr.rel (%p1673_p2) target bundleno = 148 (0x94), region = 78 }
  0x8e   : > { %s695_s18 = scalar_lea.vmem %s2927_s1, %s2951_s15  ;;  %s702_s22 = scalar_lea.vmem %s2929_s3, %s2636_s17 }
  0x8f   : > { %s707_s8 = scalar_lea.vmem %s2930_s4, %s2636_s17 }
  0x92   : > { %v2308_v32 = vmov 0.0  }
  0x93   : > { %714 = vst [vmem:[#allocation2] sm:$0xf] %v2308_v32 }
  0x94 PF: > { %v1732_v33 = vld [vmem:[%s2650_s9 + $0x70] sm:$0xf]  ;;  %v2080_v34 = vld [vmem:[%s2650_s9 + $0x74] sm:$0xf0]  ;;  %v1724_v44 = vld [vmem:[%s2650_s9 + $0x60] sm:$0xf] }
  0x95   : > { %v1796_v35 = vld [vmem:[%s2650_s9 + $0xf0] sm:$0xf]  ;;  %v1733_v36 = vor.u32 %v2080_v34, %v1732_v33  ;;  %v2096_v37 = vld [vmem:[%s2650_s9 + $0xf4] sm:$0xf0]  ;;  %v2078_v46 = vld [vmem:[%s2650_s9 + $0x64] sm:$0xf0] }
  0x96   : > { %v1860_v38 = vld [vmem:[%s2650_s9 + $0x170] sm:$0xf]  ;;  %v2112_v39 = vld [vmem:[%s2650_s9 + $0x174] sm:$0xf0]  ;;  %v1797_v40 = vor.u32 %v2096_v37, %v1796_v35  ;;  %v1788_v47 = vld [vmem:[%s2650_s9 + $0xe0] sm:$0xf]  ;;  %v1725_v49 = vor.u32 %v2078_v46, %v1724_v44 }
  0x97   : > { %v1861_v41 = vor.u32 %v2112_v39, %v1860_v38  ;;  %v1924_v42 = vld [vmem:[%s2650_s9 + $0x1f0] sm:$0xf]  ;;  %v2128_v43 = vld [vmem:[%s2650_s9 + $0x1f4] sm:$0xf0]  ;;  %1307 = vmatpush.bf16.msra.mxu0 %v1733_v36  ;;  %v2094_v48 = vld [vmem:[%s2650_s9 + $0xe4] sm:$0xf0] }
  0x98   : > { %v1925_v45 = vor.u32 %v2128_v43, %v1924_v42  ;;  %1320 = vmatpush.bf16.msra.mxu1 %v1797_v40  ;;  %v1789_v50 = vor.u32 %v2094_v48, %v1788_v47  ;;  %v1852_v51 = vld [vmem:[%s2650_s9 + $0x160] sm:$0xf]  ;;  %v2110_v52 = vld [vmem:[%s2650_s9 + $0x164] sm:$0xf0]  ;;  %v1716_v56 = vld [vmem:[%s2650_s9 + $0x50] sm:$0xf] }
  0x99   : > { %1333 = vmatpush.bf16.msra.mxu2 %v1861_v41  ;;  %v1916_v53 = vld [vmem:[%s2650_s9 + $0x1e0] sm:$0xf]  ;;  %v1853_v54 = vor.u32 %v2110_v52, %v1852_v51  ;;  %v2126_v55 = vld [vmem:[%s2650_s9 + $0x1e4] sm:$0xf0]  ;;  %v2076_v57 = vld [vmem:[%s2650_s9 + $0x54] sm:$0xf0] }
  0x9a   : > { %1346 = vmatpush.bf16.msra.mxu3 %v1925_v45  ;;  %v1917_v58 = vor.u32 %v2126_v55, %v1916_v53  ;;  %v1780_v59 = vld [vmem:[%s2650_s9 + $0xd0] sm:$0xf]  ;;  %v2092_v60 = vld [vmem:[%s2650_s9 + $0xd4] sm:$0xf0]  ;;  %v1717_v62 = vor.u32 %v2076_v57, %v1716_v56  ;;  %v1708_v4 = vld [vmem:[%s2650_s9 + $0x40] sm:$0xf] }
  0x9b   : > { %v1844_v61 = vld [vmem:[%s2650_s9 + $0x150] sm:$0xf]  ;;  %1308 = vmatpush.bf16.msra.mxu0 %v1725_v49  ;;  %v2108_v63 = vld [vmem:[%s2650_s9 + $0x154] sm:$0xf0]  ;;  %v1781_v2 = vor.u32 %v2092_v60, %v1780_v59  ;;  %v2074_v5 = vld [vmem:[%s2650_s9 + $0x44] sm:$0xf0] }
  0x9c   : > { %v1908_v0 = vld [vmem:[%s2650_s9 + $0x1d0] sm:$0xf]  ;;  %v2124_v1 = vld [vmem:[%s2650_s9 + $0x1d4] sm:$0xf0]  ;;  %1321 = vmatpush.bf16.msra.mxu1 %v1789_v50  ;;  %v1845_v3 = vor.u32 %v2108_v63, %v1844_v61  ;;  %v1772_v6 = vld [vmem:[%s2650_s9 + $0xc0] sm:$0xf]  ;;  %v1709_v13 = vor.u32 %v2074_v5, %v1708_v4 }
  0x9d   : > { %1334 = vmatpush.bf16.msra.mxu2 %v1853_v54  ;;  %v1909_v7 = vor.u32 %v2124_v1, %v1908_v0  ;;  %v2090_v8 = vld [vmem:[%s2650_s9 + $0xc4] sm:$0xf0]  ;;  %v1836_v9 = vld [vmem:[%s2650_s9 + $0x140] sm:$0xf]  ;;  %v1700_v16 = vld [vmem:[%s2650_s9 + $0x30] sm:$0xf] }
  0x9e   : > { %1347 = vmatpush.bf16.msra.mxu3 %v1917_v58  ;;  %v2106_v10 = vld [vmem:[%s2650_s9 + $0x144] sm:$0xf0]  ;;  %v1900_v11 = vld [vmem:[%s2650_s9 + $0x1c0] sm:$0xf]  ;;  %v1773_v14 = vor.u32 %v2090_v8, %v1772_v6  ;;  %v2072_v17 = vld [vmem:[%s2650_s9 + $0x34] sm:$0xf0] }
  0x9f   : > { %v2122_v12 = vld [vmem:[%s2650_s9 + $0x1c4] sm:$0xf0]  ;;  %1309 = vmatpush.bf16.msra.mxu0 %v1717_v62  ;;  %v1837_v15 = vor.u32 %v2106_v10, %v1836_v9  ;;  %v1764_v18 = vld [vmem:[%s2650_s9 + $0xb0] sm:$0xf]  ;;  %v2088_v20 = vld [vmem:[%s2650_s9 + $0xb4] sm:$0xf0]  ;;  %v1701_v25 = vor.u32 %v2072_v17, %v1700_v16 }
  0xa0   : > { %1322 = vmatpush.bf16.msra.mxu1 %v1781_v2  ;;  %v1901_v19 = vor.u32 %v2122_v12, %v1900_v11  ;;  %v1828_v21 = vld [vmem:[%s2650_s9 + $0x130] sm:$0xf]  ;;  %v2104_v22 = vld [vmem:[%s2650_s9 + $0x134] sm:$0xf0]  ;;  %v1765_v26 = vor.u32 %v2088_v20, %v1764_v18  ;;  %v1692_v28 = vld [vmem:[%s2650_s9 + $0x20] sm:$0xf] }
  0xa1   : > { %1335 = vmatpush.bf16.msra.mxu2 %v1845_v3  ;;  %v1892_v23 = vld [vmem:[%s2650_s9 + $0x1b0] sm:$0xf]  ;;  %v2120_v24 = vld [vmem:[%s2650_s9 + $0x1b4] sm:$0xf0]  ;;  %v1829_v27 = vor.u32 %v2104_v22, %v1828_v21  ;;  %v2070_v29 = vld [vmem:[%s2650_s9 + $0x24] sm:$0xf0] }
  0xa2   : > { %1348 = vmatpush.bf16.msra.mxu3 %v1909_v7  ;;  %v1756_v30 = vld [vmem:[%s2650_s9 + $0xa0] sm:$0xf]  ;;  %v1893_v31 = vor.u32 %v2120_v24, %v1892_v23  ;;  %v2086_v32 = vld [vmem:[%s2650_s9 + $0xa4] sm:$0xf0]  ;;  %v1693_v37 = vor.u32 %v2070_v29, %v1692_v28  ;;  %v1684_v40 = vld [vmem:[%s2650_s9 + $0x10] sm:$0xf] }
  0xa3   : > { %1310 = vmatpush.bf16.msra.mxu0 %v1709_v13  ;;  %v1820_v33 = vld [vmem:[%s2650_s9 + $0x120] sm:$0xf]  ;;  %v2102_v34 = vld [vmem:[%s2650_s9 + $0x124] sm:$0xf0]  ;;  %v1757_v38 = vor.u32 %v2086_v32, %v1756_v30  ;;  %v2068_v41 = vld [vmem:[%s2650_s9 + $0x14] sm:$0xf0] }
  0xa4   : > { %1323 = vmatpush.bf16.msra.mxu1 %v1773_v14  ;;  %v1884_v35 = vld [vmem:[%s2650_s9 + $0x1a0] sm:$0xf]  ;;  %v2118_v36 = vld [vmem:[%s2650_s9 + $0x1a4] sm:$0xf0]  ;;  %v1821_v39 = vor.u32 %v2102_v34, %v1820_v33  ;;  %v1748_v42 = vld [vmem:[%s2650_s9 + $0x90] sm:$0xf]  ;;  %v1685_v49 = vor.u32 %v2068_v41, %v1684_v40 }
  0xa5   : > { %1336 = vmatpush.bf16.msra.mxu2 %v1837_v15  ;;  %v1885_v43 = vor.u32 %v2118_v36, %v1884_v35  ;;  %v2084_v44 = vld [vmem:[%s2650_s9 + $0x94] sm:$0xf0]  ;;  %v1812_v45 = vld [vmem:[%s2650_s9 + $0x110] sm:$0xf]  ;;  %v1676_v50 = vld [vmem:[%s2650_s9] sm:$0xf] }
  0xa6   : > { %1349 = vmatpush.bf16.msra.mxu3 %v1901_v19  ;;  %v2100_v46 = vld [vmem:[%s2650_s9 + $0x114] sm:$0xf0]  ;;  %v1876_v47 = vld [vmem:[%s2650_s9 + $0x190] sm:$0xf]  ;;  %v2066_v51 = vld [vmem:[%s2650_s9 + $0x4] sm:$0xf0]  ;;  %v1749_v52 = vor.u32 %v2084_v44, %v1748_v42 }
  0xa7   : > { %1311 = vmatpush.bf16.msra.mxu0 %v1701_v25  ;;  %v2116_v48 = vld [vmem:[%s2650_s9 + $0x194] sm:$0xf0]  ;;  %v1813_v53 = vor.u32 %v2100_v46, %v1812_v45  ;;  %v1740_v54 = vld [vmem:[%s2650_s9 + $0x80] sm:$0xf]  ;;  %v2082_v55 = vld [vmem:[%s2650_s9 + $0x84] sm:$0xf0]  ;;  %v1677_v0 = vor.u32 %v2066_v51, %v1676_v50 }
  0xa8   : > { %1324 = vmatpush.bf16.msra.mxu1 %v1765_v26  ;;  %v1804_v56 = vld [vmem:[%s2650_s9 + $0x100] sm:$0xf]  ;;  %v1877_v57 = vor.u32 %v2116_v48, %v1876_v47  ;;  %v2098_v58 = vld [vmem:[%s2650_s9 + $0x104] sm:$0xf0]  ;;  %v1988_v61 = vld [vmem:[%s2650_s9 + $0x270] sm:$0xf]  ;;  %v1741_v4 = vor.u32 %v2082_v55, %v1740_v54 }
  0xa9   : > { %1337 = vmatpush.bf16.msra.mxu2 %v1829_v27  ;;  %v1868_v59 = vld [vmem:[%s2650_s9 + $0x180] sm:$0xf]  ;;  %v2114_v60 = vld [vmem:[%s2650_s9 + $0x184] sm:$0xf0]  ;;  %v2144_v62 = vld [vmem:[%s2650_s9 + $0x274] sm:$0xf0]  ;;  %v1805_v5 = vor.u32 %v2098_v58, %v1804_v56 }
  0xaa   : > { %1350 = vmatpush.bf16.msra.mxu3 %v1893_v31  ;;  %v2052_v63 = vld [vmem:[%s2650_s9 + $0x2f0] sm:$0xf]  ;;  %v2160_v1 = vld [vmem:[%s2650_s9 + $0x2f4] sm:$0xf0]  ;;  %v2079_v2 = vld [vmem:[%s2650_s9 + $0x74] sm:$0xf]  ;;  %v1869_v8 = vor.u32 %v2114_v60, %v1868_v59  ;;  %v1989_v9 = vor.u32 %v2144_v62, %v1988_v61 }
  0xab   : > { %1312 = vmatpush.bf16.msra.mxu0 %v1693_v37  ;;  %v1734_v3 = vld [vmem:[%s2650_s9 + $0x78] sm:$0xf0]  ;;  %v2095_v6 = vld [vmem:[%s2650_s9 + $0xf4] sm:$0xf]  ;;  %v2053_v10 = vor.u32 %v2160_v1, %v2052_v63  ;;  %v1980_v12 = vld [vmem:[%s2650_s9 + $0x260] sm:$0xf] }
  0xac   : > { %1325 = vmatpush.bf16.msra.mxu1 %v1757_v38  ;;  %v1798_v7 = vld [vmem:[%s2650_s9 + $0xf8] sm:$0xf0]  ;;  %v1737_v11 = vor.u32 %v2079_v2, %v1734_v3  ;;  %v2142_v13 = vld [vmem:[%s2650_s9 + $0x264] sm:$0xf0]  ;;  %v2044_v14 = vld [vmem:[%s2650_s9 + $0x2e0] sm:$0xf] }
  0xad   : > { %1338 = vmatpush.bf16.msra.mxu2 %v1821_v39  ;;  %v1801_v15 = vor.u32 %v2095_v6, %v1798_v7  ;;  %v2158_v16 = vld [vmem:[%s2650_s9 + $0x2e4] sm:$0xf0]  ;;  %v2077_v17 = vld [vmem:[%s2650_s9 + $0x64] sm:$0xf]  ;;  %v1726_v18 = vld [vmem:[%s2650_s9 + $0x68] sm:$0xf0]  ;;  %v1981_v21 = vor.u32 %v2142_v13, %v1980_v12 }
  0xae   : > { %1351 = vmatpush.bf16.msra.mxu3 %v1885_v43  ;;  %v2093_v19 = vld [vmem:[%s2650_s9 + $0xe4] sm:$0xf]  ;;  %v1790_v20 = vld [vmem:[%s2650_s9 + $0xe8] sm:$0xf0]  ;;  %v1972_v22 = vld [vmem:[%s2650_s9 + $0x250] sm:$0xf]  ;;  %v2045_v24 = vor.u32 %v2158_v16, %v2044_v14  ;;  %v1729_v25 = vor.u32 %v2077_v17, %v1726_v18 }
  0xaf   : > { %1313 = vmatpush.bf16.msra.mxu0 %v1685_v49  ;;  %v2140_v23 = vld [vmem:[%s2650_s9 + $0x254] sm:$0xf0]  ;;  %v2036_v26 = vld [vmem:[%s2650_s9 + $0x2d0] sm:$0xf]  ;;  %v1793_v29 = vor.u32 %v2093_v19, %v1790_v20  ;;  %v2075_v30 = vld [vmem:[%s2650_s9 + $0x54] sm:$0xf] }
  0xb0   : > { %1326 = vmatpush.bf16.msra.mxu1 %v1749_v52  ;;  %v2156_v27 = vld [vmem:[%s2650_s9 + $0x2d4] sm:$0xf0]  ;;  %v1718_v31 = vld [vmem:[%s2650_s9 + $0x58] sm:$0xf0]  ;;  %v2091_v32 = vld [vmem:[%s2650_s9 + $0xd4] sm:$0xf]  ;;  %v1973_v34 = vor.u32 %v2140_v23, %v1972_v22 }
  0xb1   : > { %1339 = vmatpush.bf16.msra.mxu2 %v1813_v53  ;;  %v716_v28 = vld [vmem:[%s695_s18] sm:$0x3f]  ;;  %v1782_v33 = vld [vmem:[%s2650_s9 + $0xd8] sm:$0xf0]  ;;  %v2037_v35 = vor.u32 %v2156_v27, %v2036_v26  ;;  %v1721_v36 = vor.u32 %v2075_v30, %v1718_v31  ;;  %v1964_v37 = vld [vmem:[%s2650_s9 + $0x240] sm:$0xf] }
  0xb2   : > { %1352 = vmatpush.bf16.msra.mxu3 %v1877_v57  ;;  %814 = vst [vmem:[#allocation1] ss:$9 sm:$0xff] %v716_v28  ;;  %v2138_v38 = vld [vmem:[%s2650_s9 + $0x244] sm:$0xf0]  ;;  %v2028_v39 = vld [vmem:[%s2650_s9 + $0x2c0] sm:$0xf]  ;;  %v1785_v40 = vor.u32 %v2091_v32, %v1782_v33 }
  0xb3   : > { %1314 = vmatpush.bf16.msra.mxu0 %v1677_v0  ;;  %v2154_v41 = vld [vmem:[%s2650_s9 + $0x2c4] sm:$0xf0]  ;;  %v2073_v42 = vld [vmem:[%s2650_s9 + $0x44] sm:$0xf]  ;;  %v1710_v43 = vld [vmem:[%s2650_s9 + $0x48] sm:$0xf0]  ;;  %v1965_v47 = vor.u32 %v2138_v38, %v1964_v37 }
  0xb4   : > { %1327 = vmatpush.bf16.msra.mxu1 %v1741_v4  ;;  %v2089_v44 = vld [vmem:[%s2650_s9 + $0xc4] sm:$0xf]  ;;  %v1774_v45 = vld [vmem:[%s2650_s9 + $0xc8] sm:$0xf0]  ;;  %v1956_v46 = vld [vmem:[%s2650_s9 + $0x230] sm:$0xf]  ;;  %v2029_v51 = vor.u32 %v2154_v41, %v2028_v39  ;;  %v1713_v52 = vor.u32 %v2073_v42, %v1710_v43 }
  0xb5   : > { %1340 = vmatpush.bf16.msra.mxu2 %v1805_v5  ;;  %v2136_v48 = vld [vmem:[%s2650_s9 + $0x234] sm:$0xf0]  ;;  %v2020_v49 = vld [vmem:[%s2650_s9 + $0x2b0] sm:$0xf]  ;;  %v1777_v56 = vor.u32 %v2089_v44, %v1774_v45  ;;  %v2071_v57 = vld [vmem:[%s2650_s9 + $0x34] sm:$0xf] }
  0xb6   : > { %1353 = vmatpush.bf16.msra.mxu3 %v1869_v8  ;;  %v2152_v50 = vld [vmem:[%s2650_s9 + $0x2b4] sm:$0xf0]  ;;  %v1702_v58 = vld [vmem:[%s2650_s9 + $0x38] sm:$0xf0]  ;;  %v2087_v60 = vld [vmem:[%s2650_s9 + $0xb4] sm:$0xf]  ;;  %v1957_v62 = vor.u32 %v2136_v48, %v1956_v46 }
  0xb7   : > { %1359 = vmatpush.bf16.msrb.mxu0 %v1989_v9  ;;  %v1766_v61 = vld [vmem:[%s2650_s9 + $0xb8] sm:$0xf0]  ;;  %v2021_v63 = vor.u32 %v2152_v50, %v2020_v49  ;;  %v1705_v0 = vor.u32 %v2071_v57, %v1702_v58  ;;  %v1948_v1 = vld [vmem:[%s2650_s9 + $0x220] sm:$0xf]  ;;  %v2134_v2 = vld [vmem:[%s2650_s9 + $0x224] sm:$0xf0] }
  0xb8   : > { %1372 = vmatpush.bf16.msrb.mxu1 %v2053_v10  ;;  %v2012_v3 = vld [vmem:[%s2650_s9 + $0x2a0] sm:$0xf]  ;;  %v1769_v4 = vor.u32 %v2087_v60, %v1766_v61  ;;  %v2150_v5 = vld [vmem:[%s2650_s9 + $0x2a4] sm:$0xf0]  ;;  %v2069_v6 = vld [vmem:[%s2650_s9 + $0x24] sm:$0xf]  ;;  %v1949_v10 = vor.u32 %v2134_v2, %v1948_v1 }
  0xb9   : > { %1385 = vmatpush.bf16.msrb.mxu2 %v1737_v11  ;;  %v2759_v53 = vld [vmem:[#allocation1] sm:$0xff]  ;;  %v2761_v54 = vld [vmem:[#allocation1 + $0x12] sm:$0xff]  ;;  %v2763_v55 = vld [vmem:[#allocation1 + $0x9] sm:$0xff]  ;;  %v2013_v11 = vor.u32 %v2150_v5, %v2012_v3  ;;  %vm1466_vm0 = vcmask 1041408   ;;  %p2058_p3 = scmp.ne.s32.totalorder %s2290_s21, 2 }
  0xba   : > { %1398 = vmatpush.bf16.msrb.mxu3 %v1801_v15  ;;  %1315 = vmatmul.bf16.vlgmr.msra.gmra.mxu0 %v2759_v53  ;;  %v2768_v59 = vld [vmem:[#allocation1 + $0x1b] sm:$0xff]  ;;  %v2085_v8 = vld [vmem:[%s2650_s9 + $0xa4] sm:$0xf]  ;;  %v2132_v14 = vld [vmem:[%s2650_s9 + $0x214] sm:$0xf0] }
  0xbb   : > { %1360 = vmatpush.bf16.msrb.mxu0 %v1981_v21  ;;  %1341 = vmatmul.bf16.vlgmr.msra.gmra.mxu2 %v2761_v54  ;;  %v1694_v7 = vld [vmem:[%s2650_s9 + $0x28] sm:$0xf0]  ;;  %v1940_v13 = vld [vmem:[%s2650_s9 + $0x210] sm:$0xf]  ;;  %v2148_v17 = vld [vmem:[%s2650_s9 + $0x294] sm:$0xf0] }
  0xbc   : > { %1373 = vmatpush.bf16.msrb.mxu1 %v2045_v24  ;;  %1354 = vmatmul.bf16.vlgmr.msra.gmra.mxu3 %v2768_v59  ;;  %v1758_v9 = vld [vmem:[%s2650_s9 + $0xa8] sm:$0xf0]  ;;  %v1697_v12 = vor.u32 %v2069_v6, %v1694_v7  ;;  %v2004_v15 = vld [vmem:[%s2650_s9 + $0x290] sm:$0xf]  ;;  %v2067_v18 = vld [vmem:[%s2650_s9 + $0x14] sm:$0xf]  ;;  %v1941_v22 = vor.u32 %v2132_v14, %v1940_v13 }
  0xbd   : > { %1386 = vmatpush.bf16.msrb.mxu2 %v1729_v25  ;;  %1328 = vmatmul.bf16.vlgmr.msra.gmra.mxu1 %v2763_v55  ;;  %v1761_v16 = vor.u32 %v2085_v8, %v1758_v9  ;;  %v1686_v19 = vld [vmem:[%s2650_s9 + $0x18] sm:$0xf0]  ;;  %v2083_v20 = vld [vmem:[%s2650_s9 + $0x94] sm:$0xf]  ;;  %v1932_v23 = vld [vmem:[%s2650_s9 + $0x200] sm:$0xf]  ;;  %v2005_v25 = vor.u32 %v2148_v17, %v2004_v15 }
  0xbe   : > { %1399 = vmatpush.bf16.msrb.mxu3 %v1793_v29  ;;  %v1750_v21 = vld [vmem:[%s2650_s9 + $0x98] sm:$0xf0]  ;;  %v2130_v24 = vld [vmem:[%s2650_s9 + $0x204] sm:$0xf0]  ;;  %v1689_v26 = vor.u32 %v2067_v18, %v1686_v19  ;;  %v1996_v27 = vld [vmem:[%s2650_s9 + $0x280] sm:$0xf] }
  0xbf   : > { %1361 = vmatpush.bf16.msrb.mxu0 %v1973_v34  ;;  %v2146_v28 = vld [vmem:[%s2650_s9 + $0x284] sm:$0xf0]  ;;  %v2065_v29 = vld [vmem:[%s2650_s9 + $0x4] sm:$0xf]  ;;  %v1753_v30 = vor.u32 %v2083_v20, %v1750_v21  ;;  %v1678_v31 = vld [vmem:[%s2650_s9 + $0x8] sm:$0xf0]  ;;  %v1933_v37 = vor.u32 %v2130_v24, %v1932_v23 }
  0xc0   : > { %1374 = vmatpush.bf16.msrb.mxu1 %v2037_v35  ;;  %v2081_v32 = vld [vmem:[%s2650_s9 + $0x84] sm:$0xf]  ;;  %v1742_v33 = vld [vmem:[%s2650_s9 + $0x88] sm:$0xf0]  ;;  %v2111_v34 = vld [vmem:[%s2650_s9 + $0x174] sm:$0xf]  ;;  %v1997_v41 = vor.u32 %v2146_v28, %v1996_v27  ;;  %v1681_v42 = vor.u32 %v2065_v29, %v1678_v31 }
  0xc1   : > { %1387 = vmatpush.bf16.msrb.mxu2 %v1721_v36  ;;  %v1862_v35 = vld [vmem:[%s2650_s9 + $0x178] sm:$0xf0]  ;;  %v2127_v36 = vld [vmem:[%s2650_s9 + $0x1f4] sm:$0xf]  ;;  %v1745_v45 = vor.u32 %v2081_v32, %v1742_v33  ;;  %v2109_v49 = vld [vmem:[%s2650_s9 + $0x164] sm:$0xf] }
  0xc2   : > { %1400 = vmatpush.bf16.msrb.mxu3 %v1785_v40  ;;  %v1926_v38 = vld [vmem:[%s2650_s9 + $0x1f8] sm:$0xf0]  ;;  %v2143_v39 = vld [vmem:[%s2650_s9 + $0x274] sm:$0xf]  ;;  %v1865_v46 = vor.u32 %v2111_v34, %v1862_v35  ;;  %v1854_v50 = vld [vmem:[%s2650_s9 + $0x168] sm:$0xf0] }
  0xc3   : > { %1362 = vmatpush.bf16.msrb.mxu0 %v1965_v47  ;;  %v1990_v40 = vld [vmem:[%s2650_s9 + $0x278] sm:$0xf0]  ;;  %v2159_v43 = vld [vmem:[%s2650_s9 + $0x2f4] sm:$0xf]  ;;  %v1929_v47 = vor.u32 %v2127_v36, %v1926_v38  ;;  %v2141_v57 = vld [vmem:[%s2650_s9 + $0x264] sm:$0xf] }
  0xc4   : > { %1375 = vmatpush.bf16.msrb.mxu1 %v2029_v51  ;;  %v2054_v44 = vld [vmem:[%s2650_s9 + $0x2f8] sm:$0xf0]  ;;  %v1993_v48 = vor.u32 %v2143_v39, %v1990_v40  ;;  %v2125_v51 = vld [vmem:[%s2650_s9 + $0x1e4] sm:$0xf]  ;;  %v1982_v58 = vld [vmem:[%s2650_s9 + $0x268] sm:$0xf0] }
  0xc5   : > { %1388 = vmatpush.bf16.msrb.mxu2 %v1713_v52  ;;  %v2057_v52 = vor.u32 %v2159_v43, %v2054_v44  ;;  %v2157_v60 = vld [vmem:[%s2650_s9 + $0x2e4] sm:$0xf]  ;;  %v2046_v61 = vld [vmem:[%s2650_s9 + $0x2e8] sm:$0xf0]  ;;  %v1985_v2 = vor.u32 %v2141_v57, %v1982_v58  ;;  %v2107_v3 = vld [vmem:[%s2650_s9 + $0x154] sm:$0xf] }
  0xc6   : > { %1401 = vmatpush.bf16.msrb.mxu3 %v1777_v56  ;;  %v1918_v56 = vld [vmem:[%s2650_s9 + $0x1e8] sm:$0xf0]  ;;  %v2123_v5 = vld [vmem:[%s2650_s9 + $0x1d4] sm:$0xf]  ;;  %v2049_v6 = vor.u32 %v2157_v60, %v2046_v61  ;;  %v1910_v7 = vld [vmem:[%s2650_s9 + $0x1d8] sm:$0xf0] }
  0xc7   : > { %1363 = vmatpush.bf16.msrb.mxu0 %v1957_v62  ;;  %v2815_v62 = vld [vmem:[#allocation1 + $0x24] sm:$0xff]  ;;  %v1921_v1 = vor.u32 %v2125_v51, %v1918_v56  ;;  %v2139_v8 = vld [vmem:[%s2650_s9 + $0x254] sm:$0xf]  ;;  %v1913_v13 = vor.u32 %v2123_v5, %v1910_v7  ;;  %v2105_v15 = vld [vmem:[%s2650_s9 + $0x144] sm:$0xf] }
  0xc8   : > { %1376 = vmatpush.bf16.msrb.mxu1 %v2021_v63  ;;  %v1857_v63 = vor.u32 %v2109_v49, %v1854_v50  ;;  %v1974_v9 = vld [vmem:[%s2650_s9 + $0x258] sm:$0xf0]  ;;  %v1902_v18 = vld [vmem:[%s2650_s9 + $0x1c8] sm:$0xf0]  ;;  %v2137_v19 = vld [vmem:[%s2650_s9 + $0x244] sm:$0xf] }
  0xc9   : > { %1389 = vmatpush.bf16.msrb.mxu2 %v1705_v0  ;;  %v2817_v0 = vld [vmem:[#allocation1 + $0x2d] sm:$0xff]  ;;  %v1977_v14 = vor.u32 %v2139_v8, %v1974_v9  ;;  %v1966_v20 = vld [vmem:[%s2650_s9 + $0x248] sm:$0xf0]  ;;  %v2119_v27 = vld [vmem:[%s2650_s9 + $0x1b4] sm:$0xf] }
  0xca   : > { %1402 = vmatpush.bf16.msrb.mxu3 %v1769_v4  ;;  %v1846_v4 = vld [vmem:[%s2650_s9 + $0x158] sm:$0xf0]  ;;  %v2153_v21 = vld [vmem:[%s2650_s9 + $0x2c4] sm:$0xf]  ;;  %v1969_v24 = vor.u32 %v2137_v19, %v1966_v20  ;;  %v2151_v32 = vld [vmem:[%s2650_s9 + $0x2b4] sm:$0xf] }
  0xcb   : > { %1364 = vmatpush.bf16.msrb.mxu0 %v1949_v10  ;;  %v2155_v10 = vld [vmem:[%s2650_s9 + $0x2d4] sm:$0xf]  ;;  %v1894_v29 = vld [vmem:[%s2650_s9 + $0x1b8] sm:$0xf0]  ;;  %v1822_v38 = vld [vmem:[%s2650_s9 + $0x128] sm:$0xf0] }
  0xcc   : > { %1377 = vmatpush.bf16.msrb.mxu1 %v2013_v11  ;;  %v2038_v11 = vld [vmem:[%s2650_s9 + $0x2d8] sm:$0xf0]  ;;  %v1897_v35 = vor.u32 %v2119_v27, %v1894_v29  ;;  %v2117_v39 = vld [vmem:[%s2650_s9 + $0x1a4] sm:$0xf]  ;;  %v1950_v43 = vld [vmem:[%s2650_s9 + $0x228] sm:$0xf0] }
  0xcd   : > { %1390 = vmatpush.bf16.msrb.mxu2 %v1697_v12  ;;  %v1849_v12 = vor.u32 %v2107_v3, %v1846_v4  ;;  %v2041_v17 = vor.u32 %v2155_v10, %v2038_v11  ;;  %v1958_v31 = vld [vmem:[%s2650_s9 + $0x238] sm:$0xf0]  ;;  %v2149_v44 = vld [vmem:[%s2650_s9 + $0x2a4] sm:$0xf]  ;;  %v2099_v49 = vld [vmem:[%s2650_s9 + $0x114] sm:$0xf] }
  0xce   : > { %1403 = vmatpush.bf16.msrb.mxu3 %v1761_v16  ;;  %v2121_v16 = vld [vmem:[%s2650_s9 + $0x1c4] sm:$0xf]  ;;  %v2022_v33 = vld [vmem:[%s2650_s9 + $0x2b8] sm:$0xf0]  ;;  %v2115_v51 = vld [vmem:[%s2650_s9 + $0x194] sm:$0xf] }
  0xcf   : > { %1365 = vmatpush.bf16.msrb.mxu0 %v1941_v22  ;;  %v1905_v23 = vor.u32 %v2121_v16, %v1902_v18  ;;  %v2025_v40 = vor.u32 %v2151_v32, %v2022_v33  ;;  %v1814_v50 = vld [vmem:[%s2650_s9 + $0x118] sm:$0xf0]  ;;  %v2131_v57 = vld [vmem:[%s2650_s9 + $0x214] sm:$0xf]  ;;  %v2097_v3 = vld [vmem:[%s2650_s9 + $0x104] sm:$0xf] }
  0xd0   : > { %1378 = vmatpush.bf16.msrb.mxu1 %v2005_v25  ;;  %v2103_v25 = vld [vmem:[%s2650_s9 + $0x134] sm:$0xf]  ;;  %v1878_v56 = vld [vmem:[%s2650_s9 + $0x198] sm:$0xf0]  ;;  %v1806_v4 = vld [vmem:[%s2650_s9 + $0x108] sm:$0xf0] }
  0xd1   : > { %1391 = vmatpush.bf16.msrb.mxu2 %v1689_v26  ;;  %v1830_v26 = vld [vmem:[%s2650_s9 + $0x138] sm:$0xf0]  ;;  %v2147_v60 = vld [vmem:[%s2650_s9 + $0x294] sm:$0xf]  ;;  %v2113_v5 = vld [vmem:[%s2650_s9 + $0x184] sm:$0xf] }
  0xd2   : > { %1404 = vmatpush.bf16.msrb.mxu3 %v1753_v30  ;;  %v2135_v30 = vld [vmem:[%s2650_s9 + $0x234] sm:$0xf]  ;;  %v1833_v34 = vor.u32 %v2103_v25, %v1830_v26  ;;  %v1942_v58 = vld [vmem:[%s2650_s9 + $0x218] sm:$0xf0]  ;;  %v1870_v7 = vld [vmem:[%s2650_s9 + $0x188] sm:$0xf0] }
  0xd3   : > { %1366 = vmatpush.bf16.msrb.mxu0 %v1933_v37  ;;  %v1961_v36 = vor.u32 %v2135_v30, %v1958_v31  ;;  %v2101_v37 = vld [vmem:[%s2650_s9 + $0x124] sm:$0xf]  ;;  %v2006_v61 = vld [vmem:[%s2650_s9 + $0x298] sm:$0xf0]  ;;  %v1934_v9 = vld [vmem:[%s2650_s9 + $0x208] sm:$0xf0] }
  0xd4   : > { %1379 = vmatpush.bf16.msrb.mxu1 %v1997_v41  ;;  %v1886_v41 = vld [vmem:[%s2650_s9 + $0x1a8] sm:$0xf0]  ;;  %v2129_v8 = vld [vmem:[%s2650_s9 + $0x204] sm:$0xf] }
  0xd5   : > { %1392 = vmatpush.bf16.msrb.mxu2 %v1681_v42  ;;  %v2133_v42 = vld [vmem:[%s2650_s9 + $0x224] sm:$0xf]  ;;  %v1998_v11 = vld [vmem:[%s2650_s9 + $0x288] sm:$0xf0] }
  0xd6   : > { %1405 = vmatpush.bf16.msrb.mxu3 %v1745_v45  ;;  %1367 = vmatmul.bf16.vlgmr.msrb.gmra.mxu0 %v2815_v62  ;;  %v2014_v45 = vld [vmem:[%s2650_s9 + $0x2a8] sm:$0xf0]  ;;  %v2145_v10 = vld [vmem:[%s2650_s9 + $0x284] sm:$0xf] }
  0xd7   : > { %1411 = vmatpush.bf16.msra.mxu0 %v1865_v46  ;;  %1380 = vmatmul.bf16.vlgmr.msrb.gmra.mxu1 %v2817_v0  ;;  %v1825_v46 = vor.u32 %v2101_v37, %v1822_v38 }
  0xd8   : > { %1424 = vmatpush.bf16.msra.mxu1 %v1929_v47  ;;  %1393 = vmatmul.bf16.vlgmr.msrb.gmra.mxu2 %v2759_v53  ;;  %v1838_v53 = vld [vmem:[%s2650_s9 + $0x148] sm:$0xf0]  ;;  %v1889_v47 = vor.u32 %v2117_v39, %v1886_v41 }
  0xd9   : > { %1437 = vmatpush.bf16.msra.mxu2 %v1993_v48  ;;  %1406 = vmatmul.bf16.vlgmr.msrb.gmra.mxu3 %v2763_v55  ;;  %v2030_v55 = vld [vmem:[%s2650_s9 + $0x2c8] sm:$0xf0]  ;;  %v1841_v22 = vor.u32 %v2105_v15, %v1838_v53  ;;  %v1953_v48 = vor.u32 %v2133_v42, %v1950_v43  ;;  %v2001_v15 = vor.u32 %v2145_v10, %v1998_v11  ;;  %v715_v42 = vld [vmem:[#allocation2] sm:$0xf] }
  0xda   : > { %1450 = vmatpush.bf16.msra.mxu3 %v2057_v52  ;;  %v2033_v28 = vor.u32 %v2153_v21, %v2030_v55  ;;  %v2017_v52 = vor.u32 %v2149_v44, %v2014_v45 }
  0xdb   : > { %1412 = vmatpush.bf16.msra.mxu0 %v1857_v63  ;;  %v1817_v63 = vor.u32 %v2099_v49, %v1814_v50 }
  0xdc   : > { %1425 = vmatpush.bf16.msra.mxu1 %v1921_v1  ;;  %v1881_v1 = vor.u32 %v2115_v51, %v1878_v56 }
  0xdd   : > { %1438 = vmatpush.bf16.msra.mxu2 %v1985_v2  ;;  %v1945_v2 = vor.u32 %v2131_v57, %v1942_v58 }
  0xde   : > { %1451 = vmatpush.bf16.msra.mxu3 %v2049_v6  ;;  %v2009_v6 = vor.u32 %v2147_v60, %v2006_v61 }
  0xdf   : > { %1413 = vmatpush.bf16.msra.mxu0 %v1849_v12  ;;  %v1809_v12 = vor.u32 %v2097_v3, %v1806_v4 }
  0xe0   : > { %1426 = vmatpush.bf16.msra.mxu1 %v1913_v13  ;;  %v1873_v13 = vor.u32 %v2113_v5, %v1870_v7 }
  0xe1   : > { %1439 = vmatpush.bf16.msra.mxu2 %v1977_v14  ;;  %v1937_v14 = vor.u32 %v2129_v8, %v1934_v9 }
  0xe2   : > { %1452 = vmatpush.bf16.msra.mxu3 %v2041_v17 }
  0xe3   : > { %1414 = vmatpush.bf16.msra.mxu0 %v1841_v22 }
  0xe4   : > { %1427 = vmatpush.bf16.msra.mxu1 %v1905_v23 }
  0xe5   : > { %1440 = vmatpush.bf16.msra.mxu2 %v1969_v24 }
  0xe6   : > { %1453 = vmatpush.bf16.msra.mxu3 %v2033_v28 }
  0xe7   : > { %1415 = vmatpush.bf16.msra.mxu0 %v1833_v34 }
  0xe8   : > { %1428 = vmatpush.bf16.msra.mxu1 %v1897_v35 }
  0xe9   : > { %1441 = vmatpush.bf16.msra.mxu2 %v1961_v36 }
  0xea   : > { %1454 = vmatpush.bf16.msra.mxu3 %v2025_v40 }
  0xeb   : > { %1416 = vmatpush.bf16.msra.mxu0 %v1825_v46 }
  0xec   : > { %1429 = vmatpush.bf16.msra.mxu1 %v1889_v47 }
  0xed   : > { %1442 = vmatpush.bf16.msra.mxu2 %v1953_v48 }
  0xee   : > { %1455 = vmatpush.bf16.msra.mxu3 %v2017_v52 }
  0xef   : > { %1417 = vmatpush.bf16.msra.mxu0 %v1817_v63 }
  0xf0   : > { %1430 = vmatpush.bf16.msra.mxu1 %v1881_v1 }
  0xf1   : > { %1443 = vmatpush.bf16.msra.mxu2 %v1945_v2 }
  0xf2   : > { %1456 = vmatpush.bf16.msra.mxu3 %v2009_v6 }
  0xf3   : > { %1418 = vmatpush.bf16.msra.mxu0 %v1809_v12 }
  0xf4   : > { %1431 = vmatpush.bf16.msra.mxu1 %v1873_v13 }
  0xf5   : > { %1444 = vmatpush.bf16.msra.mxu2 %v1937_v14 }
  0xf6   : > { %1457 = vmatpush.bf16.msra.mxu3 %v2001_v15  ;;  %1419 = vmatmul.bf16.vlgmr.msra.gmra.mxu0 %v2761_v54 }
  0xf7   : > { %1432 = vmatmul.bf16.vlgmr.msra.gmra.mxu1 %v2768_v59 }
  0xf8   : > { %1445 = vmatmul.bf16.vlgmr.msra.gmra.mxu2 %v2815_v62 }
  0xf9   : > { %1458 = vmatmul.bf16.vlgmr.msra.gmra.mxu3 %v2817_v0 }
 0x137   : > { %v1316_v53 = vpop.f32.mrf.mxu0 }
 0x13a   : > { %v1329_v16 = vpop.f32.mrf.mxu1 }
 0x13b   : > { %v1330_v28 = vadd.f32 %v1329_v16, %v1316_v53 }
 0x13e   : > { %v1342_v17 = vpop.f32.mrf.mxu2 }
 0x13f   : > { %v1318_v18 = vpop.f32.mrf.mxu0  ;;  %v1355_v19 = vpop.f32.mrf.mxu3  ;;  %v1343_v62 = vadd.f32 %v1342_v17, %v1330_v28 }
 0x141   : > { %v1356_v32 = vadd.f32 %v1355_v19, %v1343_v62 }
 0x142   : > { %v1331_v20 = vpop.f32.mrf.mxu1 }
 0x146   : > { %v1344_v21 = vpop.f32.mrf.mxu2 }
 0x147   : > { %v1357_v55 = vpop.f32.mrf.mxu3 }
 0x153   : > { %v1368_v22 = vpop.f32.mrf.mxu0 }
 0x154   : > { %v1381_v23 = vpop.f32.mrf.mxu1  ;;  %v1369_v35 = vadd.f32 %v1368_v22, %v1356_v32 }
 0x156   : > { %v1382_v41 = vadd.f32 %v1381_v23, %v1369_v35 }
 0x15b   : > { %v1394_v24 = vpop.f32.mrf.mxu2  ;;  %v1370_v26 = vpop.f32.mrf.mxu0 }
 0x15c   : > { %v1407_v25 = vpop.f32.mrf.mxu3  ;;  %v1383_v54 = vpop.f32.mrf.mxu1 }
 0x15d   : > { %v1408_v29 = vadd.f32 %v1407_v25, %v1394_v24 }
 0x163   : > { %v1396_v27 = vpop.f32.mrf.mxu2 }
 0x164   : > { %v1409_v59 = vpop.f32.mrf.mxu3 }
 0x173   : > { %v1420_v0 = vpop.f32.mrf.mxu0 }
 0x174   : > { %v1433_v30 = vpop.f32.mrf.mxu1  ;;  %v1421_v31 = vadd.f32 %v1420_v0, %v1408_v29 }
 0x176   : > { %v1434_v33 = vadd.f32 %v1433_v30, %v1421_v31 }
 0x17b   : > { %v1446_v34 = vpop.f32.mrf.mxu2  ;;  %v1422_v38 = vpop.f32.mrf.mxu0 }
 0x17c   : > { %v1447_v36 = vadd.f32 %v1446_v34, %v1434_v33  ;;  %v1459_v37 = vpop.f32.mrf.mxu3  ;;  %v1435_v39 = vpop.f32.mrf.mxu1 }
 0x17e   : > { %v1460_v40 = vadd.f32 %v1459_v37, %v1447_v36 }
 0x180   : > { %v1465_v43 = vrot.slane %v1460_v40, 6 }
 0x181   : > { %1474 = sbr.rel (%p2058_p3) target bundleno = 417 (0x1a1), region = 82 }
 0x182   : > { %v1467_v44 = vsel %vm1466_vm0, %v1382_v41, %v1465_v43 }
 0x183   : > { %v1469_v45 = vadd.f32 %v1467_v44, %v715_v42  ;;  %v1448_v46 = vpop.f32.mrf.mxu2 }
 0x184   : > { %v1461_v47 = vpop.f32.mrf.mxu3 }
 0x185   : > { %1470 = vst [vmem:[#allocation2] sm:$0xf] %v1469_v45 }
 0x186   : > { %v1476_v48 = vld [vmem:[%s702_s22] sm:$0x3]  ;;  %vm1502_vm1 = vcmask 1040384  }
 0x187   : > { %v1484_v49 = vld [vmem:[%s707_s8] sm:$0x3]  ;;  %v1478_v50 = vperm.slane %v1476_v48, 0  ;;  %v1479_v51 = vperm.slane %v1476_v48, 1 }
 0x188   : > { %v1486_v52 = vperm.slane %v1484_v49, 0  ;;  %v1487_v56 = vperm.slane %v1484_v49, 1 }
 0x189   : > { %v1480_v58 = vrot.slane %v1479_v51, 6 }
 0x18a   : > { %v1488_v60 = vrot.slane %v1487_v56, 6 }
 0x18b   : > { %v1481_v61 = vsel %vm1466_vm0, %v1478_v50, %v1480_v58 }
 0x18c   : > { %v1475_v57 = vld [vmem:[#allocation2] sm:$0xf]  ;;  %v1489_v63 = vsel %vm1466_vm0, %v1486_v52, %v1488_v60 }
 0x18d   : > { %v1483_v1 = vmul.f32 %v1481_v61, %v1475_v57 }
 0x18f   : > { %v1491_v2 = vadd.f32 %v1489_v63, %v1483_v1 }
 0x191   : > { %v1492_v3 = vmax.f32 %v1491_v2, 0.0 }
 0x193   : > { %1494 = vst [vmem:[#allocation1] ss:$4 sm:$0xff] %v1492_v3 }
 0x19a   : > { %v1495_v4 = vld.sshfl [vmem:[#allocation1] sm:$0xff pattern:$0x73625140]  ;;  %v1496_v5 = vld.sshfl [vmem:[#allocation1 + $0x8] sm:$0xff pattern:$0x73625140] }
 0x19b   : > { %v1499_v6 = vpack.c.bf16 %v1496_v5, %v1495_v4 }
 0x19d   : > { %v1501_v7 = vrot.slane %v1499_v6, 3 }
 0x19f   : > { %v1505_v8 = vsel %vm1502_vm1, %v1499_v6, %v1501_v7 }
 0x1a0   : > { %1507 = vst [vmem:[%s687_s2] sm:$0x3] %v1505_v8 }
 0x1a1 PF: > { %1514 = sbr.rel (!%p2407_p9) target bundleno = 425 (0x1a9), region = 86  ;;  %s1597_s7 = scalar_lea.vmem (%p2407_p9), %s2931_s5, %s2630_s16 }
 0x1a7   : > { %v1535_v9 = vld [vmem:[%s687_s2] sm:$0x3] }
 0x1a8   : > { %2061 = vst [vmem:[%s1597_s7 + $0x10] sm:$0x3] %v1535_v9 }
 0x1a9 PF: > { %s16_s25 = sadd.s32 1, %s2306_s25   ;;  %s2936_s18 = smov %s2278_s19 }
 0x1aa   : > { %p13_p4 = scmp.ge.s32.totalorder %s16_s25, 8   ;;  %s2937_s19 = smov %s2412_s11 }
 0x1ab   : > { %s2938_s0 = smov %s2286_s20  ;;  %s2939_s20 = smov %s2415_s12 }
 0x1ac   : > { %s2940_s21 = smov %s2298_s23  ;;  %s2941_s22 = smov %s2302_s24 }
 0x1ad   : > { %s2942_s23 = smov %s2945_s26  ;;  %s2943_s24 = smov %s2949_s27 }
 0x1ae   :  { %15 = sbr.rel (!%p13_p4) target bundleno = 7 (0x7), region = 161 }

// kernel: resnet18_forward.43
= control target key start
LH: loop header
LB: loop body
LE: loop exit
PB: predicated region body
PF: predicated region fallthrough
CT: control target
= control target key end

     0   :  { %s2362_s18 = smov 0   ;;  %s2364_s19 = smov 0   ;;  %s2916_s0 = inlined_call_operand.vmem [shape: bf16[2,4608], index: 0, kind: input, shape index: {}]   ;;  %s2917_s1 = inlined_call_operand.vmem [shape: bf16[4608,512], index: 1, kind: input, shape index: {}]   ;;  %s2918_s2 = inlined_call_operand.vmem [shape: f32[1,512], index: 2, kind: input, shape index: {}]   ;;  %s2919_s3 = inlined_call_operand.vmem [shape: f32[1,512], index: 3, kind: input, shape index: {}]   ;;  %s2920_s4 = inlined_call_operand.vmem [shape: bf16[2,512], index: 4, kind: input, shape index: {}]   ;;  %s2921_s5 = inlined_call_operand.vmem [shape: bf16[2,512], index: 5, kind: output, shape index: {}]  }
   0x1   :  { %s2366_s20 = smov 0   ;;  %s2368_s21 = smov 0  }
   0x2   :  { %s2370_s22 = smov 0   ;;  %s2372_s23 = smov 0  }
   0x3   :  { %s2374_s24 = smov 0  }
   0x4 LB: > { %s27_s25 = sadd.s32 1, %s2321_s22  ;;  %s30_s26 = sadd.s32 1, %s2325_s23  ;;  %s2329_s24 = sphi %s2374_s24, %s15_s24   ;;  %s2325_s23 = sphi %s2372_s23, %s2927_s23   ;;  %s2321_s22 = sphi %s2370_s22, %s2926_s22   ;;  %s2317_s21 = sphi %s2368_s21, %s2925_s21   ;;  %s2313_s20 = sphi %s2366_s20, %s2924_s20   ;;  %s2309_s19 = sphi %s2364_s19, %s2923_s19   ;;  %s2305_s18 = sphi %s2362_s18, %s2922_s18  }
   0x5   : > { %p28_p0 = scmp.ge.s32.totalorder %s27_s25, 6  ;;  %p78_p1 = scmp.ne.s32.totalorder %s2309_s19, %s2305_s18 }
   0x6   : > { %p79_p2 = scmp.eq.s32.totalorder %s2329_s24, 0  ;;  %s71_s30 = sadd.s32 1, %s2309_s19 }
   0x7   : > { %s2929_s25 = smov (%p28_p0, %s27_s25), 0  ;;  %s2931_s26 = smov (!%p28_p0, %s30_s26), %s2325_s23 }
   0x8   : > { %p80_p3 = por %p79_p2, %p78_p1  ;;  %p32_p4 = scmp.ge.s32.totalorder %s2931_s26, 2 }
   0x9   : > { %s66_s27 = ssub.s32 %s2321_s22, %s2929_s25  ;;  %p1722_p6 = scmp.ge.s32.totalorder %s2329_s24, 12 }
   0xa   : > { %s2933_s26 = smov (%p32_p4, %s2931_s26), 0 }
   0xb   : > { %s67_s28 = ssub.s32 %s2325_s23, %s2933_s26  ;;  %212 = sbr.rel (%p1722_p6) target bundleno = 120 (0x78), region = 16 }
   0xc   : > { %s68_s29 = sor.u32 %s67_s28, %s66_s27 }
   0xd   : > { %p69_p5 = scmp.eq.s32.totalorder %s68_s29, 0 }
   0xf   : > { %s2413_s6 = scalar_select %p69_p5, %s2309_s19, %s71_s30  }
  0x10   : > { %227 = sbr.rel (!%p80_p3) target bundleno = 120 (0x78), region = 24  ;;  %s229_s7 = sand.u32 (%p80_p3), 1, %s2309_s19  }
  0x11   : > { %s2216_s8 = smul.u32 (%p80_p3), 768, %s229_s7  ;;  %s1723_s9 = sshll.u32 (%p80_p3), %s2325_s23, 1 }
  0x12   : > { %s2119_s10 = smul.u32 (%p80_p3), 384, %s2321_s22 }
  0x13   : > { %s2427_s16 = scalar_lea.vmem (%p80_p3), [#allocation3], %s2216_s8 }
  0x14   : > { %s235_s11 = sadd.s32 (%p80_p3), %s2119_s10, %s1723_s9 }
  0x15   : > { %s1725_s12 = sshll.u32 %s235_s11, 2 }
  0x16   : > { %s2422_s15 = scalar_lea.vmem %s2917_s1, %s1725_s12 }
  0x17   : > { %v456_v0 = vld [vmem:[%s2422_s15] sm:$0xff]  ;;  %v458_v1 = vld [vmem:[%s2422_s15 + $0x10] sm:$0xff] }
  0x18   : > { %v460_v2 = vld [vmem:[%s2422_s15 + $0x20] sm:$0xff]  ;;  %457 = vst [vmem:[%s2427_s16] sm:$0xff] %v456_v0  ;;  %v462_v3 = vld [vmem:[%s2422_s15 + $0x30] sm:$0xff] }
  0x19   : > { %459 = vst [vmem:[%s2427_s16 + $0x8] sm:$0xff] %v458_v1  ;;  %v464_v4 = vld [vmem:[%s2422_s15 + $0x40] sm:$0xff]  ;;  %v466_v5 = vld [vmem:[%s2422_s15 + $0x50] sm:$0xff] }
  0x1a   : > { %461 = vst [vmem:[%s2427_s16 + $0x10] sm:$0xff] %v460_v2  ;;  %v468_v6 = vld [vmem:[%s2422_s15 + $0x60] sm:$0xff]  ;;  %v470_v7 = vld [vmem:[%s2422_s15 + $0x70] sm:$0xff] }
  0x1b   : > { %463 = vst [vmem:[%s2427_s16 + $0x18] sm:$0xff] %v462_v3  ;;  %v472_v8 = vld [vmem:[%s2422_s15 + $0x80] sm:$0xff]  ;;  %v474_v9 = vld [vmem:[%s2422_s15 + $0x90] sm:$0xff] }
  0x1c   : > { %465 = vst [vmem:[%s2427_s16 + $0x20] sm:$0xff] %v464_v4  ;;  %v476_v10 = vld [vmem:[%s2422_s15 + $0xa0] sm:$0xff]  ;;  %v478_v11 = vld [vmem:[%s2422_s15 + $0xb0] sm:$0xff] }
  0x1d   : > { %467 = vst [vmem:[%s2427_s16 + $0x28] sm:$0xff] %v466_v5  ;;  %v480_v12 = vld [vmem:[%s2422_s15 + $0xc0] sm:$0xff]  ;;  %v482_v13 = vld [vmem:[%s2422_s15 + $0xd0] sm:$0xff] }
  0x1e   : > { %469 = vst [vmem:[%s2427_s16 + $0x30] sm:$0xff] %v468_v6  ;;  %v484_v14 = vld [vmem:[%s2422_s15 + $0xe0] sm:$0xff]  ;;  %v486_v15 = vld [vmem:[%s2422_s15 + $0xf0] sm:$0xff] }
  0x1f   : > { %471 = vst [vmem:[%s2427_s16 + $0x38] sm:$0xff] %v470_v7  ;;  %v488_v16 = vld [vmem:[%s2422_s15 + $0x100] sm:$0xff]  ;;  %v490_v17 = vld [vmem:[%s2422_s15 + $0x110] sm:$0xff] }
  0x20   : > { %473 = vst [vmem:[%s2427_s16 + $0x40] sm:$0xff] %v472_v8  ;;  %v492_v18 = vld [vmem:[%s2422_s15 + $0x120] sm:$0xff]  ;;  %v494_v19 = vld [vmem:[%s2422_s15 + $0x130] sm:$0xff] }
  0x21   : > { %475 = vst [vmem:[%s2427_s16 + $0x48] sm:$0xff] %v474_v9  ;;  %v496_v20 = vld [vmem:[%s2422_s15 + $0x140] sm:$0xff]  ;;  %v498_v21 = vld [vmem:[%s2422_s15 + $0x150] sm:$0xff] }
  0x22   : > { %477 = vst [vmem:[%s2427_s16 + $0x50] sm:$0xff] %v476_v10  ;;  %v500_v22 = vld [vmem:[%s2422_s15 + $0x160] sm:$0xff]  ;;  %v502_v23 = vld [vmem:[%s2422_s15 + $0x170] sm:$0xff] }
  0x23   : > { %479 = vst [vmem:[%s2427_s16 + $0x58] sm:$0xff] %v478_v11  ;;  %v504_v24 = vld [vmem:[%s2422_s15 + $0x180] sm:$0xff]  ;;  %v506_v25 = vld [vmem:[%s2422_s15 + $0x190] sm:$0xff] }
  0x24   : > { %481 = vst [vmem:[%s2427_s16 + $0x60] sm:$0xff] %v480_v12  ;;  %v508_v26 = vld [vmem:[%s2422_s15 + $0x1a0] sm:$0xff]  ;;  %v510_v27 = vld [vmem:[%s2422_s15 + $0x1b0] sm:$0xff] }
  0x25   : > { %483 = vst [vmem:[%s2427_s16 + $0x68] sm:$0xff] %v482_v13  ;;  %v512_v28 = vld [vmem:[%s2422_s15 + $0x1c0] sm:$0xff]  ;;  %v514_v29 = vld [vmem:[%s2422_s15 + $0x1d0] sm:$0xff] }
  0x26   : > { %485 = vst [vmem:[%s2427_s16 + $0x70] sm:$0xff] %v484_v14  ;;  %v516_v30 = vld [vmem:[%s2422_s15 + $0x1e0] sm:$0xff]  ;;  %v518_v31 = vld [vmem:[%s2422_s15 + $0x1f0] sm:$0xff] }
  0x27   : > { %487 = vst [vmem:[%s2427_s16 + $0x78] sm:$0xff] %v486_v15  ;;  %v520_v32 = vld [vmem:[%s2422_s15 + $0x200] sm:$0xff]  ;;  %v522_v33 = vld [vmem:[%s2422_s15 + $0x210] sm:$0xff] }
  0x28   : > { %489 = vst [vmem:[%s2427_s16 + $0x80] sm:$0xff] %v488_v16  ;;  %v524_v34 = vld [vmem:[%s2422_s15 + $0x220] sm:$0xff]  ;;  %v526_v35 = vld [vmem:[%s2422_s15 + $0x230] sm:$0xff] }
  0x29   : > { %491 = vst [vmem:[%s2427_s16 + $0x88] sm:$0xff] %v490_v17  ;;  %v528_v36 = vld [vmem:[%s2422_s15 + $0x240] sm:$0xff]  ;;  %v530_v37 = vld [vmem:[%s2422_s15 + $0x250] sm:$0xff] }
  0x2a   : > { %493 = vst [vmem:[%s2427_s16 + $0x90] sm:$0xff] %v492_v18  ;;  %v532_v38 = vld [vmem:[%s2422_s15 + $0x260] sm:$0xff]  ;;  %v534_v39 = vld [vmem:[%s2422_s15 + $0x270] sm:$0xff] }
  0x2b   : > { %495 = vst [vmem:[%s2427_s16 + $0x98] sm:$0xff] %v494_v19  ;;  %v536_v40 = vld [vmem:[%s2422_s15 + $0x280] sm:$0xff]  ;;  %v538_v41 = vld [vmem:[%s2422_s15 + $0x290] sm:$0xff] }
  0x2c   : > { %497 = vst [vmem:[%s2427_s16 + $0xa0] sm:$0xff] %v496_v20  ;;  %v540_v42 = vld [vmem:[%s2422_s15 + $0x2a0] sm:$0xff]  ;;  %v542_v43 = vld [vmem:[%s2422_s15 + $0x2b0] sm:$0xff] }
  0x2d   : > { %499 = vst [vmem:[%s2427_s16 + $0xa8] sm:$0xff] %v498_v21  ;;  %v544_v44 = vld [vmem:[%s2422_s15 + $0x2c0] sm:$0xff]  ;;  %v546_v45 = vld [vmem:[%s2422_s15 + $0x2d0] sm:$0xff] }
  0x2e   : > { %501 = vst [vmem:[%s2427_s16 + $0xb0] sm:$0xff] %v500_v22  ;;  %v548_v46 = vld [vmem:[%s2422_s15 + $0x2e0] sm:$0xff]  ;;  %v550_v47 = vld [vmem:[%s2422_s15 + $0x2f0] sm:$0xff] }
  0x2f   : > { %503 = vst [vmem:[%s2427_s16 + $0xb8] sm:$0xff] %v502_v23  ;;  %v552_v48 = vld [vmem:[%s2422_s15 + $0x300] sm:$0xff]  ;;  %v554_v49 = vld [vmem:[%s2422_s15 + $0x310] sm:$0xff] }
  0x30   : > { %505 = vst [vmem:[%s2427_s16 + $0xc0] sm:$0xff] %v504_v24  ;;  %v556_v50 = vld [vmem:[%s2422_s15 + $0x320] sm:$0xff]  ;;  %v558_v51 = vld [vmem:[%s2422_s15 + $0x330] sm:$0xff] }
  0x31   : > { %507 = vst [vmem:[%s2427_s16 + $0xc8] sm:$0xff] %v506_v25  ;;  %v560_v52 = vld [vmem:[%s2422_s15 + $0x340] sm:$0xff]  ;;  %v562_v53 = vld [vmem:[%s2422_s15 + $0x350] sm:$0xff] }
  0x32   : > { %509 = vst [vmem:[%s2427_s16 + $0xd0] sm:$0xff] %v508_v26  ;;  %v564_v54 = vld [vmem:[%s2422_s15 + $0x360] sm:$0xff]  ;;  %v566_v55 = vld [vmem:[%s2422_s15 + $0x370] sm:$0xff] }
  0x33   : > { %511 = vst [vmem:[%s2427_s16 + $0xd8] sm:$0xff] %v510_v27  ;;  %v568_v56 = vld [vmem:[%s2422_s15 + $0x380] sm:$0xff]  ;;  %v570_v57 = vld [vmem:[%s2422_s15 + $0x390] sm:$0xff] }
  0x34   : > { %513 = vst [vmem:[%s2427_s16 + $0xe0] sm:$0xff] %v512_v28  ;;  %v572_v58 = vld [vmem:[%s2422_s15 + $0x3a0] sm:$0xff]  ;;  %v574_v59 = vld [vmem:[%s2422_s15 + $0x3b0] sm:$0xff] }
  0x35   : > { %515 = vst [vmem:[%s2427_s16 + $0xe8] sm:$0xff] %v514_v29  ;;  %v576_v60 = vld [vmem:[%s2422_s15 + $0x3c0] sm:$0xff]  ;;  %v578_v61 = vld [vmem:[%s2422_s15 + $0x3d0] sm:$0xff] }
  0x36   : > { %517 = vst [vmem:[%s2427_s16 + $0xf0] sm:$0xff] %v516_v30  ;;  %v580_v62 = vld [vmem:[%s2422_s15 + $0x3e0] sm:$0xff]  ;;  %v582_v63 = vld [vmem:[%s2422_s15 + $0x3f0] sm:$0xff] }
  0x37   : > { %519 = vst [vmem:[%s2427_s16 + $0xf8] sm:$0xff] %v518_v31  ;;  %v584_v0 = vld [vmem:[%s2422_s15 + $0x400] sm:$0xff]  ;;  %v586_v1 = vld [vmem:[%s2422_s15 + $0x410] sm:$0xff] }
  0x38   : > { %521 = vst [vmem:[%s2427_s16 + $0x100] sm:$0xff] %v520_v32  ;;  %v588_v2 = vld [vmem:[%s2422_s15 + $0x420] sm:$0xff]  ;;  %v590_v3 = vld [vmem:[%s2422_s15 + $0x430] sm:$0xff] }
  0x39   : > { %523 = vst [vmem:[%s2427_s16 + $0x108] sm:$0xff] %v522_v33  ;;  %v592_v4 = vld [vmem:[%s2422_s15 + $0x440] sm:$0xff]  ;;  %v594_v5 = vld [vmem:[%s2422_s15 + $0x450] sm:$0xff] }
  0x3a   : > { %525 = vst [vmem:[%s2427_s16 + $0x110] sm:$0xff] %v524_v34  ;;  %v596_v6 = vld [vmem:[%s2422_s15 + $0x460] sm:$0xff]  ;;  %v598_v7 = vld [vmem:[%s2422_s15 + $0x470] sm:$0xff] }
  0x3b   : > { %527 = vst [vmem:[%s2427_s16 + $0x118] sm:$0xff] %v526_v35  ;;  %v600_v8 = vld [vmem:[%s2422_s15 + $0x480] sm:$0xff]  ;;  %v602_v9 = vld [vmem:[%s2422_s15 + $0x490] sm:$0xff] }
  0x3c   : > { %529 = vst [vmem:[%s2427_s16 + $0x120] sm:$0xff] %v528_v36  ;;  %v604_v10 = vld [vmem:[%s2422_s15 + $0x4a0] sm:$0xff]  ;;  %v606_v11 = vld [vmem:[%s2422_s15 + $0x4b0] sm:$0xff] }
  0x3d   : > { %531 = vst [vmem:[%s2427_s16 + $0x128] sm:$0xff] %v530_v37  ;;  %v608_v12 = vld [vmem:[%s2422_s15 + $0x4c0] sm:$0xff]  ;;  %v610_v13 = vld [vmem:[%s2422_s15 + $0x4d0] sm:$0xff] }
  0x3e   : > { %533 = vst [vmem:[%s2427_s16 + $0x130] sm:$0xff] %v532_v38  ;;  %v612_v14 = vld [vmem:[%s2422_s15 + $0x4e0] sm:$0xff]  ;;  %v614_v15 = vld [vmem:[%s2422_s15 + $0x4f0] sm:$0xff] }
  0x3f   : > { %535 = vst [vmem:[%s2427_s16 + $0x138] sm:$0xff] %v534_v39  ;;  %v616_v16 = vld [vmem:[%s2422_s15 + $0x500] sm:$0xff]  ;;  %v618_v17 = vld [vmem:[%s2422_s15 + $0x510] sm:$0xff] }
  0x40   : > { %537 = vst [vmem:[%s2427_s16 + $0x140] sm:$0xff] %v536_v40  ;;  %v620_v18 = vld [vmem:[%s2422_s15 + $0x520] sm:$0xff]  ;;  %v622_v19 = vld [vmem:[%s2422_s15 + $0x530] sm:$0xff] }
  0x41   : > { %539 = vst [vmem:[%s2427_s16 + $0x148] sm:$0xff] %v538_v41  ;;  %v624_v20 = vld [vmem:[%s2422_s15 + $0x540] sm:$0xff]  ;;  %v626_v21 = vld [vmem:[%s2422_s15 + $0x550] sm:$0xff] }
  0x42   : > { %541 = vst [vmem:[%s2427_s16 + $0x150] sm:$0xff] %v540_v42  ;;  %v628_v22 = vld [vmem:[%s2422_s15 + $0x560] sm:$0xff]  ;;  %v630_v23 = vld [vmem:[%s2422_s15 + $0x570] sm:$0xff] }
  0x43   : > { %543 = vst [vmem:[%s2427_s16 + $0x158] sm:$0xff] %v542_v43  ;;  %v632_v24 = vld [vmem:[%s2422_s15 + $0x580] sm:$0xff]  ;;  %v634_v25 = vld [vmem:[%s2422_s15 + $0x590] sm:$0xff] }
  0x44   : > { %545 = vst [vmem:[%s2427_s16 + $0x160] sm:$0xff] %v544_v44  ;;  %v636_v26 = vld [vmem:[%s2422_s15 + $0x5a0] sm:$0xff]  ;;  %v638_v27 = vld [vmem:[%s2422_s15 + $0x5b0] sm:$0xff] }
  0x45   : > { %547 = vst [vmem:[%s2427_s16 + $0x168] sm:$0xff] %v546_v45  ;;  %v640_v28 = vld [vmem:[%s2422_s15 + $0x5c0] sm:$0xff]  ;;  %v642_v29 = vld [vmem:[%s2422_s15 + $0x5d0] sm:$0xff] }
  0x46   : > { %549 = vst [vmem:[%s2427_s16 + $0x170] sm:$0xff] %v548_v46  ;;  %v644_v30 = vld [vmem:[%s2422_s15 + $0x5e0] sm:$0xff]  ;;  %v646_v31 = vld [vmem:[%s2422_s15 + $0x5f0] sm:$0xff] }
  0x47   : > { %551 = vst [vmem:[%s2427_s16 + $0x178] sm:$0xff] %v550_v47 }
  0x48   : > { %553 = vst [vmem:[%s2427_s16 + $0x180] sm:$0xff] %v552_v48 }
  0x49   : > { %555 = vst [vmem:[%s2427_s16 + $0x188] sm:$0xff] %v554_v49 }
  0x4a   : > { %557 = vst [vmem:[%s2427_s16 + $0x190] sm:$0xff] %v556_v50 }
  0x4b   : > { %559 = vst [vmem:[%s2427_s16 + $0x198] sm:$0xff] %v558_v51 }
  0x4c   : > { %561 = vst [vmem:[%s2427_s16 + $0x1a0] sm:$0xff] %v560_v52 }
  0x4d   : > { %563 = vst [vmem:[%s2427_s16 + $0x1a8] sm:$0xff] %v562_v53 }
  0x4e   : > { %565 = vst [vmem:[%s2427_s16 + $0x1b0] sm:$0xff] %v564_v54 }
  0x4f   : > { %567 = vst [vmem:[%s2427_s16 + $0x1b8] sm:$0xff] %v566_v55 }
  0x50   : > { %569 = vst [vmem:[%s2427_s16 + $0x1c0] sm:$0xff] %v568_v56 }
  0x51   : > { %571 = vst [vmem:[%s2427_s16 + $0x1c8] sm:$0xff] %v570_v57 }
  0x52   : > { %573 = vst [vmem:[%s2427_s16 + $0x1d0] sm:$0xff] %v572_v58 }
  0x53   : > { %575 = vst [vmem:[%s2427_s16 + $0x1d8] sm:$0xff] %v574_v59 }
  0x54   : > { %577 = vst [vmem:[%s2427_s16 + $0x1e0] sm:$0xff] %v576_v60 }
  0x55   : > { %579 = vst [vmem:[%s2427_s16 + $0x1e8] sm:$0xff] %v578_v61 }
  0x56   : > { %581 = vst [vmem:[%s2427_s16 + $0x1f0] sm:$0xff] %v580_v62 }
  0x57   : > { %583 = vst [vmem:[%s2427_s16 + $0x1f8] sm:$0xff] %v582_v63 }
  0x58   : > { %585 = vst [vmem:[%s2427_s16 + $0x200] sm:$0xff] %v584_v0 }
  0x59   : > { %587 = vst [vmem:[%s2427_s16 + $0x208] sm:$0xff] %v586_v1 }
  0x5a   : > { %589 = vst [vmem:[%s2427_s16 + $0x210] sm:$0xff] %v588_v2 }
  0x5b   : > { %591 = vst [vmem:[%s2427_s16 + $0x218] sm:$0xff] %v590_v3 }
  0x5c   : > { %593 = vst [vmem:[%s2427_s16 + $0x220] sm:$0xff] %v592_v4 }
  0x5d   : > { %595 = vst [vmem:[%s2427_s16 + $0x228] sm:$0xff] %v594_v5 }
  0x5e   : > { %597 = vst [vmem:[%s2427_s16 + $0x230] sm:$0xff] %v596_v6 }
  0x5f   : > { %599 = vst [vmem:[%s2427_s16 + $0x238] sm:$0xff] %v598_v7 }
  0x60   : > { %601 = vst [vmem:[%s2427_s16 + $0x240] sm:$0xff] %v600_v8 }
  0x61   : > { %603 = vst [vmem:[%s2427_s16 + $0x248] sm:$0xff] %v602_v9 }
  0x62   : > { %605 = vst [vmem:[%s2427_s16 + $0x250] sm:$0xff] %v604_v10 }
  0x63   : > { %607 = vst [vmem:[%s2427_s16 + $0x258] sm:$0xff] %v606_v11 }
  0x64   : > { %609 = vst [vmem:[%s2427_s16 + $0x260] sm:$0xff] %v608_v12 }
  0x65   : > { %611 = vst [vmem:[%s2427_s16 + $0x268] sm:$0xff] %v610_v13 }
  0x66   : > { %613 = vst [vmem:[%s2427_s16 + $0x270] sm:$0xff] %v612_v14 }
  0x67   : > { %615 = vst [vmem:[%s2427_s16 + $0x278] sm:$0xff] %v614_v15 }
  0x68   : > { %617 = vst [vmem:[%s2427_s16 + $0x280] sm:$0xff] %v616_v16 }
  0x69   : > { %619 = vst [vmem:[%s2427_s16 + $0x288] sm:$0xff] %v618_v17 }
  0x6a   : > { %621 = vst [vmem:[%s2427_s16 + $0x290] sm:$0xff] %v620_v18 }
  0x6b   : > { %623 = vst [vmem:[%s2427_s16 + $0x298] sm:$0xff] %v622_v19 }
  0x6c   : > { %625 = vst [vmem:[%s2427_s16 + $0x2a0] sm:$0xff] %v624_v20 }
  0x6d   : > { %627 = vst [vmem:[%s2427_s16 + $0x2a8] sm:$0xff] %v626_v21 }
  0x6e   : > { %629 = vst [vmem:[%s2427_s16 + $0x2b0] sm:$0xff] %v628_v22 }
  0x6f   : > { %631 = vst [vmem:[%s2427_s16 + $0x2b8] sm:$0xff] %v630_v23 }
  0x70   : > { %633 = vst [vmem:[%s2427_s16 + $0x2c0] sm:$0xff] %v632_v24 }
  0x71   : > { %635 = vst [vmem:[%s2427_s16 + $0x2c8] sm:$0xff] %v634_v25 }
  0x72   : > { %637 = vst [vmem:[%s2427_s16 + $0x2d0] sm:$0xff] %v636_v26 }
  0x73   : > { %639 = vst [vmem:[%s2427_s16 + $0x2d8] sm:$0xff] %v638_v27 }
  0x74   : > { %641 = vst [vmem:[%s2427_s16 + $0x2e0] sm:$0xff] %v640_v28 }
  0x75   : > { %643 = vst [vmem:[%s2427_s16 + $0x2e8] sm:$0xff] %v642_v29 }
  0x76   : > { %645 = vst [vmem:[%s2427_s16 + $0x2f0] sm:$0xff] %v644_v30 }
  0x77   : > { %647 = vst [vmem:[%s2427_s16 + $0x2f8] sm:$0xff] %v646_v31 }
  0x78 PF: > { %p1726_p7 = scmp.ge.s32.totalorder %s2329_s24, 1  ;;  %p680_p8 = scmp.lt.s32.totalorder %s2329_s24, 13 }
  0x7a   : > { %p681_p9 = pnand %p1726_p7, %p680_p8 }
  0x7b   : > { %s687_s17 = sand.u32 (!%p681_p9), 1, %s2305_s18   ;;  %s741_s27 = smul.u32 (!%p681_p9), 6, %s2313_s20 }
  0x7c   : > { %684 = sbr.rel (%p681_p9) target bundleno = 410 (0x19a), region = 74  ;;  %s1727_s29 = sshll.u32 (!%p681_p9), %s2317_s21, 1 }
  0x7d   : > { %s2217_s28 = smul.u32 (!%p681_p9), 768, %s687_s17  ;;  %p744_p10 = scmp.lt.s32.totalorder (!%p681_p9), %s741_s27, 35 }
  0x7e   : > { %p753_p11 = scmp.lt.s32.totalorder (!%p681_p9), %s1727_s29, 3  ;;  %p1731_p12 = scmp.ne.s32.totalorder (!%p681_p9), %s2313_s20, 0 }
  0x7f   : > { %s2647_s7 = scalar_lea.vmem (!%p681_p9), [#allocation3], %s2217_s28 }
  0x81   : > { %s2935_s27 = smov (!%p744_p10, %s741_s27), 35  ;;  %s2937_s29 = smov (!%p753_p11, %s1727_s29), 3 }
  0x82   : > { %s748_s8 = scalar_lea.vmem %s2916_s0, %s2935_s27  ;;  %s755_s10 = scalar_lea.vmem %s2918_s2, %s2937_s29 }
  0x83   : > { %s760_s12 = scalar_lea.vmem %s2919_s3, %s2937_s29  ;;  %s769_s15 = scalar_lea.vmem %s2920_s4, %s2937_s29 }
  0x84   : > { %s778_s30 = scalar_lea.vmem %s2921_s5, %s2937_s29  ;;  %783 = sbr.rel (%p1731_p12) target bundleno = 139 (0x8b), region = 82 }
  0x89   : > { %v2331_v32 = vmov 0.0  }
  0x8a   : > { %784 = vst [vmem:[#allocation2] sm:$0xf] %v2331_v32 }
  0x8b PF: > { %v1790_v33 = vld [vmem:[%s2647_s7 + $0x70] sm:$0xf]  ;;  %v2135_v34 = vld [vmem:[%s2647_s7 + $0x74] sm:$0xf0]  ;;  %v1782_v44 = vld [vmem:[%s2647_s7 + $0x60] sm:$0xf] }
  0x8c   : > { %v1854_v35 = vld [vmem:[%s2647_s7 + $0xf0] sm:$0xf]  ;;  %v1791_v36 = vor.u32 %v2135_v34, %v1790_v33  ;;  %v2151_v37 = vld [vmem:[%s2647_s7 + $0xf4] sm:$0xf0]  ;;  %v2133_v46 = vld [vmem:[%s2647_s7 + $0x64] sm:$0xf0] }
  0x8d   : > { %v1918_v38 = vld [vmem:[%s2647_s7 + $0x170] sm:$0xf]  ;;  %v2167_v39 = vld [vmem:[%s2647_s7 + $0x174] sm:$0xf0]  ;;  %v1855_v40 = vor.u32 %v2151_v37, %v1854_v35  ;;  %v1846_v47 = vld [vmem:[%s2647_s7 + $0xe0] sm:$0xf]  ;;  %v1783_v49 = vor.u32 %v2133_v46, %v1782_v44 }
  0x8e   : > { %v1919_v41 = vor.u32 %v2167_v39, %v1918_v38  ;;  %v1982_v42 = vld [vmem:[%s2647_s7 + $0x1f0] sm:$0xf]  ;;  %v2183_v43 = vld [vmem:[%s2647_s7 + $0x1f4] sm:$0xf0]  ;;  %1377 = vmatpush.bf16.msra.mxu0 %v1791_v36  ;;  %v2149_v48 = vld [vmem:[%s2647_s7 + $0xe4] sm:$0xf0] }
  0x8f   : > { %v1983_v45 = vor.u32 %v2183_v43, %v1982_v42  ;;  %1390 = vmatpush.bf16.msra.mxu1 %v1855_v40  ;;  %v1847_v50 = vor.u32 %v2149_v48, %v1846_v47  ;;  %v1910_v51 = vld [vmem:[%s2647_s7 + $0x160] sm:$0xf]  ;;  %v2165_v52 = vld [vmem:[%s2647_s7 + $0x164] sm:$0xf0]  ;;  %v1774_v56 = vld [vmem:[%s2647_s7 + $0x50] sm:$0xf] }
  0x90   : > { %1403 = vmatpush.bf16.msra.mxu2 %v1919_v41  ;;  %v1974_v53 = vld [vmem:[%s2647_s7 + $0x1e0] sm:$0xf]  ;;  %v1911_v54 = vor.u32 %v2165_v52, %v1910_v51  ;;  %v2181_v55 = vld [vmem:[%s2647_s7 + $0x1e4] sm:$0xf0]  ;;  %v2131_v57 = vld [vmem:[%s2647_s7 + $0x54] sm:$0xf0] }
  0x91   : > { %1416 = vmatpush.bf16.msra.mxu3 %v1983_v45  ;;  %v1975_v58 = vor.u32 %v2181_v55, %v1974_v53  ;;  %v1838_v59 = vld [vmem:[%s2647_s7 + $0xd0] sm:$0xf]  ;;  %v2147_v60 = vld [vmem:[%s2647_s7 + $0xd4] sm:$0xf0]  ;;  %v1775_v62 = vor.u32 %v2131_v57, %v1774_v56  ;;  %v1766_v4 = vld [vmem:[%s2647_s7 + $0x40] sm:$0xf] }
  0x92   : > { %v1902_v61 = vld [vmem:[%s2647_s7 + $0x150] sm:$0xf]  ;;  %1378 = vmatpush.bf16.msra.mxu0 %v1783_v49  ;;  %v2163_v63 = vld [vmem:[%s2647_s7 + $0x154] sm:$0xf0]  ;;  %v1839_v2 = vor.u32 %v2147_v60, %v1838_v59  ;;  %v2129_v5 = vld [vmem:[%s2647_s7 + $0x44] sm:$0xf0] }
  0x93   : > { %v1966_v0 = vld [vmem:[%s2647_s7 + $0x1d0] sm:$0xf]  ;;  %v2179_v1 = vld [vmem:[%s2647_s7 + $0x1d4] sm:$0xf0]  ;;  %1391 = vmatpush.bf16.msra.mxu1 %v1847_v50  ;;  %v1903_v3 = vor.u32 %v2163_v63, %v1902_v61  ;;  %v1830_v6 = vld [vmem:[%s2647_s7 + $0xc0] sm:$0xf]  ;;  %v1767_v13 = vor.u32 %v2129_v5, %v1766_v4 }
  0x94   : > { %1404 = vmatpush.bf16.msra.mxu2 %v1911_v54  ;;  %v1967_v7 = vor.u32 %v2179_v1, %v1966_v0  ;;  %v2145_v8 = vld [vmem:[%s2647_s7 + $0xc4] sm:$0xf0]  ;;  %v1894_v9 = vld [vmem:[%s2647_s7 + $0x140] sm:$0xf]  ;;  %v1758_v16 = vld [vmem:[%s2647_s7 + $0x30] sm:$0xf] }
  0x95   : > { %1417 = vmatpush.bf16.msra.mxu3 %v1975_v58  ;;  %v2161_v10 = vld [vmem:[%s2647_s7 + $0x144] sm:$0xf0]  ;;  %v1958_v11 = vld [vmem:[%s2647_s7 + $0x1c0] sm:$0xf]  ;;  %v1831_v14 = vor.u32 %v2145_v8, %v1830_v6  ;;  %v2127_v17 = vld [vmem:[%s2647_s7 + $0x34] sm:$0xf0] }
  0x96   : > { %v2177_v12 = vld [vmem:[%s2647_s7 + $0x1c4] sm:$0xf0]  ;;  %1379 = vmatpush.bf16.msra.mxu0 %v1775_v62  ;;  %v1895_v15 = vor.u32 %v2161_v10, %v1894_v9  ;;  %v1822_v18 = vld [vmem:[%s2647_s7 + $0xb0] sm:$0xf]  ;;  %v2143_v20 = vld [vmem:[%s2647_s7 + $0xb4] sm:$0xf0]  ;;  %v1759_v25 = vor.u32 %v2127_v17, %v1758_v16 }
  0x97   : > { %1392 = vmatpush.bf16.msra.mxu1 %v1839_v2  ;;  %v1959_v19 = vor.u32 %v2177_v12, %v1958_v11  ;;  %v1886_v21 = vld [vmem:[%s2647_s7 + $0x130] sm:$0xf]  ;;  %v2159_v22 = vld [vmem:[%s2647_s7 + $0x134] sm:$0xf0]  ;;  %v1823_v26 = vor.u32 %v2143_v20, %v1822_v18  ;;  %v1750_v28 = vld [vmem:[%s2647_s7 + $0x20] sm:$0xf] }
  0x98   : > { %1405 = vmatpush.bf16.msra.mxu2 %v1903_v3  ;;  %v1950_v23 = vld [vmem:[%s2647_s7 + $0x1b0] sm:$0xf]  ;;  %v2175_v24 = vld [vmem:[%s2647_s7 + $0x1b4] sm:$0xf0]  ;;  %v1887_v27 = vor.u32 %v2159_v22, %v1886_v21  ;;  %v2125_v29 = vld [vmem:[%s2647_s7 + $0x24] sm:$0xf0] }
  0x99   : > { %1418 = vmatpush.bf16.msra.mxu3 %v1967_v7  ;;  %v1814_v30 = vld [vmem:[%s2647_s7 + $0xa0] sm:$0xf]  ;;  %v1951_v31 = vor.u32 %v2175_v24, %v1950_v23  ;;  %v2141_v32 = vld [vmem:[%s2647_s7 + $0xa4] sm:$0xf0]  ;;  %v1751_v37 = vor.u32 %v2125_v29, %v1750_v28  ;;  %v1742_v40 = vld [vmem:[%s2647_s7 + $0x10] sm:$0xf] }
  0x9a   : > { %1380 = vmatpush.bf16.msra.mxu0 %v1767_v13  ;;  %v1878_v33 = vld [vmem:[%s2647_s7 + $0x120] sm:$0xf]  ;;  %v2157_v34 = vld [vmem:[%s2647_s7 + $0x124] sm:$0xf0]  ;;  %v1815_v38 = vor.u32 %v2141_v32, %v1814_v30  ;;  %v2123_v41 = vld [vmem:[%s2647_s7 + $0x14] sm:$0xf0] }
  0x9b   : > { %1393 = vmatpush.bf16.msra.mxu1 %v1831_v14  ;;  %v1942_v35 = vld [vmem:[%s2647_s7 + $0x1a0] sm:$0xf]  ;;  %v2173_v36 = vld [vmem:[%s2647_s7 + $0x1a4] sm:$0xf0]  ;;  %v1879_v39 = vor.u32 %v2157_v34, %v1878_v33  ;;  %v1806_v42 = vld [vmem:[%s2647_s7 + $0x90] sm:$0xf]  ;;  %v1743_v49 = vor.u32 %v2123_v41, %v1742_v40 }
  0x9c   : > { %1406 = vmatpush.bf16.msra.mxu2 %v1895_v15  ;;  %v1943_v43 = vor.u32 %v2173_v36, %v1942_v35  ;;  %v2139_v44 = vld [vmem:[%s2647_s7 + $0x94] sm:$0xf0]  ;;  %v1870_v45 = vld [vmem:[%s2647_s7 + $0x110] sm:$0xf]  ;;  %v1734_v50 = vld [vmem:[%s2647_s7] sm:$0xf] }
  0x9d   : > { %1419 = vmatpush.bf16.msra.mxu3 %v1959_v19  ;;  %v2155_v46 = vld [vmem:[%s2647_s7 + $0x114] sm:$0xf0]  ;;  %v1934_v47 = vld [vmem:[%s2647_s7 + $0x190] sm:$0xf]  ;;  %v2121_v51 = vld [vmem:[%s2647_s7 + $0x4] sm:$0xf0]  ;;  %v1807_v52 = vor.u32 %v2139_v44, %v1806_v42 }
  0x9e   : > { %1381 = vmatpush.bf16.msra.mxu0 %v1759_v25  ;;  %v2171_v48 = vld [vmem:[%s2647_s7 + $0x194] sm:$0xf0]  ;;  %v1871_v53 = vor.u32 %v2155_v46, %v1870_v45  ;;  %v1798_v54 = vld [vmem:[%s2647_s7 + $0x80] sm:$0xf]  ;;  %v2137_v55 = vld [vmem:[%s2647_s7 + $0x84] sm:$0xf0]  ;;  %v1735_v0 = vor.u32 %v2121_v51, %v1734_v50 }
  0x9f   : > { %1394 = vmatpush.bf16.msra.mxu1 %v1823_v26  ;;  %v1862_v56 = vld [vmem:[%s2647_s7 + $0x100] sm:$0xf]  ;;  %v1935_v57 = vor.u32 %v2171_v48, %v1934_v47  ;;  %v2153_v58 = vld [vmem:[%s2647_s7 + $0x104] sm:$0xf0]  ;;  %v2046_v61 = vld [vmem:[%s2647_s7 + $0x270] sm:$0xf]  ;;  %v1799_v4 = vor.u32 %v2137_v55, %v1798_v54 }
  0xa0   : > { %1407 = vmatpush.bf16.msra.mxu2 %v1887_v27  ;;  %v1926_v59 = vld [vmem:[%s2647_s7 + $0x180] sm:$0xf]  ;;  %v2169_v60 = vld [vmem:[%s2647_s7 + $0x184] sm:$0xf0]  ;;  %v2199_v62 = vld [vmem:[%s2647_s7 + $0x274] sm:$0xf0]  ;;  %v1863_v5 = vor.u32 %v2153_v58, %v1862_v56 }
  0xa1   : > { %1420 = vmatpush.bf16.msra.mxu3 %v1951_v31  ;;  %v2110_v63 = vld [vmem:[%s2647_s7 + $0x2f0] sm:$0xf]  ;;  %v2215_v1 = vld [vmem:[%s2647_s7 + $0x2f4] sm:$0xf0]  ;;  %v2134_v2 = vld [vmem:[%s2647_s7 + $0x74] sm:$0xf]  ;;  %v1927_v8 = vor.u32 %v2169_v60, %v1926_v59  ;;  %v2047_v9 = vor.u32 %v2199_v62, %v2046_v61 }
  0xa2   : > { %1382 = vmatpush.bf16.msra.mxu0 %v1751_v37  ;;  %v1792_v3 = vld [vmem:[%s2647_s7 + $0x78] sm:$0xf0]  ;;  %v2150_v6 = vld [vmem:[%s2647_s7 + $0xf4] sm:$0xf]  ;;  %v2111_v10 = vor.u32 %v2215_v1, %v2110_v63  ;;  %v2038_v12 = vld [vmem:[%s2647_s7 + $0x260] sm:$0xf] }
  0xa3   : > { %1395 = vmatpush.bf16.msra.mxu1 %v1815_v38  ;;  %v1856_v7 = vld [vmem:[%s2647_s7 + $0xf8] sm:$0xf0]  ;;  %v1795_v11 = vor.u32 %v2134_v2, %v1792_v3  ;;  %v2197_v13 = vld [vmem:[%s2647_s7 + $0x264] sm:$0xf0]  ;;  %v2102_v14 = vld [vmem:[%s2647_s7 + $0x2e0] sm:$0xf] }
  0xa4   : > { %1408 = vmatpush.bf16.msra.mxu2 %v1879_v39  ;;  %v1859_v15 = vor.u32 %v2150_v6, %v1856_v7  ;;  %v2213_v16 = vld [vmem:[%s2647_s7 + $0x2e4] sm:$0xf0]  ;;  %v2132_v17 = vld [vmem:[%s2647_s7 + $0x64] sm:$0xf]  ;;  %v1784_v18 = vld [vmem:[%s2647_s7 + $0x68] sm:$0xf0]  ;;  %v2039_v21 = vor.u32 %v2197_v13, %v2038_v12 }
  0xa5   : > { %1421 = vmatpush.bf16.msra.mxu3 %v1943_v43  ;;  %v2148_v19 = vld [vmem:[%s2647_s7 + $0xe4] sm:$0xf]  ;;  %v1848_v20 = vld [vmem:[%s2647_s7 + $0xe8] sm:$0xf0]  ;;  %v2030_v22 = vld [vmem:[%s2647_s7 + $0x250] sm:$0xf]  ;;  %v2103_v24 = vor.u32 %v2213_v16, %v2102_v14  ;;  %v1787_v25 = vor.u32 %v2132_v17, %v1784_v18 }
  0xa6   : > { %1383 = vmatpush.bf16.msra.mxu0 %v1743_v49  ;;  %v2195_v23 = vld [vmem:[%s2647_s7 + $0x254] sm:$0xf0]  ;;  %v2094_v26 = vld [vmem:[%s2647_s7 + $0x2d0] sm:$0xf]  ;;  %v1851_v29 = vor.u32 %v2148_v19, %v1848_v20  ;;  %v2130_v30 = vld [vmem:[%s2647_s7 + $0x54] sm:$0xf] }
  0xa7   : > { %1396 = vmatpush.bf16.msra.mxu1 %v1807_v52  ;;  %v2211_v27 = vld [vmem:[%s2647_s7 + $0x2d4] sm:$0xf0]  ;;  %v1776_v31 = vld [vmem:[%s2647_s7 + $0x58] sm:$0xf0]  ;;  %v2146_v32 = vld [vmem:[%s2647_s7 + $0xd4] sm:$0xf]  ;;  %v2031_v34 = vor.u32 %v2195_v23, %v2030_v22 }
  0xa8   : > { %1409 = vmatpush.bf16.msra.mxu2 %v1871_v53  ;;  %v786_v28 = vld [vmem:[%s748_s8] sm:$0x3f]  ;;  %v1840_v33 = vld [vmem:[%s2647_s7 + $0xd8] sm:$0xf0]  ;;  %v2095_v35 = vor.u32 %v2211_v27, %v2094_v26  ;;  %v1779_v36 = vor.u32 %v2130_v30, %v1776_v31  ;;  %v2022_v37 = vld [vmem:[%s2647_s7 + $0x240] sm:$0xf] }
  0xa9   : > { %1422 = vmatpush.bf16.msra.mxu3 %v1935_v57  ;;  %884 = vst [vmem:[#allocation1] ss:$9 sm:$0xff] %v786_v28  ;;  %v2193_v38 = vld [vmem:[%s2647_s7 + $0x244] sm:$0xf0]  ;;  %v2086_v39 = vld [vmem:[%s2647_s7 + $0x2c0] sm:$0xf]  ;;  %v1843_v40 = vor.u32 %v2146_v32, %v1840_v33 }
  0xaa   : > { %1384 = vmatpush.bf16.msra.mxu0 %v1735_v0  ;;  %v2209_v41 = vld [vmem:[%s2647_s7 + $0x2c4] sm:$0xf0]  ;;  %v2128_v42 = vld [vmem:[%s2647_s7 + $0x44] sm:$0xf]  ;;  %v1768_v43 = vld [vmem:[%s2647_s7 + $0x48] sm:$0xf0]  ;;  %v2023_v47 = vor.u32 %v2193_v38, %v2022_v37 }
  0xab   : > { %1397 = vmatpush.bf16.msra.mxu1 %v1799_v4  ;;  %v2144_v44 = vld [vmem:[%s2647_s7 + $0xc4] sm:$0xf]  ;;  %v1832_v45 = vld [vmem:[%s2647_s7 + $0xc8] sm:$0xf0]  ;;  %v2014_v46 = vld [vmem:[%s2647_s7 + $0x230] sm:$0xf]  ;;  %v2087_v51 = vor.u32 %v2209_v41, %v2086_v39  ;;  %v1771_v52 = vor.u32 %v2128_v42, %v1768_v43 }
  0xac   : > { %1410 = vmatpush.bf16.msra.mxu2 %v1863_v5  ;;  %v2191_v48 = vld [vmem:[%s2647_s7 + $0x234] sm:$0xf0]  ;;  %v2078_v49 = vld [vmem:[%s2647_s7 + $0x2b0] sm:$0xf]  ;;  %v1835_v56 = vor.u32 %v2144_v44, %v1832_v45  ;;  %v2126_v57 = vld [vmem:[%s2647_s7 + $0x34] sm:$0xf] }
  0xad   : > { %1423 = vmatpush.bf16.msra.mxu3 %v1927_v8  ;;  %v2207_v50 = vld [vmem:[%s2647_s7 + $0x2b4] sm:$0xf0]  ;;  %v1760_v58 = vld [vmem:[%s2647_s7 + $0x38] sm:$0xf0]  ;;  %v2142_v60 = vld [vmem:[%s2647_s7 + $0xb4] sm:$0xf]  ;;  %v2015_v62 = vor.u32 %v2191_v48, %v2014_v46 }
  0xae   : > { %1429 = vmatpush.bf16.msrb.mxu0 %v2047_v9  ;;  %v1824_v61 = vld [vmem:[%s2647_s7 + $0xb8] sm:$0xf0]  ;;  %v2079_v63 = vor.u32 %v2207_v50, %v2078_v49  ;;  %v1763_v0 = vor.u32 %v2126_v57, %v1760_v58  ;;  %v2006_v1 = vld [vmem:[%s2647_s7 + $0x220] sm:$0xf]  ;;  %v2189_v2 = vld [vmem:[%s2647_s7 + $0x224] sm:$0xf0] }
  0xaf   : > { %1442 = vmatpush.bf16.msrb.mxu1 %v2111_v10  ;;  %v2070_v3 = vld [vmem:[%s2647_s7 + $0x2a0] sm:$0xf]  ;;  %v1827_v4 = vor.u32 %v2142_v60, %v1824_v61  ;;  %v2205_v5 = vld [vmem:[%s2647_s7 + $0x2a4] sm:$0xf0]  ;;  %v2124_v6 = vld [vmem:[%s2647_s7 + $0x24] sm:$0xf]  ;;  %v2007_v10 = vor.u32 %v2189_v2, %v2006_v1 }
  0xb0   : > { %1455 = vmatpush.bf16.msrb.mxu2 %v1795_v11  ;;  %v2755_v53 = vld [vmem:[#allocation1] sm:$0xff]  ;;  %v2757_v54 = vld [vmem:[#allocation1 + $0x12] sm:$0xff]  ;;  %v2759_v55 = vld [vmem:[#allocation1 + $0x9] sm:$0xff]  ;;  %v2071_v11 = vor.u32 %v2205_v5, %v2070_v3  ;;  %vm1536_vm0 = vcmask 1041408   ;;  %p2116_p13 = scmp.ne.s32.totalorder %s2313_s20, 5 }
  0xb1   : > { %1468 = vmatpush.bf16.msrb.mxu3 %v1859_v15  ;;  %1385 = vmatmul.bf16.vlgmr.msra.gmra.mxu0 %v2755_v53  ;;  %v2764_v59 = vld [vmem:[#allocation1 + $0x1b] sm:$0xff]  ;;  %v2140_v8 = vld [vmem:[%s2647_s7 + $0xa4] sm:$0xf]  ;;  %v2187_v14 = vld [vmem:[%s2647_s7 + $0x214] sm:$0xf0] }
  0xb2   : > { %1430 = vmatpush.bf16.msrb.mxu0 %v2039_v21  ;;  %1411 = vmatmul.bf16.vlgmr.msra.gmra.mxu2 %v2757_v54  ;;  %v1752_v7 = vld [vmem:[%s2647_s7 + $0x28] sm:$0xf0]  ;;  %v1998_v13 = vld [vmem:[%s2647_s7 + $0x210] sm:$0xf]  ;;  %v2203_v17 = vld [vmem:[%s2647_s7 + $0x294] sm:$0xf0] }
  0xb3   : > { %1443 = vmatpush.bf16.msrb.mxu1 %v2103_v24  ;;  %1424 = vmatmul.bf16.vlgmr.msra.gmra.mxu3 %v2764_v59  ;;  %v1816_v9 = vld [vmem:[%s2647_s7 + $0xa8] sm:$0xf0]  ;;  %v1755_v12 = vor.u32 %v2124_v6, %v1752_v7  ;;  %v2062_v15 = vld [vmem:[%s2647_s7 + $0x290] sm:$0xf]  ;;  %v2122_v18 = vld [vmem:[%s2647_s7 + $0x14] sm:$0xf]  ;;  %v1999_v22 = vor.u32 %v2187_v14, %v1998_v13 }
  0xb4   : > { %1456 = vmatpush.bf16.msrb.mxu2 %v1787_v25  ;;  %1398 = vmatmul.bf16.vlgmr.msra.gmra.mxu1 %v2759_v55  ;;  %v1819_v16 = vor.u32 %v2140_v8, %v1816_v9  ;;  %v1744_v19 = vld [vmem:[%s2647_s7 + $0x18] sm:$0xf0]  ;;  %v2138_v20 = vld [vmem:[%s2647_s7 + $0x94] sm:$0xf]  ;;  %v1990_v23 = vld [vmem:[%s2647_s7 + $0x200] sm:$0xf]  ;;  %v2063_v25 = vor.u32 %v2203_v17, %v2062_v15 }
  0xb5   : > { %1469 = vmatpush.bf16.msrb.mxu3 %v1851_v29  ;;  %v1808_v21 = vld [vmem:[%s2647_s7 + $0x98] sm:$0xf0]  ;;  %v2185_v24 = vld [vmem:[%s2647_s7 + $0x204] sm:$0xf0]  ;;  %v1747_v26 = vor.u32 %v2122_v18, %v1744_v19  ;;  %v2054_v27 = vld [vmem:[%s2647_s7 + $0x280] sm:$0xf] }
  0xb6   : > { %1431 = vmatpush.bf16.msrb.mxu0 %v2031_v34  ;;  %v2201_v28 = vld [vmem:[%s2647_s7 + $0x284] sm:$0xf0]  ;;  %v2120_v29 = vld [vmem:[%s2647_s7 + $0x4] sm:$0xf]  ;;  %v1811_v30 = vor.u32 %v2138_v20, %v1808_v21  ;;  %v1736_v31 = vld [vmem:[%s2647_s7 + $0x8] sm:$0xf0]  ;;  %v1991_v37 = vor.u32 %v2185_v24, %v1990_v23 }
  0xb7   : > { %1444 = vmatpush.bf16.msrb.mxu1 %v2095_v35  ;;  %v2136_v32 = vld [vmem:[%s2647_s7 + $0x84] sm:$0xf]  ;;  %v1800_v33 = vld [vmem:[%s2647_s7 + $0x88] sm:$0xf0]  ;;  %v2166_v34 = vld [vmem:[%s2647_s7 + $0x174] sm:$0xf]  ;;  %v2055_v41 = vor.u32 %v2201_v28, %v2054_v27  ;;  %v1739_v42 = vor.u32 %v2120_v29, %v1736_v31 }
  0xb8   : > { %1457 = vmatpush.bf16.msrb.mxu2 %v1779_v36  ;;  %v1920_v35 = vld [vmem:[%s2647_s7 + $0x178] sm:$0xf0]  ;;  %v2182_v36 = vld [vmem:[%s2647_s7 + $0x1f4] sm:$0xf]  ;;  %v1803_v45 = vor.u32 %v2136_v32, %v1800_v33  ;;  %v2164_v49 = vld [vmem:[%s2647_s7 + $0x164] sm:$0xf] }
  0xb9   : > { %1470 = vmatpush.bf16.msrb.mxu3 %v1843_v40  ;;  %v1984_v38 = vld [vmem:[%s2647_s7 + $0x1f8] sm:$0xf0]  ;;  %v2198_v39 = vld [vmem:[%s2647_s7 + $0x274] sm:$0xf]  ;;  %v1923_v46 = vor.u32 %v2166_v34, %v1920_v35  ;;  %v1912_v50 = vld [vmem:[%s2647_s7 + $0x168] sm:$0xf0] }
  0xba   : > { %1432 = vmatpush.bf16.msrb.mxu0 %v2023_v47  ;;  %v2048_v40 = vld [vmem:[%s2647_s7 + $0x278] sm:$0xf0]  ;;  %v2214_v43 = vld [vmem:[%s2647_s7 + $0x2f4] sm:$0xf]  ;;  %v1987_v47 = vor.u32 %v2182_v36, %v1984_v38  ;;  %v2196_v57 = vld [vmem:[%s2647_s7 + $0x264] sm:$0xf] }
  0xbb   : > { %1445 = vmatpush.bf16.msrb.mxu1 %v2087_v51  ;;  %v2112_v44 = vld [vmem:[%s2647_s7 + $0x2f8] sm:$0xf0]  ;;  %v2051_v48 = vor.u32 %v2198_v39, %v2048_v40  ;;  %v2180_v51 = vld [vmem:[%s2647_s7 + $0x1e4] sm:$0xf]  ;;  %v2040_v58 = vld [vmem:[%s2647_s7 + $0x268] sm:$0xf0] }
  0xbc   : > { %1458 = vmatpush.bf16.msrb.mxu2 %v1771_v52  ;;  %v2115_v52 = vor.u32 %v2214_v43, %v2112_v44  ;;  %v2212_v60 = vld [vmem:[%s2647_s7 + $0x2e4] sm:$0xf]  ;;  %v2104_v61 = vld [vmem:[%s2647_s7 + $0x2e8] sm:$0xf0]  ;;  %v2043_v2 = vor.u32 %v2196_v57, %v2040_v58  ;;  %v2162_v3 = vld [vmem:[%s2647_s7 + $0x154] sm:$0xf] }
  0xbd   : > { %1471 = vmatpush.bf16.msrb.mxu3 %v1835_v56  ;;  %v1976_v56 = vld [vmem:[%s2647_s7 + $0x1e8] sm:$0xf0]  ;;  %v2178_v5 = vld [vmem:[%s2647_s7 + $0x1d4] sm:$0xf]  ;;  %v2107_v6 = vor.u32 %v2212_v60, %v2104_v61  ;;  %v1968_v7 = vld [vmem:[%s2647_s7 + $0x1d8] sm:$0xf0] }
  0xbe   : > { %1433 = vmatpush.bf16.msrb.mxu0 %v2015_v62  ;;  %v2811_v62 = vld [vmem:[#allocation1 + $0x24] sm:$0xff]  ;;  %v1979_v1 = vor.u32 %v2180_v51, %v1976_v56  ;;  %v2194_v8 = vld [vmem:[%s2647_s7 + $0x254] sm:$0xf]  ;;  %v1971_v13 = vor.u32 %v2178_v5, %v1968_v7  ;;  %v2160_v15 = vld [vmem:[%s2647_s7 + $0x144] sm:$0xf] }
  0xbf   : > { %1446 = vmatpush.bf16.msrb.mxu1 %v2079_v63  ;;  %v1915_v63 = vor.u32 %v2164_v49, %v1912_v50  ;;  %v2032_v9 = vld [vmem:[%s2647_s7 + $0x258] sm:$0xf0]  ;;  %v1960_v18 = vld [vmem:[%s2647_s7 + $0x1c8] sm:$0xf0]  ;;  %v2192_v19 = vld [vmem:[%s2647_s7 + $0x244] sm:$0xf] }
  0xc0   : > { %1459 = vmatpush.bf16.msrb.mxu2 %v1763_v0  ;;  %v2813_v0 = vld [vmem:[#allocation1 + $0x2d] sm:$0xff]  ;;  %v2035_v14 = vor.u32 %v2194_v8, %v2032_v9  ;;  %v2024_v20 = vld [vmem:[%s2647_s7 + $0x248] sm:$0xf0]  ;;  %v2174_v27 = vld [vmem:[%s2647_s7 + $0x1b4] sm:$0xf] }
  0xc1   : > { %1472 = vmatpush.bf16.msrb.mxu3 %v1827_v4  ;;  %v1904_v4 = vld [vmem:[%s2647_s7 + $0x158] sm:$0xf0]  ;;  %v2208_v21 = vld [vmem:[%s2647_s7 + $0x2c4] sm:$0xf]  ;;  %v2027_v24 = vor.u32 %v2192_v19, %v2024_v20  ;;  %v2206_v32 = vld [vmem:[%s2647_s7 + $0x2b4] sm:$0xf] }
  0xc2   : > { %1434 = vmatpush.bf16.msrb.mxu0 %v2007_v10  ;;  %v2210_v10 = vld [vmem:[%s2647_s7 + $0x2d4] sm:$0xf]  ;;  %v1952_v29 = vld [vmem:[%s2647_s7 + $0x1b8] sm:$0xf0]  ;;  %v1880_v38 = vld [vmem:[%s2647_s7 + $0x128] sm:$0xf0] }
  0xc3   : > { %1447 = vmatpush.bf16.msrb.mxu1 %v2071_v11  ;;  %v2096_v11 = vld [vmem:[%s2647_s7 + $0x2d8] sm:$0xf0]  ;;  %v1955_v35 = vor.u32 %v2174_v27, %v1952_v29  ;;  %v2172_v39 = vld [vmem:[%s2647_s7 + $0x1a4] sm:$0xf]  ;;  %v2008_v43 = vld [vmem:[%s2647_s7 + $0x228] sm:$0xf0] }
  0xc4   : > { %1460 = vmatpush.bf16.msrb.mxu2 %v1755_v12  ;;  %v1907_v12 = vor.u32 %v2162_v3, %v1904_v4  ;;  %v2099_v17 = vor.u32 %v2210_v10, %v2096_v11  ;;  %v2016_v31 = vld [vmem:[%s2647_s7 + $0x238] sm:$0xf0]  ;;  %v2204_v44 = vld [vmem:[%s2647_s7 + $0x2a4] sm:$0xf]  ;;  %v2154_v49 = vld [vmem:[%s2647_s7 + $0x114] sm:$0xf] }
  0xc5   : > { %1473 = vmatpush.bf16.msrb.mxu3 %v1819_v16  ;;  %v2176_v16 = vld [vmem:[%s2647_s7 + $0x1c4] sm:$0xf]  ;;  %v2080_v33 = vld [vmem:[%s2647_s7 + $0x2b8] sm:$0xf0]  ;;  %v2170_v51 = vld [vmem:[%s2647_s7 + $0x194] sm:$0xf] }
  0xc6   : > { %1435 = vmatpush.bf16.msrb.mxu0 %v1999_v22  ;;  %v1963_v23 = vor.u32 %v2176_v16, %v1960_v18  ;;  %v2083_v40 = vor.u32 %v2206_v32, %v2080_v33  ;;  %v1872_v50 = vld [vmem:[%s2647_s7 + $0x118] sm:$0xf0]  ;;  %v2186_v57 = vld [vmem:[%s2647_s7 + $0x214] sm:$0xf]  ;;  %v2152_v3 = vld [vmem:[%s2647_s7 + $0x104] sm:$0xf] }
  0xc7   : > { %1448 = vmatpush.bf16.msrb.mxu1 %v2063_v25  ;;  %v2158_v25 = vld [vmem:[%s2647_s7 + $0x134] sm:$0xf]  ;;  %v1936_v56 = vld [vmem:[%s2647_s7 + $0x198] sm:$0xf0]  ;;  %v1864_v4 = vld [vmem:[%s2647_s7 + $0x108] sm:$0xf0] }
  0xc8   : > { %1461 = vmatpush.bf16.msrb.mxu2 %v1747_v26  ;;  %v1888_v26 = vld [vmem:[%s2647_s7 + $0x138] sm:$0xf0]  ;;  %v2202_v60 = vld [vmem:[%s2647_s7 + $0x294] sm:$0xf]  ;;  %v2168_v5 = vld [vmem:[%s2647_s7 + $0x184] sm:$0xf] }
  0xc9   : > { %1474 = vmatpush.bf16.msrb.mxu3 %v1811_v30  ;;  %v2190_v30 = vld [vmem:[%s2647_s7 + $0x234] sm:$0xf]  ;;  %v1891_v34 = vor.u32 %v2158_v25, %v1888_v26  ;;  %v2000_v58 = vld [vmem:[%s2647_s7 + $0x218] sm:$0xf0]  ;;  %v1928_v7 = vld [vmem:[%s2647_s7 + $0x188] sm:$0xf0] }
  0xca   : > { %1436 = vmatpush.bf16.msrb.mxu0 %v1991_v37  ;;  %v2019_v36 = vor.u32 %v2190_v30, %v2016_v31  ;;  %v2156_v37 = vld [vmem:[%s2647_s7 + $0x124] sm:$0xf]  ;;  %v2064_v61 = vld [vmem:[%s2647_s7 + $0x298] sm:$0xf0]  ;;  %v1992_v9 = vld [vmem:[%s2647_s7 + $0x208] sm:$0xf0] }
  0xcb   : > { %1449 = vmatpush.bf16.msrb.mxu1 %v2055_v41  ;;  %v1944_v41 = vld [vmem:[%s2647_s7 + $0x1a8] sm:$0xf0]  ;;  %v2184_v8 = vld [vmem:[%s2647_s7 + $0x204] sm:$0xf] }
  0xcc   : > { %1462 = vmatpush.bf16.msrb.mxu2 %v1739_v42  ;;  %v2188_v42 = vld [vmem:[%s2647_s7 + $0x224] sm:$0xf]  ;;  %v2056_v11 = vld [vmem:[%s2647_s7 + $0x288] sm:$0xf0] }
  0xcd   : > { %1475 = vmatpush.bf16.msrb.mxu3 %v1803_v45  ;;  %1437 = vmatmul.bf16.vlgmr.msrb.gmra.mxu0 %v2811_v62  ;;  %v2072_v45 = vld [vmem:[%s2647_s7 + $0x2a8] sm:$0xf0]  ;;  %v2200_v10 = vld [vmem:[%s2647_s7 + $0x284] sm:$0xf] }
  0xce   : > { %1481 = vmatpush.bf16.msra.mxu0 %v1923_v46  ;;  %1450 = vmatmul.bf16.vlgmr.msrb.gmra.mxu1 %v2813_v0  ;;  %v1883_v46 = vor.u32 %v2156_v37, %v1880_v38 }
  0xcf   : > { %1494 = vmatpush.bf16.msra.mxu1 %v1987_v47  ;;  %1463 = vmatmul.bf16.vlgmr.msrb.gmra.mxu2 %v2755_v53  ;;  %v1896_v53 = vld [vmem:[%s2647_s7 + $0x148] sm:$0xf0]  ;;  %v1947_v47 = vor.u32 %v2172_v39, %v1944_v41 }
  0xd0   : > { %1507 = vmatpush.bf16.msra.mxu2 %v2051_v48  ;;  %1476 = vmatmul.bf16.vlgmr.msrb.gmra.mxu3 %v2759_v55  ;;  %v2088_v55 = vld [vmem:[%s2647_s7 + $0x2c8] sm:$0xf0]  ;;  %v1899_v22 = vor.u32 %v2160_v15, %v1896_v53  ;;  %v2011_v48 = vor.u32 %v2188_v42, %v2008_v43  ;;  %v2059_v15 = vor.u32 %v2200_v10, %v2056_v11  ;;  %v785_v42 = vld [vmem:[#allocation2] sm:$0xf] }
  0xd1   : > { %1520 = vmatpush.bf16.msra.mxu3 %v2115_v52  ;;  %v2091_v28 = vor.u32 %v2208_v21, %v2088_v55  ;;  %v2075_v52 = vor.u32 %v2204_v44, %v2072_v45 }
  0xd2   : > { %1482 = vmatpush.bf16.msra.mxu0 %v1915_v63  ;;  %v1875_v63 = vor.u32 %v2154_v49, %v1872_v50 }
  0xd3   : > { %1495 = vmatpush.bf16.msra.mxu1 %v1979_v1  ;;  %v1939_v1 = vor.u32 %v2170_v51, %v1936_v56 }
  0xd4   : > { %1508 = vmatpush.bf16.msra.mxu2 %v2043_v2  ;;  %v2003_v2 = vor.u32 %v2186_v57, %v2000_v58 }
  0xd5   : > { %1521 = vmatpush.bf16.msra.mxu3 %v2107_v6  ;;  %v2067_v6 = vor.u32 %v2202_v60, %v2064_v61 }
  0xd6   : > { %1483 = vmatpush.bf16.msra.mxu0 %v1907_v12  ;;  %v1867_v12 = vor.u32 %v2152_v3, %v1864_v4 }
  0xd7   : > { %1496 = vmatpush.bf16.msra.mxu1 %v1971_v13  ;;  %v1931_v13 = vor.u32 %v2168_v5, %v1928_v7 }
  0xd8   : > { %1509 = vmatpush.bf16.msra.mxu2 %v2035_v14  ;;  %v1995_v14 = vor.u32 %v2184_v8, %v1992_v9 }
  0xd9   : > { %1522 = vmatpush.bf16.msra.mxu3 %v2099_v17 }
  0xda   : > { %1484 = vmatpush.bf16.msra.mxu0 %v1899_v22 }
  0xdb   : > { %1497 = vmatpush.bf16.msra.mxu1 %v1963_v23 }
  0xdc   : > { %1510 = vmatpush.bf16.msra.mxu2 %v2027_v24 }
  0xdd   : > { %1523 = vmatpush.bf16.msra.mxu3 %v2091_v28 }
  0xde   : > { %1485 = vmatpush.bf16.msra.mxu0 %v1891_v34 }
  0xdf   : > { %1498 = vmatpush.bf16.msra.mxu1 %v1955_v35 }
  0xe0   : > { %1511 = vmatpush.bf16.msra.mxu2 %v2019_v36 }
  0xe1   : > { %1524 = vmatpush.bf16.msra.mxu3 %v2083_v40 }
  0xe2   : > { %1486 = vmatpush.bf16.msra.mxu0 %v1883_v46 }
  0xe3   : > { %1499 = vmatpush.bf16.msra.mxu1 %v1947_v47 }
  0xe4   : > { %1512 = vmatpush.bf16.msra.mxu2 %v2011_v48 }
  0xe5   : > { %1525 = vmatpush.bf16.msra.mxu3 %v2075_v52 }
  0xe6   : > { %1487 = vmatpush.bf16.msra.mxu0 %v1875_v63 }
  0xe7   : > { %1500 = vmatpush.bf16.msra.mxu1 %v1939_v1 }
  0xe8   : > { %1513 = vmatpush.bf16.msra.mxu2 %v2003_v2 }
  0xe9   : > { %1526 = vmatpush.bf16.msra.mxu3 %v2067_v6 }
  0xea   : > { %1488 = vmatpush.bf16.msra.mxu0 %v1867_v12 }
  0xeb   : > { %1501 = vmatpush.bf16.msra.mxu1 %v1931_v13 }
  0xec   : > { %1514 = vmatpush.bf16.msra.mxu2 %v1995_v14 }
  0xed   : > { %1527 = vmatpush.bf16.msra.mxu3 %v2059_v15  ;;  %1489 = vmatmul.bf16.vlgmr.msra.gmra.mxu0 %v2757_v54 }
  0xee   : > { %1502 = vmatmul.bf16.vlgmr.msra.gmra.mxu1 %v2764_v59 }
  0xef   : > { %1515 = vmatmul.bf16.vlgmr.msra.gmra.mxu2 %v2811_v62 }
  0xf0   : > { %1528 = vmatmul.bf16.vlgmr.msra.gmra.mxu3 %v2813_v0 }
 0x12e   : > { %v1386_v53 = vpop.f32.mrf.mxu0 }
 0x131   : > { %v1399_v16 = vpop.f32.mrf.mxu1 }
 0x132   : > { %v1400_v28 = vadd.f32 %v1399_v16, %v1386_v53 }
 0x135   : > { %v1412_v17 = vpop.f32.mrf.mxu2 }
 0x136   : > { %v1388_v18 = vpop.f32.mrf.mxu0  ;;  %v1425_v19 = vpop.f32.mrf.mxu3  ;;  %v1413_v62 = vadd.f32 %v1412_v17, %v1400_v28 }
 0x138   : > { %v1426_v32 = vadd.f32 %v1425_v19, %v1413_v62 }
 0x139   : > { %v1401_v20 = vpop.f32.mrf.mxu1 }
 0x13d   : > { %v1414_v21 = vpop.f32.mrf.mxu2 }
 0x13e   : > { %v1427_v55 = vpop.f32.mrf.mxu3 }
 0x14a   : > { %v1438_v22 = vpop.f32.mrf.mxu0 }
 0x14b   : > { %v1451_v23 = vpop.f32.mrf.mxu1  ;;  %v1439_v35 = vadd.f32 %v1438_v22, %v1426_v32 }
 0x14d   : > { %v1452_v41 = vadd.f32 %v1451_v23, %v1439_v35 }
 0x152   : > { %v1464_v24 = vpop.f32.mrf.mxu2  ;;  %v1440_v26 = vpop.f32.mrf.mxu0 }
 0x153   : > { %v1477_v25 = vpop.f32.mrf.mxu3  ;;  %v1453_v54 = vpop.f32.mrf.mxu1 }
 0x154   : > { %v1478_v29 = vadd.f32 %v1477_v25, %v1464_v24 }
 0x15a   : > { %v1466_v27 = vpop.f32.mrf.mxu2 }
 0x15b   : > { %v1479_v59 = vpop.f32.mrf.mxu3 }
 0x16a   : > { %v1490_v0 = vpop.f32.mrf.mxu0 }
 0x16b   : > { %v1503_v30 = vpop.f32.mrf.mxu1  ;;  %v1491_v31 = vadd.f32 %v1490_v0, %v1478_v29 }
 0x16d   : > { %v1504_v33 = vadd.f32 %v1503_v30, %v1491_v31 }
 0x172   : > { %v1516_v34 = vpop.f32.mrf.mxu2  ;;  %v1492_v38 = vpop.f32.mrf.mxu0 }
 0x173   : > { %v1517_v36 = vadd.f32 %v1516_v34, %v1504_v33  ;;  %v1529_v37 = vpop.f32.mrf.mxu3  ;;  %v1505_v39 = vpop.f32.mrf.mxu1 }
 0x175   : > { %v1530_v40 = vadd.f32 %v1529_v37, %v1517_v36 }
 0x177   : > { %v1535_v43 = vrot.slane %v1530_v40, 6 }
 0x178   : > { %1544 = sbr.rel (%p2116_p13) target bundleno = 410 (0x19a), region = 86 }
 0x179   : > { %v1537_v44 = vsel %vm1536_vm0, %v1452_v41, %v1535_v43 }
 0x17a   : > { %v1539_v45 = vadd.f32 %v1537_v44, %v785_v42  ;;  %v1518_v46 = vpop.f32.mrf.mxu2 }
 0x17b   : > { %v1531_v47 = vpop.f32.mrf.mxu3 }
 0x17c   : > { %1540 = vst [vmem:[#allocation2] sm:$0xf] %v1539_v45 }
 0x17d   : > { %v1546_v48 = vld [vmem:[%s755_s10] sm:$0x3]  ;;  %vm1575_vm1 = vcmask 1040384  }
 0x17e   : > { %v1554_v49 = vld [vmem:[%s760_s12] sm:$0x3]  ;;  %v1548_v50 = vperm.slane %v1546_v48, 0  ;;  %v1549_v51 = vperm.slane %v1546_v48, 1 }
 0x17f   : > { %v1556_v52 = vperm.slane %v1554_v49, 0  ;;  %v1557_v56 = vperm.slane %v1554_v49, 1  ;;  %v1562_v61 = vld [vmem:[%s769_s15] sm:$0x3] }
 0x180   : > { %v1550_v58 = vrot.slane %v1549_v51, 6  ;;  %v1563_v3 = vunpack.c.l.bf16 %v1562_v61 }
 0x181   : > { %v1558_v60 = vrot.slane %v1557_v56, 6 }
 0x182   : > { %v1551_v63 = vsel %vm1536_vm0, %v1548_v50, %v1550_v58 }
 0x183   : > { %v1545_v57 = vld [vmem:[#allocation2] sm:$0xf]  ;;  %v1559_v1 = vsel %vm1536_vm0, %v1556_v52, %v1558_v60 }
 0x184   : > { %v1553_v2 = vmul.f32 %v1551_v63, %v1545_v57 }
 0x186   : > { %v1561_v4 = vadd.f32 %v1559_v1, %v1553_v2 }
 0x188   : > { %v1564_v5 = vadd.f32 %v1563_v3, %v1561_v4 }
 0x18a   : > { %v1565_v6 = vmax.f32 %v1564_v5, 0.0 }
 0x18c   : > { %1567 = vst [vmem:[#allocation1] ss:$4 sm:$0xff] %v1565_v6 }
 0x193   : > { %v1568_v7 = vld.sshfl [vmem:[#allocation1] sm:$0xff pattern:$0x73625140]  ;;  %v1569_v8 = vld.sshfl [vmem:[#allocation1 + $0x8] sm:$0xff pattern:$0x73625140] }
 0x194   : > { %v1572_v9 = vpack.c.bf16 %v1569_v8, %v1568_v7 }
 0x196   : > { %v1574_v10 = vrot.slane %v1572_v9, 3 }
 0x198   : > { %v1578_v11 = vsel %vm1575_vm1, %v1572_v9, %v1574_v10 }
 0x199   : > { %1580 = vst [vmem:[%s778_s30] sm:$0x3] %v1578_v11 }
 0x19a PF: > { %s15_s24 = sadd.s32 1, %s2329_s24   ;;  %s2922_s18 = smov %s2309_s19 }
 0x19b   : > { %p12_p0 = scmp.ge.s32.totalorder %s15_s24, 14   ;;  %s2923_s19 = smov %s2413_s6 }
 0x19c   : > { %s2924_s20 = smov %s2321_s22  ;;  %s2925_s21 = smov %s2325_s23 }
 0x19d   : > { %s2926_s22 = smov %s2929_s25  ;;  %s2927_s23 = smov %s2933_s26 }
 0x19e   :  { %14 = sbr.rel (!%p12_p0) target bundleno = 4 (0x4), region = 133 }

// kernel: resnet18_forward.49
= control target key start
LH: loop header
LB: loop body
LE: loop exit
PB: predicated region body
PF: predicated region fallthrough
CT: control target
= control target key end

     0   :  { %s2926_s0 = inlined_call_operand.vmem [shape: bf16[2,1,1,9,512], index: 0, kind: input, shape index: {}, may-alias: {0,5}]   ;;  %s2927_s1 = inlined_call_operand.vmem [shape: bf16[2,4608], index: 1, kind: input, shape index: {}]   ;;  %s2928_s2 = inlined_call_operand.vmem [shape: bf16[4608,512], index: 2, kind: input, shape index: {}]   ;;  %s2929_s3 = inlined_call_operand.vmem [shape: f32[1,512], index: 3, kind: input, shape index: {}]   ;;  %s2930_s4 = inlined_call_operand.vmem [shape: f32[1,512], index: 4, kind: input, shape index: {}]   ;;  %s2931_s5 = inlined_call_operand.vmem [shape: bf16[2,1,1,9,512], index: 5, kind: output, shape index: {}, may-alias: {0,5}]  }
   0x1   :  { %2932 = sst [smem:[#allocation5_spill]] %s2928_s2 }
   0x2   :  { %s2339_s18 = smov 0   ;;  %s2341_s19 = smov 0  }
   0x3   :  { %s2343_s0 = smov 0   ;;  %s2345_s20 = smov 0  }
   0x4   :  { %s2347_s21 = smov 0   ;;  %s2349_s22 = smov 0  }
   0x5   :  { %s2351_s23 = smov 0   ;;  %s2353_s24 = smov 0  }
   0x6   :  { %s2355_s25 = smov 0  }
   0x7 LB: > { %s28_s26 = sadd.s32 1, %s2298_s23  ;;  %s31_s27 = sadd.s32 1, %s2302_s24  ;;  %s2306_s25 = sphi %s2355_s25, %s16_s25   ;;  %s2302_s24 = sphi %s2353_s24, %s2943_s24   ;;  %s2298_s23 = sphi %s2351_s23, %s2942_s23   ;;  %s2294_s22 = sphi %s2349_s22, %s2941_s22   ;;  %s2290_s21 = sphi %s2347_s21, %s2940_s21   ;;  %s2286_s20 = sphi %s2345_s20, %s2939_s20   ;;  %s2282_s0 = sphi %s2343_s0, %s2938_s0   ;;  %s2278_s19 = sphi %s2341_s19, %s2937_s19   ;;  %s2274_s18 = sphi %s2339_s18, %s2936_s18  }
   0x8   : > { %p29_p0 = scmp.ge.s32.totalorder %s28_s26, 6  ;;  %p79_p1 = scmp.ne.s32.totalorder %s2286_s20, %s2282_s0 }
   0x9   : > { %s1662_s28 = sadd.s32 4294967295, %s2306_s25   ;;  %p80_p2 = scmp.eq.s32.totalorder %s2306_s25, 0 }
   0xa   : > { %s2945_s26 = smov (%p29_p0, %s28_s26), 0  ;;  %s2947_s27 = smov (!%p29_p0, %s31_s27), %s2302_s24 }
   0xb   : > { %p33_p3 = scmp.ge.s32.totalorder %s2947_s27, 2  ;;  %s67_s29 = ssub.s32 %s2298_s23, %s2945_s26 }
   0xc   : > { %p2395_p4 = por %p80_p2, %p79_p1  ;;  %p162_p5 = scmp.ne.s32.totalorder %s2278_s19, %s2274_s18 }
   0xd   : > { %s2949_s27 = smov (%p33_p3, %s2947_s27), 0  ;;  %s72_s6 = sadd.s32 1, %s2286_s20 }
   0xe   : > { %p163_p6 = scmp.eq.s32.totalorder %s1662_s28, 11  ;;  %s68_s7 = ssub.s32 %s2302_s24, %s2949_s27 }
   0xf   : > { %s152_s8 = sadd.s32 1, %s2278_s19  ;;  %s69_s9 = sor.u32 %s68_s7, %s67_s29 }
  0x10   : > { %p150_p7 = scmp.eq.s32.totalorder %s68_s7, 0  ;;  %p70_p8 = scmp.eq.s32.totalorder %s69_s9, 0 }
  0x11   : > { %p2407_p9 = por %p163_p6, %p162_p5  ;;  %p1665_p10 = scmp.ge.s32.totalorder %s2306_s25, 12 }
  0x12   : > { %s2412_s11 = scalar_select %p150_p7, %s2278_s19, %s152_s8  }
  0x13   : > { %s2415_s12 = scalar_select %p70_p8, %s2286_s20, %s72_s6  }
  0x14   : > { %185 = sbr.rel (%p1665_p10) target bundleno = 131 (0x83), region = 16 }
  0x19   : > { %200 = sbr.rel (!%p2395_p4) target bundleno = 131 (0x83), region = 24  ;;  %s202_s13 = sand.u32 (%p2395_p4), 1, %s2286_s20  }
  0x1a   : > { %s2161_s14 = smul.u32 (%p2395_p4), 768, %s202_s13  ;;  %s1666_s15 = sshll.u32 (%p2395_p4), %s2302_s24, 1 }
  0x1b   : > { %s2064_s16 = smul.u32 (%p2395_p4), 384, %s2298_s23  ;;  %s2935_s2 = sld [smem:[#allocation5_spill]] (%p2395_p4) }
  0x1c   : > { %s2431_s30 = scalar_lea.vmem (%p2395_p4), [#allocation3], %s2161_s14 }
  0x1d   : > { %s208_s17 = sadd.s32 (%p2395_p4), %s2064_s16, %s1666_s15 }
  0x1e   : > { %s1668_s28 = sshll.u32 %s208_s17, 2 }
  0x21   : > { %s2426_s6 = scalar_lea.vmem %s2935_s2, %s1668_s28 }
  0x22   : > { %v429_v0 = vld [vmem:[%s2426_s6] sm:$0xff]  ;;  %v431_v1 = vld [vmem:[%s2426_s6 + $0x10] sm:$0xff] }
  0x23   : > { %v433_v2 = vld [vmem:[%s2426_s6 + $0x20] sm:$0xff]  ;;  %430 = vst [vmem:[%s2431_s30] sm:$0xff] %v429_v0  ;;  %v435_v3 = vld [vmem:[%s2426_s6 + $0x30] sm:$0xff] }
  0x24   : > { %432 = vst [vmem:[%s2431_s30 + $0x8] sm:$0xff] %v431_v1  ;;  %v437_v4 = vld [vmem:[%s2426_s6 + $0x40] sm:$0xff]  ;;  %v439_v5 = vld [vmem:[%s2426_s6 + $0x50] sm:$0xff] }
  0x25   : > { %434 = vst [vmem:[%s2431_s30 + $0x10] sm:$0xff] %v433_v2  ;;  %v441_v6 = vld [vmem:[%s2426_s6 + $0x60] sm:$0xff]  ;;  %v443_v7 = vld [vmem:[%s2426_s6 + $0x70] sm:$0xff] }
  0x26   : > { %436 = vst [vmem:[%s2431_s30 + $0x18] sm:$0xff] %v435_v3  ;;  %v445_v8 = vld [vmem:[%s2426_s6 + $0x80] sm:$0xff]  ;;  %v447_v9 = vld [vmem:[%s2426_s6 + $0x90] sm:$0xff] }
  0x27   : > { %438 = vst [vmem:[%s2431_s30 + $0x20] sm:$0xff] %v437_v4  ;;  %v449_v10 = vld [vmem:[%s2426_s6 + $0xa0] sm:$0xff]  ;;  %v451_v11 = vld [vmem:[%s2426_s6 + $0xb0] sm:$0xff] }
  0x28   : > { %440 = vst [vmem:[%s2431_s30 + $0x28] sm:$0xff] %v439_v5  ;;  %v453_v12 = vld [vmem:[%s2426_s6 + $0xc0] sm:$0xff]  ;;  %v455_v13 = vld [vmem:[%s2426_s6 + $0xd0] sm:$0xff] }
  0x29   : > { %442 = vst [vmem:[%s2431_s30 + $0x30] sm:$0xff] %v441_v6  ;;  %v457_v14 = vld [vmem:[%s2426_s6 + $0xe0] sm:$0xff]  ;;  %v459_v15 = vld [vmem:[%s2426_s6 + $0xf0] sm:$0xff] }
  0x2a   : > { %444 = vst [vmem:[%s2431_s30 + $0x38] sm:$0xff] %v443_v7  ;;  %v461_v16 = vld [vmem:[%s2426_s6 + $0x100] sm:$0xff]  ;;  %v463_v17 = vld [vmem:[%s2426_s6 + $0x110] sm:$0xff] }
  0x2b   : > { %446 = vst [vmem:[%s2431_s30 + $0x40] sm:$0xff] %v445_v8  ;;  %v465_v18 = vld [vmem:[%s2426_s6 + $0x120] sm:$0xff]  ;;  %v467_v19 = vld [vmem:[%s2426_s6 + $0x130] sm:$0xff] }
  0x2c   : > { %448 = vst [vmem:[%s2431_s30 + $0x48] sm:$0xff] %v447_v9  ;;  %v469_v20 = vld [vmem:[%s2426_s6 + $0x140] sm:$0xff]  ;;  %v471_v21 = vld [vmem:[%s2426_s6 + $0x150] sm:$0xff] }
  0x2d   : > { %450 = vst [vmem:[%s2431_s30 + $0x50] sm:$0xff] %v449_v10  ;;  %v473_v22 = vld [vmem:[%s2426_s6 + $0x160] sm:$0xff]  ;;  %v475_v23 = vld [vmem:[%s2426_s6 + $0x170] sm:$0xff] }
  0x2e   : > { %452 = vst [vmem:[%s2431_s30 + $0x58] sm:$0xff] %v451_v11  ;;  %v477_v24 = vld [vmem:[%s2426_s6 + $0x180] sm:$0xff]  ;;  %v479_v25 = vld [vmem:[%s2426_s6 + $0x190] sm:$0xff] }
  0x2f   : > { %454 = vst [vmem:[%s2431_s30 + $0x60] sm:$0xff] %v453_v12  ;;  %v481_v26 = vld [vmem:[%s2426_s6 + $0x1a0] sm:$0xff]  ;;  %v483_v27 = vld [vmem:[%s2426_s6 + $0x1b0] sm:$0xff] }
  0x30   : > { %456 = vst [vmem:[%s2431_s30 + $0x68] sm:$0xff] %v455_v13  ;;  %v485_v28 = vld [vmem:[%s2426_s6 + $0x1c0] sm:$0xff]  ;;  %v487_v29 = vld [vmem:[%s2426_s6 + $0x1d0] sm:$0xff] }
  0x31   : > { %458 = vst [vmem:[%s2431_s30 + $0x70] sm:$0xff] %v457_v14  ;;  %v489_v30 = vld [vmem:[%s2426_s6 + $0x1e0] sm:$0xff]  ;;  %v491_v31 = vld [vmem:[%s2426_s6 + $0x1f0] sm:$0xff] }
  0x32   : > { %460 = vst [vmem:[%s2431_s30 + $0x78] sm:$0xff] %v459_v15  ;;  %v493_v32 = vld [vmem:[%s2426_s6 + $0x200] sm:$0xff]  ;;  %v495_v33 = vld [vmem:[%s2426_s6 + $0x210] sm:$0xff] }
  0x33   : > { %462 = vst [vmem:[%s2431_s30 + $0x80] sm:$0xff] %v461_v16  ;;  %v497_v34 = vld [vmem:[%s2426_s6 + $0x220] sm:$0xff]  ;;  %v499_v35 = vld [vmem:[%s2426_s6 + $0x230] sm:$0xff] }
  0x34   : > { %464 = vst [vmem:[%s2431_s30 + $0x88] sm:$0xff] %v463_v17  ;;  %v501_v36 = vld [vmem:[%s2426_s6 + $0x240] sm:$0xff]  ;;  %v503_v37 = vld [vmem:[%s2426_s6 + $0x250] sm:$0xff] }
  0x35   : > { %466 = vst [vmem:[%s2431_s30 + $0x90] sm:$0xff] %v465_v18  ;;  %v505_v38 = vld [vmem:[%s2426_s6 + $0x260] sm:$0xff]  ;;  %v507_v39 = vld [vmem:[%s2426_s6 + $0x270] sm:$0xff] }
  0x36   : > { %468 = vst [vmem:[%s2431_s30 + $0x98] sm:$0xff] %v467_v19  ;;  %v509_v40 = vld [vmem:[%s2426_s6 + $0x280] sm:$0xff]  ;;  %v511_v41 = vld [vmem:[%s2426_s6 + $0x290] sm:$0xff] }
  0x37   : > { %470 = vst [vmem:[%s2431_s30 + $0xa0] sm:$0xff] %v469_v20  ;;  %v513_v42 = vld [vmem:[%s2426_s6 + $0x2a0] sm:$0xff]  ;;  %v515_v43 = vld [vmem:[%s2426_s6 + $0x2b0] sm:$0xff] }
  0x38   : > { %472 = vst [vmem:[%s2431_s30 + $0xa8] sm:$0xff] %v471_v21  ;;  %v517_v44 = vld [vmem:[%s2426_s6 + $0x2c0] sm:$0xff]  ;;  %v519_v45 = vld [vmem:[%s2426_s6 + $0x2d0] sm:$0xff] }
  0x39   : > { %474 = vst [vmem:[%s2431_s30 + $0xb0] sm:$0xff] %v473_v22  ;;  %v521_v46 = vld [vmem:[%s2426_s6 + $0x2e0] sm:$0xff]  ;;  %v523_v47 = vld [vmem:[%s2426_s6 + $0x2f0] sm:$0xff] }
  0x3a   : > { %476 = vst [vmem:[%s2431_s30 + $0xb8] sm:$0xff] %v475_v23  ;;  %v525_v48 = vld [vmem:[%s2426_s6 + $0x300] sm:$0xff]  ;;  %v527_v49 = vld [vmem:[%s2426_s6 + $0x310] sm:$0xff] }
  0x3b   : > { %478 = vst [vmem:[%s2431_s30 + $0xc0] sm:$0xff] %v477_v24  ;;  %v529_v50 = vld [vmem:[%s2426_s6 + $0x320] sm:$0xff]  ;;  %v531_v51 = vld [vmem:[%s2426_s6 + $0x330] sm:$0xff] }
  0x3c   : > { %480 = vst [vmem:[%s2431_s30 + $0xc8] sm:$0xff] %v479_v25  ;;  %v533_v52 = vld [vmem:[%s2426_s6 + $0x340] sm:$0xff]  ;;  %v535_v53 = vld [vmem:[%s2426_s6 + $0x350] sm:$0xff] }
  0x3d   : > { %482 = vst [vmem:[%s2431_s30 + $0xd0] sm:$0xff] %v481_v26  ;;  %v537_v54 = vld [vmem:[%s2426_s6 + $0x360] sm:$0xff]  ;;  %v539_v55 = vld [vmem:[%s2426_s6 + $0x370] sm:$0xff] }
  0x3e   : > { %484 = vst [vmem:[%s2431_s30 + $0xd8] sm:$0xff] %v483_v27  ;;  %v541_v56 = vld [vmem:[%s2426_s6 + $0x380] sm:$0xff]  ;;  %v543_v57 = vld [vmem:[%s2426_s6 + $0x390] sm:$0xff] }
  0x3f   : > { %486 = vst [vmem:[%s2431_s30 + $0xe0] sm:$0xff] %v485_v28  ;;  %v545_v58 = vld [vmem:[%s2426_s6 + $0x3a0] sm:$0xff]  ;;  %v547_v59 = vld [vmem:[%s2426_s6 + $0x3b0] sm:$0xff] }
  0x40   : > { %488 = vst [vmem:[%s2431_s30 + $0xe8] sm:$0xff] %v487_v29  ;;  %v549_v60 = vld [vmem:[%s2426_s6 + $0x3c0] sm:$0xff]  ;;  %v551_v61 = vld [vmem:[%s2426_s6 + $0x3d0] sm:$0xff] }
  0x41   : > { %490 = vst [vmem:[%s2431_s30 + $0xf0] sm:$0xff] %v489_v30  ;;  %v553_v62 = vld [vmem:[%s2426_s6 + $0x3e0] sm:$0xff]  ;;  %v555_v63 = vld [vmem:[%s2426_s6 + $0x3f0] sm:$0xff] }
  0x42   : > { %492 = vst [vmem:[%s2431_s30 + $0xf8] sm:$0xff] %v491_v31  ;;  %v557_v0 = vld [vmem:[%s2426_s6 + $0x400] sm:$0xff]  ;;  %v559_v1 = vld [vmem:[%s2426_s6 + $0x410] sm:$0xff] }
  0x43   : > { %494 = vst [vmem:[%s2431_s30 + $0x100] sm:$0xff] %v493_v32  ;;  %v561_v2 = vld [vmem:[%s2426_s6 + $0x420] sm:$0xff]  ;;  %v563_v3 = vld [vmem:[%s2426_s6 + $0x430] sm:$0xff] }
  0x44   : > { %496 = vst [vmem:[%s2431_s30 + $0x108] sm:$0xff] %v495_v33  ;;  %v565_v4 = vld [vmem:[%s2426_s6 + $0x440] sm:$0xff]  ;;  %v567_v5 = vld [vmem:[%s2426_s6 + $0x450] sm:$0xff] }
  0x45   : > { %498 = vst [vmem:[%s2431_s30 + $0x110] sm:$0xff] %v497_v34  ;;  %v569_v6 = vld [vmem:[%s2426_s6 + $0x460] sm:$0xff]  ;;  %v571_v7 = vld [vmem:[%s2426_s6 + $0x470] sm:$0xff] }
  0x46   : > { %500 = vst [vmem:[%s2431_s30 + $0x118] sm:$0xff] %v499_v35  ;;  %v573_v8 = vld [vmem:[%s2426_s6 + $0x480] sm:$0xff]  ;;  %v575_v9 = vld [vmem:[%s2426_s6 + $0x490] sm:$0xff] }
  0x47   : > { %502 = vst [vmem:[%s2431_s30 + $0x120] sm:$0xff] %v501_v36  ;;  %v577_v10 = vld [vmem:[%s2426_s6 + $0x4a0] sm:$0xff]  ;;  %v579_v11 = vld [vmem:[%s2426_s6 + $0x4b0] sm:$0xff] }
  0x48   : > { %504 = vst [vmem:[%s2431_s30 + $0x128] sm:$0xff] %v503_v37  ;;  %v581_v12 = vld [vmem:[%s2426_s6 + $0x4c0] sm:$0xff]  ;;  %v583_v13 = vld [vmem:[%s2426_s6 + $0x4d0] sm:$0xff] }
  0x49   : > { %506 = vst [vmem:[%s2431_s30 + $0x130] sm:$0xff] %v505_v38  ;;  %v585_v14 = vld [vmem:[%s2426_s6 + $0x4e0] sm:$0xff]  ;;  %v587_v15 = vld [vmem:[%s2426_s6 + $0x4f0] sm:$0xff] }
  0x4a   : > { %508 = vst [vmem:[%s2431_s30 + $0x138] sm:$0xff] %v507_v39  ;;  %v589_v16 = vld [vmem:[%s2426_s6 + $0x500] sm:$0xff]  ;;  %v591_v17 = vld [vmem:[%s2426_s6 + $0x510] sm:$0xff] }
  0x4b   : > { %510 = vst [vmem:[%s2431_s30 + $0x140] sm:$0xff] %v509_v40  ;;  %v593_v18 = vld [vmem:[%s2426_s6 + $0x520] sm:$0xff]  ;;  %v595_v19 = vld [vmem:[%s2426_s6 + $0x530] sm:$0xff] }
  0x4c   : > { %512 = vst [vmem:[%s2431_s30 + $0x148] sm:$0xff] %v511_v41  ;;  %v597_v20 = vld [vmem:[%s2426_s6 + $0x540] sm:$0xff]  ;;  %v599_v21 = vld [vmem:[%s2426_s6 + $0x550] sm:$0xff] }
  0x4d   : > { %514 = vst [vmem:[%s2431_s30 + $0x150] sm:$0xff] %v513_v42  ;;  %v601_v22 = vld [vmem:[%s2426_s6 + $0x560] sm:$0xff]  ;;  %v603_v23 = vld [vmem:[%s2426_s6 + $0x570] sm:$0xff] }
  0x4e   : > { %516 = vst [vmem:[%s2431_s30 + $0x158] sm:$0xff] %v515_v43  ;;  %v605_v24 = vld [vmem:[%s2426_s6 + $0x580] sm:$0xff]  ;;  %v607_v25 = vld [vmem:[%s2426_s6 + $0x590] sm:$0xff] }
  0x4f   : > { %518 = vst [vmem:[%s2431_s30 + $0x160] sm:$0xff] %v517_v44  ;;  %v609_v26 = vld [vmem:[%s2426_s6 + $0x5a0] sm:$0xff]  ;;  %v611_v27 = vld [vmem:[%s2426_s6 + $0x5b0] sm:$0xff] }
  0x50   : > { %520 = vst [vmem:[%s2431_s30 + $0x168] sm:$0xff] %v519_v45  ;;  %v613_v28 = vld [vmem:[%s2426_s6 + $0x5c0] sm:$0xff]  ;;  %v615_v29 = vld [vmem:[%s2426_s6 + $0x5d0] sm:$0xff] }
  0x51   : > { %522 = vst [vmem:[%s2431_s30 + $0x170] sm:$0xff] %v521_v46  ;;  %v617_v30 = vld [vmem:[%s2426_s6 + $0x5e0] sm:$0xff]  ;;  %v619_v31 = vld [vmem:[%s2426_s6 + $0x5f0] sm:$0xff] }
  0x52   : > { %524 = vst [vmem:[%s2431_s30 + $0x178] sm:$0xff] %v523_v47 }
  0x53   : > { %526 = vst [vmem:[%s2431_s30 + $0x180] sm:$0xff] %v525_v48 }
  0x54   : > { %528 = vst [vmem:[%s2431_s30 + $0x188] sm:$0xff] %v527_v49 }
  0x55   : > { %530 = vst [vmem:[%s2431_s30 + $0x190] sm:$0xff] %v529_v50 }
  0x56   : > { %532 = vst [vmem:[%s2431_s30 + $0x198] sm:$0xff] %v531_v51 }
  0x57   : > { %534 = vst [vmem:[%s2431_s30 + $0x1a0] sm:$0xff] %v533_v52 }
  0x58   : > { %536 = vst [vmem:[%s2431_s30 + $0x1a8] sm:$0xff] %v535_v53 }
  0x59   : > { %538 = vst [vmem:[%s2431_s30 + $0x1b0] sm:$0xff] %v537_v54 }
  0x5a   : > { %540 = vst [vmem:[%s2431_s30 + $0x1b8] sm:$0xff] %v539_v55 }
  0x5b   : > { %542 = vst [vmem:[%s2431_s30 + $0x1c0] sm:$0xff] %v541_v56 }
  0x5c   : > { %544 = vst [vmem:[%s2431_s30 + $0x1c8] sm:$0xff] %v543_v57 }
  0x5d   : > { %546 = vst [vmem:[%s2431_s30 + $0x1d0] sm:$0xff] %v545_v58 }
  0x5e   : > { %548 = vst [vmem:[%s2431_s30 + $0x1d8] sm:$0xff] %v547_v59 }
  0x5f   : > { %550 = vst [vmem:[%s2431_s30 + $0x1e0] sm:$0xff] %v549_v60 }
  0x60   : > { %552 = vst [vmem:[%s2431_s30 + $0x1e8] sm:$0xff] %v551_v61 }
  0x61   : > { %554 = vst [vmem:[%s2431_s30 + $0x1f0] sm:$0xff] %v553_v62 }
  0x62   : > { %556 = vst [vmem:[%s2431_s30 + $0x1f8] sm:$0xff] %v555_v63 }
  0x63   : > { %558 = vst [vmem:[%s2431_s30 + $0x200] sm:$0xff] %v557_v0 }
  0x64   : > { %560 = vst [vmem:[%s2431_s30 + $0x208] sm:$0xff] %v559_v1 }
  0x65   : > { %562 = vst [vmem:[%s2431_s30 + $0x210] sm:$0xff] %v561_v2 }
  0x66   : > { %564 = vst [vmem:[%s2431_s30 + $0x218] sm:$0xff] %v563_v3 }
  0x67   : > { %566 = vst [vmem:[%s2431_s30 + $0x220] sm:$0xff] %v565_v4 }
  0x68   : > { %568 = vst [vmem:[%s2431_s30 + $0x228] sm:$0xff] %v567_v5 }
  0x69   : > { %570 = vst [vmem:[%s2431_s30 + $0x230] sm:$0xff] %v569_v6 }
  0x6a   : > { %572 = vst [vmem:[%s2431_s30 + $0x238] sm:$0xff] %v571_v7 }
  0x6b   : > { %574 = vst [vmem:[%s2431_s30 + $0x240] sm:$0xff] %v573_v8 }
  0x6c   : > { %576 = vst [vmem:[%s2431_s30 + $0x248] sm:$0xff] %v575_v9 }
  0x6d   : > { %578 = vst [vmem:[%s2431_s30 + $0x250] sm:$0xff] %v577_v10 }
  0x6e   : > { %580 = vst [vmem:[%s2431_s30 + $0x258] sm:$0xff] %v579_v11 }
  0x6f   : > { %582 = vst [vmem:[%s2431_s30 + $0x260] sm:$0xff] %v581_v12 }
  0x70   : > { %584 = vst [vmem:[%s2431_s30 + $0x268] sm:$0xff] %v583_v13 }
  0x71   : > { %586 = vst [vmem:[%s2431_s30 + $0x270] sm:$0xff] %v585_v14 }
  0x72   : > { %588 = vst [vmem:[%s2431_s30 + $0x278] sm:$0xff] %v587_v15 }
  0x73   : > { %590 = vst [vmem:[%s2431_s30 + $0x280] sm:$0xff] %v589_v16 }
  0x74   : > { %592 = vst [vmem:[%s2431_s30 + $0x288] sm:$0xff] %v591_v17 }
  0x75   : > { %594 = vst [vmem:[%s2431_s30 + $0x290] sm:$0xff] %v593_v18 }
  0x76   : > { %596 = vst [vmem:[%s2431_s30 + $0x298] sm:$0xff] %v595_v19 }
  0x77   : > { %598 = vst [vmem:[%s2431_s30 + $0x2a0] sm:$0xff] %v597_v20 }
  0x78   : > { %600 = vst [vmem:[%s2431_s30 + $0x2a8] sm:$0xff] %v599_v21 }
  0x79   : > { %602 = vst [vmem:[%s2431_s30 + $0x2b0] sm:$0xff] %v601_v22 }
  0x7a   : > { %604 = vst [vmem:[%s2431_s30 + $0x2b8] sm:$0xff] %v603_v23 }
  0x7b   : > { %606 = vst [vmem:[%s2431_s30 + $0x2c0] sm:$0xff] %v605_v24 }
  0x7c   : > { %608 = vst [vmem:[%s2431_s30 + $0x2c8] sm:$0xff] %v607_v25 }
  0x7d   : > { %610 = vst [vmem:[%s2431_s30 + $0x2d0] sm:$0xff] %v609_v26 }
  0x7e   : > { %612 = vst [vmem:[%s2431_s30 + $0x2d8] sm:$0xff] %v611_v27 }
  0x7f   : > { %614 = vst [vmem:[%s2431_s30 + $0x2e0] sm:$0xff] %v613_v28 }
  0x80   : > { %616 = vst [vmem:[%s2431_s30 + $0x2e8] sm:$0xff] %v615_v29 }
  0x81   : > { %618 = vst [vmem:[%s2431_s30 + $0x2f0] sm:$0xff] %v617_v30 }
  0x82   : > { %620 = vst [vmem:[%s2431_s30 + $0x2f8] sm:$0xff] %v619_v31 }
  0x83 PF: > { %p1669_p11 = scmp.ge.s32.totalorder %s2306_s25, 1  ;;  %p641_p12 = scmp.lt.s32.totalorder %s2306_s25, 13 }
  0x85   : > { %p642_p13 = pnand %p1669_p11, %p641_p12 }
  0x86   : > { %s648_s8 = sand.u32 (!%p642_p13), 1, %s2282_s0   ;;  %s685_s9 = sand.u32 (!%p642_p13), 1, %s2274_s18  }
  0x87   : > { %645 = sbr.rel (%p642_p13) target bundleno = 425 (0x1a9), region = 70  ;;  %s2626_s14 = sshll.u32 (!%p642_p13), %s685_s9, 1 }
  0x88   : > { %s2162_s13 = smul.u32 (!%p642_p13), 768, %s648_s8  ;;  %s2630_s16 = sshll.u32 (!%p642_p13), %s2294_s22, 1 }
  0x89   : > { %s688_s15 = smul.u32 (!%p642_p13), 6, %s2290_s21  ;;  %p700_p1 = scmp.lt.s32.totalorder (!%p642_p13), %s2630_s16, 3 }
  0x8a   : > { %s2650_s9 = scalar_lea.vmem (!%p642_p13), [#allocation3], %s2162_s13  ;;  %s687_s2 = scalar_lea.vmem (!%p642_p13), [#allocation4], %s2626_s14 }
  0x8b   : > { %p691_p0 = scmp.lt.s32.totalorder (!%p642_p13), %s688_s15, 35  ;;  %p1673_p2 = scmp.ne.s32.totalorder (!%p642_p13), %s2290_s21, 0 }
  0x8c   : > { %s2636_s17 = scalar_select %p700_p1, %s2630_s16, 3 }
  0x8d   : > { %s2951_s15 = smov (!%p691_p0, %s688_s15), 35  ;;  %713 = sbr.rel (%p1673_p2) target bundleno = 148 (0x94), region = 78 }
  0x8e   : > { %s695_s18 = scalar_lea.vmem %s2927_s1, %s2951_s15  ;;  %s702_s22 = scalar_lea.vmem %s2929_s3, %s2636_s17 }
  0x8f   : > { %s707_s8 = scalar_lea.vmem %s2930_s4, %s2636_s17 }
  0x92   : > { %v2308_v32 = vmov 0.0  }
  0x93   : > { %714 = vst [vmem:[#allocation2] sm:$0xf] %v2308_v32 }
  0x94 PF: > { %v1732_v33 = vld [vmem:[%s2650_s9 + $0x70] sm:$0xf]  ;;  %v2080_v34 = vld [vmem:[%s2650_s9 + $0x74] sm:$0xf0]  ;;  %v1724_v44 = vld [vmem:[%s2650_s9 + $0x60] sm:$0xf] }
  0x95   : > { %v1796_v35 = vld [vmem:[%s2650_s9 + $0xf0] sm:$0xf]  ;;  %v1733_v36 = vor.u32 %v2080_v34, %v1732_v33  ;;  %v2096_v37 = vld [vmem:[%s2650_s9 + $0xf4] sm:$0xf0]  ;;  %v2078_v46 = vld [vmem:[%s2650_s9 + $0x64] sm:$0xf0] }
  0x96   : > { %v1860_v38 = vld [vmem:[%s2650_s9 + $0x170] sm:$0xf]  ;;  %v2112_v39 = vld [vmem:[%s2650_s9 + $0x174] sm:$0xf0]  ;;  %v1797_v40 = vor.u32 %v2096_v37, %v1796_v35  ;;  %v1788_v47 = vld [vmem:[%s2650_s9 + $0xe0] sm:$0xf]  ;;  %v1725_v49 = vor.u32 %v2078_v46, %v1724_v44 }
  0x97   : > { %v1861_v41 = vor.u32 %v2112_v39, %v1860_v38  ;;  %v1924_v42 = vld [vmem:[%s2650_s9 + $0x1f0] sm:$0xf]  ;;  %v2128_v43 = vld [vmem:[%s2650_s9 + $0x1f4] sm:$0xf0]  ;;  %1307 = vmatpush.bf16.msra.mxu0 %v1733_v36  ;;  %v2094_v48 = vld [vmem:[%s2650_s9 + $0xe4] sm:$0xf0] }
  0x98   : > { %v1925_v45 = vor.u32 %v2128_v43, %v1924_v42  ;;  %1320 = vmatpush.bf16.msra.mxu1 %v1797_v40  ;;  %v1789_v50 = vor.u32 %v2094_v48, %v1788_v47  ;;  %v1852_v51 = vld [vmem:[%s2650_s9 + $0x160] sm:$0xf]  ;;  %v2110_v52 = vld [vmem:[%s2650_s9 + $0x164] sm:$0xf0]  ;;  %v1716_v56 = vld [vmem:[%s2650_s9 + $0x50] sm:$0xf] }
  0x99   : > { %1333 = vmatpush.bf16.msra.mxu2 %v1861_v41  ;;  %v1916_v53 = vld [vmem:[%s2650_s9 + $0x1e0] sm:$0xf]  ;;  %v1853_v54 = vor.u32 %v2110_v52, %v1852_v51  ;;  %v2126_v55 = vld [vmem:[%s2650_s9 + $0x1e4] sm:$0xf0]  ;;  %v2076_v57 = vld [vmem:[%s2650_s9 + $0x54] sm:$0xf0] }
  0x9a   : > { %1346 = vmatpush.bf16.msra.mxu3 %v1925_v45  ;;  %v1917_v58 = vor.u32 %v2126_v55, %v1916_v53  ;;  %v1780_v59 = vld [vmem:[%s2650_s9 + $0xd0] sm:$0xf]  ;;  %v2092_v60 = vld [vmem:[%s2650_s9 + $0xd4] sm:$0xf0]  ;;  %v1717_v62 = vor.u32 %v2076_v57, %v1716_v56  ;;  %v1708_v4 = vld [vmem:[%s2650_s9 + $0x40] sm:$0xf] }
  0x9b   : > { %v1844_v61 = vld [vmem:[%s2650_s9 + $0x150] sm:$0xf]  ;;  %1308 = vmatpush.bf16.msra.mxu0 %v1725_v49  ;;  %v2108_v63 = vld [vmem:[%s2650_s9 + $0x154] sm:$0xf0]  ;;  %v1781_v2 = vor.u32 %v2092_v60, %v1780_v59  ;;  %v2074_v5 = vld [vmem:[%s2650_s9 + $0x44] sm:$0xf0] }
  0x9c   : > { %v1908_v0 = vld [vmem:[%s2650_s9 + $0x1d0] sm:$0xf]  ;;  %v2124_v1 = vld [vmem:[%s2650_s9 + $0x1d4] sm:$0xf0]  ;;  %1321 = vmatpush.bf16.msra.mxu1 %v1789_v50  ;;  %v1845_v3 = vor.u32 %v2108_v63, %v1844_v61  ;;  %v1772_v6 = vld [vmem:[%s2650_s9 + $0xc0] sm:$0xf]  ;;  %v1709_v13 = vor.u32 %v2074_v5, %v1708_v4 }
  0x9d   : > { %1334 = vmatpush.bf16.msra.mxu2 %v1853_v54  ;;  %v1909_v7 = vor.u32 %v2124_v1, %v1908_v0  ;;  %v2090_v8 = vld [vmem:[%s2650_s9 + $0xc4] sm:$0xf0]  ;;  %v1836_v9 = vld [vmem:[%s2650_s9 + $0x140] sm:$0xf]  ;;  %v1700_v16 = vld [vmem:[%s2650_s9 + $0x30] sm:$0xf] }
  0x9e   : > { %1347 = vmatpush.bf16.msra.mxu3 %v1917_v58  ;;  %v2106_v10 = vld [vmem:[%s2650_s9 + $0x144] sm:$0xf0]  ;;  %v1900_v11 = vld [vmem:[%s2650_s9 + $0x1c0] sm:$0xf]  ;;  %v1773_v14 = vor.u32 %v2090_v8, %v1772_v6  ;;  %v2072_v17 = vld [vmem:[%s2650_s9 + $0x34] sm:$0xf0] }
  0x9f   : > { %v2122_v12 = vld [vmem:[%s2650_s9 + $0x1c4] sm:$0xf0]  ;;  %1309 = vmatpush.bf16.msra.mxu0 %v1717_v62  ;;  %v1837_v15 = vor.u32 %v2106_v10, %v1836_v9  ;;  %v1764_v18 = vld [vmem:[%s2650_s9 + $0xb0] sm:$0xf]  ;;  %v2088_v20 = vld [vmem:[%s2650_s9 + $0xb4] sm:$0xf0]  ;;  %v1701_v25 = vor.u32 %v2072_v17, %v1700_v16 }
  0xa0   : > { %1322 = vmatpush.bf16.msra.mxu1 %v1781_v2  ;;  %v1901_v19 = vor.u32 %v2122_v12, %v1900_v11  ;;  %v1828_v21 = vld [vmem:[%s2650_s9 + $0x130] sm:$0xf]  ;;  %v2104_v22 = vld [vmem:[%s2650_s9 + $0x134] sm:$0xf0]  ;;  %v1765_v26 = vor.u32 %v2088_v20, %v1764_v18  ;;  %v1692_v28 = vld [vmem:[%s2650_s9 + $0x20] sm:$0xf] }
  0xa1   : > { %1335 = vmatpush.bf16.msra.mxu2 %v1845_v3  ;;  %v1892_v23 = vld [vmem:[%s2650_s9 + $0x1b0] sm:$0xf]  ;;  %v2120_v24 = vld [vmem:[%s2650_s9 + $0x1b4] sm:$0xf0]  ;;  %v1829_v27 = vor.u32 %v2104_v22, %v1828_v21  ;;  %v2070_v29 = vld [vmem:[%s2650_s9 + $0x24] sm:$0xf0] }
  0xa2   : > { %1348 = vmatpush.bf16.msra.mxu3 %v1909_v7  ;;  %v1756_v30 = vld [vmem:[%s2650_s9 + $0xa0] sm:$0xf]  ;;  %v1893_v31 = vor.u32 %v2120_v24, %v1892_v23  ;;  %v2086_v32 = vld [vmem:[%s2650_s9 + $0xa4] sm:$0xf0]  ;;  %v1693_v37 = vor.u32 %v2070_v29, %v1692_v28  ;;  %v1684_v40 = vld [vmem:[%s2650_s9 + $0x10] sm:$0xf] }
  0xa3   : > { %1310 = vmatpush.bf16.msra.mxu0 %v1709_v13  ;;  %v1820_v33 = vld [vmem:[%s2650_s9 + $0x120] sm:$0xf]  ;;  %v2102_v34 = vld [vmem:[%s2650_s9 + $0x124] sm:$0xf0]  ;;  %v1757_v38 = vor.u32 %v2086_v32, %v1756_v30  ;;  %v2068_v41 = vld [vmem:[%s2650_s9 + $0x14] sm:$0xf0] }
  0xa4   : > { %1323 = vmatpush.bf16.msra.mxu1 %v1773_v14  ;;  %v1884_v35 = vld [vmem:[%s2650_s9 + $0x1a0] sm:$0xf]  ;;  %v2118_v36 = vld [vmem:[%s2650_s9 + $0x1a4] sm:$0xf0]  ;;  %v1821_v39 = vor.u32 %v2102_v34, %v1820_v33  ;;  %v1748_v42 = vld [vmem:[%s2650_s9 + $0x90] sm:$0xf]  ;;  %v1685_v49 = vor.u32 %v2068_v41, %v1684_v40 }
  0xa5   : > { %1336 = vmatpush.bf16.msra.mxu2 %v1837_v15  ;;  %v1885_v43 = vor.u32 %v2118_v36, %v1884_v35  ;;  %v2084_v44 = vld [vmem:[%s2650_s9 + $0x94] sm:$0xf0]  ;;  %v1812_v45 = vld [vmem:[%s2650_s9 + $0x110] sm:$0xf]  ;;  %v1676_v50 = vld [vmem:[%s2650_s9] sm:$0xf] }
  0xa6   : > { %1349 = vmatpush.bf16.msra.mxu3 %v1901_v19  ;;  %v2100_v46 = vld [vmem:[%s2650_s9 + $0x114] sm:$0xf0]  ;;  %v1876_v47 = vld [vmem:[%s2650_s9 + $0x190] sm:$0xf]  ;;  %v2066_v51 = vld [vmem:[%s2650_s9 + $0x4] sm:$0xf0]  ;;  %v1749_v52 = vor.u32 %v2084_v44, %v1748_v42 }
  0xa7   : > { %1311 = vmatpush.bf16.msra.mxu0 %v1701_v25  ;;  %v2116_v48 = vld [vmem:[%s2650_s9 + $0x194] sm:$0xf0]  ;;  %v1813_v53 = vor.u32 %v2100_v46, %v1812_v45  ;;  %v1740_v54 = vld [vmem:[%s2650_s9 + $0x80] sm:$0xf]  ;;  %v2082_v55 = vld [vmem:[%s2650_s9 + $0x84] sm:$0xf0]  ;;  %v1677_v0 = vor.u32 %v2066_v51, %v1676_v50 }
  0xa8   : > { %1324 = vmatpush.bf16.msra.mxu1 %v1765_v26  ;;  %v1804_v56 = vld [vmem:[%s2650_s9 + $0x100] sm:$0xf]  ;;  %v1877_v57 = vor.u32 %v2116_v48, %v1876_v47  ;;  %v2098_v58 = vld [vmem:[%s2650_s9 + $0x104] sm:$0xf0]  ;;  %v1988_v61 = vld [vmem:[%s2650_s9 + $0x270] sm:$0xf]  ;;  %v1741_v4 = vor.u32 %v2082_v55, %v1740_v54 }
  0xa9   : > { %1337 = vmatpush.bf16.msra.mxu2 %v1829_v27  ;;  %v1868_v59 = vld [vmem:[%s2650_s9 + $0x180] sm:$0xf]  ;;  %v2114_v60 = vld [vmem:[%s2650_s9 + $0x184] sm:$0xf0]  ;;  %v2144_v62 = vld [vmem:[%s2650_s9 + $0x274] sm:$0xf0]  ;;  %v1805_v5 = vor.u32 %v2098_v58, %v1804_v56 }
  0xaa   : > { %1350 = vmatpush.bf16.msra.mxu3 %v1893_v31  ;;  %v2052_v63 = vld [vmem:[%s2650_s9 + $0x2f0] sm:$0xf]  ;;  %v2160_v1 = vld [vmem:[%s2650_s9 + $0x2f4] sm:$0xf0]  ;;  %v2079_v2 = vld [vmem:[%s2650_s9 + $0x74] sm:$0xf]  ;;  %v1869_v8 = vor.u32 %v2114_v60, %v1868_v59  ;;  %v1989_v9 = vor.u32 %v2144_v62, %v1988_v61 }
  0xab   : > { %1312 = vmatpush.bf16.msra.mxu0 %v1693_v37  ;;  %v1734_v3 = vld [vmem:[%s2650_s9 + $0x78] sm:$0xf0]  ;;  %v2095_v6 = vld [vmem:[%s2650_s9 + $0xf4] sm:$0xf]  ;;  %v2053_v10 = vor.u32 %v2160_v1, %v2052_v63  ;;  %v1980_v12 = vld [vmem:[%s2650_s9 + $0x260] sm:$0xf] }
  0xac   : > { %1325 = vmatpush.bf16.msra.mxu1 %v1757_v38  ;;  %v1798_v7 = vld [vmem:[%s2650_s9 + $0xf8] sm:$0xf0]  ;;  %v1737_v11 = vor.u32 %v2079_v2, %v1734_v3  ;;  %v2142_v13 = vld [vmem:[%s2650_s9 + $0x264] sm:$0xf0]  ;;  %v2044_v14 = vld [vmem:[%s2650_s9 + $0x2e0] sm:$0xf] }
  0xad   : > { %1338 = vmatpush.bf16.msra.mxu2 %v1821_v39  ;;  %v1801_v15 = vor.u32 %v2095_v6, %v1798_v7  ;;  %v2158_v16 = vld [vmem:[%s2650_s9 + $0x2e4] sm:$0xf0]  ;;  %v2077_v17 = vld [vmem:[%s2650_s9 + $0x64] sm:$0xf]  ;;  %v1726_v18 = vld [vmem:[%s2650_s9 + $0x68] sm:$0xf0]  ;;  %v1981_v21 = vor.u32 %v2142_v13, %v1980_v12 }
  0xae   : > { %1351 = vmatpush.bf16.msra.mxu3 %v1885_v43  ;;  %v2093_v19 = vld [vmem:[%s2650_s9 + $0xe4] sm:$0xf]  ;;  %v1790_v20 = vld [vmem:[%s2650_s9 + $0xe8] sm:$0xf0]  ;;  %v1972_v22 = vld [vmem:[%s2650_s9 + $0x250] sm:$0xf]  ;;  %v2045_v24 = vor.u32 %v2158_v16, %v2044_v14  ;;  %v1729_v25 = vor.u32 %v2077_v17, %v1726_v18 }
  0xaf   : > { %1313 = vmatpush.bf16.msra.mxu0 %v1685_v49  ;;  %v2140_v23 = vld [vmem:[%s2650_s9 + $0x254] sm:$0xf0]  ;;  %v2036_v26 = vld [vmem:[%s2650_s9 + $0x2d0] sm:$0xf]  ;;  %v1793_v29 = vor.u32 %v2093_v19, %v1790_v20  ;;  %v2075_v30 = vld [vmem:[%s2650_s9 + $0x54] sm:$0xf] }
  0xb0   : > { %1326 = vmatpush.bf16.msra.mxu1 %v1749_v52  ;;  %v2156_v27 = vld [vmem:[%s2650_s9 + $0x2d4] sm:$0xf0]  ;;  %v1718_v31 = vld [vmem:[%s2650_s9 + $0x58] sm:$0xf0]  ;;  %v2091_v32 = vld [vmem:[%s2650_s9 + $0xd4] sm:$0xf]  ;;  %v1973_v34 = vor.u32 %v2140_v23, %v1972_v22 }
  0xb1   : > { %1339 = vmatpush.bf16.msra.mxu2 %v1813_v53  ;;  %v716_v28 = vld [vmem:[%s695_s18] sm:$0x3f]  ;;  %v1782_v33 = vld [vmem:[%s2650_s9 + $0xd8] sm:$0xf0]  ;;  %v2037_v35 = vor.u32 %v2156_v27, %v2036_v26  ;;  %v1721_v36 = vor.u32 %v2075_v30, %v1718_v31  ;;  %v1964_v37 = vld [vmem:[%s2650_s9 + $0x240] sm:$0xf] }
  0xb2   : > { %1352 = vmatpush.bf16.msra.mxu3 %v1877_v57  ;;  %814 = vst [vmem:[#allocation1] ss:$9 sm:$0xff] %v716_v28  ;;  %v2138_v38 = vld [vmem:[%s2650_s9 + $0x244] sm:$0xf0]  ;;  %v2028_v39 = vld [vmem:[%s2650_s9 + $0x2c0] sm:$0xf]  ;;  %v1785_v40 = vor.u32 %v2091_v32, %v1782_v33 }
  0xb3   : > { %1314 = vmatpush.bf16.msra.mxu0 %v1677_v0  ;;  %v2154_v41 = vld [vmem:[%s2650_s9 + $0x2c4] sm:$0xf0]  ;;  %v2073_v42 = vld [vmem:[%s2650_s9 + $0x44] sm:$0xf]  ;;  %v1710_v43 = vld [vmem:[%s2650_s9 + $0x48] sm:$0xf0]  ;;  %v1965_v47 = vor.u32 %v2138_v38, %v1964_v37 }
  0xb4   : > { %1327 = vmatpush.bf16.msra.mxu1 %v1741_v4  ;;  %v2089_v44 = vld [vmem:[%s2650_s9 + $0xc4] sm:$0xf]  ;;  %v1774_v45 = vld [vmem:[%s2650_s9 + $0xc8] sm:$0xf0]  ;;  %v1956_v46 = vld [vmem:[%s2650_s9 + $0x230] sm:$0xf]  ;;  %v2029_v51 = vor.u32 %v2154_v41, %v2028_v39  ;;  %v1713_v52 = vor.u32 %v2073_v42, %v1710_v43 }
  0xb5   : > { %1340 = vmatpush.bf16.msra.mxu2 %v1805_v5  ;;  %v2136_v48 = vld [vmem:[%s2650_s9 + $0x234] sm:$0xf0]  ;;  %v2020_v49 = vld [vmem:[%s2650_s9 + $0x2b0] sm:$0xf]  ;;  %v1777_v56 = vor.u32 %v2089_v44, %v1774_v45  ;;  %v2071_v57 = vld [vmem:[%s2650_s9 + $0x34] sm:$0xf] }
  0xb6   : > { %1353 = vmatpush.bf16.msra.mxu3 %v1869_v8  ;;  %v2152_v50 = vld [vmem:[%s2650_s9 + $0x2b4] sm:$0xf0]  ;;  %v1702_v58 = vld [vmem:[%s2650_s9 + $0x38] sm:$0xf0]  ;;  %v2087_v60 = vld [vmem:[%s2650_s9 + $0xb4] sm:$0xf]  ;;  %v1957_v62 = vor.u32 %v2136_v48, %v1956_v46 }
  0xb7   : > { %1359 = vmatpush.bf16.msrb.mxu0 %v1989_v9  ;;  %v1766_v61 = vld [vmem:[%s2650_s9 + $0xb8] sm:$0xf0]  ;;  %v2021_v63 = vor.u32 %v2152_v50, %v2020_v49  ;;  %v1705_v0 = vor.u32 %v2071_v57, %v1702_v58  ;;  %v1948_v1 = vld [vmem:[%s2650_s9 + $0x220] sm:$0xf]  ;;  %v2134_v2 = vld [vmem:[%s2650_s9 + $0x224] sm:$0xf0] }
  0xb8   : > { %1372 = vmatpush.bf16.msrb.mxu1 %v2053_v10  ;;  %v2012_v3 = vld [vmem:[%s2650_s9 + $0x2a0] sm:$0xf]  ;;  %v1769_v4 = vor.u32 %v2087_v60, %v1766_v61  ;;  %v2150_v5 = vld [vmem:[%s2650_s9 + $0x2a4] sm:$0xf0]  ;;  %v2069_v6 = vld [vmem:[%s2650_s9 + $0x24] sm:$0xf]  ;;  %v1949_v10 = vor.u32 %v2134_v2, %v1948_v1 }
  0xb9   : > { %1385 = vmatpush.bf16.msrb.mxu2 %v1737_v11  ;;  %v2759_v53 = vld [vmem:[#allocation1] sm:$0xff]  ;;  %v2761_v54 = vld [vmem:[#allocation1 + $0x12] sm:$0xff]  ;;  %v2763_v55 = vld [vmem:[#allocation1 + $0x9] sm:$0xff]  ;;  %v2013_v11 = vor.u32 %v2150_v5, %v2012_v3  ;;  %vm1466_vm0 = vcmask 1041408   ;;  %p2058_p3 = scmp.ne.s32.totalorder %s2290_s21, 5 }
  0xba   : > { %1398 = vmatpush.bf16.msrb.mxu3 %v1801_v15  ;;  %1315 = vmatmul.bf16.vlgmr.msra.gmra.mxu0 %v2759_v53  ;;  %v2768_v59 = vld [vmem:[#allocation1 + $0x1b] sm:$0xff]  ;;  %v2085_v8 = vld [vmem:[%s2650_s9 + $0xa4] sm:$0xf]  ;;  %v2132_v14 = vld [vmem:[%s2650_s9 + $0x214] sm:$0xf0] }
  0xbb   : > { %1360 = vmatpush.bf16.msrb.mxu0 %v1981_v21  ;;  %1341 = vmatmul.bf16.vlgmr.msra.gmra.mxu2 %v2761_v54  ;;  %v1694_v7 = vld [vmem:[%s2650_s9 + $0x28] sm:$0xf0]  ;;  %v1940_v13 = vld [vmem:[%s2650_s9 + $0x210] sm:$0xf]  ;;  %v2148_v17 = vld [vmem:[%s2650_s9 + $0x294] sm:$0xf0] }
  0xbc   : > { %1373 = vmatpush.bf16.msrb.mxu1 %v2045_v24  ;;  %1354 = vmatmul.bf16.vlgmr.msra.gmra.mxu3 %v2768_v59  ;;  %v1758_v9 = vld [vmem:[%s2650_s9 + $0xa8] sm:$0xf0]  ;;  %v1697_v12 = vor.u32 %v2069_v6, %v1694_v7  ;;  %v2004_v15 = vld [vmem:[%s2650_s9 + $0x290] sm:$0xf]  ;;  %v2067_v18 = vld [vmem:[%s2650_s9 + $0x14] sm:$0xf]  ;;  %v1941_v22 = vor.u32 %v2132_v14, %v1940_v13 }
  0xbd   : > { %1386 = vmatpush.bf16.msrb.mxu2 %v1729_v25  ;;  %1328 = vmatmul.bf16.vlgmr.msra.gmra.mxu1 %v2763_v55  ;;  %v1761_v16 = vor.u32 %v2085_v8, %v1758_v9  ;;  %v1686_v19 = vld [vmem:[%s2650_s9 + $0x18] sm:$0xf0]  ;;  %v2083_v20 = vld [vmem:[%s2650_s9 + $0x94] sm:$0xf]  ;;  %v1932_v23 = vld [vmem:[%s2650_s9 + $0x200] sm:$0xf]  ;;  %v2005_v25 = vor.u32 %v2148_v17, %v2004_v15 }
  0xbe   : > { %1399 = vmatpush.bf16.msrb.mxu3 %v1793_v29  ;;  %v1750_v21 = vld [vmem:[%s2650_s9 + $0x98] sm:$0xf0]  ;;  %v2130_v24 = vld [vmem:[%s2650_s9 + $0x204] sm:$0xf0]  ;;  %v1689_v26 = vor.u32 %v2067_v18, %v1686_v19  ;;  %v1996_v27 = vld [vmem:[%s2650_s9 + $0x280] sm:$0xf] }
  0xbf   : > { %1361 = vmatpush.bf16.msrb.mxu0 %v1973_v34  ;;  %v2146_v28 = vld [vmem:[%s2650_s9 + $0x284] sm:$0xf0]  ;;  %v2065_v29 = vld [vmem:[%s2650_s9 + $0x4] sm:$0xf]  ;;  %v1753_v30 = vor.u32 %v2083_v20, %v1750_v21  ;;  %v1678_v31 = vld [vmem:[%s2650_s9 + $0x8] sm:$0xf0]  ;;  %v1933_v37 = vor.u32 %v2130_v24, %v1932_v23 }
  0xc0   : > { %1374 = vmatpush.bf16.msrb.mxu1 %v2037_v35  ;;  %v2081_v32 = vld [vmem:[%s2650_s9 + $0x84] sm:$0xf]  ;;  %v1742_v33 = vld [vmem:[%s2650_s9 + $0x88] sm:$0xf0]  ;;  %v2111_v34 = vld [vmem:[%s2650_s9 + $0x174] sm:$0xf]  ;;  %v1997_v41 = vor.u32 %v2146_v28, %v1996_v27  ;;  %v1681_v42 = vor.u32 %v2065_v29, %v1678_v31 }
  0xc1   : > { %1387 = vmatpush.bf16.msrb.mxu2 %v1721_v36  ;;  %v1862_v35 = vld [vmem:[%s2650_s9 + $0x178] sm:$0xf0]  ;;  %v2127_v36 = vld [vmem:[%s2650_s9 + $0x1f4] sm:$0xf]  ;;  %v1745_v45 = vor.u32 %v2081_v32, %v1742_v33  ;;  %v2109_v49 = vld [vmem:[%s2650_s9 + $0x164] sm:$0xf] }
  0xc2   : > { %1400 = vmatpush.bf16.msrb.mxu3 %v1785_v40  ;;  %v1926_v38 = vld [vmem:[%s2650_s9 + $0x1f8] sm:$0xf0]  ;;  %v2143_v39 = vld [vmem:[%s2650_s9 + $0x274] sm:$0xf]  ;;  %v1865_v46 = vor.u32 %v2111_v34, %v1862_v35  ;;  %v1854_v50 = vld [vmem:[%s2650_s9 + $0x168] sm:$0xf0] }
  0xc3   : > { %1362 = vmatpush.bf16.msrb.mxu0 %v1965_v47  ;;  %v1990_v40 = vld [vmem:[%s2650_s9 + $0x278] sm:$0xf0]  ;;  %v2159_v43 = vld [vmem:[%s2650_s9 + $0x2f4] sm:$0xf]  ;;  %v1929_v47 = vor.u32 %v2127_v36, %v1926_v38  ;;  %v2141_v57 = vld [vmem:[%s2650_s9 + $0x264] sm:$0xf] }
  0xc4   : > { %1375 = vmatpush.bf16.msrb.mxu1 %v2029_v51  ;;  %v2054_v44 = vld [vmem:[%s2650_s9 + $0x2f8] sm:$0xf0]  ;;  %v1993_v48 = vor.u32 %v2143_v39, %v1990_v40  ;;  %v2125_v51 = vld [vmem:[%s2650_s9 + $0x1e4] sm:$0xf]  ;;  %v1982_v58 = vld [vmem:[%s2650_s9 + $0x268] sm:$0xf0] }
  0xc5   : > { %1388 = vmatpush.bf16.msrb.mxu2 %v1713_v52  ;;  %v2057_v52 = vor.u32 %v2159_v43, %v2054_v44  ;;  %v2157_v60 = vld [vmem:[%s2650_s9 + $0x2e4] sm:$0xf]  ;;  %v2046_v61 = vld [vmem:[%s2650_s9 + $0x2e8] sm:$0xf0]  ;;  %v1985_v2 = vor.u32 %v2141_v57, %v1982_v58  ;;  %v2107_v3 = vld [vmem:[%s2650_s9 + $0x154] sm:$0xf] }
  0xc6   : > { %1401 = vmatpush.bf16.msrb.mxu3 %v1777_v56  ;;  %v1918_v56 = vld [vmem:[%s2650_s9 + $0x1e8] sm:$0xf0]  ;;  %v2123_v5 = vld [vmem:[%s2650_s9 + $0x1d4] sm:$0xf]  ;;  %v2049_v6 = vor.u32 %v2157_v60, %v2046_v61  ;;  %v1910_v7 = vld [vmem:[%s2650_s9 + $0x1d8] sm:$0xf0] }
  0xc7   : > { %1363 = vmatpush.bf16.msrb.mxu0 %v1957_v62  ;;  %v2815_v62 = vld [vmem:[#allocation1 + $0x24] sm:$0xff]  ;;  %v1921_v1 = vor.u32 %v2125_v51, %v1918_v56  ;;  %v2139_v8 = vld [vmem:[%s2650_s9 + $0x254] sm:$0xf]  ;;  %v1913_v13 = vor.u32 %v2123_v5, %v1910_v7  ;;  %v2105_v15 = vld [vmem:[%s2650_s9 + $0x144] sm:$0xf] }
  0xc8   : > { %1376 = vmatpush.bf16.msrb.mxu1 %v2021_v63  ;;  %v1857_v63 = vor.u32 %v2109_v49, %v1854_v50  ;;  %v1974_v9 = vld [vmem:[%s2650_s9 + $0x258] sm:$0xf0]  ;;  %v1902_v18 = vld [vmem:[%s2650_s9 + $0x1c8] sm:$0xf0]  ;;  %v2137_v19 = vld [vmem:[%s2650_s9 + $0x244] sm:$0xf] }
  0xc9   : > { %1389 = vmatpush.bf16.msrb.mxu2 %v1705_v0  ;;  %v2817_v0 = vld [vmem:[#allocation1 + $0x2d] sm:$0xff]  ;;  %v1977_v14 = vor.u32 %v2139_v8, %v1974_v9  ;;  %v1966_v20 = vld [vmem:[%s2650_s9 + $0x248] sm:$0xf0]  ;;  %v2119_v27 = vld [vmem:[%s2650_s9 + $0x1b4] sm:$0xf] }
  0xca   : > { %1402 = vmatpush.bf16.msrb.mxu3 %v1769_v4  ;;  %v1846_v4 = vld [vmem:[%s2650_s9 + $0x158] sm:$0xf0]  ;;  %v2153_v21 = vld [vmem:[%s2650_s9 + $0x2c4] sm:$0xf]  ;;  %v1969_v24 = vor.u32 %v2137_v19, %v1966_v20  ;;  %v2151_v32 = vld [vmem:[%s2650_s9 + $0x2b4] sm:$0xf] }
  0xcb   : > { %1364 = vmatpush.bf16.msrb.mxu0 %v1949_v10  ;;  %v2155_v10 = vld [vmem:[%s2650_s9 + $0x2d4] sm:$0xf]  ;;  %v1894_v29 = vld [vmem:[%s2650_s9 + $0x1b8] sm:$0xf0]  ;;  %v1822_v38 = vld [vmem:[%s2650_s9 + $0x128] sm:$0xf0] }
  0xcc   : > { %1377 = vmatpush.bf16.msrb.mxu1 %v2013_v11  ;;  %v2038_v11 = vld [vmem:[%s2650_s9 + $0x2d8] sm:$0xf0]  ;;  %v1897_v35 = vor.u32 %v2119_v27, %v1894_v29  ;;  %v2117_v39 = vld [vmem:[%s2650_s9 + $0x1a4] sm:$0xf]  ;;  %v1950_v43 = vld [vmem:[%s2650_s9 + $0x228] sm:$0xf0] }
  0xcd   : > { %1390 = vmatpush.bf16.msrb.mxu2 %v1697_v12  ;;  %v1849_v12 = vor.u32 %v2107_v3, %v1846_v4  ;;  %v2041_v17 = vor.u32 %v2155_v10, %v2038_v11  ;;  %v1958_v31 = vld [vmem:[%s2650_s9 + $0x238] sm:$0xf0]  ;;  %v2149_v44 = vld [vmem:[%s2650_s9 + $0x2a4] sm:$0xf]  ;;  %v2099_v49 = vld [vmem:[%s2650_s9 + $0x114] sm:$0xf] }
  0xce   : > { %1403 = vmatpush.bf16.msrb.mxu3 %v1761_v16  ;;  %v2121_v16 = vld [vmem:[%s2650_s9 + $0x1c4] sm:$0xf]  ;;  %v2022_v33 = vld [vmem:[%s2650_s9 + $0x2b8] sm:$0xf0]  ;;  %v2115_v51 = vld [vmem:[%s2650_s9 + $0x194] sm:$0xf] }
  0xcf   : > { %1365 = vmatpush.bf16.msrb.mxu0 %v1941_v22  ;;  %v1905_v23 = vor.u32 %v2121_v16, %v1902_v18  ;;  %v2025_v40 = vor.u32 %v2151_v32, %v2022_v33  ;;  %v1814_v50 = vld [vmem:[%s2650_s9 + $0x118] sm:$0xf0]  ;;  %v2131_v57 = vld [vmem:[%s2650_s9 + $0x214] sm:$0xf]  ;;  %v2097_v3 = vld [vmem:[%s2650_s9 + $0x104] sm:$0xf] }
  0xd0   : > { %1378 = vmatpush.bf16.msrb.mxu1 %v2005_v25  ;;  %v2103_v25 = vld [vmem:[%s2650_s9 + $0x134] sm:$0xf]  ;;  %v1878_v56 = vld [vmem:[%s2650_s9 + $0x198] sm:$0xf0]  ;;  %v1806_v4 = vld [vmem:[%s2650_s9 + $0x108] sm:$0xf0] }
  0xd1   : > { %1391 = vmatpush.bf16.msrb.mxu2 %v1689_v26  ;;  %v1830_v26 = vld [vmem:[%s2650_s9 + $0x138] sm:$0xf0]  ;;  %v2147_v60 = vld [vmem:[%s2650_s9 + $0x294] sm:$0xf]  ;;  %v2113_v5 = vld [vmem:[%s2650_s9 + $0x184] sm:$0xf] }
  0xd2   : > { %1404 = vmatpush.bf16.msrb.mxu3 %v1753_v30  ;;  %v2135_v30 = vld [vmem:[%s2650_s9 + $0x234] sm:$0xf]  ;;  %v1833_v34 = vor.u32 %v2103_v25, %v1830_v26  ;;  %v1942_v58 = vld [vmem:[%s2650_s9 + $0x218] sm:$0xf0]  ;;  %v1870_v7 = vld [vmem:[%s2650_s9 + $0x188] sm:$0xf0] }
  0xd3   : > { %1366 = vmatpush.bf16.msrb.mxu0 %v1933_v37  ;;  %v1961_v36 = vor.u32 %v2135_v30, %v1958_v31  ;;  %v2101_v37 = vld [vmem:[%s2650_s9 + $0x124] sm:$0xf]  ;;  %v2006_v61 = vld [vmem:[%s2650_s9 + $0x298] sm:$0xf0]  ;;  %v1934_v9 = vld [vmem:[%s2650_s9 + $0x208] sm:$0xf0] }
  0xd4   : > { %1379 = vmatpush.bf16.msrb.mxu1 %v1997_v41  ;;  %v1886_v41 = vld [vmem:[%s2650_s9 + $0x1a8] sm:$0xf0]  ;;  %v2129_v8 = vld [vmem:[%s2650_s9 + $0x204] sm:$0xf] }
  0xd5   : > { %1392 = vmatpush.bf16.msrb.mxu2 %v1681_v42  ;;  %v2133_v42 = vld [vmem:[%s2650_s9 + $0x224] sm:$0xf]  ;;  %v1998_v11 = vld [vmem:[%s2650_s9 + $0x288] sm:$0xf0] }
  0xd6   : > { %1405 = vmatpush.bf16.msrb.mxu3 %v1745_v45  ;;  %1367 = vmatmul.bf16.vlgmr.msrb.gmra.mxu0 %v2815_v62  ;;  %v2014_v45 = vld [vmem:[%s2650_s9 + $0x2a8] sm:$0xf0]  ;;  %v2145_v10 = vld [vmem:[%s2650_s9 + $0x284] sm:$0xf] }
  0xd7   : > { %1411 = vmatpush.bf16.msra.mxu0 %v1865_v46  ;;  %1380 = vmatmul.bf16.vlgmr.msrb.gmra.mxu1 %v2817_v0  ;;  %v1825_v46 = vor.u32 %v2101_v37, %v1822_v38 }
  0xd8   : > { %1424 = vmatpush.bf16.msra.mxu1 %v1929_v47  ;;  %1393 = vmatmul.bf16.vlgmr.msrb.gmra.mxu2 %v2759_v53  ;;  %v1838_v53 = vld [vmem:[%s2650_s9 + $0x148] sm:$0xf0]  ;;  %v1889_v47 = vor.u32 %v2117_v39, %v1886_v41 }
  0xd9   : > { %1437 = vmatpush.bf16.msra.mxu2 %v1993_v48  ;;  %1406 = vmatmul.bf16.vlgmr.msrb.gmra.mxu3 %v2763_v55  ;;  %v2030_v55 = vld [vmem:[%s2650_s9 + $0x2c8] sm:$0xf0]  ;;  %v1841_v22 = vor.u32 %v2105_v15, %v1838_v53  ;;  %v1953_v48 = vor.u32 %v2133_v42, %v1950_v43  ;;  %v2001_v15 = vor.u32 %v2145_v10, %v1998_v11  ;;  %v715_v42 = vld [vmem:[#allocation2] sm:$0xf] }
  0xda   : > { %1450 = vmatpush.bf16.msra.mxu3 %v2057_v52  ;;  %v2033_v28 = vor.u32 %v2153_v21, %v2030_v55  ;;  %v2017_v52 = vor.u32 %v2149_v44, %v2014_v45 }
  0xdb   : > { %1412 = vmatpush.bf16.msra.mxu0 %v1857_v63  ;;  %v1817_v63 = vor.u32 %v2099_v49, %v1814_v50 }
  0xdc   : > { %1425 = vmatpush.bf16.msra.mxu1 %v1921_v1  ;;  %v1881_v1 = vor.u32 %v2115_v51, %v1878_v56 }
  0xdd   : > { %1438 = vmatpush.bf16.msra.mxu2 %v1985_v2  ;;  %v1945_v2 = vor.u32 %v2131_v57, %v1942_v58 }
  0xde   : > { %1451 = vmatpush.bf16.msra.mxu3 %v2049_v6  ;;  %v2009_v6 = vor.u32 %v2147_v60, %v2006_v61 }
  0xdf   : > { %1413 = vmatpush.bf16.msra.mxu0 %v1849_v12  ;;  %v1809_v12 = vor.u32 %v2097_v3, %v1806_v4 }
  0xe0   : > { %1426 = vmatpush.bf16.msra.mxu1 %v1913_v13  ;;  %v1873_v13 = vor.u32 %v2113_v5, %v1870_v7 }
  0xe1   : > { %1439 = vmatpush.bf16.msra.mxu2 %v1977_v14  ;;  %v1937_v14 = vor.u32 %v2129_v8, %v1934_v9 }
  0xe2   : > { %1452 = vmatpush.bf16.msra.mxu3 %v2041_v17 }
  0xe3   : > { %1414 = vmatpush.bf16.msra.mxu0 %v1841_v22 }
  0xe4   : > { %1427 = vmatpush.bf16.msra.mxu1 %v1905_v23 }
  0xe5   : > { %1440 = vmatpush.bf16.msra.mxu2 %v1969_v24 }
  0xe6   : > { %1453 = vmatpush.bf16.msra.mxu3 %v2033_v28 }
  0xe7   : > { %1415 = vmatpush.bf16.msra.mxu0 %v1833_v34 }
  0xe8   : > { %1428 = vmatpush.bf16.msra.mxu1 %v1897_v35 }
  0xe9   : > { %1441 = vmatpush.bf16.msra.mxu2 %v1961_v36 }
  0xea   : > { %1454 = vmatpush.bf16.msra.mxu3 %v2025_v40 }
  0xeb   : > { %1416 = vmatpush.bf16.msra.mxu0 %v1825_v46 }
  0xec   : > { %1429 = vmatpush.bf16.msra.mxu1 %v1889_v47 }
  0xed   : > { %1442 = vmatpush.bf16.msra.mxu2 %v1953_v48 }
  0xee   : > { %1455 = vmatpush.bf16.msra.mxu3 %v2017_v52 }
  0xef   : > { %1417 = vmatpush.bf16.msra.mxu0 %v1817_v63 }
  0xf0   : > { %1430 = vmatpush.bf16.msra.mxu1 %v1881_v1 }
  0xf1   : > { %1443 = vmatpush.bf16.msra.mxu2 %v1945_v2 }
  0xf2   : > { %1456 = vmatpush.bf16.msra.mxu3 %v2009_v6 }
  0xf3   : > { %1418 = vmatpush.bf16.msra.mxu0 %v1809_v12 }
  0xf4   : > { %1431 = vmatpush.bf16.msra.mxu1 %v1873_v13 }
  0xf5   : > { %1444 = vmatpush.bf16.msra.mxu2 %v1937_v14 }
  0xf6   : > { %1457 = vmatpush.bf16.msra.mxu3 %v2001_v15  ;;  %1419 = vmatmul.bf16.vlgmr.msra.gmra.mxu0 %v2761_v54 }
  0xf7   : > { %1432 = vmatmul.bf16.vlgmr.msra.gmra.mxu1 %v2768_v59 }
  0xf8   : > { %1445 = vmatmul.bf16.vlgmr.msra.gmra.mxu2 %v2815_v62 }
  0xf9   : > { %1458 = vmatmul.bf16.vlgmr.msra.gmra.mxu3 %v2817_v0 }
 0x137   : > { %v1316_v53 = vpop.f32.mrf.mxu0 }
 0x13a   : > { %v1329_v16 = vpop.f32.mrf.mxu1 }
 0x13b   : > { %v1330_v28 = vadd.f32 %v1329_v16, %v1316_v53 }
 0x13e   : > { %v1342_v17 = vpop.f32.mrf.mxu2 }
 0x13f   : > { %v1318_v18 = vpop.f32.mrf.mxu0  ;;  %v1355_v19 = vpop.f32.mrf.mxu3  ;;  %v1343_v62 = vadd.f32 %v1342_v17, %v1330_v28 }
 0x141   : > { %v1356_v32 = vadd.f32 %v1355_v19, %v1343_v62 }
 0x142   : > { %v1331_v20 = vpop.f32.mrf.mxu1 }
 0x146   : > { %v1344_v21 = vpop.f32.mrf.mxu2 }
 0x147   : > { %v1357_v55 = vpop.f32.mrf.mxu3 }
 0x153   : > { %v1368_v22 = vpop.f32.mrf.mxu0 }
 0x154   : > { %v1381_v23 = vpop.f32.mrf.mxu1  ;;  %v1369_v35 = vadd.f32 %v1368_v22, %v1356_v32 }
 0x156   : > { %v1382_v41 = vadd.f32 %v1381_v23, %v1369_v35 }
 0x15b   : > { %v1394_v24 = vpop.f32.mrf.mxu2  ;;  %v1370_v26 = vpop.f32.mrf.mxu0 }
 0x15c   : > { %v1407_v25 = vpop.f32.mrf.mxu3  ;;  %v1383_v54 = vpop.f32.mrf.mxu1 }
 0x15d   : > { %v1408_v29 = vadd.f32 %v1407_v25, %v1394_v24 }
 0x163   : > { %v1396_v27 = vpop.f32.mrf.mxu2 }
 0x164   : > { %v1409_v59 = vpop.f32.mrf.mxu3 }
 0x173   : > { %v1420_v0 = vpop.f32.mrf.mxu0 }
 0x174   : > { %v1433_v30 = vpop.f32.mrf.mxu1  ;;  %v1421_v31 = vadd.f32 %v1420_v0, %v1408_v29 }
 0x176   : > { %v1434_v33 = vadd.f32 %v1433_v30, %v1421_v31 }
 0x17b   : > { %v1446_v34 = vpop.f32.mrf.mxu2  ;;  %v1422_v38 = vpop.f32.mrf.mxu0 }
 0x17c   : > { %v1447_v36 = vadd.f32 %v1446_v34, %v1434_v33  ;;  %v1459_v37 = vpop.f32.mrf.mxu3  ;;  %v1435_v39 = vpop.f32.mrf.mxu1 }
 0x17e   : > { %v1460_v40 = vadd.f32 %v1459_v37, %v1447_v36 }
 0x180   : > { %v1465_v43 = vrot.slane %v1460_v40, 6 }
 0x181   : > { %1474 = sbr.rel (%p2058_p3) target bundleno = 417 (0x1a1), region = 82 }
 0x182   : > { %v1467_v44 = vsel %vm1466_vm0, %v1382_v41, %v1465_v43 }
 0x183   : > { %v1469_v45 = vadd.f32 %v1467_v44, %v715_v42  ;;  %v1448_v46 = vpop.f32.mrf.mxu2 }
 0x184   : > { %v1461_v47 = vpop.f32.mrf.mxu3 }
 0x185   : > { %1470 = vst [vmem:[#allocation2] sm:$0xf] %v1469_v45 }
 0x186   : > { %v1476_v48 = vld [vmem:[%s702_s22] sm:$0x3]  ;;  %vm1502_vm1 = vcmask 1040384  }
 0x187   : > { %v1484_v49 = vld [vmem:[%s707_s8] sm:$0x3]  ;;  %v1478_v50 = vperm.slane %v1476_v48, 0  ;;  %v1479_v51 = vperm.slane %v1476_v48, 1 }
 0x188   : > { %v1486_v52 = vperm.slane %v1484_v49, 0  ;;  %v1487_v56 = vperm.slane %v1484_v49, 1 }
 0x189   : > { %v1480_v58 = vrot.slane %v1479_v51, 6 }
 0x18a   : > { %v1488_v60 = vrot.slane %v1487_v56, 6 }
 0x18b   : > { %v1481_v61 = vsel %vm1466_vm0, %v1478_v50, %v1480_v58 }
 0x18c   : > { %v1475_v57 = vld [vmem:[#allocation2] sm:$0xf]  ;;  %v1489_v63 = vsel %vm1466_vm0, %v1486_v52, %v1488_v60 }
 0x18d   : > { %v1483_v1 = vmul.f32 %v1481_v61, %v1475_v57 }
 0x18f   : > { %v1491_v2 = vadd.f32 %v1489_v63, %v1483_v1 }
 0x191   : > { %v1492_v3 = vmax.f32 %v1491_v2, 0.0 }
 0x193   : > { %1494 = vst [vmem:[#allocation1] ss:$4 sm:$0xff] %v1492_v3 }
 0x19a   : > { %v1495_v4 = vld.sshfl [vmem:[#allocation1] sm:$0xff pattern:$0x73625140]  ;;  %v1496_v5 = vld.sshfl [vmem:[#allocation1 + $0x8] sm:$0xff pattern:$0x73625140] }
 0x19b   : > { %v1499_v6 = vpack.c.bf16 %v1496_v5, %v1495_v4 }
 0x19d   : > { %v1501_v7 = vrot.slane %v1499_v6, 3 }
 0x19f   : > { %v1505_v8 = vsel %vm1502_vm1, %v1499_v6, %v1501_v7 }
 0x1a0   : > { %1507 = vst [vmem:[%s687_s2] sm:$0x3] %v1505_v8 }
 0x1a1 PF: > { %1514 = sbr.rel (!%p2407_p9) target bundleno = 425 (0x1a9), region = 86  ;;  %s1597_s7 = scalar_lea.vmem (%p2407_p9), %s2931_s5, %s2630_s16 }
 0x1a7   : > { %v1535_v9 = vld [vmem:[%s687_s2] sm:$0x3] }
 0x1a8   : > { %2061 = vst [vmem:[%s1597_s7 + $0x10] sm:$0x3] %v1535_v9 }
 0x1a9 PF: > { %s16_s25 = sadd.s32 1, %s2306_s25   ;;  %s2936_s18 = smov %s2278_s19 }
 0x1aa   : > { %p13_p4 = scmp.ge.s32.totalorder %s16_s25, 14   ;;  %s2937_s19 = smov %s2412_s11 }
 0x1ab   : > { %s2938_s0 = smov %s2286_s20  ;;  %s2939_s20 = smov %s2415_s12 }
 0x1ac   : > { %s2940_s21 = smov %s2298_s23  ;;  %s2941_s22 = smov %s2302_s24 }
 0x1ad   : > { %s2942_s23 = smov %s2945_s26  ;;  %s2943_s24 = smov %s2949_s27 }
 0x1ae   :  { %15 = sbr.rel (!%p13_p4) target bundleno = 7 (0x7), region = 161 }

// kernel: resnet18_forward.45
= control target key start
LH: loop header
LB: loop body
LE: loop exit
PB: predicated region body
PF: predicated region fallthrough
CT: control target
= control target key end

     0   :  { %s464_s0 = inlined_call_operand.vmem [shape: bf16[2,1,512], index: 0, kind: input, shape index: {}]   ;;  %s465_s1 = inlined_call_operand.vmem [shape: f32[512,10], index: 1, kind: input, shape index: {}]   ;;  %s466_s2 = inlined_call_operand.vmem [shape: f32[1,10], index: 2, kind: input, shape index: {}]   ;;  %s467_s3 = inlined_call_operand.hbm [shape: f32[2,10], index: 3, kind: output, shape index: {}]  }
   0x1   :  { %v68_v0 = vld [vmem:[%s465_s1 + $0x178] sm:$0xff]  ;;  %v67_v2 = vld [vmem:[%s465_s1 + $0x170] sm:$0xff]  ;;  %v66_v6 = vld [vmem:[%s465_s1 + $0x168] sm:$0xff] }
   0x2   :  { %v36_v1 = vld [vmem:[%s465_s1 + $0x78] sm:$0xff]  ;;  %148 = vmatpush.msra.mxu2 %v68_v0  ;;  %v35_v4 = vld [vmem:[%s465_s1 + $0x70] sm:$0xff]  ;;  %v34_v8 = vld [vmem:[%s465_s1 + $0x68] sm:$0xff] }
   0x3   :  { %108 = vmatpush.msra.mxu0 %v36_v1  ;;  %v84_v3 = vld [vmem:[%s465_s1 + $0x1f8] sm:$0xff]  ;;  %v83_v7 = vld [vmem:[%s465_s1 + $0x1f0] sm:$0xff]  ;;  %v82_v10 = vld [vmem:[%s465_s1 + $0x1e8] sm:$0xff] }
   0x4   :  { %v52_v5 = vld [vmem:[%s465_s1 + $0xf8] sm:$0xff]  ;;  %168 = vmatpush.msra.mxu3 %v84_v3  ;;  %149 = vmatpush.msra.mxu2 %v67_v2  ;;  %v51_v9 = vld [vmem:[%s465_s1 + $0xf0] sm:$0xff]  ;;  %v65_v11 = vld [vmem:[%s465_s1 + $0x160] sm:$0xff] }
   0x5   :  { %128 = vmatpush.msra.mxu1 %v52_v5  ;;  %109 = vmatpush.msra.mxu0 %v35_v4  ;;  %v33_v12 = vld [vmem:[%s465_s1 + $0x60] sm:$0xff]  ;;  %v50_v13 = vld [vmem:[%s465_s1 + $0xe8] sm:$0xff]  ;;  %v64_v16 = vld [vmem:[%s465_s1 + $0x158] sm:$0xff] }
   0x6   :  { %169 = vmatpush.msra.mxu3 %v83_v7  ;;  %150 = vmatpush.msra.mxu2 %v66_v6  ;;  %v81_v14 = vld [vmem:[%s465_s1 + $0x1e0] sm:$0xff]  ;;  %v32_v17 = vld [vmem:[%s465_s1 + $0x58] sm:$0xff]  ;;  %v63_v20 = vld [vmem:[%s465_s1 + $0x150] sm:$0xff] }
   0x7   :  { %129 = vmatpush.msra.mxu1 %v51_v9  ;;  %110 = vmatpush.msra.mxu0 %v34_v8  ;;  %v49_v15 = vld [vmem:[%s465_s1 + $0xe0] sm:$0xff]  ;;  %v80_v18 = vld [vmem:[%s465_s1 + $0x1d8] sm:$0xff]  ;;  %v31_v21 = vld [vmem:[%s465_s1 + $0x50] sm:$0xff] }
   0x8   :  { %170 = vmatpush.msra.mxu3 %v82_v10  ;;  %151 = vmatpush.msra.mxu2 %v65_v11  ;;  %v48_v19 = vld [vmem:[%s465_s1 + $0xd8] sm:$0xff]  ;;  %v79_v22 = vld [vmem:[%s465_s1 + $0x1d0] sm:$0xff]  ;;  %v62_v24 = vld [vmem:[%s465_s1 + $0x148] sm:$0xff] }
   0x9   :  { %130 = vmatpush.msra.mxu1 %v50_v13  ;;  %111 = vmatpush.msra.mxu0 %v33_v12  ;;  %v47_v23 = vld [vmem:[%s465_s1 + $0xd0] sm:$0xff]  ;;  %v30_v25 = vld [vmem:[%s465_s1 + $0x48] sm:$0xff]  ;;  %v61_v28 = vld [vmem:[%s465_s1 + $0x140] sm:$0xff] }
   0xa   :  { %171 = vmatpush.msra.mxu3 %v81_v14  ;;  %152 = vmatpush.msra.mxu2 %v64_v16  ;;  %v78_v26 = vld [vmem:[%s465_s1 + $0x1c8] sm:$0xff]  ;;  %v29_v29 = vld [vmem:[%s465_s1 + $0x40] sm:$0xff]  ;;  %v60_v32 = vld [vmem:[%s465_s1 + $0x138] sm:$0xff] }
   0xb   :  { %131 = vmatpush.msra.mxu1 %v49_v15  ;;  %112 = vmatpush.msra.mxu0 %v32_v17  ;;  %v46_v27 = vld [vmem:[%s465_s1 + $0xc8] sm:$0xff]  ;;  %v77_v30 = vld [vmem:[%s465_s1 + $0x1c0] sm:$0xff]  ;;  %v28_v33 = vld [vmem:[%s465_s1 + $0x38] sm:$0xff] }
   0xc   :  { %172 = vmatpush.msra.mxu3 %v80_v18  ;;  %153 = vmatpush.msra.mxu2 %v63_v20  ;;  %v45_v31 = vld [vmem:[%s465_s1 + $0xc0] sm:$0xff]  ;;  %v76_v34 = vld [vmem:[%s465_s1 + $0x1b8] sm:$0xff]  ;;  %v59_v36 = vld [vmem:[%s465_s1 + $0x130] sm:$0xff] }
   0xd   :  { %132 = vmatpush.msra.mxu1 %v48_v19  ;;  %113 = vmatpush.msra.mxu0 %v31_v21  ;;  %v44_v35 = vld [vmem:[%s465_s1 + $0xb8] sm:$0xff]  ;;  %v27_v37 = vld [vmem:[%s465_s1 + $0x30] sm:$0xff]  ;;  %v58_v40 = vld [vmem:[%s465_s1 + $0x128] sm:$0xff] }
   0xe   :  { %173 = vmatpush.msra.mxu3 %v79_v22  ;;  %154 = vmatpush.msra.mxu2 %v62_v24  ;;  %v75_v38 = vld [vmem:[%s465_s1 + $0x1b0] sm:$0xff]  ;;  %v26_v41 = vld [vmem:[%s465_s1 + $0x28] sm:$0xff]  ;;  %v57_v44 = vld [vmem:[%s465_s1 + $0x120] sm:$0xff] }
   0xf   :  { %133 = vmatpush.msra.mxu1 %v47_v23  ;;  %114 = vmatpush.msra.mxu0 %v30_v25  ;;  %v43_v39 = vld [vmem:[%s465_s1 + $0xb0] sm:$0xff]  ;;  %v74_v42 = vld [vmem:[%s465_s1 + $0x1a8] sm:$0xff]  ;;  %v25_v45 = vld [vmem:[%s465_s1 + $0x20] sm:$0xff] }
  0x10   :  { %174 = vmatpush.msra.mxu3 %v78_v26  ;;  %155 = vmatpush.msra.mxu2 %v61_v28  ;;  %v42_v43 = vld [vmem:[%s465_s1 + $0xa8] sm:$0xff]  ;;  %v207_v46 = vld [vmem:[%s464_s0] sm:$0xff]   ;;  %v56_v51 = vld [vmem:[%s465_s1 + $0x118] sm:$0xff] }
  0x11   :  { %134 = vmatpush.msra.mxu1 %v46_v27  ;;  %115 = vmatpush.msra.mxu0 %v29_v29  ;;  %v73_v47 = vld [vmem:[%s465_s1 + $0x1a0] sm:$0xff]  ;;  %v208_v49 = vunpack.c.l.bf16 %v207_v46  ;;  %v209_v50 = vunpack.c.h.bf16 %v207_v46  ;;  %v24_v52 = vld [vmem:[%s465_s1 + $0x18] sm:$0xff] }
  0x12   :  { %175 = vmatpush.msra.mxu3 %v77_v30  ;;  %156 = vmatpush.msra.mxu2 %v60_v32  ;;  %v41_v48 = vld [vmem:[%s465_s1 + $0xa0] sm:$0xff] }
  0x13   :  { %135 = vmatpush.msra.mxu1 %v45_v31  ;;  %116 = vmatpush.msra.mxu0 %v28_v33 }
  0x14   :  { %176 = vmatpush.msra.mxu3 %v76_v34  ;;  %157 = vmatpush.msra.mxu2 %v59_v36 }
  0x15   :  { %136 = vmatpush.msra.mxu1 %v44_v35  ;;  %117 = vmatpush.msra.mxu0 %v27_v37 }
  0x16   :  { %177 = vmatpush.msra.mxu3 %v75_v38  ;;  %158 = vmatpush.msra.mxu2 %v58_v40 }
  0x17   :  { %137 = vmatpush.msra.mxu1 %v43_v39  ;;  %118 = vmatpush.msra.mxu0 %v26_v41 }
  0x18   :  { %178 = vmatpush.msra.mxu3 %v74_v42 }
  0x19   :  { %138 = vmatpush.msra.mxu1 %v42_v43 }
  0x1a   :  { %8 = vsyncpa [#allocation3], 0  ;;  %159 = vmatpush.msra.mxu2 %v57_v44  ;;  %119 = vmatpush.msra.mxu0 %v25_v45  ;;  %v72_v53 = vld [vmem:[%s465_s1 + $0x198] sm:$0xff]  ;;  %v55_v55 = vld [vmem:[%s465_s1 + $0x110] sm:$0xff]  ;;  %v93_v59 = vperm.slane %v208_v49, 4  ;;  %v97_v60 = vperm.slane %v209_v50, 4 }
  0x1b   :  { %v40_v54 = vld [vmem:[%s465_s1 + $0x98] sm:$0xff]  ;;  %179 = vmatpush.msra.mxu3 %v73_v47  ;;  %139 = vmatpush.msra.mxu1 %v41_v48  ;;  %v23_v56 = vld [vmem:[%s465_s1 + $0x10] sm:$0xff]  ;;  %vm99_vm0 = vcmask 1041409   ;;  %v54_v61 = vld [vmem:[%s465_s1 + $0x108] sm:$0xff]  ;;  %v91_v63 = vperm.slane %v208_v49, 0  ;;  %v95_v0 = vperm.slane %v209_v50, 0 }
  0x1c   :  { %160 = vmatpush.msra.mxu2 %v56_v51  ;;  %120 = vmatpush.msra.mxu0 %v24_v52  ;;  %v71_v57 = vld [vmem:[%s465_s1 + $0x190] sm:$0xff]  ;;  %v22_v62 = vld [vmem:[%s465_s1 + $0x8] sm:$0xff]  ;;  %v94_v1 = vperm.slane %v208_v49, 6  ;;  %v98_v2 = vperm.slane %v209_v50, 6  ;;  %v53_v5 = vld [vmem:[%s465_s1 + $0x100] sm:$0xff]  ;;  %v92_v7 = vperm.slane %v208_v49, 2  ;;  %v102_v9 = vsel %vm99_vm0, %v97_v60, %v93_v59 }
  0x1d   :  { %v39_v58 = vld [vmem:[%s465_s1 + $0x90] sm:$0xff]  ;;  %180 = vmatpush.msra.mxu3 %v72_v53  ;;  %140 = vmatpush.msra.mxu1 %v40_v54  ;;  %v70_v3 = vld [vmem:[%s465_s1 + $0x188] sm:$0xff]  ;;  %v21_v6 = vld [vmem:[%s465_s1] sm:$0xff]  ;;  %v96_v8 = vperm.slane %v209_v50, 2  ;;  %v100_v11 = vsel %vm99_vm0, %v95_v0, %v91_v63  ;;  %s238_s7 = smov [#allocation2]   ;;  %s197_s10 = sshll.u32 %s467_s3, 4  ;;  %s198_s10 = int_to_ptr.hbm [resolvable:$true] %s197_s10 }
  0x1e   :  { %161 = vmatpush.msra.mxu2 %v55_v55  ;;  %121 = vmatpush.msra.mxu0 %v23_v56  ;;  %v38_v4 = vld [vmem:[%s465_s1 + $0x88] sm:$0xff]  ;;  %v69_v10 = vld [vmem:[%s465_s1 + $0x180] sm:$0xff]  ;;  %v103_v12 = vsel %vm99_vm0, %v98_v2, %v94_v1  ;;  %s195_s8 = sshll.u32 %s238_s7, 4  ;;  %vm188_vm1 = vcmask 74752   ;;  %s196_s8 = int_to_ptr.vmem [resolvable:$true] %s195_s8 }
  0x1f   :  { %181 = vmatpush.msra.mxu3 %v71_v57  ;;  %141 = vmatpush.msra.mxu1 %v39_v58  ;;  %v37_v13 = vld [vmem:[%s465_s1 + $0x80] sm:$0xff]  ;;  %v101_v14 = vsel %vm99_vm0, %v96_v8, %v92_v7 }
  0x20   :  { %162 = vmatpush.msra.mxu2 %v54_v61  ;;  %122 = vmatpush.msra.mxu0 %v22_v62  ;;  %v211_v15 = vld [vmem:[%s466_s2] ss:$0 sm:$0xff] }
  0x21   :  { %182 = vmatpush.msra.mxu3 %v70_v3  ;;  %142 = vmatpush.msra.mxu1 %v38_v4 }
  0x22   :  { %163 = vmatpush.msra.mxu2 %v53_v5  ;;  %123 = vmatpush.msra.mxu0 %v21_v6 }
  0x23   :  { %164 = vmatmul.f32.vlgmr.msra.gmra.mxu2 %v102_v9  ;;  %183 = vmatpush.msra.mxu3 %v69_v10 }
  0x24   :  { %124 = vmatmul.f32.vlgmr.msra.gmra.mxu0 %v100_v11  ;;  %184 = vmatmul.f32.vlgmr.msra.gmra.mxu3 %v103_v12 }
  0x25   :  { %143 = vmatpush.msra.mxu1 %v37_v13 }
  0x26   :  { %144 = vmatmul.f32.vlgmr.msra.gmra.mxu1 %v101_v14 }
  0xa1   :  { %v125_v16 = vpop.f32.mrf.mxu0 }
  0xa2   :  { %v126_v17 = vadd.f32 %v211_v15, %v125_v16 }
  0xa3   :  { %v145_v18 = vpop.f32.mrf.mxu1 }
  0xa4   :  { %v146_v19 = vadd.f32 %v145_v18, %v126_v17 }
  0xa6   :  { %v165_v20 = vpop.f32.mrf.mxu2 }
  0xa7   :  { %v166_v21 = vadd.f32 %v165_v20, %v146_v19  ;;  %v185_v22 = vpop.f32.mrf.mxu3 }
  0xa9   :  { %v186_v23 = vadd.f32 %v185_v22, %v166_v21 }
  0xab   :  { %189 = vst.msk [vmem:[#allocation2] sm:$0x3] %vm188_vm1, %v186_v23 }
  0xac   :  { %200 = dma.vmem_to_hbm [thread:$0]  %s196_s8, 32, %s198_s10, [#allocation3]  }
  0xad   :  { %236 = dma.done.wait [#allocation3], 32  }
  0xae   :  { %237 = vsyncadd [#allocation3], 4294967264 }
  0xaf   :  { %205 = vsyncpa [#allocation3], 1 }

</bundles_post_ra>
